<compile_context>
chip_gen: v7x
topology: tpu7x:2x2x1
jax: 0.10.0
libtpu: 0.0.40
codegen_flags: <defaults>
</compile_context>

<pallas_src>
import jax
import jax.numpy as jnp
from jax.experimental import pallas as pl
from jax.experimental.pallas import tpu as pltpu


D_IN = 64 * 64              # 4096
D1, D2, D3 = 1024, 512, 256
N_OUT_LANES = 128           # lane-dense output width; column 0 is the logit
TK = 2048                   # K-tile for layer 1 -> 2 grid steps over D_IN


def _leaky_relu(h, negative_slope=0.4):
    return jnp.where(h >= 0, h, negative_slope * h)


def discriminator_kernel(x_ref,
                         w1_ref, b1_ref,
                         w2_ref, b2_ref,
                         w3_ref, b3_ref,
                         w4_ref, b4_ref,
                         o_ref,
                         acc_ref):
    """Grid = (batch_tiles, K_tiles).  Layer-1 partial products accumulate in
    acc_ref; layers 2-4 + sigmoid run on the last K step."""
    k = pl.program_id(1)

    @pl.when(k == 0)
    def _():
        acc_ref[...] = jnp.zeros_like(acc_ref)

    # Layer 1 partial: (bm, TK) bf16 @ (TK, 1024) bf16, f32 accumulate.
    acc_ref[...] += jnp.dot(x_ref[...], w1_ref[...],
                            preferred_element_type=jnp.float32)

    @pl.when(k == pl.num_programs(1) - 1)
    def _():
        # Layer 1 epilogue: bias + LeakyReLU(0.4)
        h = _leaky_relu(acc_ref[...] + b1_ref[...])            # (bm, 1024) f32
        # TODO(synk): nn.Dropout(0.6) is identity in eval mode; training-mode
        # masking (pltpu.prng_seed / prng_random_bits + 1/(1-p) scale) omitted.

        # Layer 2: Linear(1024 -> 512) + LeakyReLU(0.4)
        h = _leaky_relu(jnp.dot(h.astype(jnp.bfloat16), w2_ref[...],
                                preferred_element_type=jnp.float32)
                        + b2_ref[...])

        # Layer 3: Linear(512 -> 256) + LeakyReLU(0.4)
        h = _leaky_relu(jnp.dot(h.astype(jnp.bfloat16), w3_ref[...],
                                preferred_element_type=jnp.float32)
                        + b3_ref[...])                          # (bm, 256) f32

        # Layer 4: Linear(256 -> 1) as a lane-dense MXU matmul against a
        # (256, 128) W4 whose column 0 holds the real weights (rest zero);
        # writes the whole output block directly.  Bias from SMEM scalar.
        logits = jnp.dot(h, w4_ref[...],
                         preferred_element_type=jnp.float32) + b4_ref[0, 0]
        # Sigmoid via numerically stable tanh (EUP).
        o_ref[...] = 0.5 * (jnp.tanh(0.5 * logits) + 1.0)


def _round_up(n, m):
    return (n + m - 1) // m * m


def discriminator_forward(x_img, params):
    """x_img: (B, 1, 64, 64) / (B, 64, 64) / (B, 4096).  Returns (B, 1) f32."""
    x = x_img.reshape(-1, D_IN)                                 # == .view(-1, 4096)
    B = x.shape[0]

    # Batch tile: one tile up to 512 rows (W1 streamed once), else 512-row
    # tiles to amortize the per-tile W1 re-stream on large batches.
    if B <= 512:
        bm = _round_up(B, 8)
    else:
        bm = 512
    B_pad = _round_up(B, bm)

    # Stream activations as bf16: halves x traffic, removes per-step VPU cast.
    x = x.astype(jnp.bfloat16)
    if B_pad != B:
        x = jnp.pad(x, ((0, B_pad - B), (0, 0)))

    (w1, b1), (w2, b2), (w3, b3), (w4, b4) = params

    n_btiles = B_pad // bm
    n_ktiles = D_IN // TK
    grid = (n_btiles, n_ktiles)

    in_specs = [
        pl.BlockSpec((bm, TK), lambda b, k: (b, k)),        # x        (bf16)
        pl.BlockSpec((TK, D1), lambda b, k: (k, 0)),        # w1       (bf16)
        pl.BlockSpec((1, D1), lambda b, k: (0, 0)),         # b1       (f32)
        pl.BlockSpec((D1, D2), lambda b, k: (0, 0)),        # w2       (bf16)
        pl.BlockSpec((1, D2), lambda b, k: (0, 0)),         # b2       (f32)
        pl.BlockSpec((D2, D3), lambda b, k: (0, 0)),        # w3       (bf16)
        pl.BlockSpec((1, D3), lambda b, k: (0, 0)),         # b3       (f32)
        pl.BlockSpec((D3, N_OUT_LANES), lambda b, k: (0, 0)),  # w4 pad (f32)
        pl.BlockSpec(memory_space=pltpu.MemorySpace.SMEM),  # b4 (1,1) f32
    ]
    out_specs = pl.BlockSpec((bm, N_OUT_LANES), lambda b, k: (b, 0))

    # Advisory cost estimate: kernel is dominated by the per-batch-tile W1
    # stream plus the bf16 activation stream.
    big_w_bytes = 2 * (D_IN * D1 + D1 * D2 + D2 * D3)           # bf16 weights
    small_bytes = 4 * (D1 + D2 + D3 + D3 * N_OUT_LANES + 1)     # biases + w4
    cost = pl.CostEstimate(
        flops=int(2 * B_pad * (D_IN * D1 + D1 * D2 + D2 * D3 + D3 * N_OUT_LANES)),
        transcendentals=int(B_pad * N_OUT_LANES),
        bytes_accessed=int(2 * B_pad * D_IN                      # x (bf16)
                           + n_btiles * big_w_bytes + small_bytes
                           + 4 * B_pad * N_OUT_LANES),           # out (f32)
    )

    out = pl.pallas_call(
        discriminator_kernel,
        out_shape=jax.ShapeDtypeStruct((B_pad, N_OUT_LANES), jnp.float32),
        grid_spec=pltpu.PrefetchScalarGridSpec(
            num_scalar_prefetch=0,
            grid=grid,
            in_specs=in_specs,
            out_specs=out_specs,
            scratch_shapes=[pltpu.VMEM((bm, D1), jnp.float32)],
        ),
        compiler_params=pltpu.CompilerParams(
            dimension_semantics=("parallel", "arbitrary"),
            vmem_limit_bytes=32 * 1024 * 1024,
        ),
        cost_estimate=cost,
    )(x, w1, b1, w2, b2, w3, b3, w4, b4)

    return out[:B, 0:1]


def init_raw_params(key):
    """f32 master weights, PyTorch-Linear-style init U(-1/sqrt(fan_in), ...).
    Layout: W (in, out), b (1, out)."""
    dims = [(D_IN, D1), (D1, D2), (D2, D3), (D3, 1)]
    raw = []
    for fan_in, fan_out in dims:
        key, kw, kb = jax.random.split(key, 3)
        bound = float(fan_in) ** -0.5
        w = jax.random.uniform(kw, (fan_in, fan_out), jnp.float32, -bound, bound)
        b = jax.random.uniform(kb, (1, fan_out), jnp.float32, -bound, bound)
        raw.append((w, b))
    return raw


def pack_params(raw):
    """Kernel storage layout:
      w1/w2/w3: (in, out) bf16;  b1/b2/b3: (1, out) f32
      w4: (256, 128) f32 with column 0 = real weights;  b4: (1, 1) f32 (SMEM)
    """
    (w1, b1), (w2, b2), (w3, b3), (w4, b4) = raw
    w4_pad = jnp.zeros((D3, N_OUT_LANES), jnp.float32).at[:, 0:1].set(w4)
    return [
        (w1.astype(jnp.bfloat16), b1),
        (w2.astype(jnp.bfloat16), b2),
        (w3.astype(jnp.bfloat16), b3),
        (w4_pad, b4.reshape(1, 1)),
    ]


def discriminator_ref(x_img, raw):
    """Pure-JAX f32 reference (eval-mode dropout = identity)."""
    x = x_img.reshape(-1, D_IN).astype(jnp.float32)
    (w1, b1), (w2, b2), (w3, b3), (w4, b4) = raw
    h = _leaky_relu(x @ w1 + b1)
    h = _leaky_relu(h @ w2 + b2)
    h = _leaky_relu(h @ w3 + b3)
    return jax.nn.sigmoid(h @ w4 + b4)


if __name__ == "__main__":
    key = jax.random.PRNGKey(0)
    key, k_x = jax.random.split(key)

    # Small batch of 64x64 "images" (NCHW), consistent with .view(-1, 64*64).
    x = jax.random.normal(k_x, (2, 1, 64, 64), dtype=jnp.float32)

    raw = init_raw_params(key)
    params = pack_params(raw)

    y = discriminator_forward(x, params)
    jax.block_until_ready(y)

    y_ref = discriminator_ref(x, raw)

    assert y.shape == (2, 1)
    assert bool(jnp.all((y >= 0.0) & (y <= 1.0)))
    # bf16 streaming vs f32 reference: ~1e-2 absolute tolerance on sigmoid out.
    assert bool(jnp.allclose(y, y_ref, atol=3e-2)), (y, y_ref)
    print("KERNEL_OK")
</pallas_src>

<mosaic_0001>
module attributes {stable_mosaic.version = 11 : i64} {
  func.func @discriminator_kernel(%arg0: i32, %arg1: i32, %arg2: memref<8x2048xbf16, #tpu.memory_space<vmem>>, %arg3: memref<2048x1024xbf16, #tpu.memory_space<vmem>>, %arg4: memref<1x1024xf32, #tpu.memory_space<vmem>>, %arg5: memref<1024x512xbf16, #tpu.memory_space<vmem>>, %arg6: memref<1x512xf32, #tpu.memory_space<vmem>>, %arg7: memref<512x256xbf16, #tpu.memory_space<vmem>>, %arg8: memref<1x256xf32, #tpu.memory_space<vmem>>, %arg9: memref<256x128xf32, #tpu.memory_space<vmem>>, %arg10: memref<1x1xf32, #tpu.memory_space<smem>>, %arg11: memref<8x128xf32, #tpu.memory_space<vmem>>, %arg12: memref<8x1024xf32, #tpu.memory_space<vmem>>) attributes {dimension_semantics = [#tpu.dimension_semantics<parallel>, #tpu.dimension_semantics<arbitrary>], iteration_bounds = array<i64: 1, 2>, scalar_prefetch = 0 : i64, scratch_operands = 1 : i64, tpu.core_type = #tpu.core_type<tc>, window_params = [{transform_indices = @transform_0, window_bounds = array<i64: 8, 2048>}, {transform_indices = @transform_1, window_bounds = array<i64: 2048, 1024>}, {pipeline_mode = #tpu.pipeline_mode<synchronous>, transform_indices = @transform_2, window_bounds = array<i64: 1, 1024>}, {pipeline_mode = #tpu.pipeline_mode<synchronous>, transform_indices = @transform_3, window_bounds = array<i64: 1024, 512>}, {pipeline_mode = #tpu.pipeline_mode<synchronous>, transform_indices = @transform_4, window_bounds = array<i64: 1, 512>}, {pipeline_mode = #tpu.pipeline_mode<synchronous>, transform_indices = @transform_5, window_bounds = array<i64: 512, 256>}, {pipeline_mode = #tpu.pipeline_mode<synchronous>, transform_indices = @transform_6, window_bounds = array<i64: 1, 256>}, {pipeline_mode = #tpu.pipeline_mode<synchronous>, transform_indices = @transform_7, window_bounds = array<i64: 256, 128>}, {transform_indices = @transform_8, window_bounds = array<i64: 1, 1>}, {transform_indices = @transform_9, window_bounds = array<i64: 8, 128>}]} {
    %c0_i32 = arith.constant 0 : i32
    %0 = arith.cmpi eq, %arg1, %c0_i32 : i32
    %1 = arith.extui %0 : i1 to i32
    %c0_i32_0 = arith.constant 0 : i32
    %2 = arith.cmpi ne, %1, %c0_i32_0 : i32
    scf.if %2 {
      %cst_9 = arith.constant 0.000000e+00 : f32
      %12 = vector.broadcast %cst_9 : f32 to vector<8x1024xf32>
      %c0_10 = arith.constant 0 : index
      %c0_11 = arith.constant 0 : index
      %13 = vector.load %arg12[%c0_10, %c0_11] : memref<8x1024xf32, #tpu.memory_space<vmem>>, vector<8x1024xf32>
      tpu.vector_store %arg12[%c0_10, %c0_11], %12 {strides = array<i32>} : memref<8x1024xf32, #tpu.memory_space<vmem>>, vector<8x1024xf32>,
    } else {
    }
    %c0 = arith.constant 0 : index
    %c0_1 = arith.constant 0 : index
    %3 = vector.load %arg12[%c0, %c0_1] : memref<8x1024xf32, #tpu.memory_space<vmem>>, vector<8x1024xf32>
    %c0_2 = arith.constant 0 : index
    %c0_3 = arith.constant 0 : index
    %4 = vector.load %arg2[%c0_2, %c0_3] : memref<8x2048xbf16, #tpu.memory_space<vmem>>, vector<8x2048xbf16>
    %c0_4 = arith.constant 0 : index
    %c0_5 = arith.constant 0 : index
    %5 = vector.load %arg3[%c0_4, %c0_5] : memref<2048x1024xbf16, #tpu.memory_space<vmem>>, vector<2048x1024xbf16>
    %cst = arith.constant dense<0.000000e+00> : vector<8x1024xf32>
    %6 = tpu.matmul %4, %5, %cst {dimension_numbers = #tpu.dot_dimension_numbers<[1], [0], [0], [1], [0, 0, 1, 1], [], []>} : vector<8x2048xbf16>, vector<2048x1024xbf16>, vector<8x1024xf32> -> vector<8x1024xf32>
    %7 = arith.addf %3, %6 : vector<8x1024xf32>
    %c0_6 = arith.constant 0 : index
    %c0_7 = arith.constant 0 : index
    %8 = vector.load %arg12[%c0_6, %c0_7] : memref<8x1024xf32, #tpu.memory_space<vmem>>, vector<8x1024xf32>
    tpu.vector_store %arg12[%c0_6, %c0_7], %7 {strides = array<i32>} : memref<8x1024xf32, #tpu.memory_space<vmem>>, vector<8x1024xf32>,
    %c1_i32 = arith.constant 1 : i32
    %9 = arith.cmpi eq, %arg1, %c1_i32 : i32
    %10 = arith.extui %9 : i1 to i32
    %c0_i32_8 = arith.constant 0 : i32
    %11 = arith.cmpi ne, %10, %c0_i32_8 : i32
    scf.if %11 {
      %c0_9 = arith.constant 0 : index
      %c0_10 = arith.constant 0 : index
      %12 = vector.load %arg12[%c0_9, %c0_10] : memref<8x1024xf32, #tpu.memory_space<vmem>>, vector<8x1024xf32>
      %c0_11 = arith.constant 0 : index
      %c0_12 = arith.constant 0 : index
      %13 = vector.load %arg4[%c0_11, %c0_12] : memref<1x1024xf32, #tpu.memory_space<vmem>>, vector<1x1024xf32>
      %14 = vector.broadcast %13 : vector<1x1024xf32> to vector<8x1024xf32>
      %15 = arith.addf %12, %14 : vector<8x1024xf32>
      %cst_13 = arith.constant 0.000000e+00 : f32
      %16 = vector.broadcast %cst_13 : f32 to vector<8x1024xf32>
      %17 = arith.cmpf oge, %15, %16 : vector<8x1024xf32>
      %cst_14 = arith.constant 4.000000e-01 : f32
      %18 = vector.broadcast %cst_14 : f32 to vector<8x1024xf32>
      %19 = arith.mulf %18, %15 : vector<8x1024xf32>
      %20 = arith.select %17, %15, %19 : vector<8x1024xi1>, vector<8x1024xf32>
      %21 = arith.truncf %20 : vector<8x1024xf32> to vector<8x1024xbf16>
      %c0_15 = arith.constant 0 : index
      %c0_16 = arith.constant 0 : index
      %22 = vector.load %arg5[%c0_15, %c0_16] : memref<1024x512xbf16, #tpu.memory_space<vmem>>, vector<1024x512xbf16>
      %cst_17 = arith.constant dense<0.000000e+00> : vector<8x512xf32>
      %23 = tpu.matmul %21, %22, %cst_17 {dimension_numbers = #tpu.dot_dimension_numbers<[1], [0], [0], [1], [0, 0, 1, 1], [], []>} : vector<8x1024xbf16>, vector<1024x512xbf16>, vector<8x512xf32> -> vector<8x512xf32>
      %c0_18 = arith.constant 0 : index
      %c0_19 = arith.constant 0 : index
      %24 = vector.load %arg6[%c0_18, %c0_19] : memref<1x512xf32, #tpu.memory_space<vmem>>, vector<1x512xf32>
      %25 = vector.broadcast %24 : vector<1x512xf32> to vector<8x512xf32>
      %26 = arith.addf %23, %25 : vector<8x512xf32>
      %cst_20 = arith.constant 0.000000e+00 : f32
      %27 = vector.broadcast %cst_20 : f32 to vector<8x512xf32>
      %28 = arith.cmpf oge, %26, %27 : vector<8x512xf32>
      %cst_21 = arith.constant 4.000000e-01 : f32
      %29 = vector.broadcast %cst_21 : f32 to vector<8x512xf32>
      %30 = arith.mulf %29, %26 : vector<8x512xf32>
      %31 = arith.select %28, %26, %30 : vector<8x512xi1>, vector<8x512xf32>
      %32 = arith.truncf %31 : vector<8x512xf32> to vector<8x512xbf16>
      %c0_22 = arith.constant 0 : index
      %c0_23 = arith.constant 0 : index
      %33 = vector.load %arg7[%c0_22, %c0_23] : memref<512x256xbf16, #tpu.memory_space<vmem>>, vector<512x256xbf16>
      %cst_24 = arith.constant dense<0.000000e+00> : vector<8x256xf32>
      %34 = tpu.matmul %32, %33, %cst_24 {dimension_numbers = #tpu.dot_dimension_numbers<[1], [0], [0], [1], [0, 0, 1, 1], [], []>} : vector<8x512xbf16>, vector<512x256xbf16>, vector<8x256xf32> -> vector<8x256xf32>
      %c0_25 = arith.constant 0 : index
      %c0_26 = arith.constant 0 : index
      %35 = vector.load %arg8[%c0_25, %c0_26] : memref<1x256xf32, #tpu.memory_space<vmem>>, vector<1x256xf32>
      %36 = vector.broadcast %35 : vector<1x256xf32> to vector<8x256xf32>
      %37 = arith.addf %34, %36 : vector<8x256xf32>
      %cst_27 = arith.constant 0.000000e+00 : f32
      %38 = vector.broadcast %cst_27 : f32 to vector<8x256xf32>
      %39 = arith.cmpf oge, %37, %38 : vector<8x256xf32>
      %cst_28 = arith.constant 4.000000e-01 : f32
      %40 = vector.broadcast %cst_28 : f32 to vector<8x256xf32>
      %41 = arith.mulf %40, %37 : vector<8x256xf32>
      %42 = arith.select %39, %37, %41 : vector<8x256xi1>, vector<8x256xf32>
      %c0_29 = arith.constant 0 : index
      %c0_30 = arith.constant 0 : index
      %43 = vector.load %arg9[%c0_29, %c0_30] : memref<256x128xf32, #tpu.memory_space<vmem>>, vector<256x128xf32>
      %cst_31 = arith.constant dense<0.000000e+00> : vector<8x128xf32>
      %44 = tpu.matmul %42, %43, %cst_31 {dimension_numbers = #tpu.dot_dimension_numbers<[1], [0], [0], [1], [0, 0, 1, 1], [], []>} : vector<8x256xf32>, vector<256x128xf32>, vector<8x128xf32> -> vector<8x128xf32>
      %c0_32 = arith.constant 0 : index
      %c0_33 = arith.constant 0 : index
      %45 = memref.load %arg10[%c0_32, %c0_33] : memref<1x1xf32, #tpu.memory_space<smem>>
      %46 = vector.broadcast %45 : f32 to vector<8x128xf32>
      %47 = arith.addf %44, %46 : vector<8x128xf32>
      %cst_34 = arith.constant 5.000000e-01 : f32
      %48 = vector.broadcast %cst_34 : f32 to vector<8x128xf32>
      %49 = arith.mulf %48, %47 : vector<8x128xf32>
      %50 = math.tanh %49 : vector<8x128xf32>
      %cst_35 = arith.constant 1.000000e+00 : f32
      %51 = vector.broadcast %cst_35 : f32 to vector<8x128xf32>
      %52 = arith.addf %50, %51 : vector<8x128xf32>
      %cst_36 = arith.constant 5.000000e-01 : f32
      %53 = vector.broadcast %cst_36 : f32 to vector<8x128xf32>
      %54 = arith.mulf %53, %52 : vector<8x128xf32>
      %c0_37 = arith.constant 0 : index
      %c0_38 = arith.constant 0 : index
      %55 = vector.load %arg11[%c0_37, %c0_38] : memref<8x128xf32, #tpu.memory_space<vmem>>, vector<8x128xf32>
      tpu.vector_store %arg11[%c0_37, %c0_38], %54 {strides = array<i32>} : memref<8x128xf32, #tpu.memory_space<vmem>>, vector<8x128xf32>,
    } else {
    }
    return
  }
  func.func @transform_0(%arg0: i32, %arg1: i32) -> (i32, i32) {
    %c0_i32 = arith.constant 0 : i32
    return %arg0, %arg1 : i32, i32
  }
  func.func @transform_1(%arg0: i32, %arg1: i32) -> (i32, i32) {
    %c0_i32 = arith.constant 0 : i32
    %c0_i32_0 = arith.constant 0 : i32
    return %arg1, %c0_i32 : i32, i32
  }
  func.func @transform_2(%arg0: i32, %arg1: i32) -> (i32, i32) {
    %c0_i32 = arith.constant 0 : i32
    %c0_i32_0 = arith.constant 0 : i32
    %c0_i32_1 = arith.constant 0 : i32
    return %c0_i32, %c0_i32_0 : i32, i32
  }
  func.func @transform_3(%arg0: i32, %arg1: i32) -> (i32, i32) {
    %c0_i32 = arith.constant 0 : i32
    %c0_i32_0 = arith.constant 0 : i32
    %c0_i32_1 = arith.constant 0 : i32
    return %c0_i32, %c0_i32_0 : i32, i32
  }
  func.func @transform_4(%arg0: i32, %arg1: i32) -> (i32, i32) {
    %c0_i32 = arith.constant 0 : i32
    %c0_i32_0 = arith.constant 0 : i32
    %c0_i32_1 = arith.constant 0 : i32
    return %c0_i32, %c0_i32_0 : i32, i32
  }
  func.func @transform_5(%arg0: i32, %arg1: i32) -> (i32, i32) {
    %c0_i32 = arith.constant 0 : i32
    %c0_i32_0 = arith.constant 0 : i32
    %c0_i32_1 = arith.constant 0 : i32
    return %c0_i32, %c0_i32_0 : i32, i32
  }
  func.func @transform_6(%arg0: i32, %arg1: i32) -> (i32, i32) {
    %c0_i32 = arith.constant 0 : i32
    %c0_i32_0 = arith.constant 0 : i32
    %c0_i32_1 = arith.constant 0 : i32
    return %c0_i32, %c0_i32_0 : i32, i32
  }
  func.func @transform_7(%arg0: i32, %arg1: i32) -> (i32, i32) {
    %c0_i32 = arith.constant 0 : i32
    %c0_i32_0 = arith.constant 0 : i32
    %c0_i32_1 = arith.constant 0 : i32
    return %c0_i32, %c0_i32_0 : i32, i32
  }
  func.func @transform_8(%arg0: i32, %arg1: i32) -> (i32, i32) {
    %c0_i32 = arith.constant 0 : i32
    %c0_i32_0 = arith.constant 0 : i32
    %c0_i32_1 = arith.constant 0 : i32
    return %c0_i32, %c0_i32_0 : i32, i32
  }
  func.func @transform_9(%arg0: i32, %arg1: i32) -> (i32, i32) {
    %c0_i32 = arith.constant 0 : i32
    %c0_i32_0 = arith.constant 0 : i32
    return %arg0, %c0_i32 : i32, i32
  }
}

</mosaic_0001>

<bundles_post_ra>
// kernel: tpu_custom_call.1
= control target key start
LH: loop header
LB: loop body
LE: loop exit
PB: predicated region body
PF: predicated region fallthrough
CT: control target
= control target key end

     0   :  { %s14979_s0 = inlined_call_operand.hbm [shape: bf16[8,4096], index: 0, kind: input, shape index: {}]   ;;  %s14980_s1 = inlined_call_operand.hbm [shape: bf16[4096,1024], index: 1, kind: input, shape index: {}]   ;;  %s14981_s2 = inlined_call_operand.hbm [shape: f32[1,1024], index: 2, kind: input, shape index: {}]   ;;  %s14982_s3 = inlined_call_operand.hbm [shape: bf16[1024,512], index: 3, kind: input, shape index: {}]   ;;  %s14983_s4 = inlined_call_operand.hbm [shape: f32[1,512], index: 4, kind: input, shape index: {}]   ;;  %s14984_s5 = inlined_call_operand.hbm [shape: bf16[512,256], index: 5, kind: input, shape index: {}]   ;;  %s14985_s6 = inlined_call_operand.hbm [shape: f32[1,256], index: 6, kind: input, shape index: {}]   ;;  %s14986_s7 = inlined_call_operand.hbm [shape: f32[256,128], index: 7, kind: input, shape index: {}]   ;;  %s14987_s8 = inlined_call_operand.<no memory space> [shape: f32[1,1], index: 8, kind: input, shape index: {}]   ;;  %s14988_s9 = inlined_call_operand.hbm [shape: f32[8,128], index: 9, kind: output, shape index: {}]  }
   0x1   :  { %14992 = sst [smem:[#allocation27_spill]] %s14981_s2 }
   0x2   :  { %14993 = sst [smem:[#allocation28_spill]] %s14982_s3 }
   0x3   :  { %14994 = sst [smem:[#allocation29_spill]] %s14988_s9 }
   0x4   :  { %14 = sst [smem:[#allocation3]] %s14987_s8 }
   0x5   :  { %15 = vsyncpa [#allocation5], 0 }
   0x6   :  { %17 = vsyncpa [#allocation5 + $0x1], 0 }
   0x7   :  { %18 = vsyncpa [#allocation8], 0 }
   0x8   :  { %20 = vsyncpa [#allocation8 + $0x1], 0 }
   0x9   :  { %21 = vsyncpa [#allocation11], 0 }
   0xa   :  { %22 = vsyncpa [#allocation14], 0 }
   0xb   :  { %23 = vsyncpa [#allocation17], 0 }
   0xc   :  { %24 = vsyncpa [#allocation6], 0  ;;  %s13306_s11 = smov 0   ;;  %s13308_s12 = smov 0  }
   0xd   :  { %s13310_s13 = smov 0   ;;  %s13312_s14 = smov 0  }
   0xe   :  { %s13314_s15 = smov 0   ;;  %s13316_s16 = smov 0  }
   0xf LB: > { %14995 = sst [smem:[#allocation26_spill]] %s13227_s14  ;;  %s13337_s8 = sadd.s32 4294967295, %s13235_s16   ;;  %s13235_s16 = sphi %s13316_s16, %s30_s16   ;;  %s13231_s15 = sphi %s13314_s15, %s15022_s15   ;;  %s13227_s14 = sphi %s13312_s14, %s15021_s14   ;;  %s13223_s13 = sphi %s13310_s13, %s15020_s13   ;;  %s13219_s12 = sphi %s13308_s12, %s15019_s12   ;;  %s13215_s11 = sphi %s13306_s11, %s15018_s11  }
  0x10   : > { %p10782_p0 = scmp.ge.s32.totalorder %s13235_s16, 1  ;;  %p14989_p1 = scmp.eq.s32.totalorder %s13337_s8, 0 }
  0x11   : > { %p274_p2 = scmp.lt.s32.totalorder %s13235_s16, 3  ;;  %s13237_s18 = smov [#allocation9]  }
  0x12   : > { %s287_s19 = sshll.u32 %s13237_s18, 4  ;;  %s13238_s20 = smov [#allocation10]   ;;  %s288_s19 = int_to_ptr.vmem [resolvable:$true] %s287_s19 }
  0x13   : > { %p13342_p3 = pnand %p10782_p0, %p274_p2  ;;  %s297_s21 = sshll.u32 %s13238_s20, 4  ;;  %s13354_s21 = int_to_ptr.vmem [resolvable:$true] %s297_s21 }
  0x14   : > { %s13239_s23 = smov [#allocation13]   ;;  %s14998_s2 = sld [smem:[#allocation27_spill]] }
  0x15   : > { %s14996_s17 = scalar_select %p13342_p3, 1, 0 }
  0x16   : > { %p12306_p4 = pneg %p13342_p3  ;;  %s13356_s24 = sshll.u32 %s13239_s23, 4  ;;  %s322_s24 = int_to_ptr.vmem [resolvable:$true] %s13356_s24 }
  0x18   : > { %p13350_p5 = pnand %p12306_p4, %p14989_p1 }
  0x1a   : > { %s12907_s27 = scalar_lea.hbm %s14998_s2, 128  ;;  %p13366_p7 = pneg %p13350_p5 }
  0x1b   : > { %p12908_p6 = scmp.ne.s32.totalorder %s14998_s2, %s12907_s27  ;;  %p12914_p10 = scmp.lt.u32.totalorder %s12907_s27, %s14998_s2 }
  0x1d   : > { %p12910_p8 = pnand %p13366_p7, %p12908_p6 }
  0x1f   : > { %p12911_p9 = pneg %p12910_p8 }
  0x21   : > { %p12916_p11 = pnand %p12914_p10, %p12911_p9 }
  0x23   : > { %12919 = shalt.err (!%p12916_p11)
}
  0x24   : > { %s12920_s20 = scalar_lea.vmem %s288_s19, 128  ;;  %p12928_p2 = scmp.lt.s32.totalorder %s288_s19, %s288_s19 }
  0x25   : > { %p12921_p12 = scmp.ne.s32.totalorder %s288_s19, %s12920_s20  ;;  %p12929_p4 = scmp.lt.s32.totalorder %s12920_s20, %s12920_s20 }
  0x27   : > { %p12923_p13 = pnand %p12921_p12, %p13366_p7  ;;  %p12930_p1 = por %p12929_p4, %p12928_p2 }
  0x29   : > { %p12924_p0 = pneg %p12923_p13 }
  0x2b   : > { %p12931_p3 = pnand %p12930_p1, %p12924_p0 }
  0x2d   : > { %12934 = shalt.err (!%p12931_p3)
}
  0x2e   : > { %12309 = dma.hbm_to_vmem [thread:$0]  (!%p13350_p5), %s14998_s2, 128, %s288_s19, [#allocation8]  }
  0x2f   : > { %s15000_s3 = sld [smem:[#allocation28_spill]] }
  0x35   : > { %s12935_s28 = scalar_lea.hbm %s15000_s3, 32768 }
  0x36   : > { %p12936_p6 = scmp.ne.s32.totalorder %s15000_s3, %s12935_s28  ;;  %p12942_p1 = scmp.lt.u32.totalorder %s12935_s28, %s15000_s3 }
  0x38   : > { %p12938_p8 = pnand %p12936_p6, %p13366_p7 }
  0x3a   : > { %p12939_p9 = pneg %p12938_p8 }
  0x3c   : > { %p12944_p3 = pnand %p12942_p1, %p12939_p9 }
  0x3e   : > { %12947 = shalt.err (!%p12944_p3)
}
  0x3f   : > { %s12948_s19 = scalar_lea.vmem %s13354_s21, 32768  ;;  %p12956_p13 = scmp.lt.s32.totalorder %s13354_s21, %s13354_s21 }
  0x40   : > { %p12949_p10 = scmp.ne.s32.totalorder %s13354_s21, %s12948_s19  ;;  %p12957_p0 = scmp.lt.s32.totalorder %s12948_s19, %s12948_s19 }
  0x42   : > { %p12951_p11 = pnand %p12949_p10, %p13366_p7  ;;  %p12958_p2 = por %p12957_p0, %p12956_p13 }
  0x44   : > { %p12952_p12 = pneg %p12951_p11 }
  0x46   : > { %p12959_p4 = pnand %p12958_p2, %p12952_p12 }
  0x48   : > { %12962 = shalt.err (!%p12959_p4)
}
  0x49   : > { %s13240_s23 = smov 256   ;;  %s13241_s25 = smov 16  }
  0x4a   : > { %12312 = dma.hbm_to_vmem [thread:$0]  (!%p13350_p5), %s15000_s3, 32768, %s13354_s21, [#allocation11], %s13240_s23, %s13240_s23, %s13241_s25  }
  0x4b   : > { %s12963_s10 = scalar_lea.hbm %s14984_s5, 8192 }
  0x4c   : > { %p12964_p6 = scmp.ne.s32.totalorder %s14984_s5, %s12963_s10  ;;  %p12970_p1 = scmp.lt.u32.totalorder %s12963_s10, %s14984_s5 }
  0x4e   : > { %p12966_p8 = pnand %p12964_p6, %p13366_p7 }
  0x50   : > { %p12967_p9 = pneg %p12966_p8 }
  0x52   : > { %p12972_p3 = pnand %p12970_p1, %p12967_p9 }
  0x54   : > { %12975 = shalt.err (!%p12972_p3)
}
  0x55   : > { %s12976_s26 = scalar_lea.vmem %s322_s24, 8192  ;;  %p12984_p13 = scmp.lt.s32.totalorder %s322_s24, %s322_s24 }
  0x56   : > { %p12977_p10 = scmp.ne.s32.totalorder %s322_s24, %s12976_s26  ;;  %p12985_p0 = scmp.lt.s32.totalorder %s12976_s26, %s12976_s26 }
  0x58   : > { %p12979_p11 = pnand %p12977_p10, %p13366_p7  ;;  %p12986_p2 = por %p12985_p0, %p12984_p13 }
  0x5a   : > { %p12980_p12 = pneg %p12979_p11 }
  0x5c   : > { %p12987_p4 = pnand %p12986_p2, %p12980_p12 }
  0x5e   : > { %12990 = shalt.err (!%p12987_p4)
}
  0x5f   : > { %s13242_s21 = smov 128   ;;  %s13243_s23 = smov 8  }
  0x60   : > { %12318 = dma.hbm_to_vmem [thread:$0]  (!%p13350_p5), %s14984_s5, 8192, %s322_s24, [#allocation14], %s13242_s21, %s13242_s21, %s13243_s23  }
  0x61   : > { %s13244_s27 = smov [#allocation12]   ;;  %s13245_s29 = smov [#allocation15]  }
  0x62   : > { %s311_s28 = sshll.u32 %s13244_s27, 4  ;;  %s335_s10 = sshll.u32 %s13245_s29, 4  ;;  %s312_s28 = int_to_ptr.vmem [resolvable:$true] %s311_s28  ;;  %s336_s10 = int_to_ptr.vmem [resolvable:$true] %s335_s10 }
  0x63   : > { %s12991_s19 = scalar_lea.hbm %s14983_s4, 64 }
  0x64   : > { %p12992_p6 = scmp.ne.s32.totalorder %s14983_s4, %s12991_s19  ;;  %p12998_p1 = scmp.lt.u32.totalorder %s12991_s19, %s14983_s4 }
  0x66   : > { %p12994_p8 = pnand %p12992_p6, %p13366_p7 }
  0x68   : > { %p12995_p9 = pneg %p12994_p8 }
  0x6a   : > { %p13000_p3 = pnand %p12998_p1, %p12995_p9 }
  0x6c   : > { %13003 = shalt.err (!%p13000_p3)
}
  0x6d   : > { %s13004_s24 = scalar_lea.vmem %s312_s28, 64  ;;  %p13012_p13 = scmp.lt.s32.totalorder %s312_s28, %s312_s28 }
  0x6e   : > { %p13005_p10 = scmp.ne.s32.totalorder %s312_s28, %s13004_s24  ;;  %p13013_p0 = scmp.lt.s32.totalorder %s13004_s24, %s13004_s24 }
  0x70   : > { %p13007_p11 = pnand %p13005_p10, %p13366_p7  ;;  %p13014_p2 = por %p13013_p0, %p13012_p13 }
  0x72   : > { %p13008_p12 = pneg %p13007_p11 }
  0x74   : > { %p13015_p4 = pnand %p13014_p2, %p13008_p12 }
  0x76   : > { %13018 = shalt.err (!%p13015_p4)
}
  0x77   : > { %12315 = dma.hbm_to_vmem [thread:$0]  (!%p13350_p5), %s14983_s4, 64, %s312_s28, [#allocation11]  }
  0x78   : > { %s13019_s25 = scalar_lea.hbm %s14985_s6, 32 }
  0x79   : > { %p13020_p6 = scmp.ne.s32.totalorder %s14985_s6, %s13019_s25  ;;  %p13026_p1 = scmp.lt.u32.totalorder %s13019_s25, %s14985_s6 }
  0x7b   : > { %p13022_p8 = pnand %p13020_p6, %p13366_p7 }
  0x7d   : > { %p13023_p9 = pneg %p13022_p8 }
  0x7f   : > { %p13028_p3 = pnand %p13026_p1, %p13023_p9 }
  0x81   : > { %13031 = shalt.err (!%p13028_p3)
}
  0x82   : > { %s13032_s19 = scalar_lea.vmem %s336_s10, 32  ;;  %p13040_p13 = scmp.lt.s32.totalorder %s336_s10, %s336_s10 }
  0x83   : > { %p13033_p10 = scmp.ne.s32.totalorder %s336_s10, %s13032_s19  ;;  %p13041_p0 = scmp.lt.s32.totalorder %s13032_s19, %s13032_s19 }
  0x85   : > { %p13035_p11 = pnand %p13033_p10, %p13366_p7  ;;  %p13042_p2 = por %p13041_p0, %p13040_p13 }
  0x87   : > { %p13036_p12 = pneg %p13035_p11 }
  0x89   : > { %p13043_p4 = pnand %p13042_p2, %p13036_p12 }
  0x8b   : > { %13046 = shalt.err (!%p13043_p4)
}
  0x8c   : > { %12321 = dma.hbm_to_vmem [thread:$0]  (!%p13350_p5), %s14985_s6, 32, %s336_s10, [#allocation14]  }
  0x8d   : > { %s13246_s24 = smov [#allocation16]   ;;  %s13047_s14 = scalar_lea.hbm %s14986_s7, 4096 }
  0x8e   : > { %s345_s3 = sshll.u32 %s13246_s24, 4  ;;  %p13048_p6 = scmp.ne.s32.totalorder %s14986_s7, %s13047_s14  ;;  %s346_s3 = int_to_ptr.vmem [resolvable:$true] %s345_s3 }
  0x8f   : > { %p13054_p1 = scmp.lt.u32.totalorder %s13047_s14, %s14986_s7 }
  0x90   : > { %p13050_p8 = pnand %p13048_p6, %p13366_p7 }
  0x92   : > { %p13051_p9 = pneg %p13050_p8 }
  0x94   : > { %p13056_p3 = pnand %p13054_p1, %p13051_p9 }
  0x96   : > { %13059 = shalt.err (!%p13056_p3)
}
  0x97   : > { %s13060_s10 = scalar_lea.vmem %s346_s3, 4096  ;;  %p13068_p13 = scmp.lt.s32.totalorder %s346_s3, %s346_s3 }
  0x98   : > { %p13061_p10 = scmp.ne.s32.totalorder %s346_s3, %s13060_s10  ;;  %p13069_p0 = scmp.lt.s32.totalorder %s13060_s10, %s13060_s10 }
  0x9a   : > { %p13063_p11 = pnand %p13061_p10, %p13366_p7  ;;  %p13070_p2 = por %p13069_p0, %p13068_p13 }
  0x9c   : > { %p13064_p12 = pneg %p13063_p11 }
  0x9e   : > { %p13071_p4 = pnand %p13070_p2, %p13064_p12 }
  0xa0   : > { %13074 = shalt.err (!%p13071_p4)
}
  0xa1   : > { %12324 = dma.hbm_to_vmem [thread:$0]  (!%p13350_p5), %s14986_s7, 4096, %s346_s3, [#allocation17], %s13242_s21, %s13242_s21, %s13243_s23  }
  0xa2   : > { %s39_s22 = sadd.s32 1, %s13231_s15  ;;  %s51_s30 = sadd.s32 1, %s13223_s13 }
  0xa3   : > { %p40_p7 = scmp.ge.s32.totalorder %s39_s22, 2  ;;  %p58_p6 = scmp.ne.s32.totalorder %s13223_s13, %s13219_s12 }
  0xa4   : > { %p59_p8 = scmp.eq.s32.totalorder %s13235_s16, 0  ;;  %p64_p9 = scmp.ne.s32.totalorder %s13219_s12, %s13215_s11 }
  0xa5   : > { %s15024_s22 = smov (%p40_p7, %s39_s22), 0  ;;  %p15002_p3 = scmp.eq.s32.totalorder %s13337_s8, 0 }
  0xa6   : > { %p13493_p1 = por %p59_p8, %p58_p6  ;;  %s47_s21 = ssub.s32 %s13231_s15, %s15024_s22 }
  0xa7   : > { %p13499_p10 = por %p15002_p3, %p64_p9  ;;  %p12338_p5 = scmp.lt.s32.totalorder %s13235_s16, 2 }
  0xa8   : > { %p49_p11 = scmp.eq.s32.totalorder %s47_s21, 0  ;;  %s13507_s23 = sand.u32 1, %s13223_s13  }
  0xa9   : > { %s10790_s11 = sshll.u32 %s13507_s23, 6  ;;  %s12172_s3 = sshll.u32 %s13231_s15, 10 }
  0xaa   : > { %s13511_s24 = scalar_select %p49_p11, %s13223_s13, %s51_s30  }
  0xab   : > { %s13517_s14 = scalar_lea.hbm %s14979_s0, %s12172_s3  ;;  %s366_s25 = scalar_lea.vmem [#allocation4], %s10790_s11 }
  0xac   : > { %s376_s27 = sshll.u32 %s366_s25, 4  ;;  %p13523_p12 = pnand %p12338_p5, %p13493_p1  ;;  %s13519_s27 = int_to_ptr.vmem [resolvable:$true] %s376_s27 }
  0xad   : > { %s10793_s18 = sshll.u32 %s13507_s23, 13  ;;  %s12174_s10 = sshll.u32 %s13231_s15, 17 }
  0xae   : > { %s363_s20 = scalar_lea.sflag [#allocation5], %s13507_s23  ;;  %s13075_s19 = scalar_lea.hbm %s13517_s14, 1024 }
  0xaf   : > { %p13076_p13 = scmp.ne.s32.totalorder %s13517_s14, %s13075_s19  ;;  %p13077_p0 = pneg %p13523_p12 }
  0xb0   : > { %s13080_s28 = scalar_lea.hbm %s14979_s0, 2048  ;;  %p13081_p7 = scmp.lt.u32.totalorder %s13517_s14, %s14979_s0 }
  0xb1   : > { %p13078_p2 = pnand %p13077_p0, %p13076_p13  ;;  %p13082_p6 = scmp.lt.u32.totalorder %s13080_s28, %s13075_s19 }
  0xb2   : > { %p13084_p9 = scmp.lt.u32.totalorder %s13075_s19, %s13517_s14 }
  0xb3   : > { %p13079_p4 = pneg %p13078_p2  ;;  %p13083_p8 = por %p13082_p6, %p13081_p7 }
  0xb5   : > { %p13085_p1 = por %p13084_p9, %p13083_p8 }
  0xb7   : > { %p13086_p3 = pnand %p13085_p1, %p13079_p4 }
  0xb9   : > { %13089 = shalt.err (!%p13086_p3)
}
  0xba   : > { %s13090_s2 = scalar_lea.vmem %s13519_s27, 1024  ;;  %s13247_s9 = smov [#allocation4]  }
  0xbb   : > { %p13091_p5 = scmp.ne.s32.totalorder %s13519_s27, %s13090_s2  ;;  %s13095_s25 = sshll.u32 %s13247_s9, 4  ;;  %s13096_s25 = int_to_ptr.vmem [resolvable:$false] %s13095_s25 }
  0xbc   : > { %s13097_s30 = scalar_lea.vmem %s13096_s25, 2048  ;;  %p13098_p2 = scmp.lt.s32.totalorder %s13519_s27, %s13096_s25 }
  0xbd   : > { %p13093_p11 = pnand %p13091_p5, %p13077_p0  ;;  %p13099_p7 = scmp.lt.s32.totalorder %s13097_s30, %s13090_s2 }
  0xbf   : > { %p13094_p13 = pneg %p13093_p11  ;;  %p13100_p6 = por %p13099_p7, %p13098_p2 }
  0xc1   : > { %p13101_p8 = pnand %p13100_p6, %p13094_p13 }
  0xc3   : > { %13104 = shalt.err (!%p13101_p8)
}
  0xc4   : > { %12328 = dma.hbm_to_vmem [thread:$0]  (!%p13523_p12), %s13517_s14, 1024, %s13519_s27, %s363_s20  }
  0xc5   : > { %s387_s19 = scalar_lea.vmem [#allocation7], %s10793_s18  ;;  %s383_s28 = sand.u32 1, %s13235_s16  }
  0xc6   : > { %s395_s21 = sshll.u32 %s387_s19, 4  ;;  %s13565_s2 = scalar_lea.hbm %s14980_s1, %s12174_s10  ;;  %s13558_s21 = int_to_ptr.vmem [resolvable:$true] %s395_s21 }
  0xc7   : > { %s13567_s9 = scalar_lea.sflag [#allocation8], %s383_s28  ;;  %s13105_s25 = scalar_lea.hbm %s13565_s2, 131072 }
  0xc8   : > { %p13106_p4 = scmp.ne.s32.totalorder %s13565_s2, %s13105_s25  ;;  %s13110_s27 = scalar_lea.hbm %s14980_s1, 262144 }
  0xc9   : > { %p13111_p3 = scmp.lt.u32.totalorder %s13565_s2, %s14980_s1  ;;  %p13112_p5 = scmp.lt.u32.totalorder %s13110_s27, %s13105_s25 }
  0xca   : > { %p13108_p9 = pnand %p13106_p4, %p13077_p0  ;;  %p13114_p13 = scmp.lt.u32.totalorder %s13105_s25, %s13565_s2 }
  0xcb   : > { %p13113_p11 = por %p13112_p5, %p13111_p3 }
  0xcc   : > { %p13109_p1 = pneg %p13108_p9 }
  0xcd   : > { %p13115_p2 = por %p13114_p13, %p13113_p11 }
  0xcf   : > { %p13116_p7 = pnand %p13115_p2, %p13109_p1 }
  0xd1   : > { %13119 = shalt.err (!%p13116_p7)
}
  0xd2   : > { %s13120_s10 = scalar_lea.vmem %s13558_s21, 131072  ;;  %s13248_s30 = smov [#allocation7]  }
  0xd3   : > { %p13121_p6 = scmp.ne.s32.totalorder %s13558_s21, %s13120_s10  ;;  %s13125_s19 = sshll.u32 %s13248_s30, 4  ;;  %s13126_s19 = int_to_ptr.vmem [resolvable:$false] %s13125_s19 }
  0xd4   : > { %s13127_s28 = scalar_lea.vmem %s13126_s19, 262144  ;;  %p13128_p9 = scmp.lt.s32.totalorder %s13558_s21, %s13126_s19 }
  0xd5   : > { %p13123_p8 = pnand %p13121_p6, %p13077_p0  ;;  %p13129_p3 = scmp.lt.s32.totalorder %s13127_s28, %s13120_s10 }
  0xd7   : > { %p13124_p4 = pneg %p13123_p8  ;;  %p13130_p5 = por %p13129_p3, %p13128_p9 }
  0xd9   : > { %p13131_p11 = pnand %p13130_p5, %p13124_p4 }
  0xdb   : > { %13134 = shalt.err (!%p13131_p11)
}
  0xdc   : > { %s13249_s11 = smov 512   ;;  %s13250_s3 = smov 32  }
  0xdd   : > { %12331 = dma.hbm_to_vmem [thread:$0]  (!%p13523_p12), %s13565_s2, 131072, %s13558_s21, %s13567_s9, %s13249_s11, %s13249_s11, %s13250_s3  }
  0xde   : > { %p15005_p0 = scmp.ne.s32.totalorder %s14996_s17, 0 }
  0xdf   : > { %s409_s25 = sand.u32 (!%p15005_p0), 1, %s13219_s12  }
  0xe0   : > { %407 = sbr.rel (%p15005_p0) target bundleno = 2490 (0x9ba), region = 56  ;;  %s10798_s23 = sshll.u32 (!%p15005_p0), %s409_s25, 6 }
  0xe1   : > { %s410_s14 = scalar_lea.sflag (!%p15005_p0), [#allocation5], %s409_s25  ;;  %s13596_s27 = scalar_lea.vmem (!%p15005_p0), [#allocation4], %s10798_s23 }
  0xe7   : > { %13186 = dma.done.wait (%p13499_p10), %s410_s14, 1024  }
  0xe8   : > { %13188 = vsyncadd (%p13499_p10), %s410_s14, 4294966272  ;;  %s418_s18 = sand.u32 1, %s13337_s8   ;;  %s10799_s29 = sshll.u32 %s409_s25, 13 }
  0xe9   : > { %s419_s21 = scalar_lea.sflag [#allocation8], %s418_s18  ;;  %s13603_s2 = scalar_lea.vmem [#allocation7], %s10799_s29 }
  0xea   : > { %13190 = dma.done.wait (%p13499_p10), %s419_s21, 131072  }
  0xeb   : > { %13192 = vsyncadd (%p13499_p10), %s419_s21, 4294836224  ;;  %p15006_p12 = scmp.eq.s32.totalorder %s13337_s8, 0 }
  0xed   : > { %13194 = dma.done.wait (%p15006_p12), [#allocation8], 128   ;;  %p15007_p1 = pmov %p15006_p12 }
  0xef   : > { %13196 = vsyncadd (%p15007_p1), [#allocation8], 4294967168  ;;  %p15008_p13 = pmov %p15007_p1 }
  0xf0   : > { %p15009_p2 = pmov %p15007_p1 }
  0xf1   : > { %13198 = dma.done.wait (%p15008_p13), [#allocation11], 32832  }
  0xf2   : > { %13200 = vsyncadd (%p15009_p2), [#allocation11], 4294934464  ;;  %p15010_p7 = pmov %p15007_p1 }
  0xf3   : > { %p15011_p6 = pmov %p15007_p1 }
  0xf4   : > { %13202 = dma.done.wait (%p15010_p7), [#allocation14], 8224  }
  0xf5   : > { %13204 = vsyncadd (%p15011_p6), [#allocation14], 4294959072  ;;  %p15012_p10 = pmov %p15007_p1 }
  0xf6   : > { %p15013_p8 = pmov %p15007_p1 }
  0xf7   : > { %13206 = dma.done.wait (%p15012_p10), [#allocation17], 4096  }
  0xf8   : > { %13208 = vsyncadd (%p15013_p8), [#allocation17], 4294963200  ;;  %s15014_s17 = sld [smem:[#allocation26_spill]] }
  0xfe   : > { %p10806_p4 = scmp.ne.s32.totalorder %s15014_s17, 0 }
  0xff   : > { %v13251_v0 = vmov (!%p10806_p4), 0.0  }
 0x100   : > { %486 = sbr.rel (%p10806_p4) target bundleno = 263 (0x107), region = 92  ;;  %487 = vst [vmem:[#allocation2] sm:$0xff] (!%p10806_p4), %v13251_v0  ;;  %488 = vst [vmem:[#allocation2 + $0x8] sm:$0xff] (!%p10806_p4), %v13251_v0 }
 0x101   : > { %489 = vst [vmem:[#allocation2 + $0x10] sm:$0xff] (!%p10806_p4), %v13251_v0  ;;  %490 = vst [vmem:[#allocation2 + $0x18] sm:$0xff] (!%p10806_p4), %v13251_v0 }
 0x102   : > { %491 = vst [vmem:[#allocation2 + $0x20] sm:$0xff] (!%p10806_p4), %v13251_v0  ;;  %492 = vst [vmem:[#allocation2 + $0x28] sm:$0xff] (!%p10806_p4), %v13251_v0 }
 0x103   : > { %493 = vst [vmem:[#allocation2 + $0x30] sm:$0xff] (!%p10806_p4), %v13251_v0  ;;  %494 = vst [vmem:[#allocation2 + $0x38] sm:$0xff] (!%p10806_p4), %v13251_v0 }
 0x107 PF: > { %v511_v1 = vld [vmem:[%s13603_s2] sm:$0xff]  ;;  %v13658_v55 = vld [vmem:[%s13596_s27 + $0x8] sm:$0xff]  ;;  %s15015_s26 = sld [smem:[#allocation26_spill]] }
 0x108   : > { %v515_v2 = vld [vmem:[%s13603_s2 + $0x20] sm:$0xff]  ;;  %v13668_v60 = vcombine.high %v13658_v55, %v13658_v55 }
 0x109   : > { %v639_v3 = vld [vmem:[%s13603_s2 + $0x400] sm:$0xff]  ;;  %v10824_v4 = vcombine.high %v511_v1, %v515_v2  ;;  %v10823_v6 = vcombine.low %v511_v1, %v515_v2 }
 0x10a   : > { %v643_v5 = vld [vmem:[%s13603_s2 + $0x420] sm:$0xff]  ;;  %6784 = vmatprep.mubr.bf16.mxu1 %v13668_v60 }
 0x10b   : > { %v519_v7 = vld [vmem:[%s13603_s2 + $0x40] sm:$0xff]  ;;  %v10952_v9 = vcombine.high %v639_v3, %v643_v5  ;;  %v10951_v10 = vcombine.low %v639_v3, %v643_v5  ;;  %6711 = vmatprep.subr.bf16.mxu0 %v10824_v4 }
 0x10c   : > { %v523_v8 = vld [vmem:[%s13603_s2 + $0x60] sm:$0xff]  ;;  %6712 = vmatpush1.bf16.msra.mxu0 %v10823_v6 }
 0x10d   : > { %v10832_v11 = vcombine.high %v519_v7, %v523_v8  ;;  %v647_v12 = vld [vmem:[%s13603_s2 + $0x440] sm:$0xff]  ;;  %6752 = vmatprep.subr.bf16.mxu1 %v10952_v9  ;;  %v10831_v19 = vcombine.low %v519_v7, %v523_v8  ;;  %p11847_p9 = scmp.ne.s32.totalorder %s15015_s26, 1 }
 0x10e   : > { %v651_v13 = vld [vmem:[%s13603_s2 + $0x460] sm:$0xff]  ;;  %6753 = vmatpush1.bf16.msra.mxu1 %v10951_v10  ;;  %s10551_s9 = sld [smem:[#allocation3]] (!%p11847_p9) }
 0x10f   : > { %v527_v14 = vld [vmem:[%s13603_s2 + $0x80] sm:$0xff]  ;;  %v10960_v15 = vcombine.high %v647_v12, %v651_v13  ;;  %6713 = vmatprep.subr.bf16.mxu0 %v10832_v11  ;;  %v10959_v20 = vcombine.low %v647_v12, %v651_v13 }
 0x110   : > { %v531_v16 = vld [vmem:[%s13603_s2 + $0xa0] sm:$0xff]  ;;  %6714 = vmatpush1.bf16.msra.mxu0 %v10831_v19 }
 0x111   : > { %v655_v17 = vld [vmem:[%s13603_s2 + $0x480] sm:$0xff]  ;;  %v10840_v21 = vcombine.high %v527_v14, %v531_v16  ;;  %6754 = vmatprep.subr.bf16.mxu1 %v10960_v15  ;;  %v10839_v27 = vcombine.low %v527_v14, %v531_v16 }
 0x112   : > { %v659_v18 = vld [vmem:[%s13603_s2 + $0x4a0] sm:$0xff]  ;;  %6755 = vmatpush1.bf16.msra.mxu1 %v10959_v20 }
 0x113   : > { %v10968_v22 = vcombine.high %v655_v17, %v659_v18  ;;  %v535_v23 = vld [vmem:[%s13603_s2 + $0xc0] sm:$0xff]  ;;  %6715 = vmatprep.subr.bf16.mxu0 %v10840_v21  ;;  %v10967_v28 = vcombine.low %v655_v17, %v659_v18 }
 0x114   : > { %v539_v24 = vld [vmem:[%s13603_s2 + $0xe0] sm:$0xff]  ;;  %6716 = vmatpush1.bf16.msra.mxu0 %v10839_v27 }
 0x115   : > { %v663_v25 = vld [vmem:[%s13603_s2 + $0x4c0] sm:$0xff]  ;;  %v10848_v29 = vcombine.high %v535_v23, %v539_v24  ;;  %6756 = vmatprep.subr.bf16.mxu1 %v10968_v22  ;;  %v10847_v35 = vcombine.low %v535_v23, %v539_v24 }
 0x116   : > { %v667_v26 = vld [vmem:[%s13603_s2 + $0x4e0] sm:$0xff]  ;;  %6757 = vmatpush1.bf16.msra.mxu1 %v10967_v28 }
 0x117   : > { %v10976_v30 = vcombine.high %v663_v25, %v667_v26  ;;  %v543_v31 = vld [vmem:[%s13603_s2 + $0x100] sm:$0xff]  ;;  %6717 = vmatprep.subr.bf16.mxu0 %v10848_v29  ;;  %v10975_v36 = vcombine.low %v663_v25, %v667_v26 }
 0x118   : > { %v547_v32 = vld [vmem:[%s13603_s2 + $0x120] sm:$0xff]  ;;  %6718 = vmatpush1.bf16.msra.mxu0 %v10847_v35 }
 0x119   : > { %v671_v33 = vld [vmem:[%s13603_s2 + $0x500] sm:$0xff]  ;;  %v10856_v37 = vcombine.high %v543_v31, %v547_v32  ;;  %6758 = vmatprep.subr.bf16.mxu1 %v10976_v30  ;;  %v10855_v43 = vcombine.low %v543_v31, %v547_v32 }
 0x11a   : > { %v675_v34 = vld [vmem:[%s13603_s2 + $0x520] sm:$0xff]  ;;  %6759 = vmatpush1.bf16.msra.mxu1 %v10975_v36 }
 0x11b   : > { %v10984_v38 = vcombine.high %v671_v33, %v675_v34  ;;  %v551_v39 = vld [vmem:[%s13603_s2 + $0x140] sm:$0xff]  ;;  %6719 = vmatprep.subr.bf16.mxu0 %v10856_v37  ;;  %v10983_v44 = vcombine.low %v671_v33, %v675_v34 }
 0x11c   : > { %v555_v40 = vld [vmem:[%s13603_s2 + $0x160] sm:$0xff]  ;;  %6720 = vmatpush1.bf16.msra.mxu0 %v10855_v43 }
 0x11d   : > { %v679_v41 = vld [vmem:[%s13603_s2 + $0x540] sm:$0xff]  ;;  %v10864_v45 = vcombine.high %v551_v39, %v555_v40  ;;  %6760 = vmatprep.subr.bf16.mxu1 %v10984_v38  ;;  %v10863_v51 = vcombine.low %v551_v39, %v555_v40 }
 0x11e   : > { %v683_v42 = vld [vmem:[%s13603_s2 + $0x560] sm:$0xff]  ;;  %6761 = vmatpush1.bf16.msra.mxu1 %v10983_v44 }
 0x11f   : > { %v10992_v46 = vcombine.high %v679_v41, %v683_v42  ;;  %v559_v47 = vld [vmem:[%s13603_s2 + $0x180] sm:$0xff]  ;;  %6721 = vmatprep.subr.bf16.mxu0 %v10864_v45  ;;  %v10991_v52 = vcombine.low %v679_v41, %v683_v42 }
 0x120   : > { %v563_v48 = vld [vmem:[%s13603_s2 + $0x1a0] sm:$0xff]  ;;  %6722 = vmatpush1.bf16.msra.mxu0 %v10863_v51 }
 0x121   : > { %v687_v49 = vld [vmem:[%s13603_s2 + $0x580] sm:$0xff]  ;;  %v10872_v53 = vcombine.high %v559_v47, %v563_v48  ;;  %6762 = vmatprep.subr.bf16.mxu1 %v10992_v46  ;;  %v10871_v63 = vcombine.low %v559_v47, %v563_v48 }
 0x122   : > { %v691_v50 = vld [vmem:[%s13603_s2 + $0x5a0] sm:$0xff]  ;;  %6763 = vmatpush1.bf16.msra.mxu1 %v10991_v52 }
 0x123   : > { %v13655_v54 = vld [vmem:[%s13596_s27] sm:$0xff]  ;;  %v11000_v56 = vcombine.high %v687_v49, %v691_v50  ;;  %6723 = vmatprep.subr.bf16.mxu0 %v10872_v53  ;;  %v10999_v0 = vcombine.low %v687_v49, %v691_v50 }
 0x124   : > { %v567_v57 = vld [vmem:[%s13603_s2 + $0x1c0] sm:$0xff]  ;;  %v13664_v59 = vcombine.high %v13655_v54, %v13655_v54  ;;  %6724 = vmatpush1.bf16.msra.mxu0 %v10871_v63 }
 0x125   : > { %v571_v58 = vld [vmem:[%s13603_s2 + $0x1e0] sm:$0xff]  ;;  %6764 = vmatprep.subr.bf16.mxu1 %v11000_v56 }
 0x126   : > { %v695_v61 = vld [vmem:[%s13603_s2 + $0x5c0] sm:$0xff]  ;;  %6743 = vmatprep.mubr.bf16.mxu0 %v13664_v59  ;;  %v10880_v1 = vcombine.high %v567_v57, %v571_v58  ;;  %v10879_v7 = vcombine.low %v567_v57, %v571_v58  ;;  %6765 = vmatpush1.bf16.msra.mxu1 %v10999_v0 }
 0x127   : > { %v699_v62 = vld [vmem:[%s13603_s2 + $0x5e0] sm:$0xff] }
 0x128   : > { %v11008_v2 = vcombine.high %v695_v61, %v699_v62  ;;  %v575_v3 = vld [vmem:[%s13603_s2 + $0x200] sm:$0xff]  ;;  %6725 = vmatprep.subr.bf16.mxu0 %v10880_v1  ;;  %v11007_v8 = vcombine.low %v695_v61, %v699_v62 }
 0x129   : > { %v579_v4 = vld [vmem:[%s13603_s2 + $0x220] sm:$0xff]  ;;  %6726 = vmatpush1.bf16.msra.mxu0 %v10879_v7 }
 0x12a   : > { %v703_v5 = vld [vmem:[%s13603_s2 + $0x600] sm:$0xff]  ;;  %v10888_v9 = vcombine.high %v575_v3, %v579_v4  ;;  %6766 = vmatprep.subr.bf16.mxu1 %v11008_v2  ;;  %v10887_v15 = vcombine.low %v575_v3, %v579_v4 }
 0x12b   : > { %v707_v6 = vld [vmem:[%s13603_s2 + $0x620] sm:$0xff]  ;;  %6767 = vmatpush1.bf16.msra.mxu1 %v11007_v8 }
 0x12c   : > { %v11016_v10 = vcombine.high %v703_v5, %v707_v6  ;;  %v583_v11 = vld [vmem:[%s13603_s2 + $0x240] sm:$0xff]  ;;  %6727 = vmatprep.subr.bf16.mxu0 %v10888_v9  ;;  %v11015_v16 = vcombine.low %v703_v5, %v707_v6 }
 0x12d   : > { %v587_v12 = vld [vmem:[%s13603_s2 + $0x260] sm:$0xff]  ;;  %6728 = vmatpush1.bf16.msra.mxu0 %v10887_v15 }
 0x12e   : > { %v711_v13 = vld [vmem:[%s13603_s2 + $0x640] sm:$0xff]  ;;  %v10896_v17 = vcombine.high %v583_v11, %v587_v12  ;;  %6768 = vmatprep.subr.bf16.mxu1 %v11016_v10  ;;  %v10895_v23 = vcombine.low %v583_v11, %v587_v12 }
 0x12f   : > { %v715_v14 = vld [vmem:[%s13603_s2 + $0x660] sm:$0xff]  ;;  %6769 = vmatpush1.bf16.msra.mxu1 %v11015_v16 }
 0x130   : > { %v11024_v18 = vcombine.high %v711_v13, %v715_v14  ;;  %v591_v19 = vld [vmem:[%s13603_s2 + $0x280] sm:$0xff]  ;;  %6729 = vmatprep.subr.bf16.mxu0 %v10896_v17  ;;  %v11023_v24 = vcombine.low %v711_v13, %v715_v14  ;;  %v13714_v17 = vcombine.low %v13655_v54, %v13655_v54 }
 0x131   : > { %v595_v20 = vld [vmem:[%s13603_s2 + $0x2a0] sm:$0xff]  ;;  %6730 = vmatpush1.bf16.msra.mxu0 %v10895_v23  ;;  %v13726_v23 = vld [vmem:[%s13596_s27 + $0x18] sm:$0xff] }
 0x132   : > { %v719_v21 = vld [vmem:[%s13603_s2 + $0x680] sm:$0xff]  ;;  %v10904_v25 = vcombine.high %v591_v19, %v595_v20  ;;  %6770 = vmatprep.subr.bf16.mxu1 %v11024_v18  ;;  %v10903_v31 = vcombine.low %v591_v19, %v595_v20  ;;  %v13719_v20 = vld [vmem:[%s13596_s27 + $0x10] sm:$0xff] }
 0x133   : > { %v723_v22 = vld [vmem:[%s13603_s2 + $0x6a0] sm:$0xff]  ;;  %6771 = vmatpush1.bf16.msra.mxu1 %v11023_v24 }
 0x134   : > { %v11032_v26 = vcombine.high %v719_v21, %v723_v22  ;;  %v599_v27 = vld [vmem:[%s13603_s2 + $0x2c0] sm:$0xff]  ;;  %6731 = vmatprep.subr.bf16.mxu0 %v10904_v25  ;;  %v11031_v32 = vcombine.low %v719_v21, %v723_v22  ;;  %v13723_v21 = vcombine.low %v13658_v55, %v13658_v55 }
 0x135   : > { %v603_v28 = vld [vmem:[%s13603_s2 + $0x2e0] sm:$0xff]  ;;  %6732 = vmatpush1.bf16.msra.mxu0 %v10903_v31 }
 0x136   : > { %v727_v29 = vld [vmem:[%s13603_s2 + $0x6c0] sm:$0xff]  ;;  %v10912_v33 = vcombine.high %v599_v27, %v603_v28  ;;  %6772 = vmatprep.subr.bf16.mxu1 %v11032_v26  ;;  %v10911_v39 = vcombine.low %v599_v27, %v603_v28  ;;  %v13732_v28 = vcombine.high %v13719_v20, %v13719_v20 }
 0x137   : > { %v731_v30 = vld [vmem:[%s13603_s2 + $0x6e0] sm:$0xff]  ;;  %6773 = vmatpush1.bf16.msra.mxu1 %v11031_v32 }
 0x138   : > { %v11040_v34 = vcombine.high %v727_v29, %v731_v30  ;;  %v607_v35 = vld [vmem:[%s13603_s2 + $0x300] sm:$0xff]  ;;  %6733 = vmatprep.subr.bf16.mxu0 %v10912_v33  ;;  %v11039_v40 = vcombine.low %v727_v29, %v731_v30  ;;  %v13739_v30 = vcombine.high %v13726_v23, %v13726_v23 }
 0x139   : > { %v611_v36 = vld [vmem:[%s13603_s2 + $0x320] sm:$0xff]  ;;  %6734 = vmatpush1.bf16.msra.mxu0 %v10911_v39 }
 0x13a   : > { %v735_v37 = vld [vmem:[%s13603_s2 + $0x700] sm:$0xff]  ;;  %v10920_v41 = vcombine.high %v607_v35, %v611_v36  ;;  %6774 = vmatprep.subr.bf16.mxu1 %v11040_v34  ;;  %v10919_v47 = vcombine.low %v607_v35, %v611_v36 }
 0x13b   : > { %v739_v38 = vld [vmem:[%s13603_s2 + $0x720] sm:$0xff]  ;;  %6775 = vmatpush1.bf16.msra.mxu1 %v11039_v40 }
 0x13c   : > { %v11048_v42 = vcombine.high %v735_v37, %v739_v38  ;;  %v615_v43 = vld [vmem:[%s13603_s2 + $0x340] sm:$0xff]  ;;  %6735 = vmatprep.subr.bf16.mxu0 %v10920_v41  ;;  %v11047_v48 = vcombine.low %v735_v37, %v739_v38 }
 0x13d   : > { %v619_v44 = vld [vmem:[%s13603_s2 + $0x360] sm:$0xff]  ;;  %6736 = vmatpush1.bf16.msra.mxu0 %v10919_v47 }
 0x13e   : > { %v743_v45 = vld [vmem:[%s13603_s2 + $0x740] sm:$0xff]  ;;  %v10928_v49 = vcombine.high %v615_v43, %v619_v44  ;;  %6776 = vmatprep.subr.bf16.mxu1 %v11048_v42  ;;  %v10927_v57 = vcombine.low %v615_v43, %v619_v44 }
 0x13f   : > { %v747_v46 = vld [vmem:[%s13603_s2 + $0x760] sm:$0xff]  ;;  %6777 = vmatpush1.bf16.msra.mxu1 %v11047_v48 }
 0x140   : > { %v11056_v50 = vcombine.high %v743_v45, %v747_v46  ;;  %v623_v51 = vld [vmem:[%s13603_s2 + $0x380] sm:$0xff]  ;;  %6737 = vmatprep.subr.bf16.mxu0 %v10928_v49  ;;  %v11055_v58 = vcombine.low %v743_v45, %v747_v46 }
 0x141   : > { %v627_v52 = vld [vmem:[%s13603_s2 + $0x3a0] sm:$0xff]  ;;  %6738 = vmatpush1.bf16.msra.mxu0 %v10927_v57 }
 0x142   : > { %v751_v53 = vld [vmem:[%s13603_s2 + $0x780] sm:$0xff]  ;;  %v10936_v61 = vcombine.high %v623_v51, %v627_v52  ;;  %6778 = vmatprep.subr.bf16.mxu1 %v11056_v50  ;;  %v10935_v3 = vcombine.low %v623_v51, %v627_v52 }
 0x143   : > { %v755_v56 = vld [vmem:[%s13603_s2 + $0x7a0] sm:$0xff]  ;;  %6779 = vmatpush1.bf16.msra.mxu1 %v11055_v58 }
 0x144   : > { %v11064_v62 = vcombine.high %v751_v53, %v755_v56  ;;  %v631_v63 = vld [vmem:[%s13603_s2 + $0x3c0] sm:$0xff]  ;;  %6739 = vmatprep.subr.bf16.mxu0 %v10936_v61  ;;  %v11063_v4 = vcombine.low %v751_v53, %v755_v56 }
 0x145   : > { %v635_v0 = vld [vmem:[%s13603_s2 + $0x3e0] sm:$0xff]  ;;  %6740 = vmatpush1.bf16.msra.mxu0 %v10935_v3 }
 0x146   : > { %v759_v1 = vld [vmem:[%s13603_s2 + $0x7c0] sm:$0xff]  ;;  %v10944_v5 = vcombine.high %v631_v63, %v635_v0  ;;  %6780 = vmatprep.subr.bf16.mxu1 %v11064_v62  ;;  %v10943_v11 = vcombine.low %v631_v63, %v635_v0 }
 0x147   : > { %v763_v2 = vld [vmem:[%s13603_s2 + $0x7e0] sm:$0xff]  ;;  %6781 = vmatpush1.bf16.msra.mxu1 %v11063_v4 }
 0x148   : > { %v11072_v6 = vcombine.high %v759_v1, %v763_v2  ;;  %v767_v7 = vld [vmem:[%s13603_s2 + $0x800] sm:$0xff]  ;;  %6741 = vmatprep.subr.bf16.mxu0 %v10944_v5  ;;  %v11071_v12 = vcombine.low %v759_v1, %v763_v2 }
 0x149   : > { %v771_v8 = vld [vmem:[%s13603_s2 + $0x820] sm:$0xff]  ;;  %6742 = vmatpush1.bf16.msra.mxu0 %v10943_v11 }
 0x14a   : > { %v895_v9 = vld [vmem:[%s13603_s2 + $0xc00] sm:$0xff]  ;;  %v11080_v13 = vcombine.high %v767_v7, %v771_v8  ;;  %6782 = vmatprep.subr.bf16.mxu1 %v11072_v6  ;;  %v11079_v22 = vcombine.low %v767_v7, %v771_v8 }
 0x14b   : > { %v899_v10 = vld [vmem:[%s13603_s2 + $0xc20] sm:$0xff]  ;;  %6783 = vmatpush1.bf16.msra.mxu1 %v11071_v12 }
 0x14c   : > { %v11208_v14 = vcombine.high %v895_v9, %v899_v10  ;;  %v775_v15 = vld [vmem:[%s13603_s2 + $0x840] sm:$0xff]  ;;  %6793 = vmatprep.subr.bf16.mxu0 %v11080_v13  ;;  %v11207_v24 = vcombine.low %v895_v9, %v899_v10  ;;  %6744 = vmatmul.mubr.bf16.vlgmr.msra.gmra.mrb[0].mxu0 %v13714_v17 }
 0x14d   : > { %v779_v16 = vld [vmem:[%s13603_s2 + $0x860] sm:$0xff]  ;;  %6794 = vmatpush1.bf16.msra.mxu0 %v11079_v22  ;;  %6825 = vmatprep.mubr.bf16.mxu0 %v13732_v28 }
 0x14e   : > { %v903_v18 = vld [vmem:[%s13603_s2 + $0xc40] sm:$0xff]  ;;  %v11088_v25 = vcombine.high %v775_v15, %v779_v16  ;;  %6834 = vmatprep.subr.bf16.mxu1 %v11208_v14  ;;  %6785 = vmatmul.mubr.bf16.vlgmr.msra.gmra.mrb[0].mxu1 %v13723_v21  ;;  %v11087_v31 = vcombine.low %v775_v15, %v779_v16 }
 0x14f   : > { %v907_v19 = vld [vmem:[%s13603_s2 + $0xc60] sm:$0xff]  ;;  %6835 = vmatpush1.bf16.msra.mxu1 %v11207_v24  ;;  %6866 = vmatprep.mubr.bf16.mxu1 %v13739_v30 }
 0x150   : > { %v11216_v54 = vcombine.high %v903_v18, %v907_v19  ;;  %v783_v26 = vld [vmem:[%s13603_s2 + $0x880] sm:$0xff]  ;;  %6795 = vmatprep.subr.bf16.mxu0 %v11088_v25  ;;  %v11215_v32 = vcombine.low %v903_v18, %v907_v19 }
 0x151   : > { %v787_v27 = vld [vmem:[%s13603_s2 + $0x8a0] sm:$0xff]  ;;  %6796 = vmatpush1.bf16.msra.mxu0 %v11087_v31 }
 0x152   : > { %v911_v55 = vld [vmem:[%s13603_s2 + $0xc80] sm:$0xff]  ;;  %v11096_v33 = vcombine.high %v783_v26, %v787_v27  ;;  %6836 = vmatprep.subr.bf16.mxu1 %v11216_v54  ;;  %v11095_v39 = vcombine.low %v783_v26, %v787_v27 }
 0x153   : > { %v915_v29 = vld [vmem:[%s13603_s2 + $0xca0] sm:$0xff]  ;;  %6837 = vmatpush1.bf16.msra.mxu1 %v11215_v32 }
 0x154   : > { %v11224_v34 = vcombine.high %v911_v55, %v915_v29  ;;  %v791_v35 = vld [vmem:[%s13603_s2 + $0x8c0] sm:$0xff]  ;;  %6797 = vmatprep.subr.bf16.mxu0 %v11096_v33  ;;  %v11223_v40 = vcombine.low %v911_v55, %v915_v29 }
 0x155   : > { %v795_v36 = vld [vmem:[%s13603_s2 + $0x8e0] sm:$0xff]  ;;  %6798 = vmatpush1.bf16.msra.mxu0 %v11095_v39 }
 0x156   : > { %v919_v37 = vld [vmem:[%s13603_s2 + $0xcc0] sm:$0xff]  ;;  %v11104_v41 = vcombine.high %v791_v35, %v795_v36  ;;  %6838 = vmatprep.subr.bf16.mxu1 %v11224_v34  ;;  %v11103_v47 = vcombine.low %v791_v35, %v795_v36 }
 0x157   : > { %v923_v38 = vld [vmem:[%s13603_s2 + $0xce0] sm:$0xff]  ;;  %6839 = vmatpush1.bf16.msra.mxu1 %v11223_v40 }
 0x158   : > { %v11232_v42 = vcombine.high %v919_v37, %v923_v38  ;;  %v799_v43 = vld [vmem:[%s13603_s2 + $0x900] sm:$0xff]  ;;  %6799 = vmatprep.subr.bf16.mxu0 %v11104_v41  ;;  %v11231_v48 = vcombine.low %v919_v37, %v923_v38 }
 0x159   : > { %v803_v44 = vld [vmem:[%s13603_s2 + $0x920] sm:$0xff]  ;;  %6800 = vmatpush1.bf16.msra.mxu0 %v11103_v47 }
 0x15a   : > { %v927_v45 = vld [vmem:[%s13603_s2 + $0xd00] sm:$0xff]  ;;  %v11112_v49 = vcombine.high %v799_v43, %v803_v44  ;;  %6840 = vmatprep.subr.bf16.mxu1 %v11232_v42  ;;  %v11111_v57 = vcombine.low %v799_v43, %v803_v44 }
 0x15b   : > { %v931_v46 = vld [vmem:[%s13603_s2 + $0xd20] sm:$0xff]  ;;  %6841 = vmatpush1.bf16.msra.mxu1 %v11231_v48 }
 0x15c   : > { %v11240_v50 = vcombine.high %v927_v45, %v931_v46  ;;  %v807_v51 = vld [vmem:[%s13603_s2 + $0x940] sm:$0xff]  ;;  %6801 = vmatprep.subr.bf16.mxu0 %v11112_v49  ;;  %v11239_v58 = vcombine.low %v927_v45, %v931_v46 }
 0x15d   : > { %v811_v52 = vld [vmem:[%s13603_s2 + $0x960] sm:$0xff]  ;;  %6802 = vmatpush1.bf16.msra.mxu0 %v11111_v57 }
 0x15e   : > { %v935_v53 = vld [vmem:[%s13603_s2 + $0xd40] sm:$0xff]  ;;  %v11120_v61 = vcombine.high %v807_v51, %v811_v52  ;;  %6842 = vmatprep.subr.bf16.mxu1 %v11240_v50  ;;  %v11119_v3 = vcombine.low %v807_v51, %v811_v52 }
 0x15f   : > { %v939_v56 = vld [vmem:[%s13603_s2 + $0xd60] sm:$0xff]  ;;  %6843 = vmatpush1.bf16.msra.mxu1 %v11239_v58 }
 0x160   : > { %v11248_v62 = vcombine.high %v935_v53, %v939_v56  ;;  %v815_v63 = vld [vmem:[%s13603_s2 + $0x980] sm:$0xff]  ;;  %6803 = vmatprep.subr.bf16.mxu0 %v11120_v61  ;;  %v11247_v4 = vcombine.low %v935_v53, %v939_v56 }
 0x161   : > { %v819_v0 = vld [vmem:[%s13603_s2 + $0x9a0] sm:$0xff]  ;;  %6804 = vmatpush1.bf16.msra.mxu0 %v11119_v3 }
 0x162   : > { %v943_v1 = vld [vmem:[%s13603_s2 + $0xd80] sm:$0xff]  ;;  %v11128_v5 = vcombine.high %v815_v63, %v819_v0  ;;  %6844 = vmatprep.subr.bf16.mxu1 %v11248_v62  ;;  %v11127_v11 = vcombine.low %v815_v63, %v819_v0 }
 0x163   : > { %v947_v2 = vld [vmem:[%s13603_s2 + $0xda0] sm:$0xff]  ;;  %6845 = vmatpush1.bf16.msra.mxu1 %v11247_v4 }
 0x164   : > { %v11256_v6 = vcombine.high %v943_v1, %v947_v2  ;;  %v823_v7 = vld [vmem:[%s13603_s2 + $0x9c0] sm:$0xff]  ;;  %6805 = vmatprep.subr.bf16.mxu0 %v11128_v5  ;;  %v11255_v12 = vcombine.low %v943_v1, %v947_v2 }
 0x165   : > { %v827_v8 = vld [vmem:[%s13603_s2 + $0x9e0] sm:$0xff]  ;;  %6806 = vmatpush1.bf16.msra.mxu0 %v11127_v11 }
 0x166   : > { %v951_v9 = vld [vmem:[%s13603_s2 + $0xdc0] sm:$0xff]  ;;  %v11136_v13 = vcombine.high %v823_v7, %v827_v8  ;;  %6846 = vmatprep.subr.bf16.mxu1 %v11256_v6  ;;  %v11135_v22 = vcombine.low %v823_v7, %v827_v8 }
 0x167   : > { %v955_v10 = vld [vmem:[%s13603_s2 + $0xde0] sm:$0xff]  ;;  %6847 = vmatpush1.bf16.msra.mxu1 %v11255_v12 }
 0x168   : > { %v11264_v14 = vcombine.high %v951_v9, %v955_v10  ;;  %v831_v15 = vld [vmem:[%s13603_s2 + $0xa00] sm:$0xff]  ;;  %6807 = vmatprep.subr.bf16.mxu0 %v11136_v13  ;;  %v11263_v24 = vcombine.low %v951_v9, %v955_v10 }
 0x169   : > { %v835_v16 = vld [vmem:[%s13603_s2 + $0xa20] sm:$0xff]  ;;  %6808 = vmatpush1.bf16.msra.mxu0 %v11135_v22 }
 0x16a   : > { %v959_v18 = vld [vmem:[%s13603_s2 + $0xe00] sm:$0xff]  ;;  %v11144_v25 = vcombine.high %v831_v15, %v835_v16  ;;  %6848 = vmatprep.subr.bf16.mxu1 %v11264_v14  ;;  %v11143_v31 = vcombine.low %v831_v15, %v835_v16 }
 0x16b   : > { %v963_v19 = vld [vmem:[%s13603_s2 + $0xe20] sm:$0xff]  ;;  %6849 = vmatpush1.bf16.msra.mxu1 %v11263_v24 }
 0x16c   : > { %v11272_v54 = vcombine.high %v959_v18, %v963_v19  ;;  %v839_v26 = vld [vmem:[%s13603_s2 + $0xa40] sm:$0xff]  ;;  %6809 = vmatprep.subr.bf16.mxu0 %v11144_v25  ;;  %v11271_v32 = vcombine.low %v959_v18, %v963_v19 }
 0x16d   : > { %v843_v27 = vld [vmem:[%s13603_s2 + $0xa60] sm:$0xff]  ;;  %6810 = vmatpush1.bf16.msra.mxu0 %v11143_v31 }
 0x16e   : > { %v967_v55 = vld [vmem:[%s13603_s2 + $0xe40] sm:$0xff]  ;;  %v11152_v33 = vcombine.high %v839_v26, %v843_v27  ;;  %6850 = vmatprep.subr.bf16.mxu1 %v11272_v54  ;;  %v11151_v39 = vcombine.low %v839_v26, %v843_v27 }
 0x16f   : > { %v971_v29 = vld [vmem:[%s13603_s2 + $0xe60] sm:$0xff]  ;;  %6851 = vmatpush1.bf16.msra.mxu1 %v11271_v32 }
 0x170   : > { %v11280_v34 = vcombine.high %v967_v55, %v971_v29  ;;  %v847_v35 = vld [vmem:[%s13603_s2 + $0xa80] sm:$0xff]  ;;  %6811 = vmatprep.subr.bf16.mxu0 %v11152_v33  ;;  %v11279_v40 = vcombine.low %v967_v55, %v971_v29 }
 0x171   : > { %v851_v36 = vld [vmem:[%s13603_s2 + $0xaa0] sm:$0xff]  ;;  %6812 = vmatpush1.bf16.msra.mxu0 %v11151_v39 }
 0x172   : > { %v975_v37 = vld [vmem:[%s13603_s2 + $0xe80] sm:$0xff]  ;;  %v11160_v41 = vcombine.high %v847_v35, %v851_v36  ;;  %6852 = vmatprep.subr.bf16.mxu1 %v11280_v34  ;;  %v11159_v47 = vcombine.low %v847_v35, %v851_v36 }
 0x173   : > { %v979_v38 = vld [vmem:[%s13603_s2 + $0xea0] sm:$0xff]  ;;  %6853 = vmatpush1.bf16.msra.mxu1 %v11279_v40 }
 0x174   : > { %v11288_v42 = vcombine.high %v975_v37, %v979_v38  ;;  %v855_v43 = vld [vmem:[%s13603_s2 + $0xac0] sm:$0xff]  ;;  %6813 = vmatprep.subr.bf16.mxu0 %v11160_v41  ;;  %v11287_v48 = vcombine.low %v975_v37, %v979_v38  ;;  %v13804_v37 = vcombine.low %v13719_v20, %v13719_v20  ;;  %v13813_v41 = vcombine.low %v13726_v23, %v13726_v23 }
 0x175   : > { %v859_v44 = vld [vmem:[%s13603_s2 + $0xae0] sm:$0xff]  ;;  %6814 = vmatpush1.bf16.msra.mxu0 %v11159_v47 }
 0x176   : > { %v983_v45 = vld [vmem:[%s13603_s2 + $0xec0] sm:$0xff]  ;;  %v11168_v49 = vcombine.high %v855_v43, %v859_v44  ;;  %6854 = vmatprep.subr.bf16.mxu1 %v11288_v42  ;;  %v11167_v57 = vcombine.low %v855_v43, %v859_v44  ;;  %v13816_v43 = vld [vmem:[%s13596_s27 + $0x28] sm:$0xff] }
 0x177   : > { %v987_v46 = vld [vmem:[%s13603_s2 + $0xee0] sm:$0xff]  ;;  %6855 = vmatpush1.bf16.msra.mxu1 %v11287_v48 }
 0x178   : > { %v11296_v50 = vcombine.high %v983_v45, %v987_v46  ;;  %v863_v51 = vld [vmem:[%s13603_s2 + $0xb00] sm:$0xff]  ;;  %6815 = vmatprep.subr.bf16.mxu0 %v11168_v49  ;;  %v11295_v58 = vcombine.low %v983_v45, %v987_v46 }
 0x179   : > { %v867_v52 = vld [vmem:[%s13603_s2 + $0xb20] sm:$0xff]  ;;  %6816 = vmatpush1.bf16.msra.mxu0 %v11167_v57 }
 0x17a   : > { %v991_v53 = vld [vmem:[%s13603_s2 + $0xf00] sm:$0xff]  ;;  %v11176_v61 = vcombine.high %v863_v51, %v867_v52  ;;  %6856 = vmatprep.subr.bf16.mxu1 %v11296_v50  ;;  %v11175_v3 = vcombine.low %v863_v51, %v867_v52  ;;  %v13829_v50 = vcombine.high %v13816_v43, %v13816_v43 }
 0x17b   : > { %v995_v56 = vld [vmem:[%s13603_s2 + $0xf20] sm:$0xff]  ;;  %6857 = vmatpush1.bf16.msra.mxu1 %v11295_v58 }
 0x17c   : > { %v11304_v62 = vcombine.high %v991_v53, %v995_v56  ;;  %v871_v63 = vld [vmem:[%s13603_s2 + $0xb40] sm:$0xff]  ;;  %6817 = vmatprep.subr.bf16.mxu0 %v11176_v61  ;;  %v11303_v4 = vcombine.low %v991_v53, %v995_v56 }
 0x17d   : > { %v875_v0 = vld [vmem:[%s13603_s2 + $0xb60] sm:$0xff]  ;;  %6818 = vmatpush1.bf16.msra.mxu0 %v11175_v3 }
 0x17e   : > { %v999_v1 = vld [vmem:[%s13603_s2 + $0xf40] sm:$0xff]  ;;  %v11184_v5 = vcombine.high %v871_v63, %v875_v0  ;;  %6858 = vmatprep.subr.bf16.mxu1 %v11304_v62  ;;  %v11183_v11 = vcombine.low %v871_v63, %v875_v0 }
 0x17f   : > { %v1003_v2 = vld [vmem:[%s13603_s2 + $0xf60] sm:$0xff]  ;;  %6859 = vmatpush1.bf16.msra.mxu1 %v11303_v4 }
 0x180   : > { %v11312_v6 = vcombine.high %v999_v1, %v1003_v2  ;;  %v879_v7 = vld [vmem:[%s13603_s2 + $0xb80] sm:$0xff]  ;;  %6819 = vmatprep.subr.bf16.mxu0 %v11184_v5  ;;  %v11311_v12 = vcombine.low %v999_v1, %v1003_v2 }
 0x181   : > { %v883_v8 = vld [vmem:[%s13603_s2 + $0xba0] sm:$0xff]  ;;  %6820 = vmatpush1.bf16.msra.mxu0 %v11183_v11 }
 0x182   : > { %v1007_v9 = vld [vmem:[%s13603_s2 + $0xf80] sm:$0xff]  ;;  %v11192_v13 = vcombine.high %v879_v7, %v883_v8  ;;  %6860 = vmatprep.subr.bf16.mxu1 %v11312_v6  ;;  %v11191_v22 = vcombine.low %v879_v7, %v883_v8 }
 0x183   : > { %v1011_v10 = vld [vmem:[%s13603_s2 + $0xfa0] sm:$0xff]  ;;  %6861 = vmatpush1.bf16.msra.mxu1 %v11311_v12 }
 0x184   : > { %v11320_v14 = vcombine.high %v1007_v9, %v1011_v10  ;;  %v887_v15 = vld [vmem:[%s13603_s2 + $0xbc0] sm:$0xff]  ;;  %6821 = vmatprep.subr.bf16.mxu0 %v11192_v13  ;;  %v11319_v24 = vcombine.low %v1007_v9, %v1011_v10 }
 0x185   : > { %v891_v16 = vld [vmem:[%s13603_s2 + $0xbe0] sm:$0xff]  ;;  %6822 = vmatpush1.bf16.msra.mxu0 %v11191_v22 }
 0x186   : > { %v1015_v18 = vld [vmem:[%s13603_s2 + $0xfc0] sm:$0xff]  ;;  %v11200_v25 = vcombine.high %v887_v15, %v891_v16  ;;  %6862 = vmatprep.subr.bf16.mxu1 %v11320_v14  ;;  %v11199_v31 = vcombine.low %v887_v15, %v891_v16 }
 0x187   : > { %v1019_v19 = vld [vmem:[%s13603_s2 + $0xfe0] sm:$0xff]  ;;  %6863 = vmatpush1.bf16.msra.mxu1 %v11319_v24 }
 0x188   : > { %v11328_v54 = vcombine.high %v1015_v18, %v1019_v19  ;;  %v1023_v26 = vld [vmem:[%s13603_s2 + $0x1000] sm:$0xff]  ;;  %6823 = vmatprep.subr.bf16.mxu0 %v11200_v25  ;;  %v11327_v32 = vcombine.low %v1015_v18, %v1019_v19 }
 0x189   : > { %v1027_v27 = vld [vmem:[%s13603_s2 + $0x1020] sm:$0xff]  ;;  %6824 = vmatpush1.bf16.msra.mxu0 %v11199_v31 }
 0x18a   : > { %v1151_v55 = vld [vmem:[%s13603_s2 + $0x1400] sm:$0xff]  ;;  %v11336_v33 = vcombine.high %v1023_v26, %v1027_v27  ;;  %6864 = vmatprep.subr.bf16.mxu1 %v11328_v54  ;;  %v11335_v42 = vcombine.low %v1023_v26, %v1027_v27 }
 0x18b   : > { %v1155_v29 = vld [vmem:[%s13603_s2 + $0x1420] sm:$0xff]  ;;  %6865 = vmatpush1.bf16.msra.mxu1 %v11327_v32 }
 0x18c   : > { %v11464_v34 = vcombine.high %v1151_v55, %v1155_v29  ;;  %v1031_v35 = vld [vmem:[%s13603_s2 + $0x1040] sm:$0xff]  ;;  %6875 = vmatprep.subr.bf16.mxu0 %v11336_v33  ;;  %v11463_v44 = vcombine.low %v1151_v55, %v1155_v29  ;;  %6826 = vmatmul.mubr.bf16.vlgmr.msra.gmra.mrb[4].mxu0 %v13804_v37 }
 0x18d   : > { %v1035_v36 = vld [vmem:[%s13603_s2 + $0x1060] sm:$0xff]  ;;  %6876 = vmatpush1.bf16.msra.mxu0 %v11335_v42 }
 0x18e   : > { %v1159_v38 = vld [vmem:[%s13603_s2 + $0x1440] sm:$0xff]  ;;  %v11344_v45 = vcombine.high %v1031_v35, %v1035_v36  ;;  %6916 = vmatprep.subr.bf16.mxu1 %v11464_v34  ;;  %6867 = vmatmul.mubr.bf16.vlgmr.msra.gmra.mrb[4].mxu1 %v13813_v41  ;;  %v11343_v51 = vcombine.low %v1031_v35, %v1035_v36 }
 0x18f   : > { %v1163_v39 = vld [vmem:[%s13603_s2 + $0x1460] sm:$0xff]  ;;  %6917 = vmatpush1.bf16.msra.mxu1 %v11463_v44  ;;  %6948 = vmatprep.mubr.bf16.mxu1 %v13829_v50 }
 0x190   : > { %v13809_v40 = vld [vmem:[%s13596_s27 + $0x20] sm:$0xff]  ;;  %v11472_v20 = vcombine.high %v1159_v38, %v1163_v39  ;;  %6877 = vmatprep.subr.bf16.mxu0 %v11344_v45  ;;  %v11471_v52 = vcombine.low %v1159_v38, %v1163_v39 }
 0x191   : > { %v1039_v46 = vld [vmem:[%s13603_s2 + $0x1080] sm:$0xff]  ;;  %v13822_v48 = vcombine.high %v13809_v40, %v13809_v40  ;;  %6878 = vmatpush1.bf16.msra.mxu0 %v11343_v51 }
 0x192   : > { %v1043_v47 = vld [vmem:[%s13603_s2 + $0x10a0] sm:$0xff]  ;;  %6918 = vmatprep.subr.bf16.mxu1 %v11472_v20 }
 0x193   : > { %v1167_v23 = vld [vmem:[%s13603_s2 + $0x1480] sm:$0xff]  ;;  %v11352_v53 = vcombine.high %v1039_v46, %v1043_v47  ;;  %6907 = vmatprep.mubr.bf16.mxu0 %v13822_v48  ;;  %v11351_v63 = vcombine.low %v1039_v46, %v1043_v47  ;;  %6919 = vmatpush1.bf16.msra.mxu1 %v11471_v52 }
 0x194   : > { %v1171_v49 = vld [vmem:[%s13603_s2 + $0x14a0] sm:$0xff] }
 0x195   : > { %v11480_v56 = vcombine.high %v1167_v23, %v1171_v49  ;;  %v1047_v57 = vld [vmem:[%s13603_s2 + $0x10c0] sm:$0xff]  ;;  %6879 = vmatprep.subr.bf16.mxu0 %v11352_v53  ;;  %v11479_v0 = vcombine.low %v1167_v23, %v1171_v49 }
 0x196   : > { %v1051_v58 = vld [vmem:[%s13603_s2 + $0x10e0] sm:$0xff]  ;;  %6880 = vmatpush1.bf16.msra.mxu0 %v11351_v63 }
 0x197   : > { %v1175_v61 = vld [vmem:[%s13603_s2 + $0x14c0] sm:$0xff]  ;;  %v11360_v1 = vcombine.high %v1047_v57, %v1051_v58  ;;  %6920 = vmatprep.subr.bf16.mxu1 %v11480_v56  ;;  %v11359_v7 = vcombine.low %v1047_v57, %v1051_v58 }
 0x198   : > { %v1179_v62 = vld [vmem:[%s13603_s2 + $0x14e0] sm:$0xff]  ;;  %6921 = vmatpush1.bf16.msra.mxu1 %v11479_v0 }
 0x199   : > { %v11488_v2 = vcombine.high %v1175_v61, %v1179_v62  ;;  %v1055_v3 = vld [vmem:[%s13603_s2 + $0x1100] sm:$0xff]  ;;  %6881 = vmatprep.subr.bf16.mxu0 %v11360_v1  ;;  %v11487_v8 = vcombine.low %v1175_v61, %v1179_v62 }
 0x19a   : > { %v1059_v4 = vld [vmem:[%s13603_s2 + $0x1120] sm:$0xff]  ;;  %6882 = vmatpush1.bf16.msra.mxu0 %v11359_v7 }
 0x19b   : > { %v1183_v5 = vld [vmem:[%s13603_s2 + $0x1500] sm:$0xff]  ;;  %v11368_v9 = vcombine.high %v1055_v3, %v1059_v4  ;;  %6922 = vmatprep.subr.bf16.mxu1 %v11488_v2  ;;  %v11367_v15 = vcombine.low %v1055_v3, %v1059_v4 }
 0x19c   : > { %v1187_v6 = vld [vmem:[%s13603_s2 + $0x1520] sm:$0xff]  ;;  %6923 = vmatpush1.bf16.msra.mxu1 %v11487_v8 }
 0x19d   : > { %v11496_v10 = vcombine.high %v1183_v5, %v1187_v6  ;;  %v1063_v11 = vld [vmem:[%s13603_s2 + $0x1140] sm:$0xff]  ;;  %6883 = vmatprep.subr.bf16.mxu0 %v11368_v9  ;;  %v11495_v16 = vcombine.low %v1183_v5, %v1187_v6 }
 0x19e   : > { %v1067_v12 = vld [vmem:[%s13603_s2 + $0x1160] sm:$0xff]  ;;  %6884 = vmatpush1.bf16.msra.mxu0 %v11367_v15 }
 0x19f   : > { %v1191_v13 = vld [vmem:[%s13603_s2 + $0x1540] sm:$0xff]  ;;  %v11376_v18 = vcombine.high %v1063_v11, %v1067_v12  ;;  %6924 = vmatprep.subr.bf16.mxu1 %v11496_v10  ;;  %v11375_v26 = vcombine.low %v1063_v11, %v1067_v12 }
 0x1a0   : > { %v1195_v14 = vld [vmem:[%s13603_s2 + $0x1560] sm:$0xff]  ;;  %6925 = vmatpush1.bf16.msra.mxu1 %v11495_v16 }
 0x1a1   : > { %v11504_v19 = vcombine.high %v1191_v13, %v1195_v14  ;;  %v1071_v22 = vld [vmem:[%s13603_s2 + $0x1180] sm:$0xff]  ;;  %6885 = vmatprep.subr.bf16.mxu0 %v11376_v18  ;;  %v11503_v27 = vcombine.low %v1191_v13, %v1195_v14 }
 0x1a2   : > { %v1075_v24 = vld [vmem:[%s13603_s2 + $0x11a0] sm:$0xff]  ;;  %6886 = vmatpush1.bf16.msra.mxu0 %v11375_v26 }
 0x1a3   : > { %v1199_v25 = vld [vmem:[%s13603_s2 + $0x1580] sm:$0xff]  ;;  %v11384_v55 = vcombine.high %v1071_v22, %v1075_v24  ;;  %6926 = vmatprep.subr.bf16.mxu1 %v11504_v19  ;;  %v11383_v35 = vcombine.low %v1071_v22, %v1075_v24 }
 0x1a4   : > { %v1203_v54 = vld [vmem:[%s13603_s2 + $0x15a0] sm:$0xff]  ;;  %6927 = vmatpush1.bf16.msra.mxu1 %v11503_v27 }
 0x1a5   : > { %v11512_v29 = vcombine.high %v1199_v25, %v1203_v54  ;;  %v1079_v31 = vld [vmem:[%s13603_s2 + $0x11c0] sm:$0xff]  ;;  %6887 = vmatprep.subr.bf16.mxu0 %v11384_v55  ;;  %v11511_v36 = vcombine.low %v1199_v25, %v1203_v54 }
 0x1a6   : > { %v1083_v32 = vld [vmem:[%s13603_s2 + $0x11e0] sm:$0xff]  ;;  %6888 = vmatpush1.bf16.msra.mxu0 %v11383_v35 }
 0x1a7   : > { %v1207_v33 = vld [vmem:[%s13603_s2 + $0x15c0] sm:$0xff]  ;;  %v11392_v38 = vcombine.high %v1079_v31, %v1083_v32  ;;  %6928 = vmatprep.subr.bf16.mxu1 %v11512_v29  ;;  %v11391_v46 = vcombine.low %v1079_v31, %v1083_v32 }
 0x1a8   : > { %v1211_v34 = vld [vmem:[%s13603_s2 + $0x15e0] sm:$0xff]  ;;  %6929 = vmatpush1.bf16.msra.mxu1 %v11511_v36 }
 0x1a9   : > { %v11520_v39 = vcombine.high %v1207_v33, %v1211_v34  ;;  %v1087_v42 = vld [vmem:[%s13603_s2 + $0x1200] sm:$0xff]  ;;  %6889 = vmatprep.subr.bf16.mxu0 %v11392_v38  ;;  %v11519_v47 = vcombine.low %v1207_v33, %v1211_v34 }
 0x1aa   : > { %v1091_v44 = vld [vmem:[%s13603_s2 + $0x1220] sm:$0xff]  ;;  %6890 = vmatpush1.bf16.msra.mxu0 %v11391_v46 }
 0x1ab   : > { %v1215_v45 = vld [vmem:[%s13603_s2 + $0x1600] sm:$0xff]  ;;  %v11400_v23 = vcombine.high %v1087_v42, %v1091_v44  ;;  %6930 = vmatprep.subr.bf16.mxu1 %v11520_v39  ;;  %v11399_v57 = vcombine.low %v1087_v42, %v1091_v44 }
 0x1ac   : > { %v1219_v20 = vld [vmem:[%s13603_s2 + $0x1620] sm:$0xff]  ;;  %6931 = vmatpush1.bf16.msra.mxu1 %v11519_v47 }
 0x1ad   : > { %v11528_v49 = vcombine.high %v1215_v45, %v1219_v20  ;;  %v1095_v51 = vld [vmem:[%s13603_s2 + $0x1240] sm:$0xff]  ;;  %6891 = vmatprep.subr.bf16.mxu0 %v11400_v23  ;;  %v11527_v58 = vcombine.low %v1215_v45, %v1219_v20 }
 0x1ae   : > { %v1099_v52 = vld [vmem:[%s13603_s2 + $0x1260] sm:$0xff]  ;;  %6892 = vmatpush1.bf16.msra.mxu0 %v11399_v57 }
 0x1af   : > { %v1223_v53 = vld [vmem:[%s13603_s2 + $0x1640] sm:$0xff]  ;;  %v11408_v61 = vcombine.high %v1095_v51, %v1099_v52  ;;  %6932 = vmatprep.subr.bf16.mxu1 %v11528_v49  ;;  %v11407_v3 = vcombine.low %v1095_v51, %v1099_v52 }
 0x1b0   : > { %v1227_v56 = vld [vmem:[%s13603_s2 + $0x1660] sm:$0xff]  ;;  %6933 = vmatpush1.bf16.msra.mxu1 %v11527_v58 }
 0x1b1   : > { %v11536_v62 = vcombine.high %v1223_v53, %v1227_v56  ;;  %v1103_v63 = vld [vmem:[%s13603_s2 + $0x1280] sm:$0xff]  ;;  %6893 = vmatprep.subr.bf16.mxu0 %v11408_v61  ;;  %v11535_v4 = vcombine.low %v1223_v53, %v1227_v56 }
 0x1b2   : > { %v1107_v0 = vld [vmem:[%s13603_s2 + $0x12a0] sm:$0xff]  ;;  %6894 = vmatpush1.bf16.msra.mxu0 %v11407_v3 }
 0x1b3   : > { %v1231_v1 = vld [vmem:[%s13603_s2 + $0x1680] sm:$0xff]  ;;  %v11416_v5 = vcombine.high %v1103_v63, %v1107_v0  ;;  %6934 = vmatprep.subr.bf16.mxu1 %v11536_v62  ;;  %v11415_v11 = vcombine.low %v1103_v63, %v1107_v0 }
 0x1b4   : > { %v1235_v2 = vld [vmem:[%s13603_s2 + $0x16a0] sm:$0xff]  ;;  %6935 = vmatpush1.bf16.msra.mxu1 %v11535_v4 }
 0x1b5   : > { %v11544_v6 = vcombine.high %v1231_v1, %v1235_v2  ;;  %v1111_v7 = vld [vmem:[%s13603_s2 + $0x12c0] sm:$0xff]  ;;  %6895 = vmatprep.subr.bf16.mxu0 %v11416_v5  ;;  %v11543_v12 = vcombine.low %v1231_v1, %v1235_v2  ;;  %v13894_v5 = vcombine.low %v13809_v40, %v13809_v40 }
 0x1b6   : > { %v1115_v8 = vld [vmem:[%s13603_s2 + $0x12e0] sm:$0xff]  ;;  %6896 = vmatpush1.bf16.msra.mxu0 %v11415_v11  ;;  %v13906_v11 = vld [vmem:[%s13596_s27 + $0x38] sm:$0xff] }
 0x1b7   : > { %v1239_v9 = vld [vmem:[%s13603_s2 + $0x16c0] sm:$0xff]  ;;  %v11424_v13 = vcombine.high %v1111_v7, %v1115_v8  ;;  %6936 = vmatprep.subr.bf16.mxu1 %v11544_v6  ;;  %v11423_v22 = vcombine.low %v1111_v7, %v1115_v8  ;;  %v13899_v8 = vld [vmem:[%s13596_s27 + $0x30] sm:$0xff] }
 0x1b8   : > { %v1243_v10 = vld [vmem:[%s13603_s2 + $0x16e0] sm:$0xff]  ;;  %6937 = vmatpush1.bf16.msra.mxu1 %v11543_v12 }
 0x1b9   : > { %v11552_v14 = vcombine.high %v1239_v9, %v1243_v10  ;;  %v1119_v15 = vld [vmem:[%s13603_s2 + $0x1300] sm:$0xff]  ;;  %6897 = vmatprep.subr.bf16.mxu0 %v11424_v13  ;;  %v11551_v24 = vcombine.low %v1239_v9, %v1243_v10  ;;  %v13903_v9 = vcombine.low %v13816_v43, %v13816_v43 }
 0x1ba   : > { %v1123_v16 = vld [vmem:[%s13603_s2 + $0x1320] sm:$0xff]  ;;  %6898 = vmatpush1.bf16.msra.mxu0 %v11423_v22 }
 0x1bb   : > { %v1247_v18 = vld [vmem:[%s13603_s2 + $0x1700] sm:$0xff]  ;;  %v11432_v25 = vcombine.high %v1119_v15, %v1123_v16  ;;  %6938 = vmatprep.subr.bf16.mxu1 %v11552_v14  ;;  %v11431_v31 = vcombine.low %v1119_v15, %v1123_v16  ;;  %v13912_v16 = vcombine.high %v13899_v8, %v13899_v8 }
 0x1bc   : > { %v1251_v19 = vld [vmem:[%s13603_s2 + $0x1720] sm:$0xff]  ;;  %6939 = vmatpush1.bf16.msra.mxu1 %v11551_v24 }
 0x1bd   : > { %v11560_v54 = vcombine.high %v1247_v18, %v1251_v19  ;;  %v1127_v26 = vld [vmem:[%s13603_s2 + $0x1340] sm:$0xff]  ;;  %6899 = vmatprep.subr.bf16.mxu0 %v11432_v25  ;;  %v11559_v32 = vcombine.low %v1247_v18, %v1251_v19  ;;  %v13919_v19 = vcombine.high %v13906_v11, %v13906_v11 }
 0x1be   : > { %v1131_v27 = vld [vmem:[%s13603_s2 + $0x1360] sm:$0xff]  ;;  %6900 = vmatpush1.bf16.msra.mxu0 %v11431_v31 }
 0x1bf   : > { %v1255_v55 = vld [vmem:[%s13603_s2 + $0x1740] sm:$0xff]  ;;  %v11440_v33 = vcombine.high %v1127_v26, %v1131_v27  ;;  %6940 = vmatprep.subr.bf16.mxu1 %v11560_v54  ;;  %v11439_v42 = vcombine.low %v1127_v26, %v1131_v27 }
 0x1c0   : > { %v1259_v29 = vld [vmem:[%s13603_s2 + $0x1760] sm:$0xff]  ;;  %6941 = vmatpush1.bf16.msra.mxu1 %v11559_v32 }
 0x1c1   : > { %v11568_v34 = vcombine.high %v1255_v55, %v1259_v29  ;;  %v1135_v35 = vld [vmem:[%s13603_s2 + $0x1380] sm:$0xff]  ;;  %6901 = vmatprep.subr.bf16.mxu0 %v11440_v33  ;;  %v11567_v44 = vcombine.low %v1255_v55, %v1259_v29 }
 0x1c2   : > { %v1139_v36 = vld [vmem:[%s13603_s2 + $0x13a0] sm:$0xff]  ;;  %6902 = vmatpush1.bf16.msra.mxu0 %v11439_v42 }
 0x1c3   : > { %v1263_v38 = vld [vmem:[%s13603_s2 + $0x1780] sm:$0xff]  ;;  %v11448_v45 = vcombine.high %v1135_v35, %v1139_v36  ;;  %6942 = vmatprep.subr.bf16.mxu1 %v11568_v34  ;;  %v11447_v51 = vcombine.low %v1135_v35, %v1139_v36 }
 0x1c4   : > { %v1267_v39 = vld [vmem:[%s13603_s2 + $0x17a0] sm:$0xff]  ;;  %6943 = vmatpush1.bf16.msra.mxu1 %v11567_v44 }
 0x1c5   : > { %v11576_v20 = vcombine.high %v1263_v38, %v1267_v39  ;;  %v1143_v46 = vld [vmem:[%s13603_s2 + $0x13c0] sm:$0xff]  ;;  %6903 = vmatprep.subr.bf16.mxu0 %v11448_v45  ;;  %v11575_v52 = vcombine.low %v1263_v38, %v1267_v39 }
 0x1c6   : > { %v1147_v47 = vld [vmem:[%s13603_s2 + $0x13e0] sm:$0xff]  ;;  %6904 = vmatpush1.bf16.msra.mxu0 %v11447_v51 }
 0x1c7   : > { %v1271_v23 = vld [vmem:[%s13603_s2 + $0x17c0] sm:$0xff]  ;;  %v11456_v53 = vcombine.high %v1143_v46, %v1147_v47  ;;  %6944 = vmatprep.subr.bf16.mxu1 %v11576_v20  ;;  %v11455_v63 = vcombine.low %v1143_v46, %v1147_v47 }
 0x1c8   : > { %v1275_v49 = vld [vmem:[%s13603_s2 + $0x17e0] sm:$0xff]  ;;  %6945 = vmatpush1.bf16.msra.mxu1 %v11575_v52 }
 0x1c9   : > { %v11584_v56 = vcombine.high %v1271_v23, %v1275_v49  ;;  %v1279_v57 = vld [vmem:[%s13603_s2 + $0x1800] sm:$0xff]  ;;  %6905 = vmatprep.subr.bf16.mxu0 %v11456_v53  ;;  %v11583_v0 = vcombine.low %v1271_v23, %v1275_v49 }
 0x1ca   : > { %v1283_v58 = vld [vmem:[%s13603_s2 + $0x1820] sm:$0xff]  ;;  %6906 = vmatpush1.bf16.msra.mxu0 %v11455_v63 }
 0x1cb   : > { %v1407_v61 = vld [vmem:[%s13603_s2 + $0x1c00] sm:$0xff]  ;;  %v11592_v1 = vcombine.high %v1279_v57, %v1283_v58  ;;  %6946 = vmatprep.subr.bf16.mxu1 %v11584_v56  ;;  %v11591_v10 = vcombine.low %v1279_v57, %v1283_v58 }
 0x1cc   : > { %v1411_v62 = vld [vmem:[%s13603_s2 + $0x1c20] sm:$0xff]  ;;  %6947 = vmatpush1.bf16.msra.mxu1 %v11583_v0 }
 0x1cd   : > { %v11720_v2 = vcombine.high %v1407_v61, %v1411_v62  ;;  %v1287_v3 = vld [vmem:[%s13603_s2 + $0x1840] sm:$0xff]  ;;  %6957 = vmatprep.subr.bf16.mxu0 %v11592_v1  ;;  %v11719_v12 = vcombine.low %v1407_v61, %v1411_v62  ;;  %6908 = vmatmul.mubr.bf16.vlgmr.msra.gmra.mrb[8].mxu0 %v13894_v5 }
 0x1ce   : > { %v1291_v4 = vld [vmem:[%s13603_s2 + $0x1860] sm:$0xff]  ;;  %6958 = vmatpush1.bf16.msra.mxu0 %v11591_v10  ;;  %6989 = vmatprep.mubr.bf16.mxu0 %v13912_v16 }
 0x1cf   : > { %v1415_v6 = vld [vmem:[%s13603_s2 + $0x1c40] sm:$0xff]  ;;  %v11600_v13 = vcombine.high %v1287_v3, %v1291_v4  ;;  %6998 = vmatprep.subr.bf16.mxu1 %v11720_v2  ;;  %6949 = vmatmul.mubr.bf16.vlgmr.msra.gmra.mrb[8].mxu1 %v13903_v9  ;;  %v11599_v22 = vcombine.low %v1287_v3, %v1291_v4 }
 0x1d0   : > { %v1419_v7 = vld [vmem:[%s13603_s2 + $0x1c60] sm:$0xff]  ;;  %6999 = vmatpush1.bf16.msra.mxu1 %v11719_v12  ;;  %7030 = vmatprep.mubr.bf16.mxu1 %v13919_v19 }
 0x1d1   : > { %v11728_v40 = vcombine.high %v1415_v6, %v1419_v7  ;;  %v1295_v14 = vld [vmem:[%s13603_s2 + $0x1880] sm:$0xff]  ;;  %6959 = vmatprep.subr.bf16.mxu0 %v11600_v13  ;;  %v11727_v24 = vcombine.low %v1415_v6, %v1419_v7 }
 0x1d2   : > { %v1299_v15 = vld [vmem:[%s13603_s2 + $0x18a0] sm:$0xff]  ;;  %6960 = vmatpush1.bf16.msra.mxu0 %v11599_v22 }
 0x1d3   : > { %v1423_v43 = vld [vmem:[%s13603_s2 + $0x1c80] sm:$0xff]  ;;  %v11608_v25 = vcombine.high %v1295_v14, %v1299_v15  ;;  %7000 = vmatprep.subr.bf16.mxu1 %v11728_v40  ;;  %v11607_v31 = vcombine.low %v1295_v14, %v1299_v15 }
 0x1d4   : > { %v1427_v18 = vld [vmem:[%s13603_s2 + $0x1ca0] sm:$0xff]  ;;  %7001 = vmatpush1.bf16.msra.mxu1 %v11727_v24 }
 0x1d5   : > { %v11736_v54 = vcombine.high %v1423_v43, %v1427_v18  ;;  %v1303_v26 = vld [vmem:[%s13603_s2 + $0x18c0] sm:$0xff]  ;;  %6961 = vmatprep.subr.bf16.mxu0 %v11608_v25  ;;  %v11735_v32 = vcombine.low %v1423_v43, %v1427_v18 }
 0x1d6   : > { %v1307_v27 = vld [vmem:[%s13603_s2 + $0x18e0] sm:$0xff]  ;;  %6962 = vmatpush1.bf16.msra.mxu0 %v11607_v31 }
 0x1d7   : > { %v1431_v55 = vld [vmem:[%s13603_s2 + $0x1cc0] sm:$0xff]  ;;  %v11616_v33 = vcombine.high %v1303_v26, %v1307_v27  ;;  %7002 = vmatprep.subr.bf16.mxu1 %v11736_v54  ;;  %v11615_v42 = vcombine.low %v1303_v26, %v1307_v27 }
 0x1d8   : > { %v1435_v29 = vld [vmem:[%s13603_s2 + $0x1ce0] sm:$0xff]  ;;  %7003 = vmatpush1.bf16.msra.mxu1 %v11735_v32 }
 0x1d9   : > { %v11744_v34 = vcombine.high %v1431_v55, %v1435_v29  ;;  %v1311_v35 = vld [vmem:[%s13603_s2 + $0x1900] sm:$0xff]  ;;  %6963 = vmatprep.subr.bf16.mxu0 %v11616_v33  ;;  %v11743_v44 = vcombine.low %v1431_v55, %v1435_v29 }
 0x1da   : > { %v1315_v36 = vld [vmem:[%s13603_s2 + $0x1920] sm:$0xff]  ;;  %6964 = vmatpush1.bf16.msra.mxu0 %v11615_v42 }
 0x1db   : > { %v1439_v38 = vld [vmem:[%s13603_s2 + $0x1d00] sm:$0xff]  ;;  %v11624_v45 = vcombine.high %v1311_v35, %v1315_v36  ;;  %7004 = vmatprep.subr.bf16.mxu1 %v11744_v34  ;;  %v11623_v51 = vcombine.low %v1311_v35, %v1315_v36 }
 0x1dc   : > { %v1443_v39 = vld [vmem:[%s13603_s2 + $0x1d20] sm:$0xff]  ;;  %7005 = vmatpush1.bf16.msra.mxu1 %v11743_v44 }
 0x1dd   : > { %v11752_v20 = vcombine.high %v1439_v38, %v1443_v39  ;;  %v1319_v46 = vld [vmem:[%s13603_s2 + $0x1940] sm:$0xff]  ;;  %6965 = vmatprep.subr.bf16.mxu0 %v11624_v45  ;;  %v11751_v52 = vcombine.low %v1439_v38, %v1443_v39 }
 0x1de   : > { %v1323_v47 = vld [vmem:[%s13603_s2 + $0x1960] sm:$0xff]  ;;  %6966 = vmatpush1.bf16.msra.mxu0 %v11623_v51 }
 0x1df   : > { %v1447_v23 = vld [vmem:[%s13603_s2 + $0x1d40] sm:$0xff]  ;;  %v11632_v53 = vcombine.high %v1319_v46, %v1323_v47  ;;  %7006 = vmatprep.subr.bf16.mxu1 %v11752_v20  ;;  %v11631_v63 = vcombine.low %v1319_v46, %v1323_v47 }
 0x1e0   : > { %v1451_v49 = vld [vmem:[%s13603_s2 + $0x1d60] sm:$0xff]  ;;  %7007 = vmatpush1.bf16.msra.mxu1 %v11751_v52 }
 0x1e1   : > { %v11760_v56 = vcombine.high %v1447_v23, %v1451_v49  ;;  %v1327_v57 = vld [vmem:[%s13603_s2 + $0x1980] sm:$0xff]  ;;  %6967 = vmatprep.subr.bf16.mxu0 %v11632_v53  ;;  %v11759_v0 = vcombine.low %v1447_v23, %v1451_v49 }
 0x1e2   : > { %v1331_v58 = vld [vmem:[%s13603_s2 + $0x19a0] sm:$0xff]  ;;  %6968 = vmatpush1.bf16.msra.mxu0 %v11631_v63 }
 0x1e3   : > { %v1455_v61 = vld [vmem:[%s13603_s2 + $0x1d80] sm:$0xff]  ;;  %v11640_v1 = vcombine.high %v1327_v57, %v1331_v58  ;;  %7008 = vmatprep.subr.bf16.mxu1 %v11760_v56  ;;  %v11639_v10 = vcombine.low %v1327_v57, %v1331_v58 }
 0x1e4   : > { %v1459_v62 = vld [vmem:[%s13603_s2 + $0x1da0] sm:$0xff]  ;;  %7009 = vmatpush1.bf16.msra.mxu1 %v11759_v0 }
 0x1e5   : > { %v11768_v2 = vcombine.high %v1455_v61, %v1459_v62  ;;  %v1335_v3 = vld [vmem:[%s13603_s2 + $0x19c0] sm:$0xff]  ;;  %6969 = vmatprep.subr.bf16.mxu0 %v11640_v1  ;;  %v11767_v12 = vcombine.low %v1455_v61, %v1459_v62 }
 0x1e6   : > { %v1339_v4 = vld [vmem:[%s13603_s2 + $0x19e0] sm:$0xff]  ;;  %6970 = vmatpush1.bf16.msra.mxu0 %v11639_v10 }
 0x1e7   : > { %v1463_v6 = vld [vmem:[%s13603_s2 + $0x1dc0] sm:$0xff]  ;;  %v11648_v13 = vcombine.high %v1335_v3, %v1339_v4  ;;  %7010 = vmatprep.subr.bf16.mxu1 %v11768_v2  ;;  %v11647_v22 = vcombine.low %v1335_v3, %v1339_v4 }
 0x1e8   : > { %v1467_v7 = vld [vmem:[%s13603_s2 + $0x1de0] sm:$0xff]  ;;  %7011 = vmatpush1.bf16.msra.mxu1 %v11767_v12 }
 0x1e9   : > { %v11776_v40 = vcombine.high %v1463_v6, %v1467_v7  ;;  %v1343_v14 = vld [vmem:[%s13603_s2 + $0x1a00] sm:$0xff]  ;;  %6971 = vmatprep.subr.bf16.mxu0 %v11648_v13  ;;  %v11775_v24 = vcombine.low %v1463_v6, %v1467_v7 }
 0x1ea   : > { %v1347_v15 = vld [vmem:[%s13603_s2 + $0x1a20] sm:$0xff]  ;;  %6972 = vmatpush1.bf16.msra.mxu0 %v11647_v22 }
 0x1eb   : > { %v1471_v43 = vld [vmem:[%s13603_s2 + $0x1e00] sm:$0xff]  ;;  %v11656_v25 = vcombine.high %v1343_v14, %v1347_v15  ;;  %7012 = vmatprep.subr.bf16.mxu1 %v11776_v40  ;;  %v11655_v31 = vcombine.low %v1343_v14, %v1347_v15 }
 0x1ec   : > { %v1475_v18 = vld [vmem:[%s13603_s2 + $0x1e20] sm:$0xff]  ;;  %7013 = vmatpush1.bf16.msra.mxu1 %v11775_v24 }
 0x1ed   : > { %v11784_v54 = vcombine.high %v1471_v43, %v1475_v18  ;;  %v1351_v26 = vld [vmem:[%s13603_s2 + $0x1a40] sm:$0xff]  ;;  %6973 = vmatprep.subr.bf16.mxu0 %v11656_v25  ;;  %v11783_v32 = vcombine.low %v1471_v43, %v1475_v18 }
 0x1ee   : > { %v1355_v27 = vld [vmem:[%s13603_s2 + $0x1a60] sm:$0xff]  ;;  %6974 = vmatpush1.bf16.msra.mxu0 %v11655_v31 }
 0x1ef   : > { %v1479_v55 = vld [vmem:[%s13603_s2 + $0x1e40] sm:$0xff]  ;;  %v11664_v33 = vcombine.high %v1351_v26, %v1355_v27  ;;  %7014 = vmatprep.subr.bf16.mxu1 %v11784_v54  ;;  %v11663_v42 = vcombine.low %v1351_v26, %v1355_v27 }
 0x1f0   : > { %v1483_v29 = vld [vmem:[%s13603_s2 + $0x1e60] sm:$0xff]  ;;  %7015 = vmatpush1.bf16.msra.mxu1 %v11783_v32 }
 0x1f1   : > { %v11792_v34 = vcombine.high %v1479_v55, %v1483_v29  ;;  %v1359_v35 = vld [vmem:[%s13603_s2 + $0x1a80] sm:$0xff]  ;;  %6975 = vmatprep.subr.bf16.mxu0 %v11664_v33  ;;  %v11791_v44 = vcombine.low %v1479_v55, %v1483_v29 }
 0x1f2   : > { %v1363_v36 = vld [vmem:[%s13603_s2 + $0x1aa0] sm:$0xff]  ;;  %6976 = vmatpush1.bf16.msra.mxu0 %v11663_v42 }
 0x1f3   : > { %v1487_v38 = vld [vmem:[%s13603_s2 + $0x1e80] sm:$0xff]  ;;  %v11672_v45 = vcombine.high %v1359_v35, %v1363_v36  ;;  %7016 = vmatprep.subr.bf16.mxu1 %v11792_v34  ;;  %v11671_v51 = vcombine.low %v1359_v35, %v1363_v36  ;;  %v512_v35 = vld [vmem:[%s13603_s2 + $0x8] sm:$0xff] }
 0x1f4   : > { %v1491_v39 = vld [vmem:[%s13603_s2 + $0x1ea0] sm:$0xff]  ;;  %7017 = vmatpush1.bf16.msra.mxu1 %v11791_v44  ;;  %v516_v36 = vld [vmem:[%s13603_s2 + $0x28] sm:$0xff] }
 0x1f5   : > { %v11800_v20 = vcombine.high %v1487_v38, %v1491_v39  ;;  %v1367_v46 = vld [vmem:[%s13603_s2 + $0x1ac0] sm:$0xff]  ;;  %6977 = vmatprep.subr.bf16.mxu0 %v11672_v45  ;;  %v11799_v52 = vcombine.low %v1487_v38, %v1491_v39  ;;  %v640_v38 = vld [vmem:[%s13603_s2 + $0x408] sm:$0xff]  ;;  %v10826_v45 = vcombine.high %v512_v35, %v516_v36 }
 0x1f6   : > { %v1371_v47 = vld [vmem:[%s13603_s2 + $0x1ae0] sm:$0xff]  ;;  %6978 = vmatpush1.bf16.msra.mxu0 %v11671_v51  ;;  %v644_v39 = vld [vmem:[%s13603_s2 + $0x428] sm:$0xff] }
 0x1f7   : > { %v1495_v23 = vld [vmem:[%s13603_s2 + $0x1ec0] sm:$0xff]  ;;  %v11680_v53 = vcombine.high %v1367_v46, %v1371_v47  ;;  %7018 = vmatprep.subr.bf16.mxu1 %v11800_v20  ;;  %v11679_v63 = vcombine.low %v1367_v46, %v1371_v47  ;;  %v10954_v20 = vcombine.high %v640_v38, %v644_v39  ;;  %v520_v46 = vld [vmem:[%s13603_s2 + $0x48] sm:$0xff] }
 0x1f8   : > { %v1499_v49 = vld [vmem:[%s13603_s2 + $0x1ee0] sm:$0xff]  ;;  %7019 = vmatpush1.bf16.msra.mxu1 %v11799_v52  ;;  %v524_v47 = vld [vmem:[%s13603_s2 + $0x68] sm:$0xff]  ;;  %v13990_v52 = vcombine.low %v13906_v11, %v13906_v11 }
 0x1f9   : > { %v11808_v56 = vcombine.high %v1495_v23, %v1499_v49  ;;  %v1375_v57 = vld [vmem:[%s13603_s2 + $0x1b00] sm:$0xff]  ;;  %6979 = vmatprep.subr.bf16.mxu0 %v11680_v53  ;;  %v11807_v0 = vcombine.low %v1495_v23, %v1499_v49  ;;  %v13984_v23 = vcombine.low %v13899_v8, %v13899_v8  ;;  %v648_v49 = vld [vmem:[%s13603_s2 + $0x448] sm:$0xff]  ;;  %v10825_v53 = vcombine.low %v512_v35, %v516_v36 }
 0x1fa   : > { %v1379_v58 = vld [vmem:[%s13603_s2 + $0x1b20] sm:$0xff]  ;;  %6980 = vmatpush1.bf16.msra.mxu0 %v11679_v63  ;;  %v652_v51 = vld [vmem:[%s13603_s2 + $0x468] sm:$0xff]  ;;  %v10833_v11 = vcombine.low %v520_v46, %v524_v47 }
 0x1fb   : > { %v1503_v61 = vld [vmem:[%s13603_s2 + $0x1f00] sm:$0xff]  ;;  %v11688_v1 = vcombine.high %v1375_v57, %v1379_v58  ;;  %7020 = vmatprep.subr.bf16.mxu1 %v11808_v56  ;;  %v11687_v10 = vcombine.low %v1375_v57, %v1379_v58  ;;  %v10953_v56 = vcombine.low %v640_v38, %v644_v39  ;;  %v10834_v57 = vcombine.high %v520_v46, %v524_v47  ;;  %v532_v8 = vld [vmem:[%s13603_s2 + $0xa8] sm:$0xff] }
 0x1fc   : > { %v1507_v62 = vld [vmem:[%s13603_s2 + $0x1f20] sm:$0xff]  ;;  %7021 = vmatpush1.bf16.msra.mxu1 %v11807_v0  ;;  %v10962_v58 = vcombine.high %v648_v49, %v652_v51  ;;  %v660_v63 = vld [vmem:[%s13603_s2 + $0x4a8] sm:$0xff]  ;;  %v10961_v0 = vcombine.low %v648_v49, %v652_v51 }
 0x1fd   : > { %v11816_v2 = vcombine.high %v1503_v61, %v1507_v62  ;;  %v1383_v3 = vld [vmem:[%s13603_s2 + $0x1b40] sm:$0xff]  ;;  %6981 = vmatprep.subr.bf16.mxu0 %v11688_v1  ;;  %v11815_v12 = vcombine.low %v1503_v61, %v1507_v62  ;;  %v528_v61 = vld [vmem:[%s13603_s2 + $0x88] sm:$0xff] }
 0x1fe   : > { %v1387_v4 = vld [vmem:[%s13603_s2 + $0x1b60] sm:$0xff]  ;;  %6982 = vmatpush1.bf16.msra.mxu0 %v11687_v10  ;;  %v656_v62 = vld [vmem:[%s13603_s2 + $0x488] sm:$0xff]  ;;  %v10842_v1 = vcombine.high %v528_v61, %v532_v8  ;;  %v10841_v10 = vcombine.low %v528_v61, %v532_v8 }
 0x1ff   : > { %v1511_v6 = vld [vmem:[%s13603_s2 + $0x1f40] sm:$0xff]  ;;  %v11696_v13 = vcombine.high %v1383_v3, %v1387_v4  ;;  %7022 = vmatprep.subr.bf16.mxu1 %v11816_v2  ;;  %v11695_v22 = vcombine.low %v1383_v3, %v1387_v4  ;;  %v10970_v2 = vcombine.high %v656_v62, %v660_v63  ;;  %v536_v3 = vld [vmem:[%s13603_s2 + $0xc8] sm:$0xff] }
 0x200   : > { %v1515_v7 = vld [vmem:[%s13603_s2 + $0x1f60] sm:$0xff]  ;;  %7023 = vmatpush1.bf16.msra.mxu1 %v11815_v12  ;;  %v540_v4 = vld [vmem:[%s13603_s2 + $0xe8] sm:$0xff]  ;;  %v10969_v12 = vcombine.low %v656_v62, %v660_v63 }
 0x201   : > { %v11824_v40 = vcombine.high %v1511_v6, %v1515_v7  ;;  %v1391_v14 = vld [vmem:[%s13603_s2 + $0x1b80] sm:$0xff]  ;;  %6983 = vmatprep.subr.bf16.mxu0 %v11696_v13  ;;  %v11823_v24 = vcombine.low %v1511_v6, %v1515_v7  ;;  %v664_v6 = vld [vmem:[%s13603_s2 + $0x4c8] sm:$0xff]  ;;  %v10850_v13 = vcombine.high %v536_v3, %v540_v4 }
 0x202   : > { %v1395_v15 = vld [vmem:[%s13603_s2 + $0x1ba0] sm:$0xff]  ;;  %6984 = vmatpush1.bf16.msra.mxu0 %v11695_v22  ;;  %v668_v7 = vld [vmem:[%s13603_s2 + $0x4e8] sm:$0xff]  ;;  %v10849_v22 = vcombine.low %v536_v3, %v540_v4 }
 0x203   : > { %v1519_v43 = vld [vmem:[%s13603_s2 + $0x1f80] sm:$0xff]  ;;  %v11704_v25 = vcombine.high %v1391_v14, %v1395_v15  ;;  %7024 = vmatprep.subr.bf16.mxu1 %v11824_v40  ;;  %v11703_v31 = vcombine.low %v1391_v14, %v1395_v15  ;;  %v10978_v40 = vcombine.high %v664_v6, %v668_v7  ;;  %v544_v14 = vld [vmem:[%s13603_s2 + $0x108] sm:$0xff] }
 0x204   : > { %v1523_v18 = vld [vmem:[%s13603_s2 + $0x1fa0] sm:$0xff]  ;;  %7025 = vmatpush1.bf16.msra.mxu1 %v11823_v24  ;;  %v548_v15 = vld [vmem:[%s13603_s2 + $0x128] sm:$0xff]  ;;  %v10977_v24 = vcombine.low %v664_v6, %v668_v7 }
 0x205   : > { %v11832_v54 = vcombine.high %v1519_v43, %v1523_v18  ;;  %v1399_v26 = vld [vmem:[%s13603_s2 + $0x1bc0] sm:$0xff]  ;;  %6985 = vmatprep.subr.bf16.mxu0 %v11704_v25  ;;  %v11831_v32 = vcombine.low %v1519_v43, %v1523_v18  ;;  %v672_v43 = vld [vmem:[%s13603_s2 + $0x508] sm:$0xff]  ;;  %v10858_v25 = vcombine.high %v544_v14, %v548_v15 }
 0x206   : > { %v1403_v27 = vld [vmem:[%s13603_s2 + $0x1be0] sm:$0xff]  ;;  %6986 = vmatpush1.bf16.msra.mxu0 %v11703_v31  ;;  %v676_v18 = vld [vmem:[%s13603_s2 + $0x528] sm:$0xff]  ;;  %v10857_v31 = vcombine.low %v544_v14, %v548_v15 }
 0x207   : > { %v1527_v55 = vld [vmem:[%s13603_s2 + $0x1fc0] sm:$0xff]  ;;  %v11712_v33 = vcombine.high %v1399_v26, %v1403_v27  ;;  %7026 = vmatprep.subr.bf16.mxu1 %v11832_v54  ;;  %v11711_v42 = vcombine.low %v1399_v26, %v1403_v27  ;;  %v10986_v54 = vcombine.high %v672_v43, %v676_v18  ;;  %v552_v26 = vld [vmem:[%s13603_s2 + $0x148] sm:$0xff] }
 0x208   : > { %v1531_v29 = vld [vmem:[%s13603_s2 + $0x1fe0] sm:$0xff]  ;;  %7027 = vmatpush1.bf16.msra.mxu1 %v11831_v32  ;;  %v556_v27 = vld [vmem:[%s13603_s2 + $0x168] sm:$0xff]  ;;  %v10985_v32 = vcombine.low %v672_v43, %v676_v18 }
 0x209   : > { %v11840_v34 = vcombine.high %v1527_v55, %v1531_v29  ;;  %6987 = vmatprep.subr.bf16.mxu0 %v11712_v33  ;;  %v11839_v44 = vcombine.low %v1527_v55, %v1531_v29  ;;  %v680_v55 = vld [vmem:[%s13603_s2 + $0x548] sm:$0xff]  ;;  %v10866_v33 = vcombine.high %v552_v26, %v556_v27 }
 0x20a   : > { %6988 = vmatpush1.bf16.msra.mxu0 %v11711_v42  ;;  %v684_v29 = vld [vmem:[%s13603_s2 + $0x568] sm:$0xff]  ;;  %v10865_v42 = vcombine.low %v552_v26, %v556_v27 }
 0x20b   : > { %7028 = vmatprep.subr.bf16.mxu1 %v11840_v34  ;;  %7039 = vmatprep.subr.bf16.mxu0 %v10826_v45  ;;  %v10994_v34 = vcombine.high %v680_v55, %v684_v29  ;;  %v560_v35 = vld [vmem:[%s13603_s2 + $0x188] sm:$0xff] }
 0x20c   : > { %7029 = vmatpush1.bf16.msra.mxu1 %v11839_v44  ;;  %v564_v36 = vld [vmem:[%s13603_s2 + $0x1a8] sm:$0xff]  ;;  %v10993_v44 = vcombine.low %v680_v55, %v684_v29 }
 0x20d   : > { %7080 = vmatprep.subr.bf16.mxu1 %v10954_v20  ;;  %6990 = vmatmul.mubr.bf16.vlgmr.msra.gmra.mrb[12].mxu0 %v13984_v23  ;;  %v688_v38 = vld [vmem:[%s13603_s2 + $0x588] sm:$0xff]  ;;  %v10874_v45 = vcombine.high %v560_v35, %v564_v36  ;;  %v10873_v62 = vcombine.low %v560_v35, %v564_v36 }
 0x20e   : > { %7040 = vmatpush1.bf16.msra.mxu0 %v10825_v53  ;;  %7071 = vmatprep.mubr.bf16.mxu0 %v13664_v59  ;;  %v692_v39 = vld [vmem:[%s13603_s2 + $0x5a8] sm:$0xff] }
 0x20f   : > { %7031 = vmatmul.mubr.bf16.vlgmr.msra.gmra.mrb[12].mxu1 %v13990_v52  ;;  %7041 = vmatprep.subr.bf16.mxu0 %v10834_v57  ;;  %v11002_v46 = vcombine.high %v688_v38, %v692_v39  ;;  %v568_v47 = vld [vmem:[%s13603_s2 + $0x1c8] sm:$0xff] }
 0x210   : > { %7081 = vmatpush1.bf16.msra.mxu1 %v10953_v56  ;;  %7112 = vmatprep.mubr.bf16.mxu1 %v13668_v60  ;;  %v572_v49 = vld [vmem:[%s13603_s2 + $0x1e8] sm:$0xff] }
 0x211   : > { %7082 = vmatprep.subr.bf16.mxu1 %v10962_v58  ;;  %v696_v56 = vld [vmem:[%s13603_s2 + $0x5c8] sm:$0xff] }
 0x212   : > { %7042 = vmatpush1.bf16.msra.mxu0 %v10833_v11  ;;  %v700_v57 = vld [vmem:[%s13603_s2 + $0x5e8] sm:$0xff] }
 0x213   : > { %7043 = vmatprep.subr.bf16.mxu0 %v10842_v1  ;;  %v11001_v1 = vcombine.low %v688_v38, %v692_v39  ;;  %v11010_v4 = vcombine.high %v696_v56, %v700_v57  ;;  %v576_v6 = vld [vmem:[%s13603_s2 + $0x208] sm:$0xff] }
 0x214   : > { %7083 = vmatpush1.bf16.msra.mxu1 %v10961_v0  ;;  %v580_v7 = vld [vmem:[%s13603_s2 + $0x228] sm:$0xff] }
 0x215   : > { %7084 = vmatprep.subr.bf16.mxu1 %v10970_v2  ;;  %v10882_v2 = vcombine.high %v568_v47, %v572_v49  ;;  %v10890_v14 = vcombine.high %v576_v6, %v580_v7  ;;  %v584_v43 = vld [vmem:[%s13603_s2 + $0x248] sm:$0xff] }
 0x216   : > { %7044 = vmatpush1.bf16.msra.mxu0 %v10841_v10  ;;  %v704_v10 = vld [vmem:[%s13603_s2 + $0x608] sm:$0xff] }
 0x217   : > { %7045 = vmatprep.subr.bf16.mxu0 %v10850_v13  ;;  %v10881_v13 = vcombine.low %v568_v47, %v572_v49  ;;  %v588_v18 = vld [vmem:[%s13603_s2 + $0x268] sm:$0xff] }
 0x218   : > { %7085 = vmatpush1.bf16.msra.mxu1 %v10969_v12  ;;  %v708_v12 = vld [vmem:[%s13603_s2 + $0x628] sm:$0xff]  ;;  %v10898_v26 = vcombine.high %v584_v43, %v588_v18 }
 0x219   : > { %7086 = vmatprep.subr.bf16.mxu1 %v10978_v40  ;;  %v11009_v40 = vcombine.low %v696_v56, %v700_v57  ;;  %v11018_v15 = vcombine.high %v704_v10, %v708_v12  ;;  %v592_v55 = vld [vmem:[%s13603_s2 + $0x288] sm:$0xff] }
 0x21a   : > { %7046 = vmatpush1.bf16.msra.mxu0 %v10849_v22  ;;  %v712_v22 = vld [vmem:[%s13603_s2 + $0x648] sm:$0xff] }
 0x21b   : > { %7047 = vmatprep.subr.bf16.mxu0 %v10858_v25  ;;  %v10889_v25 = vcombine.low %v576_v6, %v580_v7  ;;  %v596_v29 = vld [vmem:[%s13603_s2 + $0x2a8] sm:$0xff] }
 0x21c   : > { %7087 = vmatpush1.bf16.msra.mxu1 %v10977_v24  ;;  %v716_v24 = vld [vmem:[%s13603_s2 + $0x668] sm:$0xff]  ;;  %v10906_v35 = vcombine.high %v592_v55, %v596_v29 }
 0x21d   : > { %7088 = vmatprep.subr.bf16.mxu1 %v10986_v54  ;;  %v11017_v54 = vcombine.low %v704_v10, %v708_v12  ;;  %v11026_v27 = vcombine.high %v712_v22, %v716_v24  ;;  %v600_v38 = vld [vmem:[%s13603_s2 + $0x2c8] sm:$0xff] }
 0x21e   : > { %7048 = vmatpush1.bf16.msra.mxu0 %v10857_v31  ;;  %v720_v31 = vld [vmem:[%s13603_s2 + $0x688] sm:$0xff] }
 0x21f   : > { %7049 = vmatprep.subr.bf16.mxu0 %v10866_v33  ;;  %v6745_v20 = vpop.f32.mrb[0].mxu0  ;;  %v10897_v33 = vcombine.low %v584_v43, %v588_v18  ;;  %v604_v39 = vld [vmem:[%s13603_s2 + $0x2e8] sm:$0xff] }
 0x220   : > { %7089 = vmatpush1.bf16.msra.mxu1 %v10985_v32  ;;  %v6747_v53 = vpop.f32.mrb[1].mxu0  ;;  %v724_v32 = vld [vmem:[%s13603_s2 + $0x6a8] sm:$0xff]  ;;  %v10913_v57 = vcombine.low %v600_v38, %v604_v39 }
 0x221   : > { %7090 = vmatprep.subr.bf16.mxu1 %v10994_v34  ;;  %v6786_v51 = vpop.f32.mrb[0].mxu1  ;;  %v6749_v8 = vpop.f32.mrb[2].mxu0  ;;  %v11025_v34 = vcombine.low %v712_v22, %v716_v24  ;;  %v11034_v36 = vcombine.high %v720_v31, %v724_v32  ;;  %v608_v49 = vld [vmem:[%s13603_s2 + $0x308] sm:$0xff] }
 0x222   : > { %v14020_v58 = vadd.f32 %v6786_v51, %v6745_v20  ;;  %v6788_v61 = vpop.f32.mrb[1].mxu1  ;;  %7050 = vmatpush1.bf16.msra.mxu0 %v10865_v42  ;;  %v6750_v0 = vpop.f32.mrb[3].mxu0  ;;  %v728_v42 = vld [vmem:[%s13603_s2 + $0x6c8] sm:$0xff]  ;;  %v11033_v20 = vcombine.low %v720_v31, %v724_v32 }
 0x223   : > { %v14022_v63 = vadd.f32 %v6788_v61, %v6747_v53  ;;  %v6790_v11 = vpop.f32.mrb[2].mxu1  ;;  %7051 = vmatprep.subr.bf16.mxu0 %v10874_v45  ;;  %v10905_v45 = vcombine.low %v592_v55, %v596_v29  ;;  %v612_v51 = vld [vmem:[%s13603_s2 + $0x328] sm:$0xff] }
 0x224   : > { %7091 = vmatpush1.bf16.msra.mxu1 %v10993_v44  ;;  %v6791_v3 = vpop.f32.mrb[3].mxu1  ;;  %v732_v44 = vld [vmem:[%s13603_s2 + $0x6e8] sm:$0xff]  ;;  %v10922_v8 = vcombine.high %v608_v49, %v612_v51 }
 0x225   : > { %7092 = vmatprep.subr.bf16.mxu1 %v11002_v46  ;;  %v10914_v46 = vcombine.high %v600_v38, %v604_v39  ;;  %v11042_v47 = vcombine.high %v728_v42, %v732_v44  ;;  %v736_v53 = vld [vmem:[%s13603_s2 + $0x708] sm:$0xff]  ;;  %v11041_v61 = vcombine.low %v728_v42, %v732_v44  ;;  %v10921_v3 = vcombine.low %v608_v49, %v612_v51 }
 0x226   : > { %7052 = vmatpush1.bf16.msra.mxu0 %v10873_v62  ;;  %v740_v56 = vld [vmem:[%s13603_s2 + $0x728] sm:$0xff] }
 0x227   : > { %7053 = vmatprep.subr.bf16.mxu0 %v10882_v2  ;;  %v11050_v62 = vcombine.high %v736_v53, %v740_v56  ;;  %v616_v11 = vld [vmem:[%s13603_s2 + $0x348] sm:$0xff] }
 0x228   : > { %7093 = vmatpush1.bf16.msra.mxu1 %v11001_v1  ;;  %v620_v0 = vld [vmem:[%s13603_s2 + $0x368] sm:$0xff] }
 0x229   : > { %7094 = vmatprep.subr.bf16.mxu1 %v11010_v4  ;;  %v744_v1 = vld [vmem:[%s13603_s2 + $0x748] sm:$0xff]  ;;  %v11049_v4 = vcombine.low %v736_v53, %v740_v56  ;;  %v10930_v6 = vcombine.high %v616_v11, %v620_v0 }
 0x22a   : > { %7054 = vmatpush1.bf16.msra.mxu0 %v10881_v13  ;;  %v748_v2 = vld [vmem:[%s13603_s2 + $0x768] sm:$0xff] }
 0x22b   : > { %7055 = vmatprep.subr.bf16.mxu0 %v10890_v14  ;;  %v11058_v7 = vcombine.high %v744_v1, %v748_v2  ;;  %v624_v10 = vld [vmem:[%s13603_s2 + $0x388] sm:$0xff]  ;;  %v10929_v14 = vcombine.low %v616_v11, %v620_v0 }
 0x22c   : > { %7095 = vmatpush1.bf16.msra.mxu1 %v11009_v40  ;;  %v628_v12 = vld [vmem:[%s13603_s2 + $0x3a8] sm:$0xff] }
 0x22d   : > { %7096 = vmatprep.subr.bf16.mxu1 %v11018_v15  ;;  %v752_v13 = vld [vmem:[%s13603_s2 + $0x788] sm:$0xff]  ;;  %v11057_v15 = vcombine.low %v744_v1, %v748_v2  ;;  %v10938_v43 = vcombine.high %v624_v10, %v628_v12 }
 0x22e   : > { %7056 = vmatpush1.bf16.msra.mxu0 %v10889_v25  ;;  %v756_v40 = vld [vmem:[%s13603_s2 + $0x7a8] sm:$0xff] }
 0x22f   : > { %7057 = vmatprep.subr.bf16.mxu0 %v10898_v26  ;;  %v11066_v18 = vcombine.high %v752_v13, %v756_v40  ;;  %v632_v22 = vld [vmem:[%s13603_s2 + $0x3c8] sm:$0xff]  ;;  %v10937_v26 = vcombine.low %v624_v10, %v628_v12 }
 0x230   : > { %7097 = vmatpush1.bf16.msra.mxu1 %v11017_v54  ;;  %v636_v24 = vld [vmem:[%s13603_s2 + $0x3e8] sm:$0xff] }
 0x231   : > { %7098 = vmatprep.subr.bf16.mxu1 %v11026_v27  ;;  %v760_v25 = vld [vmem:[%s13603_s2 + $0x7c8] sm:$0xff]  ;;  %v11065_v27 = vcombine.low %v752_v13, %v756_v40  ;;  %v10946_v55 = vcombine.high %v632_v22, %v636_v24 }
 0x232   : > { %7058 = vmatpush1.bf16.msra.mxu0 %v10897_v33  ;;  %v764_v54 = vld [vmem:[%s13603_s2 + $0x7e8] sm:$0xff] }
 0x233   : > { %7059 = vmatprep.subr.bf16.mxu0 %v10906_v35  ;;  %v11074_v29 = vcombine.high %v760_v25, %v764_v54  ;;  %v768_v31 = vld [vmem:[%s13603_s2 + $0x808] sm:$0xff]  ;;  %v10945_v35 = vcombine.low %v632_v22, %v636_v24 }
 0x234   : > { %7099 = vmatpush1.bf16.msra.mxu1 %v11025_v34  ;;  %v772_v32 = vld [vmem:[%s13603_s2 + $0x828] sm:$0xff] }
 0x235   : > { %7100 = vmatprep.subr.bf16.mxu1 %v11034_v36  ;;  %v896_v33 = vld [vmem:[%s13603_s2 + $0xc08] sm:$0xff]  ;;  %v11073_v36 = vcombine.low %v760_v25, %v764_v54  ;;  %v11082_v38 = vcombine.high %v768_v31, %v772_v32 }
 0x236   : > { %7060 = vmatpush1.bf16.msra.mxu0 %v10905_v45  ;;  %v900_v34 = vld [vmem:[%s13603_s2 + $0xc28] sm:$0xff] }
 0x237   : > { %7061 = vmatprep.subr.bf16.mxu0 %v10914_v46  ;;  %v11210_v39 = vcombine.high %v896_v33, %v900_v34  ;;  %v776_v42 = vld [vmem:[%s13603_s2 + $0x848] sm:$0xff]  ;;  %v11081_v46 = vcombine.low %v768_v31, %v772_v32 }
 0x238   : > { %7101 = vmatpush1.bf16.msra.mxu1 %v11033_v20  ;;  %v780_v44 = vld [vmem:[%s13603_s2 + $0x868] sm:$0xff] }
 0x239   : > { %7102 = vmatprep.subr.bf16.mxu1 %v11042_v47  ;;  %v904_v45 = vld [vmem:[%s13603_s2 + $0xc48] sm:$0xff]  ;;  %v11209_v47 = vcombine.low %v896_v33, %v900_v34  ;;  %v11090_v49 = vcombine.high %v776_v42, %v780_v44 }
 0x23a   : > { %7062 = vmatpush1.bf16.msra.mxu0 %v10913_v57  ;;  %v908_v20 = vld [vmem:[%s13603_s2 + $0xc68] sm:$0xff] }
 0x23b   : > { %7063 = vmatprep.subr.bf16.mxu0 %v10922_v8  ;;  %v11218_v51 = vcombine.high %v904_v45, %v908_v20  ;;  %v784_v53 = vld [vmem:[%s13603_s2 + $0x888] sm:$0xff]  ;;  %v11089_v8 = vcombine.low %v776_v42, %v780_v44 }
 0x23c   : > { %7103 = vmatpush1.bf16.msra.mxu1 %v11041_v61  ;;  %v788_v56 = vld [vmem:[%s13603_s2 + $0x8a8] sm:$0xff] }
 0x23d   : > { %7104 = vmatprep.subr.bf16.mxu1 %v11050_v62  ;;  %v912_v57 = vld [vmem:[%s13603_s2 + $0xc88] sm:$0xff]  ;;  %v11217_v62 = vcombine.low %v904_v45, %v908_v20  ;;  %v11098_v11 = vcombine.high %v784_v53, %v788_v56 }
 0x23e   : > { %7064 = vmatpush1.bf16.msra.mxu0 %v10921_v3  ;;  %v916_v61 = vld [vmem:[%s13603_s2 + $0xca8] sm:$0xff] }
 0x23f   : > { %7065 = vmatprep.subr.bf16.mxu0 %v10930_v6  ;;  %v11226_v0 = vcombine.high %v912_v57, %v916_v61  ;;  %v792_v1 = vld [vmem:[%s13603_s2 + $0x8c8] sm:$0xff]  ;;  %v11097_v6 = vcombine.low %v784_v53, %v788_v56 }
 0x240   : > { %7105 = vmatpush1.bf16.msra.mxu1 %v11049_v4  ;;  %v796_v2 = vld [vmem:[%s13603_s2 + $0x8e8] sm:$0xff] }
 0x241   : > { %7106 = vmatprep.subr.bf16.mxu1 %v11058_v7  ;;  %v920_v3 = vld [vmem:[%s13603_s2 + $0xcc8] sm:$0xff]  ;;  %v11225_v7 = vcombine.low %v912_v57, %v916_v61  ;;  %v11106_v10 = vcombine.high %v792_v1, %v796_v2 }
 0x242   : > { %7066 = vmatpush1.bf16.msra.mxu0 %v10929_v14  ;;  %v924_v4 = vld [vmem:[%s13603_s2 + $0xce8] sm:$0xff] }
 0x243   : > { %7067 = vmatprep.subr.bf16.mxu0 %v10938_v43  ;;  %v11234_v12 = vcombine.high %v920_v3, %v924_v4  ;;  %v800_v13 = vld [vmem:[%s13603_s2 + $0x908] sm:$0xff]  ;;  %v11105_v43 = vcombine.low %v792_v1, %v796_v2 }
 0x244   : > { %7107 = vmatpush1.bf16.msra.mxu1 %v11057_v15  ;;  %v804_v40 = vld [vmem:[%s13603_s2 + $0x928] sm:$0xff] }
 0x245   : > { %7108 = vmatprep.subr.bf16.mxu1 %v11066_v18  ;;  %v928_v14 = vld [vmem:[%s13603_s2 + $0xd08] sm:$0xff]  ;;  %v11233_v18 = vcombine.low %v920_v3, %v924_v4  ;;  %v11114_v22 = vcombine.high %v800_v13, %v804_v40 }
 0x246   : > { %7068 = vmatpush1.bf16.msra.mxu0 %v10937_v26  ;;  %v932_v15 = vld [vmem:[%s13603_s2 + $0xd28] sm:$0xff] }
 0x247   : > { %7069 = vmatprep.subr.bf16.mxu0 %v10946_v55  ;;  %v11242_v24 = vcombine.high %v928_v14, %v932_v15  ;;  %v808_v25 = vld [vmem:[%s13603_s2 + $0x948] sm:$0xff]  ;;  %v11113_v55 = vcombine.low %v800_v13, %v804_v40 }
 0x248   : > { %7109 = vmatpush1.bf16.msra.mxu1 %v11065_v27  ;;  %v812_v54 = vld [vmem:[%s13603_s2 + $0x968] sm:$0xff] }
 0x249   : > { %7110 = vmatprep.subr.bf16.mxu1 %v11074_v29  ;;  %v936_v26 = vld [vmem:[%s13603_s2 + $0xd48] sm:$0xff]  ;;  %v11241_v29 = vcombine.low %v928_v14, %v932_v15  ;;  %v11122_v31 = vcombine.high %v808_v25, %v812_v54 }
 0x24a   : > { %7070 = vmatpush1.bf16.msra.mxu0 %v10945_v35  ;;  %v940_v27 = vld [vmem:[%s13603_s2 + $0xd68] sm:$0xff] }
 0x24b   : > { %7121 = vmatprep.subr.bf16.mxu0 %v11082_v38  ;;  %v11250_v32 = vcombine.high %v936_v26, %v940_v27  ;;  %v816_v33 = vld [vmem:[%s13603_s2 + $0x988] sm:$0xff]  ;;  %v11121_v38 = vcombine.low %v808_v25, %v812_v54 }
 0x24c   : > { %7111 = vmatpush1.bf16.msra.mxu1 %v11073_v36  ;;  %v820_v34 = vld [vmem:[%s13603_s2 + $0x9a8] sm:$0xff] }
 0x24d   : > { %7162 = vmatprep.subr.bf16.mxu1 %v11210_v39  ;;  %7072 = vmatmul.mubr.bf16.vlgmr.msra.gmra.mrb[16].mxu0 %v13714_v17  ;;  %v944_v35 = vld [vmem:[%s13603_s2 + $0xd88] sm:$0xff]  ;;  %v11249_v39 = vcombine.low %v936_v26, %v940_v27  ;;  %v11130_v42 = vcombine.high %v816_v33, %v820_v34 }
 0x24e   : > { %7122 = vmatpush1.bf16.msra.mxu0 %v11081_v46  ;;  %7153 = vmatprep.mubr.bf16.mxu0 %v13732_v28  ;;  %v948_v36 = vld [vmem:[%s13603_s2 + $0xda8] sm:$0xff] }
 0x24f   : > { %7113 = vmatmul.mubr.bf16.vlgmr.msra.gmra.mrb[16].mxu1 %v13723_v21  ;;  %7123 = vmatprep.subr.bf16.mxu0 %v11090_v49  ;;  %v11258_v45 = vcombine.high %v944_v35, %v948_v36  ;;  %v824_v20 = vld [vmem:[%s13603_s2 + $0x9c8] sm:$0xff] }
 0x250   : > { %7163 = vmatpush1.bf16.msra.mxu1 %v11209_v47  ;;  %7194 = vmatprep.mubr.bf16.mxu1 %v13739_v30  ;;  %v828_v46 = vld [vmem:[%s13603_s2 + $0x9e8] sm:$0xff] }
 0x251   : > { %7164 = vmatprep.subr.bf16.mxu1 %v11218_v51  ;;  %v952_v53 = vld [vmem:[%s13603_s2 + $0xdc8] sm:$0xff]  ;;  %v11138_v2 = vcombine.high %v824_v20, %v828_v46  ;;  %v11137_v13 = vcombine.low %v824_v20, %v828_v46 }
 0x252   : > { %7124 = vmatpush1.bf16.msra.mxu0 %v11089_v8  ;;  %v956_v56 = vld [vmem:[%s13603_s2 + $0xde8] sm:$0xff] }
 0x253   : > { %7125 = vmatprep.subr.bf16.mxu0 %v11098_v11  ;;  %v11266_v4 = vcombine.high %v952_v53, %v956_v56  ;;  %v11265_v40 = vcombine.low %v952_v53, %v956_v56  ;;  %v992_v53 = vld [vmem:[%s13603_s2 + $0xf08] sm:$0xff] }
 0x254   : > { %7165 = vmatpush1.bf16.msra.mxu1 %v11217_v62  ;;  %v11129_v62 = vcombine.low %v816_v33, %v820_v34  ;;  %v996_v56 = vld [vmem:[%s13603_s2 + $0xf28] sm:$0xff] }
 0x255   : > { %7166 = vmatprep.subr.bf16.mxu1 %v11226_v0 }
 0x256   : > { %7126 = vmatpush1.bf16.msra.mxu0 %v11097_v6  ;;  %v832_v6 = vld [vmem:[%s13603_s2 + $0xa08] sm:$0xff] }
 0x257   : > { %7127 = vmatprep.subr.bf16.mxu0 %v11106_v10  ;;  %v960_v10 = vld [vmem:[%s13603_s2 + $0xe08] sm:$0xff] }
 0x258   : > { %7167 = vmatpush1.bf16.msra.mxu1 %v11225_v7  ;;  %v836_v7 = vld [vmem:[%s13603_s2 + $0xa28] sm:$0xff] }
 0x259   : > { %7168 = vmatprep.subr.bf16.mxu1 %v11234_v12  ;;  %v964_v12 = vld [vmem:[%s13603_s2 + $0xe28] sm:$0xff]  ;;  %v11146_v14 = vcombine.high %v832_v6, %v836_v7  ;;  %v11145_v25 = vcombine.low %v832_v6, %v836_v7 }
 0x25a   : > { %7128 = vmatpush1.bf16.msra.mxu0 %v11105_v43  ;;  %v11274_v15 = vcombine.high %v960_v10, %v964_v12  ;;  %v840_v43 = vld [vmem:[%s13603_s2 + $0xa48] sm:$0xff]  ;;  %v11273_v54 = vcombine.low %v960_v10, %v964_v12 }
 0x25b   : > { %7129 = vmatprep.subr.bf16.mxu0 %v11114_v22  ;;  %v968_v22 = vld [vmem:[%s13603_s2 + $0xe48] sm:$0xff] }
 0x25c   : > { %7169 = vmatpush1.bf16.msra.mxu1 %v11233_v18  ;;  %v844_v18 = vld [vmem:[%s13603_s2 + $0xa68] sm:$0xff] }
 0x25d   : > { %7170 = vmatprep.subr.bf16.mxu1 %v11242_v24  ;;  %v972_v24 = vld [vmem:[%s13603_s2 + $0xe68] sm:$0xff]  ;;  %v11154_v26 = vcombine.high %v840_v43, %v844_v18  ;;  %v11153_v33 = vcombine.low %v840_v43, %v844_v18 }
 0x25e   : > { %7130 = vmatpush1.bf16.msra.mxu0 %v11113_v55  ;;  %v11282_v27 = vcombine.high %v968_v22, %v972_v24  ;;  %v848_v55 = vld [vmem:[%s13603_s2 + $0xa88] sm:$0xff]  ;;  %v11281_v34 = vcombine.low %v968_v22, %v972_v24 }
 0x25f   : > { %7131 = vmatprep.subr.bf16.mxu0 %v11122_v31  ;;  %v6827_v44 = vpop.f32.mrb[4].mxu0  ;;  %v976_v31 = vld [vmem:[%s13603_s2 + $0xe88] sm:$0xff] }
 0x260   : > { %7171 = vmatpush1.bf16.msra.mxu1 %v11241_v29  ;;  %v6828_v47 = vadd.f32 %v6827_v44, %v14020_v58  ;;  %v6829_v51 = vpop.f32.mrb[5].mxu0  ;;  %v11257_v58 = vcombine.low %v944_v35, %v948_v36  ;;  %v852_v29 = vld [vmem:[%s13603_s2 + $0xaa8] sm:$0xff] }
 0x261   : > { %7172 = vmatprep.subr.bf16.mxu1 %v11250_v32  ;;  %v6868_v49 = vpop.f32.mrb[4].mxu1  ;;  %v6830_v57 = vadd.f32 %v6829_v51, %v14022_v63  ;;  %v6831_v8 = vpop.f32.mrb[6].mxu0  ;;  %v980_v32 = vld [vmem:[%s13603_s2 + $0xea8] sm:$0xff]  ;;  %v11162_v35 = vcombine.high %v848_v55, %v852_v29 }
 0x262   : > { %v6870_v61 = vpop.f32.mrb[5].mxu1  ;;  %7132 = vmatpush1.bf16.msra.mxu0 %v11121_v38  ;;  %v14094_v11 = vadd.f32 %v6868_v49, %v6828_v47  ;;  %v6832_v1 = vpop.f32.mrb[7].mxu0  ;;  %v11290_v36 = vcombine.high %v976_v31, %v980_v32  ;;  %v856_v38 = vld [vmem:[%s13603_s2 + $0xac8] sm:$0xff]  ;;  %v11289_v20 = vcombine.low %v976_v31, %v980_v32 }
 0x263   : > { %v6872_v0 = vpop.f32.mrb[6].mxu1  ;;  %7133 = vmatprep.subr.bf16.mxu0 %v11130_v42  ;;  %v14096_v3 = vadd.f32 %v6870_v61, %v6830_v57  ;;  %v984_v42 = vld [vmem:[%s13603_s2 + $0xec8] sm:$0xff] }
 0x264   : > { %7173 = vmatpush1.bf16.msra.mxu1 %v11249_v39  ;;  %v6873_v63 = vpop.f32.mrb[7].mxu1  ;;  %v860_v39 = vld [vmem:[%s13603_s2 + $0xae8] sm:$0xff] }
 0x265   : > { %7174 = vmatprep.subr.bf16.mxu1 %v11258_v45  ;;  %v988_v44 = vld [vmem:[%s13603_s2 + $0xee8] sm:$0xff]  ;;  %v11161_v45 = vcombine.low %v848_v55, %v852_v29  ;;  %v11170_v46 = vcombine.high %v856_v38, %v860_v39  ;;  %v11169_v57 = vcombine.low %v856_v38, %v860_v39 }
 0x266   : > { %7134 = vmatpush1.bf16.msra.mxu0 %v11129_v62  ;;  %v11298_v47 = vcombine.high %v984_v42, %v988_v44  ;;  %v864_v49 = vld [vmem:[%s13603_s2 + $0xb08] sm:$0xff]  ;;  %v11297_v61 = vcombine.low %v984_v42, %v988_v44  ;;  %v11306_v62 = vcombine.high %v992_v53, %v996_v56 }
 0x267   : > { %7135 = vmatprep.subr.bf16.mxu0 %v11138_v2  ;;  %v868_v51 = vld [vmem:[%s13603_s2 + $0xb28] sm:$0xff] }
 0x268   : > { %7175 = vmatpush1.bf16.msra.mxu1 %v11257_v58  ;;  %v11178_v8 = vcombine.high %v864_v49, %v868_v51  ;;  %v872_v0 = vld [vmem:[%s13603_s2 + $0xb48] sm:$0xff]  ;;  %v11177_v63 = vcombine.low %v864_v49, %v868_v51 }
 0x269   : > { %7176 = vmatprep.subr.bf16.mxu1 %v11266_v4  ;;  %v876_v1 = vld [vmem:[%s13603_s2 + $0xb68] sm:$0xff]  ;;  %v11305_v4 = vcombine.low %v992_v53, %v996_v56 }
 0x26a   : > { %7136 = vmatpush1.bf16.msra.mxu0 %v11137_v13  ;;  %v1000_v58 = vld [vmem:[%s13603_s2 + $0xf48] sm:$0xff]  ;;  %v11186_v6 = vcombine.high %v872_v0, %v876_v1 }
 0x26b   : > { %7137 = vmatprep.subr.bf16.mxu0 %v11146_v14  ;;  %v1004_v2 = vld [vmem:[%s13603_s2 + $0xf68] sm:$0xff]  ;;  %v11185_v14 = vcombine.low %v872_v0, %v876_v1 }
 0x26c   : > { %7177 = vmatpush1.bf16.msra.mxu1 %v11265_v40  ;;  %v11314_v7 = vcombine.high %v1000_v58, %v1004_v2  ;;  %v880_v10 = vld [vmem:[%s13603_s2 + $0xb88] sm:$0xff] }
 0x26d   : > { %7178 = vmatprep.subr.bf16.mxu1 %v11274_v15  ;;  %v884_v12 = vld [vmem:[%s13603_s2 + $0xba8] sm:$0xff]  ;;  %v11313_v15 = vcombine.low %v1000_v58, %v1004_v2 }
 0x26e   : > { %7138 = vmatpush1.bf16.msra.mxu0 %v11145_v25  ;;  %v1008_v13 = vld [vmem:[%s13603_s2 + $0xf88] sm:$0xff]  ;;  %v11194_v43 = vcombine.high %v880_v10, %v884_v12 }
 0x26f   : > { %7139 = vmatprep.subr.bf16.mxu0 %v11154_v26  ;;  %v1012_v40 = vld [vmem:[%s13603_s2 + $0xfa8] sm:$0xff]  ;;  %v11193_v26 = vcombine.low %v880_v10, %v884_v12 }
 0x270   : > { %7179 = vmatpush1.bf16.msra.mxu1 %v11273_v54  ;;  %v11322_v18 = vcombine.high %v1008_v13, %v1012_v40  ;;  %v888_v22 = vld [vmem:[%s13603_s2 + $0xbc8] sm:$0xff] }
 0x271   : > { %7180 = vmatprep.subr.bf16.mxu1 %v11282_v27  ;;  %v892_v24 = vld [vmem:[%s13603_s2 + $0xbe8] sm:$0xff]  ;;  %v11321_v27 = vcombine.low %v1008_v13, %v1012_v40 }
 0x272   : > { %7140 = vmatpush1.bf16.msra.mxu0 %v11153_v33  ;;  %v1016_v25 = vld [vmem:[%s13603_s2 + $0xfc8] sm:$0xff]  ;;  %v11202_v55 = vcombine.high %v888_v22, %v892_v24 }
 0x273   : > { %7141 = vmatprep.subr.bf16.mxu0 %v11162_v35  ;;  %v1020_v54 = vld [vmem:[%s13603_s2 + $0xfe8] sm:$0xff]  ;;  %v11201_v35 = vcombine.low %v888_v22, %v892_v24 }
 0x274   : > { %7181 = vmatpush1.bf16.msra.mxu1 %v11281_v34  ;;  %v11330_v29 = vcombine.high %v1016_v25, %v1020_v54  ;;  %v1024_v31 = vld [vmem:[%s13603_s2 + $0x1008] sm:$0xff] }
 0x275   : > { %7182 = vmatprep.subr.bf16.mxu1 %v11290_v36  ;;  %v1028_v32 = vld [vmem:[%s13603_s2 + $0x1028] sm:$0xff]  ;;  %v11329_v36 = vcombine.low %v1016_v25, %v1020_v54 }
 0x276   : > { %7142 = vmatpush1.bf16.msra.mxu0 %v11161_v45  ;;  %v1152_v33 = vld [vmem:[%s13603_s2 + $0x1408] sm:$0xff]  ;;  %v11338_v38 = vcombine.high %v1024_v31, %v1028_v32 }
 0x277   : > { %7143 = vmatprep.subr.bf16.mxu0 %v11170_v46  ;;  %v1156_v34 = vld [vmem:[%s13603_s2 + $0x1428] sm:$0xff]  ;;  %v11337_v46 = vcombine.low %v1024_v31, %v1028_v32 }
 0x278   : > { %7183 = vmatpush1.bf16.msra.mxu1 %v11289_v20  ;;  %v11466_v39 = vcombine.high %v1152_v33, %v1156_v34  ;;  %v1032_v42 = vld [vmem:[%s13603_s2 + $0x1048] sm:$0xff] }
 0x279   : > { %7184 = vmatprep.subr.bf16.mxu1 %v11298_v47  ;;  %v1036_v44 = vld [vmem:[%s13603_s2 + $0x1068] sm:$0xff]  ;;  %v11465_v47 = vcombine.low %v1152_v33, %v1156_v34 }
 0x27a   : > { %7144 = vmatpush1.bf16.msra.mxu0 %v11169_v57  ;;  %v1160_v45 = vld [vmem:[%s13603_s2 + $0x1448] sm:$0xff]  ;;  %v11346_v49 = vcombine.high %v1032_v42, %v1036_v44 }
 0x27b   : > { %7145 = vmatprep.subr.bf16.mxu0 %v11178_v8  ;;  %v1164_v20 = vld [vmem:[%s13603_s2 + $0x1468] sm:$0xff]  ;;  %v11345_v8 = vcombine.low %v1032_v42, %v1036_v44 }
 0x27c   : > { %7185 = vmatpush1.bf16.msra.mxu1 %v11297_v61  ;;  %v11474_v51 = vcombine.high %v1160_v45, %v1164_v20  ;;  %v1040_v53 = vld [vmem:[%s13603_s2 + $0x1088] sm:$0xff] }
 0x27d   : > { %7186 = vmatprep.subr.bf16.mxu1 %v11306_v62  ;;  %v1044_v56 = vld [vmem:[%s13603_s2 + $0x10a8] sm:$0xff]  ;;  %v11473_v62 = vcombine.low %v1160_v45, %v1164_v20 }
 0x27e   : > { %7146 = vmatpush1.bf16.msra.mxu0 %v11177_v63  ;;  %v1168_v57 = vld [vmem:[%s13603_s2 + $0x1488] sm:$0xff]  ;;  %v11354_v0 = vcombine.high %v1040_v53, %v1044_v56 }
 0x27f   : > { %7147 = vmatprep.subr.bf16.mxu0 %v11186_v6  ;;  %v1172_v61 = vld [vmem:[%s13603_s2 + $0x14a8] sm:$0xff]  ;;  %v11353_v6 = vcombine.low %v1040_v53, %v1044_v56 }
 0x280   : > { %7187 = vmatpush1.bf16.msra.mxu1 %v11305_v4  ;;  %v11482_v1 = vcombine.high %v1168_v57, %v1172_v61  ;;  %v1048_v58 = vld [vmem:[%s13603_s2 + $0x10c8] sm:$0xff] }
 0x281   : > { %7188 = vmatprep.subr.bf16.mxu1 %v11314_v7  ;;  %v1052_v2 = vld [vmem:[%s13603_s2 + $0x10e8] sm:$0xff]  ;;  %v11481_v7 = vcombine.low %v1168_v57, %v1172_v61 }
 0x282   : > { %7148 = vmatpush1.bf16.msra.mxu0 %v11185_v14  ;;  %v1176_v63 = vld [vmem:[%s13603_s2 + $0x14c8] sm:$0xff]  ;;  %v11362_v10 = vcombine.high %v1048_v58, %v1052_v2 }
 0x283   : > { %7149 = vmatprep.subr.bf16.mxu0 %v11194_v43  ;;  %v1180_v4 = vld [vmem:[%s13603_s2 + $0x14e8] sm:$0xff]  ;;  %v11361_v43 = vcombine.low %v1048_v58, %v1052_v2 }
 0x284   : > { %7189 = vmatpush1.bf16.msra.mxu1 %v11313_v15  ;;  %v11490_v12 = vcombine.high %v1176_v63, %v1180_v4  ;;  %v1056_v13 = vld [vmem:[%s13603_s2 + $0x1108] sm:$0xff] }
 0x285   : > { %7190 = vmatprep.subr.bf16.mxu1 %v11322_v18  ;;  %v1060_v40 = vld [vmem:[%s13603_s2 + $0x1128] sm:$0xff]  ;;  %v11489_v18 = vcombine.low %v1176_v63, %v1180_v4 }
 0x286   : > { %7150 = vmatpush1.bf16.msra.mxu0 %v11193_v26  ;;  %v1184_v14 = vld [vmem:[%s13603_s2 + $0x1508] sm:$0xff]  ;;  %v11370_v22 = vcombine.high %v1056_v13, %v1060_v40 }
 0x287   : > { %7151 = vmatprep.subr.bf16.mxu0 %v11202_v55  ;;  %v1188_v15 = vld [vmem:[%s13603_s2 + $0x1528] sm:$0xff]  ;;  %v11369_v55 = vcombine.low %v1056_v13, %v1060_v40 }
 0x288   : > { %7191 = vmatpush1.bf16.msra.mxu1 %v11321_v27  ;;  %v11498_v24 = vcombine.high %v1184_v14, %v1188_v15  ;;  %v1064_v25 = vld [vmem:[%s13603_s2 + $0x1148] sm:$0xff] }
 0x289   : > { %7192 = vmatprep.subr.bf16.mxu1 %v11330_v29  ;;  %v1068_v54 = vld [vmem:[%s13603_s2 + $0x1168] sm:$0xff]  ;;  %v11497_v29 = vcombine.low %v1184_v14, %v1188_v15 }
 0x28a   : > { %7152 = vmatpush1.bf16.msra.mxu0 %v11201_v35  ;;  %v1192_v26 = vld [vmem:[%s13603_s2 + $0x1548] sm:$0xff]  ;;  %v11378_v31 = vcombine.high %v1064_v25, %v1068_v54 }
 0x28b   : > { %7203 = vmatprep.subr.bf16.mxu0 %v11338_v38  ;;  %v1196_v27 = vld [vmem:[%s13603_s2 + $0x1568] sm:$0xff]  ;;  %v11377_v38 = vcombine.low %v1064_v25, %v1068_v54 }
 0x28c   : > { %7193 = vmatpush1.bf16.msra.mxu1 %v11329_v36  ;;  %v11506_v32 = vcombine.high %v1192_v26, %v1196_v27  ;;  %v1072_v33 = vld [vmem:[%s13603_s2 + $0x1188] sm:$0xff] }
 0x28d   : > { %7244 = vmatprep.subr.bf16.mxu1 %v11466_v39  ;;  %7154 = vmatmul.mubr.bf16.vlgmr.msra.gmra.mrb[20].mxu0 %v13804_v37  ;;  %v1076_v34 = vld [vmem:[%s13603_s2 + $0x11a8] sm:$0xff]  ;;  %v11505_v39 = vcombine.low %v1192_v26, %v1196_v27 }
 0x28e   : > { %7204 = vmatpush1.bf16.msra.mxu0 %v11337_v46  ;;  %7235 = vmatprep.mubr.bf16.mxu0 %v13822_v48  ;;  %v1200_v35 = vld [vmem:[%s13603_s2 + $0x1588] sm:$0xff]  ;;  %v11386_v42 = vcombine.high %v1072_v33, %v1076_v34 }
 0x28f   : > { %7195 = vmatmul.mubr.bf16.vlgmr.msra.gmra.mrb[20].mxu1 %v13813_v41  ;;  %7205 = vmatprep.subr.bf16.mxu0 %v11346_v49  ;;  %v1204_v36 = vld [vmem:[%s13603_s2 + $0x15a8] sm:$0xff] }
 0x290   : > { %7245 = vmatpush1.bf16.msra.mxu1 %v11465_v47  ;;  %7276 = vmatprep.mubr.bf16.mxu1 %v13829_v50  ;;  %v11514_v45 = vcombine.high %v1200_v35, %v1204_v36  ;;  %v1080_v20 = vld [vmem:[%s13603_s2 + $0x11c8] sm:$0xff] }
 0x291   : > { %7246 = vmatprep.subr.bf16.mxu1 %v11474_v51  ;;  %v1084_v46 = vld [vmem:[%s13603_s2 + $0x11e8] sm:$0xff] }
 0x292   : > { %7206 = vmatpush1.bf16.msra.mxu0 %v11345_v8  ;;  %v1208_v53 = vld [vmem:[%s13603_s2 + $0x15c8] sm:$0xff]  ;;  %v11394_v2 = vcombine.high %v1080_v20, %v1084_v46  ;;  %v11393_v13 = vcombine.low %v1080_v20, %v1084_v46 }
 0x293   : > { %7207 = vmatprep.subr.bf16.mxu0 %v11354_v0  ;;  %v1212_v56 = vld [vmem:[%s13603_s2 + $0x15e8] sm:$0xff] }
 0x294   : > { %7247 = vmatpush1.bf16.msra.mxu1 %v11473_v62  ;;  %v11385_v62 = vcombine.low %v1072_v33, %v1076_v34  ;;  %v11522_v4 = vcombine.high %v1208_v53, %v1212_v56  ;;  %v11521_v40 = vcombine.low %v1208_v53, %v1212_v56  ;;  %v1248_v53 = vld [vmem:[%s13603_s2 + $0x1708] sm:$0xff] }
 0x295   : > { %7248 = vmatprep.subr.bf16.mxu1 %v11482_v1  ;;  %v1252_v56 = vld [vmem:[%s13603_s2 + $0x1728] sm:$0xff] }
 0x296   : > { %7208 = vmatpush1.bf16.msra.mxu0 %v11353_v6  ;;  %v1088_v6 = vld [vmem:[%s13603_s2 + $0x1208] sm:$0xff] }
 0x297   : > { %7209 = vmatprep.subr.bf16.mxu0 %v11362_v10  ;;  %v1216_v10 = vld [vmem:[%s13603_s2 + $0x1608] sm:$0xff] }
 0x298   : > { %7249 = vmatpush1.bf16.msra.mxu1 %v11481_v7  ;;  %v1092_v7 = vld [vmem:[%s13603_s2 + $0x1228] sm:$0xff] }
 0x299   : > { %7250 = vmatprep.subr.bf16.mxu1 %v11490_v12  ;;  %v1220_v12 = vld [vmem:[%s13603_s2 + $0x1628] sm:$0xff]  ;;  %v11402_v14 = vcombine.high %v1088_v6, %v1092_v7  ;;  %v11401_v25 = vcombine.low %v1088_v6, %v1092_v7 }
 0x29a   : > { %7210 = vmatpush1.bf16.msra.mxu0 %v11361_v43  ;;  %v11530_v15 = vcombine.high %v1216_v10, %v1220_v12  ;;  %v1096_v43 = vld [vmem:[%s13603_s2 + $0x1248] sm:$0xff]  ;;  %v11529_v54 = vcombine.low %v1216_v10, %v1220_v12 }
 0x29b   : > { %7211 = vmatprep.subr.bf16.mxu0 %v11370_v22  ;;  %v1224_v22 = vld [vmem:[%s13603_s2 + $0x1648] sm:$0xff] }
 0x29c   : > { %7251 = vmatpush1.bf16.msra.mxu1 %v11489_v18  ;;  %v1100_v18 = vld [vmem:[%s13603_s2 + $0x1268] sm:$0xff] }
 0x29d   : > { %7252 = vmatprep.subr.bf16.mxu1 %v11498_v24  ;;  %v1228_v24 = vld [vmem:[%s13603_s2 + $0x1668] sm:$0xff]  ;;  %v11410_v26 = vcombine.high %v1096_v43, %v1100_v18  ;;  %v11409_v33 = vcombine.low %v1096_v43, %v1100_v18 }
 0x29e   : > { %7212 = vmatpush1.bf16.msra.mxu0 %v11369_v55  ;;  %v11538_v27 = vcombine.high %v1224_v22, %v1228_v24  ;;  %v1104_v55 = vld [vmem:[%s13603_s2 + $0x1288] sm:$0xff]  ;;  %v11537_v34 = vcombine.low %v1224_v22, %v1228_v24 }
 0x29f   : > { %7213 = vmatprep.subr.bf16.mxu0 %v11378_v31  ;;  %v1232_v31 = vld [vmem:[%s13603_s2 + $0x1688] sm:$0xff] }
 0x2a0   : > { %7253 = vmatpush1.bf16.msra.mxu1 %v11497_v29  ;;  %v6909_v44 = vpop.f32.mrb[8].mxu0  ;;  %v1108_v29 = vld [vmem:[%s13603_s2 + $0x12a8] sm:$0xff] }
 0x2a1   : > { %7254 = vmatprep.subr.bf16.mxu1 %v11506_v32  ;;  %v6910_v47 = vadd.f32 %v6909_v44, %v14094_v11  ;;  %v6911_v51 = vpop.f32.mrb[9].mxu0  ;;  %v11513_v11 = vcombine.low %v1200_v35, %v1204_v36  ;;  %v1236_v32 = vld [vmem:[%s13603_s2 + $0x16a8] sm:$0xff]  ;;  %v11418_v35 = vcombine.high %v1104_v55, %v1108_v29 }
 0x2a2   : > { %v6950_v49 = vpop.f32.mrb[8].mxu1  ;;  %v6912_v57 = vadd.f32 %v6911_v51, %v14096_v3  ;;  %v6913_v8 = vpop.f32.mrb[10].mxu0  ;;  %7214 = vmatpush1.bf16.msra.mxu0 %v11377_v38  ;;  %v11546_v36 = vcombine.high %v1232_v31, %v1236_v32  ;;  %v1112_v38 = vld [vmem:[%s13603_s2 + $0x12c8] sm:$0xff]  ;;  %v11545_v20 = vcombine.low %v1232_v31, %v1236_v32 }
 0x2a3   : > { %v6952_v61 = vpop.f32.mrb[9].mxu1  ;;  %v14168_v0 = vadd.f32 %v6950_v49, %v6910_v47  ;;  %v6914_v58 = vpop.f32.mrb[11].mxu0  ;;  %7215 = vmatprep.subr.bf16.mxu0 %v11386_v42  ;;  %v1240_v42 = vld [vmem:[%s13603_s2 + $0x16c8] sm:$0xff] }
 0x2a4   : > { %v6954_v1 = vpop.f32.mrb[10].mxu1  ;;  %7255 = vmatpush1.bf16.msra.mxu1 %v11505_v39  ;;  %v14170_v63 = vadd.f32 %v6952_v61, %v6912_v57  ;;  %v1116_v39 = vld [vmem:[%s13603_s2 + $0x12e8] sm:$0xff] }
 0x2a5   : > { %v6955_v3 = vpop.f32.mrb[11].mxu1  ;;  %7256 = vmatprep.subr.bf16.mxu1 %v11514_v45  ;;  %v1244_v44 = vld [vmem:[%s13603_s2 + $0x16e8] sm:$0xff]  ;;  %v11417_v45 = vcombine.low %v1104_v55, %v1108_v29  ;;  %v11426_v46 = vcombine.high %v1112_v38, %v1116_v39  ;;  %v11425_v57 = vcombine.low %v1112_v38, %v1116_v39 }
 0x2a6   : > { %7216 = vmatpush1.bf16.msra.mxu0 %v11385_v62  ;;  %v11554_v47 = vcombine.high %v1240_v42, %v1244_v44  ;;  %v1120_v49 = vld [vmem:[%s13603_s2 + $0x1308] sm:$0xff]  ;;  %v11553_v61 = vcombine.low %v1240_v42, %v1244_v44  ;;  %v11562_v62 = vcombine.high %v1248_v53, %v1252_v56 }
 0x2a7   : > { %7217 = vmatprep.subr.bf16.mxu0 %v11394_v2  ;;  %v1124_v51 = vld [vmem:[%s13603_s2 + $0x1328] sm:$0xff] }
 0x2a8   : > { %7257 = vmatpush1.bf16.msra.mxu1 %v11513_v11  ;;  %v11434_v8 = vcombine.high %v1120_v49, %v1124_v51  ;;  %v1128_v1 = vld [vmem:[%s13603_s2 + $0x1348] sm:$0xff]  ;;  %v11433_v3 = vcombine.low %v1120_v49, %v1124_v51 }
 0x2a9   : > { %7258 = vmatprep.subr.bf16.mxu1 %v11522_v4  ;;  %v1132_v58 = vld [vmem:[%s13603_s2 + $0x1368] sm:$0xff]  ;;  %v11561_v4 = vcombine.low %v1248_v53, %v1252_v56 }
 0x2aa   : > { %7218 = vmatpush1.bf16.msra.mxu0 %v11393_v13  ;;  %v1256_v11 = vld [vmem:[%s13603_s2 + $0x1748] sm:$0xff]  ;;  %v11442_v6 = vcombine.high %v1128_v1, %v1132_v58 }
 0x2ab   : > { %7219 = vmatprep.subr.bf16.mxu0 %v11402_v14  ;;  %v1260_v2 = vld [vmem:[%s13603_s2 + $0x1768] sm:$0xff]  ;;  %v11441_v14 = vcombine.low %v1128_v1, %v1132_v58 }
 0x2ac   : > { %7259 = vmatpush1.bf16.msra.mxu1 %v11521_v40  ;;  %v11570_v7 = vcombine.high %v1256_v11, %v1260_v2  ;;  %v1136_v10 = vld [vmem:[%s13603_s2 + $0x1388] sm:$0xff] }
 0x2ad   : > { %7260 = vmatprep.subr.bf16.mxu1 %v11530_v15  ;;  %v1140_v12 = vld [vmem:[%s13603_s2 + $0x13a8] sm:$0xff]  ;;  %v11569_v15 = vcombine.low %v1256_v11, %v1260_v2 }
 0x2ae   : > { %7220 = vmatpush1.bf16.msra.mxu0 %v11401_v25  ;;  %v1264_v13 = vld [vmem:[%s13603_s2 + $0x1788] sm:$0xff]  ;;  %v11450_v43 = vcombine.high %v1136_v10, %v1140_v12 }
 0x2af   : > { %7221 = vmatprep.subr.bf16.mxu0 %v11410_v26  ;;  %v1268_v40 = vld [vmem:[%s13603_s2 + $0x17a8] sm:$0xff]  ;;  %v11449_v26 = vcombine.low %v1136_v10, %v1140_v12 }
 0x2b0   : > { %7261 = vmatpush1.bf16.msra.mxu1 %v11529_v54  ;;  %v11578_v18 = vcombine.high %v1264_v13, %v1268_v40  ;;  %v1144_v22 = vld [vmem:[%s13603_s2 + $0x13c8] sm:$0xff] }
 0x2b1   : > { %7262 = vmatprep.subr.bf16.mxu1 %v11538_v27  ;;  %v1148_v24 = vld [vmem:[%s13603_s2 + $0x13e8] sm:$0xff]  ;;  %v11577_v27 = vcombine.low %v1264_v13, %v1268_v40 }
 0x2b2   : > { %7222 = vmatpush1.bf16.msra.mxu0 %v11409_v33  ;;  %v1272_v25 = vld [vmem:[%s13603_s2 + $0x17c8] sm:$0xff]  ;;  %v11458_v55 = vcombine.high %v1144_v22, %v1148_v24 }
 0x2b3   : > { %7223 = vmatprep.subr.bf16.mxu0 %v11418_v35  ;;  %v1276_v54 = vld [vmem:[%s13603_s2 + $0x17e8] sm:$0xff]  ;;  %v11457_v35 = vcombine.low %v1144_v22, %v1148_v24 }
 0x2b4   : > { %7263 = vmatpush1.bf16.msra.mxu1 %v11537_v34  ;;  %v11586_v29 = vcombine.high %v1272_v25, %v1276_v54  ;;  %v1280_v31 = vld [vmem:[%s13603_s2 + $0x1808] sm:$0xff] }
 0x2b5   : > { %7264 = vmatprep.subr.bf16.mxu1 %v11546_v36  ;;  %v1284_v32 = vld [vmem:[%s13603_s2 + $0x1828] sm:$0xff]  ;;  %v11585_v36 = vcombine.low %v1272_v25, %v1276_v54 }
 0x2b6   : > { %7224 = vmatpush1.bf16.msra.mxu0 %v11417_v45  ;;  %v1408_v33 = vld [vmem:[%s13603_s2 + $0x1c08] sm:$0xff]  ;;  %v11594_v38 = vcombine.high %v1280_v31, %v1284_v32 }
 0x2b7   : > { %7225 = vmatprep.subr.bf16.mxu0 %v11426_v46  ;;  %v1412_v34 = vld [vmem:[%s13603_s2 + $0x1c28] sm:$0xff]  ;;  %v11593_v46 = vcombine.low %v1280_v31, %v1284_v32 }
 0x2b8   : > { %7265 = vmatpush1.bf16.msra.mxu1 %v11545_v20  ;;  %v11722_v39 = vcombine.high %v1408_v33, %v1412_v34  ;;  %v1288_v42 = vld [vmem:[%s13603_s2 + $0x1848] sm:$0xff] }
 0x2b9   : > { %7266 = vmatprep.subr.bf16.mxu1 %v11554_v47  ;;  %v1292_v44 = vld [vmem:[%s13603_s2 + $0x1868] sm:$0xff]  ;;  %v11721_v47 = vcombine.low %v1408_v33, %v1412_v34 }
 0x2ba   : > { %7226 = vmatpush1.bf16.msra.mxu0 %v11425_v57  ;;  %v1416_v45 = vld [vmem:[%s13603_s2 + $0x1c48] sm:$0xff]  ;;  %v11602_v49 = vcombine.high %v1288_v42, %v1292_v44 }
 0x2bb   : > { %7227 = vmatprep.subr.bf16.mxu0 %v11434_v8  ;;  %v1420_v20 = vld [vmem:[%s13603_s2 + $0x1c68] sm:$0xff]  ;;  %v11601_v8 = vcombine.low %v1288_v42, %v1292_v44 }
 0x2bc   : > { %7267 = vmatpush1.bf16.msra.mxu1 %v11553_v61  ;;  %v11730_v51 = vcombine.high %v1416_v45, %v1420_v20  ;;  %v1296_v53 = vld [vmem:[%s13603_s2 + $0x1888] sm:$0xff] }
 0x2bd   : > { %7268 = vmatprep.subr.bf16.mxu1 %v11562_v62  ;;  %v1300_v56 = vld [vmem:[%s13603_s2 + $0x18a8] sm:$0xff]  ;;  %v11729_v62 = vcombine.low %v1416_v45, %v1420_v20 }
 0x2be   : > { %7228 = vmatpush1.bf16.msra.mxu0 %v11433_v3  ;;  %v1424_v57 = vld [vmem:[%s13603_s2 + $0x1c88] sm:$0xff]  ;;  %v11610_v1 = vcombine.high %v1296_v53, %v1300_v56 }
 0x2bf   : > { %7229 = vmatprep.subr.bf16.mxu0 %v11442_v6  ;;  %v1428_v61 = vld [vmem:[%s13603_s2 + $0x1ca8] sm:$0xff]  ;;  %v11609_v6 = vcombine.low %v1296_v53, %v1300_v56 }
 0x2c0   : > { %7269 = vmatpush1.bf16.msra.mxu1 %v11561_v4  ;;  %v11738_v58 = vcombine.high %v1424_v57, %v1428_v61  ;;  %v1304_v11 = vld [vmem:[%s13603_s2 + $0x18c8] sm:$0xff] }
 0x2c1   : > { %7270 = vmatprep.subr.bf16.mxu1 %v11570_v7  ;;  %v1308_v2 = vld [vmem:[%s13603_s2 + $0x18e8] sm:$0xff]  ;;  %v11737_v7 = vcombine.low %v1424_v57, %v1428_v61  ;;  %v495_v57 = vld [vmem:[#allocation2] sm:$0xff] }
 0x2c2   : > { %7230 = vmatpush1.bf16.msra.mxu0 %v11441_v14  ;;  %v1432_v3 = vld [vmem:[%s13603_s2 + $0x1cc8] sm:$0xff]  ;;  %v11618_v10 = vcombine.high %v1304_v11, %v1308_v2 }
 0x2c3   : > { %7231 = vmatprep.subr.bf16.mxu0 %v11450_v43  ;;  %v1436_v4 = vld [vmem:[%s13603_s2 + $0x1ce8] sm:$0xff]  ;;  %v11617_v43 = vcombine.low %v1304_v11, %v1308_v2 }
 0x2c4   : > { %7271 = vmatpush1.bf16.msra.mxu1 %v11569_v15  ;;  %v11746_v12 = vcombine.high %v1432_v3, %v1436_v4  ;;  %v1312_v13 = vld [vmem:[%s13603_s2 + $0x1908] sm:$0xff] }
 0x2c5   : > { %7272 = vmatprep.subr.bf16.mxu1 %v11578_v18  ;;  %v1316_v40 = vld [vmem:[%s13603_s2 + $0x1928] sm:$0xff]  ;;  %v11745_v18 = vcombine.low %v1432_v3, %v1436_v4 }
 0x2c6   : > { %7232 = vmatpush1.bf16.msra.mxu0 %v11449_v26  ;;  %v1440_v14 = vld [vmem:[%s13603_s2 + $0x1d08] sm:$0xff]  ;;  %v11626_v22 = vcombine.high %v1312_v13, %v1316_v40 }
 0x2c7   : > { %7233 = vmatprep.subr.bf16.mxu0 %v11458_v55  ;;  %v1444_v15 = vld [vmem:[%s13603_s2 + $0x1d28] sm:$0xff]  ;;  %v11625_v55 = vcombine.low %v1312_v13, %v1316_v40 }
 0x2c8   : > { %7273 = vmatpush1.bf16.msra.mxu1 %v11577_v27  ;;  %v11754_v24 = vcombine.high %v1440_v14, %v1444_v15  ;;  %v1320_v25 = vld [vmem:[%s13603_s2 + $0x1948] sm:$0xff] }
 0x2c9   : > { %7274 = vmatprep.subr.bf16.mxu1 %v11586_v29  ;;  %v1324_v54 = vld [vmem:[%s13603_s2 + $0x1968] sm:$0xff]  ;;  %v11753_v29 = vcombine.low %v1440_v14, %v1444_v15 }
 0x2ca   : > { %7234 = vmatpush1.bf16.msra.mxu0 %v11457_v35  ;;  %v1448_v26 = vld [vmem:[%s13603_s2 + $0x1d48] sm:$0xff]  ;;  %v11634_v31 = vcombine.high %v1320_v25, %v1324_v54 }
 0x2cb   : > { %7285 = vmatprep.subr.bf16.mxu0 %v11594_v38  ;;  %v1452_v27 = vld [vmem:[%s13603_s2 + $0x1d68] sm:$0xff]  ;;  %v11633_v38 = vcombine.low %v1320_v25, %v1324_v54 }
 0x2cc   : > { %7275 = vmatpush1.bf16.msra.mxu1 %v11585_v36  ;;  %v11762_v32 = vcombine.high %v1448_v26, %v1452_v27  ;;  %v1328_v33 = vld [vmem:[%s13603_s2 + $0x1988] sm:$0xff] }
 0x2cd   : > { %7326 = vmatprep.subr.bf16.mxu1 %v11722_v39  ;;  %7236 = vmatmul.mubr.bf16.vlgmr.msra.gmra.mrb[24].mxu0 %v13894_v5  ;;  %v1332_v34 = vld [vmem:[%s13603_s2 + $0x19a8] sm:$0xff]  ;;  %v11761_v39 = vcombine.low %v1448_v26, %v1452_v27 }
 0x2ce   : > { %7286 = vmatpush1.bf16.msra.mxu0 %v11593_v46  ;;  %7317 = vmatprep.mubr.bf16.mxu0 %v13912_v16  ;;  %v1456_v35 = vld [vmem:[%s13603_s2 + $0x1d88] sm:$0xff]  ;;  %v11642_v42 = vcombine.high %v1328_v33, %v1332_v34 }
 0x2cf   : > { %7277 = vmatmul.mubr.bf16.vlgmr.msra.gmra.mrb[24].mxu1 %v13903_v9  ;;  %7287 = vmatprep.subr.bf16.mxu0 %v11602_v49  ;;  %v1460_v36 = vld [vmem:[%s13603_s2 + $0x1da8] sm:$0xff] }
 0x2d0   : > { %7327 = vmatpush1.bf16.msra.mxu1 %v11721_v47  ;;  %7358 = vmatprep.mubr.bf16.mxu1 %v13919_v19  ;;  %v11770_v45 = vcombine.high %v1456_v35, %v1460_v36  ;;  %v1336_v20 = vld [vmem:[%s13603_s2 + $0x19c8] sm:$0xff]  ;;  %v11769_v3 = vcombine.low %v1456_v35, %v1460_v36 }
 0x2d1   : > { %7328 = vmatprep.subr.bf16.mxu1 %v11730_v51  ;;  %v1340_v46 = vld [vmem:[%s13603_s2 + $0x19e8] sm:$0xff] }
 0x2d2   : > { %7288 = vmatpush1.bf16.msra.mxu0 %v11601_v8  ;;  %v1464_v53 = vld [vmem:[%s13603_s2 + $0x1dc8] sm:$0xff]  ;;  %v11650_v4 = vcombine.high %v1336_v20, %v1340_v46 }
 0x2d3   : > { %7289 = vmatprep.subr.bf16.mxu0 %v11610_v1  ;;  %v1468_v56 = vld [vmem:[%s13603_s2 + $0x1de8] sm:$0xff]  ;;  %v11641_v1 = vcombine.low %v1328_v33, %v1332_v34 }
 0x2d4   : > { %7329 = vmatpush1.bf16.msra.mxu1 %v11729_v62  ;;  %v496_v11 = vld [vmem:[#allocation2 + $0x8] sm:$0xff] }
 0x2d5   : > { %7330 = vmatprep.subr.bf16.mxu1 %v11738_v58  ;;  %v1472_v40 = vld [vmem:[%s13603_s2 + $0x1e08] sm:$0xff] }
 0x2d6   : > { %7290 = vmatpush1.bf16.msra.mxu0 %v11609_v6  ;;  %v1476_v14 = vld [vmem:[%s13603_s2 + $0x1e28] sm:$0xff] }
 0x2d7   : > { %7291 = vmatprep.subr.bf16.mxu0 %v11618_v10  ;;  %v1344_v10 = vld [vmem:[%s13603_s2 + $0x1a08] sm:$0xff] }
 0x2d8   : > { %7331 = vmatpush1.bf16.msra.mxu1 %v11737_v7  ;;  %v1352_v25 = vld [vmem:[%s13603_s2 + $0x1a48] sm:$0xff] }
 0x2d9   : > { %7332 = vmatprep.subr.bf16.mxu1 %v11746_v12  ;;  %v1348_v12 = vld [vmem:[%s13603_s2 + $0x1a28] sm:$0xff] }
 0x2da   : > { %7292 = vmatpush1.bf16.msra.mxu0 %v11617_v43  ;;  %v11649_v43 = vcombine.low %v1336_v20, %v1340_v46  ;;  %v1356_v54 = vld [vmem:[%s13603_s2 + $0x1a68] sm:$0xff] }
 0x2db   : > { %7293 = vmatprep.subr.bf16.mxu0 %v11626_v22  ;;  %v11658_v22 = vcombine.high %v1344_v10, %v1348_v12  ;;  %v1480_v26 = vld [vmem:[%s13603_s2 + $0x1e48] sm:$0xff] }
 0x2dc   : > { %7333 = vmatpush1.bf16.msra.mxu1 %v11745_v18  ;;  %v11777_v18 = vcombine.low %v1464_v53, %v1468_v56  ;;  %v1484_v27 = vld [vmem:[%s13603_s2 + $0x1e68] sm:$0xff] }
 0x2dd   : > { %7334 = vmatprep.subr.bf16.mxu1 %v11754_v24  ;;  %v11786_v24 = vcombine.high %v1472_v40, %v1476_v14  ;;  %v1360_v33 = vld [vmem:[%s13603_s2 + $0x1a88] sm:$0xff] }
 0x2de   : > { %7294 = vmatpush1.bf16.msra.mxu0 %v11625_v55  ;;  %v11657_v55 = vcombine.low %v1344_v10, %v1348_v12  ;;  %v1364_v34 = vld [vmem:[%s13603_s2 + $0x1aa8] sm:$0xff] }
 0x2df   : > { %7295 = vmatprep.subr.bf16.mxu0 %v11634_v31  ;;  %v11666_v31 = vcombine.high %v1352_v25, %v1356_v54  ;;  %v1488_v35 = vld [vmem:[%s13603_s2 + $0x1e88] sm:$0xff] }
 0x2e0   : > { %7335 = vmatpush1.bf16.msra.mxu1 %v11753_v29  ;;  %v6991_v44 = vpop.f32.mrb[12].mxu0  ;;  %v11785_v29 = vcombine.low %v1472_v40, %v1476_v14  ;;  %v1492_v36 = vld [vmem:[%s13603_s2 + $0x1ea8] sm:$0xff] }
 0x2e1   : > { %7336 = vmatprep.subr.bf16.mxu1 %v11762_v32  ;;  %v6992_v47 = vadd.f32 %v6991_v44, %v14168_v0  ;;  %v6993_v51 = vpop.f32.mrb[13].mxu0  ;;  %v11794_v32 = vcombine.high %v1480_v26, %v1484_v27  ;;  %v11802_v44 = vcombine.high %v1488_v35, %v1492_v36  ;;  %v1372_v20 = vld [vmem:[%s13603_s2 + $0x1ae8] sm:$0xff] }
 0x2e2   : > { %v7032_v49 = vpop.f32.mrb[12].mxu1  ;;  %v6994_v61 = vadd.f32 %v6993_v51, %v14170_v63  ;;  %v6995_v62 = vpop.f32.mrb[14].mxu0  ;;  %7296 = vmatpush1.bf16.msra.mxu0 %v11633_v38  ;;  %v11778_v63 = vcombine.high %v1464_v53, %v1468_v56  ;;  %v11665_v38 = vcombine.low %v1352_v25, %v1356_v54  ;;  %v1496_v46 = vld [vmem:[%s13603_s2 + $0x1ec8] sm:$0xff]  ;;  %v11801_v51 = vcombine.low %v1488_v35, %v1492_v36  ;;  %v641_v35 = vld [vmem:[%s13603_s2 + $0x410] sm:$0xff] }
 0x2e3   : > { %v7034_v8 = vpop.f32.mrb[13].mxu1  ;;  %v7033_v58 = vadd.f32 %v7032_v49, %v6992_v47  ;;  %v6996_v0 = vpop.f32.mrb[15].mxu0  ;;  %7297 = vmatprep.subr.bf16.mxu0 %v11642_v42  ;;  %v11674_v42 = vcombine.high %v1360_v33, %v1364_v34  ;;  %v1500_v47 = vld [vmem:[%s13603_s2 + $0x1ee8] sm:$0xff]  ;;  %v11673_v49 = vcombine.low %v1360_v33, %v1364_v34  ;;  %v513_v33 = vld [vmem:[%s13603_s2 + $0x10] sm:$0xff] }
 0x2e4   : > { %v7036_v2 = vpop.f32.mrb[14].mxu1  ;;  %7337 = vmatpush1.bf16.msra.mxu1 %v11761_v39  ;;  %v7035_v6 = vadd.f32 %v7034_v8, %v6994_v61  ;;  %v11793_v39 = vcombine.low %v1480_v26, %v1484_v27  ;;  %v11810_v56 = vcombine.high %v1496_v46, %v1500_v47  ;;  %v1380_v61 = vld [vmem:[%s13603_s2 + $0x1b28] sm:$0xff]  ;;  %v517_v34 = vld [vmem:[%s13603_s2 + $0x30] sm:$0xff] }
 0x2e5   : > { %v7037_v7 = vpop.f32.mrb[15].mxu1  ;;  %7338 = vmatprep.subr.bf16.mxu1 %v11770_v45  ;;  %v8023_v13 = vadd.f32 %v7033_v58, %v495_v57  ;;  %v1368_v45 = vld [vmem:[%s13603_s2 + $0x1ac8] sm:$0xff]  ;;  %v11809_v58 = vcombine.low %v1496_v46, %v1500_v47  ;;  %v645_v36 = vld [vmem:[%s13603_s2 + $0x430] sm:$0xff] }
 0x2e6   : > { %v8024_v15 = vadd.f32 %v7035_v6, %v496_v11  ;;  %7298 = vmatpush1.bf16.msra.mxu0 %v11641_v1  ;;  %v11682_v53 = vcombine.high %v1368_v45, %v1372_v20  ;;  %v1376_v57 = vld [vmem:[%s13603_s2 + $0x1b08] sm:$0xff]  ;;  %v11681_v1 = vcombine.low %v1368_v45, %v1372_v20  ;;  %v521_v45 = vld [vmem:[%s13603_s2 + $0x50] sm:$0xff] }
 0x2e7   : > { %8031 = vst [vmem:[#allocation2] sm:$0xff] %v8023_v13  ;;  %7299 = vmatprep.subr.bf16.mxu0 %v11650_v4  ;;  %v1504_v8 = vld [vmem:[%s13603_s2 + $0x1f08] sm:$0xff]  ;;  %v11690_v11 = vcombine.high %v1376_v57, %v1380_v61  ;;  %v11689_v7 = vcombine.low %v1376_v57, %v1380_v61  ;;  %v525_v20 = vld [vmem:[%s13603_s2 + $0x70] sm:$0xff] }
 0x2e8   : > { %7339 = vmatpush1.bf16.msra.mxu1 %v11769_v3  ;;  %8032 = vst [vmem:[#allocation2 + $0x8] sm:$0xff] %v8024_v15  ;;  %v1508_v62 = vld [vmem:[%s13603_s2 + $0x1f28] sm:$0xff]  ;;  %v649_v46 = vld [vmem:[%s13603_s2 + $0x450] sm:$0xff] }
 0x2e9   : > { %7340 = vmatprep.subr.bf16.mxu1 %v11778_v63  ;;  %v11818_v2 = vcombine.high %v1504_v8, %v1508_v62  ;;  %v1384_v0 = vld [vmem:[%s13603_s2 + $0x1b48] sm:$0xff]  ;;  %v11817_v63 = vcombine.low %v1504_v8, %v1508_v62  ;;  %v653_v47 = vld [vmem:[%s13603_s2 + $0x470] sm:$0xff] }
 0x2ea   : > { %7300 = vmatpush1.bf16.msra.mxu0 %v11649_v43  ;;  %v1388_v3 = vld [vmem:[%s13603_s2 + $0x1b68] sm:$0xff]  ;;  %v529_v57 = vld [vmem:[%s13603_s2 + $0x90] sm:$0xff] }
 0x2eb   : > { %7301 = vmatprep.subr.bf16.mxu0 %v11658_v22  ;;  %v1512_v4 = vld [vmem:[%s13603_s2 + $0x1f48] sm:$0xff]  ;;  %v11698_v10 = vcombine.high %v1384_v0, %v1388_v3  ;;  %v11697_v43 = vcombine.low %v1384_v0, %v1388_v3  ;;  %v533_v61 = vld [vmem:[%s13603_s2 + $0xb0] sm:$0xff] }
 0x2ec   : > { %7341 = vmatpush1.bf16.msra.mxu1 %v11777_v18  ;;  %v1516_v6 = vld [vmem:[%s13603_s2 + $0x1f68] sm:$0xff]  ;;  %v657_v8 = vld [vmem:[%s13603_s2 + $0x490] sm:$0xff] }
 0x2ed   : > { %7342 = vmatprep.subr.bf16.mxu1 %v11786_v24  ;;  %v11826_v12 = vcombine.high %v1512_v4, %v1516_v6  ;;  %v1392_v13 = vld [vmem:[%s13603_s2 + $0x1b88] sm:$0xff]  ;;  %v11825_v18 = vcombine.low %v1512_v4, %v1516_v6  ;;  %v661_v62 = vld [vmem:[%s13603_s2 + $0x4b0] sm:$0xff] }
 0x2ee   : > { %7302 = vmatpush1.bf16.msra.mxu0 %v11657_v55  ;;  %v1396_v40 = vld [vmem:[%s13603_s2 + $0x1ba8] sm:$0xff]  ;;  %v537_v0 = vld [vmem:[%s13603_s2 + $0xd0] sm:$0xff] }
 0x2ef   : > { %7303 = vmatprep.subr.bf16.mxu0 %v11666_v31  ;;  %v1520_v14 = vld [vmem:[%s13603_s2 + $0x1f88] sm:$0xff]  ;;  %v11706_v22 = vcombine.high %v1392_v13, %v1396_v40  ;;  %v11705_v55 = vcombine.low %v1392_v13, %v1396_v40  ;;  %v541_v3 = vld [vmem:[%s13603_s2 + $0xf0] sm:$0xff] }
 0x2f0   : > { %7343 = vmatpush1.bf16.msra.mxu1 %v11785_v29  ;;  %v1524_v15 = vld [vmem:[%s13603_s2 + $0x1fa8] sm:$0xff]  ;;  %v665_v4 = vld [vmem:[%s13603_s2 + $0x4d0] sm:$0xff] }
 0x2f1   : > { %7344 = vmatprep.subr.bf16.mxu1 %v11794_v32  ;;  %v11834_v24 = vcombine.high %v1520_v14, %v1524_v15  ;;  %v1400_v25 = vld [vmem:[%s13603_s2 + $0x1bc8] sm:$0xff]  ;;  %v11833_v29 = vcombine.low %v1520_v14, %v1524_v15  ;;  %v669_v6 = vld [vmem:[%s13603_s2 + $0x4f0] sm:$0xff] }
 0x2f2   : > { %7304 = vmatpush1.bf16.msra.mxu0 %v11665_v38  ;;  %v1404_v54 = vld [vmem:[%s13603_s2 + $0x1be8] sm:$0xff]  ;;  %v545_v13 = vld [vmem:[%s13603_s2 + $0x110] sm:$0xff] }
 0x2f3   : > { %7305 = vmatprep.subr.bf16.mxu0 %v11674_v42  ;;  %v1528_v26 = vld [vmem:[%s13603_s2 + $0x1fc8] sm:$0xff]  ;;  %v11714_v31 = vcombine.high %v1400_v25, %v1404_v54  ;;  %v11713_v38 = vcombine.low %v1400_v25, %v1404_v54  ;;  %v10828_v42 = vcombine.high %v513_v33, %v517_v34  ;;  %v549_v40 = vld [vmem:[%s13603_s2 + $0x130] sm:$0xff] }
 0x2f4   : > { %7345 = vmatpush1.bf16.msra.mxu1 %v11793_v39  ;;  %v1532_v27 = vld [vmem:[%s13603_s2 + $0x1fe8] sm:$0xff]  ;;  %v673_v14 = vld [vmem:[%s13603_s2 + $0x510] sm:$0xff] }
 0x2f5   : > { %7346 = vmatprep.subr.bf16.mxu1 %v11802_v44  ;;  %v11842_v32 = vcombine.high %v1528_v26, %v1532_v27  ;;  %v11841_v39 = vcombine.low %v1528_v26, %v1532_v27  ;;  %v10956_v44 = vcombine.high %v641_v35, %v645_v36  ;;  %v677_v15 = vld [vmem:[%s13603_s2 + $0x530] sm:$0xff] }
 0x2f6   : > { %7306 = vmatpush1.bf16.msra.mxu0 %v11673_v49  ;;  %v10827_v49 = vcombine.low %v513_v33, %v517_v34  ;;  %v553_v25 = vld [vmem:[%s13603_s2 + $0x150] sm:$0xff] }
 0x2f7   : > { %7307 = vmatprep.subr.bf16.mxu0 %v11682_v53  ;;  %v10836_v53 = vcombine.high %v521_v45, %v525_v20  ;;  %v557_v54 = vld [vmem:[%s13603_s2 + $0x170] sm:$0xff] }
 0x2f8   : > { %7347 = vmatpush1.bf16.msra.mxu1 %v11801_v51  ;;  %v10955_v51 = vcombine.low %v641_v35, %v645_v36  ;;  %v681_v26 = vld [vmem:[%s13603_s2 + $0x550] sm:$0xff] }
 0x2f9   : > { %7348 = vmatprep.subr.bf16.mxu1 %v11810_v56  ;;  %v10964_v56 = vcombine.high %v649_v46, %v653_v47  ;;  %v685_v27 = vld [vmem:[%s13603_s2 + $0x570] sm:$0xff] }
 0x2fa   : > { %7308 = vmatpush1.bf16.msra.mxu0 %v11681_v1  ;;  %v10835_v1 = vcombine.low %v521_v45, %v525_v20  ;;  %v561_v33 = vld [vmem:[%s13603_s2 + $0x190] sm:$0xff] }
 0x2fb   : > { %7309 = vmatprep.subr.bf16.mxu0 %v11690_v11  ;;  %v10844_v11 = vcombine.high %v529_v57, %v533_v61  ;;  %v565_v34 = vld [vmem:[%s13603_s2 + $0x1b0] sm:$0xff] }
 0x2fc   : > { %7349 = vmatpush1.bf16.msra.mxu1 %v11809_v58  ;;  %v10963_v58 = vcombine.low %v649_v46, %v653_v47  ;;  %v689_v35 = vld [vmem:[%s13603_s2 + $0x590] sm:$0xff] }
 0x2fd   : > { %7350 = vmatprep.subr.bf16.mxu1 %v11818_v2  ;;  %v10972_v2 = vcombine.high %v657_v8, %v661_v62  ;;  %v693_v36 = vld [vmem:[%s13603_s2 + $0x5b0] sm:$0xff] }
 0x2fe   : > { %7310 = vmatpush1.bf16.msra.mxu0 %v11689_v7  ;;  %v10843_v7 = vcombine.low %v529_v57, %v533_v61  ;;  %v11004_v45 = vcombine.high %v689_v35, %v693_v36  ;;  %v569_v20 = vld [vmem:[%s13603_s2 + $0x1d0] sm:$0xff] }
 0x2ff   : > { %7311 = vmatprep.subr.bf16.mxu0 %v11698_v10  ;;  %v10852_v10 = vcombine.high %v537_v0, %v541_v3  ;;  %v573_v46 = vld [vmem:[%s13603_s2 + $0x1f0] sm:$0xff] }
 0x300   : > { %7351 = vmatpush1.bf16.msra.mxu1 %v11817_v63  ;;  %v10971_v63 = vcombine.low %v657_v8, %v661_v62  ;;  %v10875_v8 = vcombine.low %v561_v33, %v565_v34 }
 0x301   : > { %7352 = vmatprep.subr.bf16.mxu1 %v11826_v12  ;;  %v10980_v12 = vcombine.high %v665_v4, %v669_v6 }
 0x302   : > { %7312 = vmatpush1.bf16.msra.mxu0 %v11697_v43  ;;  %v10851_v43 = vcombine.low %v537_v0, %v541_v3 }
 0x303   : > { %7313 = vmatprep.subr.bf16.mxu0 %v11706_v22  ;;  %v10860_v22 = vcombine.high %v545_v13, %v549_v40 }
 0x304   : > { %7353 = vmatpush1.bf16.msra.mxu1 %v11825_v18  ;;  %v10979_v18 = vcombine.low %v665_v4, %v669_v6  ;;  %v577_v4 = vld [vmem:[%s13603_s2 + $0x210] sm:$0xff] }
 0x305   : > { %7354 = vmatprep.subr.bf16.mxu1 %v11834_v24  ;;  %v10988_v24 = vcombine.high %v673_v14, %v677_v15  ;;  %v581_v6 = vld [vmem:[%s13603_s2 + $0x230] sm:$0xff] }
 0x306   : > { %7314 = vmatpush1.bf16.msra.mxu0 %v11705_v55  ;;  %v10859_v55 = vcombine.low %v545_v13, %v549_v40  ;;  %v10892_v13 = vcombine.high %v577_v4, %v581_v6 }
 0x307   : > { %7315 = vmatprep.subr.bf16.mxu0 %v11714_v31  ;;  %v10868_v31 = vcombine.high %v553_v25, %v557_v54 }
 0x308   : > { %7355 = vmatpush1.bf16.msra.mxu1 %v11833_v29  ;;  %v10987_v29 = vcombine.low %v673_v14, %v677_v15  ;;  %v585_v14 = vld [vmem:[%s13603_s2 + $0x250] sm:$0xff] }
 0x309   : > { %7356 = vmatprep.subr.bf16.mxu1 %v11842_v32  ;;  %v10996_v32 = vcombine.high %v681_v26, %v685_v27  ;;  %v589_v15 = vld [vmem:[%s13603_s2 + $0x270] sm:$0xff] }
 0x30a   : > { %7316 = vmatpush1.bf16.msra.mxu0 %v11713_v38  ;;  %v10867_v38 = vcombine.low %v553_v25, %v557_v54  ;;  %v10900_v25 = vcombine.high %v585_v14, %v589_v15 }
 0x30b   : > { %7367 = vmatprep.subr.bf16.mxu0 %v10828_v42  ;;  %v10876_v42 = vcombine.high %v561_v33, %v565_v34 }
 0x30c   : > { %7357 = vmatpush1.bf16.msra.mxu1 %v11841_v39  ;;  %v10995_v39 = vcombine.low %v681_v26, %v685_v27  ;;  %v593_v26 = vld [vmem:[%s13603_s2 + $0x290] sm:$0xff] }
 0x30d   : > { %7408 = vmatprep.subr.bf16.mxu1 %v10956_v44  ;;  %7318 = vmatmul.mubr.bf16.vlgmr.msra.gmra.mrb[28].mxu0 %v13984_v23  ;;  %v597_v27 = vld [vmem:[%s13603_s2 + $0x2b0] sm:$0xff] }
 0x30e   : > { %7368 = vmatpush1.bf16.msra.mxu0 %v10827_v49  ;;  %7399 = vmatprep.mubr.bf16.mxu0 %v13664_v59  ;;  %v10908_v33 = vcombine.high %v593_v26, %v597_v27 }
 0x30f   : > { %7359 = vmatmul.mubr.bf16.vlgmr.msra.gmra.mrb[28].mxu1 %v13990_v52  ;;  %7369 = vmatprep.subr.bf16.mxu0 %v10836_v53  ;;  %v701_v53 = vld [vmem:[%s13603_s2 + $0x5f0] sm:$0xff] }
 0x310   : > { %7409 = vmatpush1.bf16.msra.mxu1 %v10955_v51  ;;  %7440 = vmatprep.mubr.bf16.mxu1 %v13668_v60  ;;  %v697_v51 = vld [vmem:[%s13603_s2 + $0x5d0] sm:$0xff] }
 0x311   : > { %7410 = vmatprep.subr.bf16.mxu1 %v10964_v56  ;;  %v11012_v3 = vcombine.high %v697_v51, %v701_v53 }
 0x312   : > { %7370 = vmatpush1.bf16.msra.mxu0 %v10835_v1 }
 0x313   : > { %7371 = vmatprep.subr.bf16.mxu0 %v10844_v11  ;;  %v11003_v11 = vcombine.low %v689_v35, %v693_v36  ;;  %v601_v35 = vld [vmem:[%s13603_s2 + $0x2d0] sm:$0xff] }
 0x314   : > { %7411 = vmatpush1.bf16.msra.mxu1 %v10963_v58  ;;  %v605_v36 = vld [vmem:[%s13603_s2 + $0x2f0] sm:$0xff] }
 0x315   : > { %7412 = vmatprep.subr.bf16.mxu1 %v10972_v2  ;;  %v10884_v2 = vcombine.high %v569_v20, %v573_v46 }
 0x316   : > { %7372 = vmatpush1.bf16.msra.mxu0 %v10843_v7  ;;  %v705_v7 = vld [vmem:[%s13603_s2 + $0x610] sm:$0xff] }
 0x317   : > { %7373 = vmatprep.subr.bf16.mxu0 %v10852_v10  ;;  %v10883_v10 = vcombine.low %v569_v20, %v573_v46  ;;  %v609_v46 = vld [vmem:[%s13603_s2 + $0x310] sm:$0xff] }
 0x318   : > { %7413 = vmatpush1.bf16.msra.mxu1 %v10971_v63  ;;  %v709_v63 = vld [vmem:[%s13603_s2 + $0x630] sm:$0xff] }
 0x319   : > { %7414 = vmatprep.subr.bf16.mxu1 %v10980_v12  ;;  %v11011_v12 = vcombine.low %v697_v51, %v701_v53  ;;  %v11020_v40 = vcombine.high %v705_v7, %v709_v63  ;;  %v741_v51 = vld [vmem:[%s13603_s2 + $0x730] sm:$0xff]  ;;  %v10915_v53 = vcombine.low %v601_v35, %v605_v36 }
 0x31a   : > { %7374 = vmatpush1.bf16.msra.mxu0 %v10851_v43  ;;  %v713_v43 = vld [vmem:[%s13603_s2 + $0x650] sm:$0xff] }
 0x31b   : > { %7375 = vmatprep.subr.bf16.mxu0 %v10860_v22  ;;  %v10891_v22 = vcombine.low %v577_v4, %v581_v6 }
 0x31c   : > { %7415 = vmatpush1.bf16.msra.mxu1 %v10979_v18  ;;  %v717_v18 = vld [vmem:[%s13603_s2 + $0x670] sm:$0xff] }
 0x31d   : > { %7416 = vmatprep.subr.bf16.mxu1 %v10988_v24  ;;  %v11019_v24 = vcombine.low %v705_v7, %v709_v63  ;;  %v11028_v54 = vcombine.high %v713_v43, %v717_v18  ;;  %v625_v7 = vld [vmem:[%s13603_s2 + $0x390] sm:$0xff] }
 0x31e   : > { %7376 = vmatpush1.bf16.msra.mxu0 %v10859_v55  ;;  %v721_v55 = vld [vmem:[%s13603_s2 + $0x690] sm:$0xff] }
 0x31f   : > { %7377 = vmatprep.subr.bf16.mxu0 %v10868_v31  ;;  %v10899_v31 = vcombine.low %v585_v14, %v589_v15  ;;  %v629_v63 = vld [vmem:[%s13603_s2 + $0x3b0] sm:$0xff] }
 0x320   : > { %7417 = vmatpush1.bf16.msra.mxu1 %v10987_v29  ;;  %v7073_v44 = vpop.f32.mrb[16].mxu0  ;;  %v725_v29 = vld [vmem:[%s13603_s2 + $0x6b0] sm:$0xff]  ;;  %v10940_v14 = vcombine.high %v625_v7, %v629_v63 }
 0x321   : > { %7418 = vmatprep.subr.bf16.mxu1 %v10996_v32  ;;  %v7075_v49 = vpop.f32.mrb[17].mxu0  ;;  %v11027_v32 = vcombine.low %v713_v43, %v717_v18  ;;  %v11036_v34 = vcombine.high %v721_v55, %v725_v29  ;;  %v633_v43 = vld [vmem:[%s13603_s2 + $0x3d0] sm:$0xff] }
 0x322   : > { %v7114_v47 = vpop.f32.mrb[16].mxu1  ;;  %v7077_v61 = vpop.f32.mrb[18].mxu0  ;;  %7378 = vmatpush1.bf16.msra.mxu0 %v10867_v38  ;;  %v729_v38 = vld [vmem:[%s13603_s2 + $0x6d0] sm:$0xff] }
 0x323   : > { %v14310_v56 = vadd.f32 %v7114_v47, %v7073_v44  ;;  %v7116_v57 = vpop.f32.mrb[17].mxu1  ;;  %v7078_v58 = vpop.f32.mrb[19].mxu0  ;;  %7379 = vmatprep.subr.bf16.mxu0 %v10876_v42  ;;  %v10907_v42 = vcombine.low %v593_v26, %v597_v27  ;;  %v11035_v44 = vcombine.low %v721_v55, %v725_v29  ;;  %v613_v47 = vld [vmem:[%s13603_s2 + $0x330] sm:$0xff] }
 0x324   : > { %v14312_v62 = vadd.f32 %v7116_v57, %v7075_v49  ;;  %v7118_v1 = vpop.f32.mrb[18].mxu1  ;;  %7419 = vmatpush1.bf16.msra.mxu1 %v10995_v39  ;;  %v733_v39 = vld [vmem:[%s13603_s2 + $0x6f0] sm:$0xff]  ;;  %v10924_v61 = vcombine.high %v609_v46, %v613_v47 }
 0x325   : > { %v7119_v0 = vpop.f32.mrb[19].mxu1  ;;  %7420 = vmatprep.subr.bf16.mxu1 %v11004_v45  ;;  %v10916_v45 = vcombine.high %v601_v35, %v605_v36  ;;  %v11044_v20 = vcombine.high %v729_v38, %v733_v39  ;;  %v737_v49 = vld [vmem:[%s13603_s2 + $0x710] sm:$0xff]  ;;  %v11043_v57 = vcombine.low %v729_v38, %v733_v39 }
 0x326   : > { %7380 = vmatpush1.bf16.msra.mxu0 %v10875_v8  ;;  %v11052_v8 = vcombine.high %v737_v49, %v741_v51  ;;  %v617_v1 = vld [vmem:[%s13603_s2 + $0x350] sm:$0xff]  ;;  %v10923_v0 = vcombine.low %v609_v46, %v613_v47 }
 0x327   : > { %7381 = vmatprep.subr.bf16.mxu0 %v10884_v2  ;;  %v621_v58 = vld [vmem:[%s13603_s2 + $0x370] sm:$0xff] }
 0x328   : > { %7421 = vmatpush1.bf16.msra.mxu1 %v11003_v11  ;;  %v745_v11 = vld [vmem:[%s13603_s2 + $0x750] sm:$0xff]  ;;  %v10932_v4 = vcombine.high %v617_v1, %v621_v58 }
 0x329   : > { %7422 = vmatprep.subr.bf16.mxu1 %v11012_v3  ;;  %v749_v2 = vld [vmem:[%s13603_s2 + $0x770] sm:$0xff]  ;;  %v11051_v3 = vcombine.low %v737_v49, %v741_v51 }
 0x32a   : > { %7382 = vmatpush1.bf16.msra.mxu0 %v10883_v10  ;;  %v11060_v6 = vcombine.high %v745_v11, %v749_v2  ;;  %v753_v10 = vld [vmem:[%s13603_s2 + $0x790] sm:$0xff] }
 0x32b   : > { %7383 = vmatprep.subr.bf16.mxu0 %v10892_v13  ;;  %v10931_v13 = vcombine.low %v617_v1, %v621_v58  ;;  %v637_v18 = vld [vmem:[%s13603_s2 + $0x3f0] sm:$0xff] }
 0x32c   : > { %7423 = vmatpush1.bf16.msra.mxu1 %v11011_v12  ;;  %v757_v12 = vld [vmem:[%s13603_s2 + $0x7b0] sm:$0xff]  ;;  %v10948_v26 = vcombine.high %v633_v43, %v637_v18 }
 0x32d   : > { %7424 = vmatprep.subr.bf16.mxu1 %v11020_v40  ;;  %v11059_v40 = vcombine.low %v745_v11, %v749_v2  ;;  %v11068_v15 = vcombine.high %v753_v10, %v757_v12  ;;  %v769_v55 = vld [vmem:[%s13603_s2 + $0x810] sm:$0xff] }
 0x32e   : > { %7384 = vmatpush1.bf16.msra.mxu0 %v10891_v22  ;;  %v761_v22 = vld [vmem:[%s13603_s2 + $0x7d0] sm:$0xff] }
 0x32f   : > { %7385 = vmatprep.subr.bf16.mxu0 %v10900_v25  ;;  %v10939_v25 = vcombine.low %v625_v7, %v629_v63  ;;  %v773_v29 = vld [vmem:[%s13603_s2 + $0x830] sm:$0xff] }
 0x330   : > { %7425 = vmatpush1.bf16.msra.mxu1 %v11019_v24  ;;  %v765_v24 = vld [vmem:[%s13603_s2 + $0x7f0] sm:$0xff]  ;;  %v11084_v35 = vcombine.high %v769_v55, %v773_v29 }
 0x331   : > { %7426 = vmatprep.subr.bf16.mxu1 %v11028_v54  ;;  %v11067_v54 = vcombine.low %v753_v10, %v757_v12  ;;  %v11076_v27 = vcombine.high %v761_v22, %v765_v24  ;;  %v777_v38 = vld [vmem:[%s13603_s2 + $0x850] sm:$0xff] }
 0x332   : > { %7386 = vmatpush1.bf16.msra.mxu0 %v10899_v31  ;;  %v897_v31 = vld [vmem:[%s13603_s2 + $0xc10] sm:$0xff] }
 0x333   : > { %7387 = vmatprep.subr.bf16.mxu0 %v10908_v33  ;;  %v10947_v33 = vcombine.low %v633_v43, %v637_v18  ;;  %v781_v39 = vld [vmem:[%s13603_s2 + $0x870] sm:$0xff] }
 0x334   : > { %7427 = vmatpush1.bf16.msra.mxu1 %v11027_v32  ;;  %v901_v32 = vld [vmem:[%s13603_s2 + $0xc30] sm:$0xff]  ;;  %v11092_v46 = vcombine.high %v777_v38, %v781_v39 }
 0x335   : > { %7428 = vmatprep.subr.bf16.mxu1 %v11036_v34  ;;  %v11075_v34 = vcombine.low %v761_v22, %v765_v24  ;;  %v11212_v36 = vcombine.high %v897_v31, %v901_v32  ;;  %v785_v49 = vld [vmem:[%s13603_s2 + $0x890] sm:$0xff] }
 0x336   : > { %7388 = vmatpush1.bf16.msra.mxu0 %v10907_v42  ;;  %v905_v42 = vld [vmem:[%s13603_s2 + $0xc50] sm:$0xff] }
 0x337   : > { %7389 = vmatprep.subr.bf16.mxu0 %v10916_v45  ;;  %v11083_v45 = vcombine.low %v769_v55, %v773_v29  ;;  %v789_v51 = vld [vmem:[%s13603_s2 + $0x8b0] sm:$0xff] }
 0x338   : > { %7429 = vmatpush1.bf16.msra.mxu1 %v11035_v44  ;;  %v909_v44 = vld [vmem:[%s13603_s2 + $0xc70] sm:$0xff]  ;;  %v11100_v1 = vcombine.high %v785_v49, %v789_v51 }
 0x339   : > { %7430 = vmatprep.subr.bf16.mxu1 %v11044_v20  ;;  %v11211_v20 = vcombine.low %v897_v31, %v901_v32  ;;  %v11220_v47 = vcombine.high %v905_v42, %v909_v44  ;;  %v793_v11 = vld [vmem:[%s13603_s2 + $0x8d0] sm:$0xff] }
 0x33a   : > { %7390 = vmatpush1.bf16.msra.mxu0 %v10915_v53  ;;  %v913_v53 = vld [vmem:[%s13603_s2 + $0xc90] sm:$0xff] }
 0x33b   : > { %7391 = vmatprep.subr.bf16.mxu0 %v10924_v61  ;;  %v11091_v61 = vcombine.low %v777_v38, %v781_v39  ;;  %v797_v2 = vld [vmem:[%s13603_s2 + $0x8f0] sm:$0xff] }
 0x33c   : > { %7431 = vmatpush1.bf16.msra.mxu1 %v11043_v57  ;;  %v917_v57 = vld [vmem:[%s13603_s2 + $0xcb0] sm:$0xff]  ;;  %v11108_v7 = vcombine.high %v793_v11, %v797_v2 }
 0x33d   : > { %7432 = vmatprep.subr.bf16.mxu1 %v11052_v8  ;;  %v11219_v8 = vcombine.low %v905_v42, %v909_v44  ;;  %v11228_v58 = vcombine.high %v913_v53, %v917_v57  ;;  %v801_v10 = vld [vmem:[%s13603_s2 + $0x910] sm:$0xff] }
 0x33e   : > { %7392 = vmatpush1.bf16.msra.mxu0 %v10923_v0  ;;  %v921_v0 = vld [vmem:[%s13603_s2 + $0xcd0] sm:$0xff] }
 0x33f   : > { %7393 = vmatprep.subr.bf16.mxu0 %v10932_v4  ;;  %v11099_v4 = vcombine.low %v785_v49, %v789_v51  ;;  %v805_v12 = vld [vmem:[%s13603_s2 + $0x930] sm:$0xff] }
 0x340   : > { %7433 = vmatpush1.bf16.msra.mxu1 %v11051_v3  ;;  %v925_v3 = vld [vmem:[%s13603_s2 + $0xcf0] sm:$0xff]  ;;  %v11116_v43 = vcombine.high %v801_v10, %v805_v12 }
 0x341   : > { %7434 = vmatprep.subr.bf16.mxu1 %v11060_v6  ;;  %v11227_v6 = vcombine.low %v913_v53, %v917_v57  ;;  %v11236_v63 = vcombine.high %v921_v0, %v925_v3  ;;  %v809_v22 = vld [vmem:[%s13603_s2 + $0x950] sm:$0xff] }
 0x342   : > { %7394 = vmatpush1.bf16.msra.mxu0 %v10931_v13  ;;  %v929_v13 = vld [vmem:[%s13603_s2 + $0xd10] sm:$0xff] }
 0x343   : > { %7395 = vmatprep.subr.bf16.mxu0 %v10940_v14  ;;  %v11107_v14 = vcombine.low %v793_v11, %v797_v2  ;;  %v813_v24 = vld [vmem:[%s13603_s2 + $0x970] sm:$0xff] }
 0x344   : > { %7435 = vmatpush1.bf16.msra.mxu1 %v11059_v40  ;;  %v933_v40 = vld [vmem:[%s13603_s2 + $0xd30] sm:$0xff]  ;;  %v11124_v55 = vcombine.high %v809_v22, %v813_v24 }
 0x345   : > { %7436 = vmatprep.subr.bf16.mxu1 %v11068_v15  ;;  %v11235_v15 = vcombine.low %v921_v0, %v925_v3  ;;  %v11244_v18 = vcombine.high %v929_v13, %v933_v40  ;;  %v817_v31 = vld [vmem:[%s13603_s2 + $0x990] sm:$0xff] }
 0x346   : > { %7396 = vmatpush1.bf16.msra.mxu0 %v10939_v25  ;;  %v937_v25 = vld [vmem:[%s13603_s2 + $0xd50] sm:$0xff] }
 0x347   : > { %7397 = vmatprep.subr.bf16.mxu0 %v10948_v26  ;;  %v11115_v26 = vcombine.low %v801_v10, %v805_v12  ;;  %v821_v32 = vld [vmem:[%s13603_s2 + $0x9b0] sm:$0xff] }
 0x348   : > { %7437 = vmatpush1.bf16.msra.mxu1 %v11067_v54  ;;  %v941_v54 = vld [vmem:[%s13603_s2 + $0xd70] sm:$0xff]  ;;  %v11132_v38 = vcombine.high %v817_v31, %v821_v32 }
 0x349   : > { %7438 = vmatprep.subr.bf16.mxu1 %v11076_v27  ;;  %v11243_v27 = vcombine.low %v929_v13, %v933_v40  ;;  %v11252_v29 = vcombine.high %v937_v25, %v941_v54  ;;  %v825_v44 = vld [vmem:[%s13603_s2 + $0x9d0] sm:$0xff] }
 0x34a   : > { %7398 = vmatpush1.bf16.msra.mxu0 %v10947_v33  ;;  %v945_v33 = vld [vmem:[%s13603_s2 + $0xd90] sm:$0xff] }
 0x34b   : > { %7449 = vmatprep.subr.bf16.mxu0 %v11084_v35  ;;  %v11123_v35 = vcombine.low %v809_v22, %v813_v24  ;;  %v953_v49 = vld [vmem:[%s13603_s2 + $0xdd0] sm:$0xff] }
 0x34c   : > { %7439 = vmatpush1.bf16.msra.mxu1 %v11075_v34  ;;  %v949_v34 = vld [vmem:[%s13603_s2 + $0xdb0] sm:$0xff] }
 0x34d   : > { %7490 = vmatprep.subr.bf16.mxu1 %v11212_v36  ;;  %7400 = vmatmul.mubr.bf16.vlgmr.msra.gmra.mrb[32].mxu0 %v13714_v17  ;;  %v11251_v36 = vcombine.low %v937_v25, %v941_v54  ;;  %v11260_v42 = vcombine.high %v945_v33, %v949_v34  ;;  %v957_v51 = vld [vmem:[%s13603_s2 + $0xdf0] sm:$0xff] }
 0x34e   : > { %7450 = vmatpush1.bf16.msra.mxu0 %v11083_v45  ;;  %7481 = vmatprep.mubr.bf16.mxu0 %v13732_v28  ;;  %v829_v45 = vld [vmem:[%s13603_s2 + $0x9f0] sm:$0xff]  ;;  %v11268_v3 = vcombine.high %v953_v49, %v957_v51  ;;  %v11267_v12 = vcombine.low %v953_v49, %v957_v51 }
 0x34f   : > { %7441 = vmatmul.mubr.bf16.vlgmr.msra.gmra.mrb[32].mxu1 %v13723_v21  ;;  %7451 = vmatprep.subr.bf16.mxu0 %v11092_v46  ;;  %v11140_v2 = vcombine.high %v825_v44, %v829_v45  ;;  %v11139_v10 = vcombine.low %v825_v44, %v829_v45  ;;  %v993_v49 = vld [vmem:[%s13603_s2 + $0xf10] sm:$0xff] }
 0x350   : > { %7491 = vmatpush1.bf16.msra.mxu1 %v11211_v20  ;;  %7522 = vmatprep.mubr.bf16.mxu1 %v13739_v30  ;;  %v997_v51 = vld [vmem:[%s13603_s2 + $0xf30] sm:$0xff] }
 0x351   : > { %7492 = vmatprep.subr.bf16.mxu1 %v11220_v47 }
 0x352   : > { %7452 = vmatpush1.bf16.msra.mxu0 %v11091_v61 }
 0x353   : > { %7453 = vmatprep.subr.bf16.mxu0 %v11100_v1 }
 0x354   : > { %7493 = vmatpush1.bf16.msra.mxu1 %v11219_v8  ;;  %v11131_v8 = vcombine.low %v817_v31, %v821_v32 }
 0x355   : > { %7494 = vmatprep.subr.bf16.mxu1 %v11228_v58 }
 0x356   : > { %7454 = vmatpush1.bf16.msra.mxu0 %v11099_v4  ;;  %v833_v4 = vld [vmem:[%s13603_s2 + $0xa10] sm:$0xff] }
 0x357   : > { %7455 = vmatprep.subr.bf16.mxu0 %v11108_v7  ;;  %v961_v7 = vld [vmem:[%s13603_s2 + $0xe10] sm:$0xff] }
 0x358   : > { %7495 = vmatpush1.bf16.msra.mxu1 %v11227_v6  ;;  %v837_v6 = vld [vmem:[%s13603_s2 + $0xa30] sm:$0xff] }
 0x359   : > { %7496 = vmatprep.subr.bf16.mxu1 %v11236_v63  ;;  %v965_v63 = vld [vmem:[%s13603_s2 + $0xe30] sm:$0xff]  ;;  %v11148_v13 = vcombine.high %v833_v4, %v837_v6  ;;  %v11147_v22 = vcombine.low %v833_v4, %v837_v6 }
 0x35a   : > { %7456 = vmatpush1.bf16.msra.mxu0 %v11107_v14  ;;  %v11276_v40 = vcombine.high %v961_v7, %v965_v63  ;;  %v841_v14 = vld [vmem:[%s13603_s2 + $0xa50] sm:$0xff]  ;;  %v11275_v24 = vcombine.low %v961_v7, %v965_v63 }
 0x35b   : > { %7457 = vmatprep.subr.bf16.mxu0 %v11116_v43  ;;  %v969_v43 = vld [vmem:[%s13603_s2 + $0xe50] sm:$0xff] }
 0x35c   : > { %7497 = vmatpush1.bf16.msra.mxu1 %v11235_v15  ;;  %v845_v15 = vld [vmem:[%s13603_s2 + $0xa70] sm:$0xff] }
 0x35d   : > { %7498 = vmatprep.subr.bf16.mxu1 %v11244_v18  ;;  %v973_v18 = vld [vmem:[%s13603_s2 + $0xe70] sm:$0xff]  ;;  %v11156_v25 = vcombine.high %v841_v14, %v845_v15  ;;  %v11155_v31 = vcombine.low %v841_v14, %v845_v15 }
 0x35e   : > { %7458 = vmatpush1.bf16.msra.mxu0 %v11115_v26  ;;  %v11284_v54 = vcombine.high %v969_v43, %v973_v18  ;;  %v849_v26 = vld [vmem:[%s13603_s2 + $0xa90] sm:$0xff]  ;;  %v11283_v32 = vcombine.low %v969_v43, %v973_v18 }
 0x35f   : > { %7459 = vmatprep.subr.bf16.mxu0 %v11124_v55  ;;  %v977_v55 = vld [vmem:[%s13603_s2 + $0xe90] sm:$0xff] }
 0x360   : > { %7499 = vmatpush1.bf16.msra.mxu1 %v11243_v27  ;;  %v7155_v39 = vpop.f32.mrb[20].mxu0  ;;  %v853_v27 = vld [vmem:[%s13603_s2 + $0xab0] sm:$0xff] }
 0x361   : > { %7500 = vmatprep.subr.bf16.mxu1 %v11252_v29  ;;  %v7156_v20 = vadd.f32 %v7155_v39, %v14310_v56  ;;  %v7157_v47 = vpop.f32.mrb[21].mxu0  ;;  %v11259_v56 = vcombine.low %v945_v33, %v949_v34  ;;  %v981_v29 = vld [vmem:[%s13603_s2 + $0xeb0] sm:$0xff]  ;;  %v11164_v33 = vcombine.high %v849_v26, %v853_v27 }
 0x362   : > { %v7196_v46 = vpop.f32.mrb[20].mxu1  ;;  %v7158_v53 = vadd.f32 %v7157_v47, %v14312_v62  ;;  %v7159_v61 = vpop.f32.mrb[22].mxu0  ;;  %7460 = vmatpush1.bf16.msra.mxu0 %v11123_v35  ;;  %v11292_v34 = vcombine.high %v977_v55, %v981_v29  ;;  %v857_v35 = vld [vmem:[%s13603_s2 + $0xad0] sm:$0xff]  ;;  %v11291_v44 = vcombine.low %v977_v55, %v981_v29 }
 0x363   : > { %v7198_v57 = vpop.f32.mrb[21].mxu1  ;;  %v14384_v1 = vadd.f32 %v7196_v46, %v7156_v20  ;;  %v7160_v11 = vpop.f32.mrb[23].mxu0  ;;  %7461 = vmatprep.subr.bf16.mxu0 %v11132_v38  ;;  %v985_v38 = vld [vmem:[%s13603_s2 + $0xed0] sm:$0xff] }
 0x364   : > { %v7200_v58 = vpop.f32.mrb[22].mxu1  ;;  %7501 = vmatpush1.bf16.msra.mxu1 %v11251_v36  ;;  %v14386_v0 = vadd.f32 %v7198_v57, %v7158_v53  ;;  %v861_v36 = vld [vmem:[%s13603_s2 + $0xaf0] sm:$0xff] }
 0x365   : > { %v7201_v62 = vpop.f32.mrb[23].mxu1  ;;  %7502 = vmatprep.subr.bf16.mxu1 %v11260_v42  ;;  %v989_v39 = vld [vmem:[%s13603_s2 + $0xef0] sm:$0xff]  ;;  %v11163_v42 = vcombine.low %v849_v26, %v853_v27  ;;  %v11172_v45 = vcombine.high %v857_v35, %v861_v36  ;;  %v11171_v53 = vcombine.low %v857_v35, %v861_v36 }
 0x366   : > { %7462 = vmatpush1.bf16.msra.mxu0 %v11131_v8  ;;  %v11300_v20 = vcombine.high %v985_v38, %v989_v39  ;;  %v865_v46 = vld [vmem:[%s13603_s2 + $0xb10] sm:$0xff]  ;;  %v11299_v57 = vcombine.low %v985_v38, %v989_v39  ;;  %v11308_v8 = vcombine.high %v993_v49, %v997_v51 }
 0x367   : > { %7463 = vmatprep.subr.bf16.mxu0 %v11140_v2  ;;  %v869_v47 = vld [vmem:[%s13603_s2 + $0xb30] sm:$0xff] }
 0x368   : > { %7503 = vmatpush1.bf16.msra.mxu1 %v11259_v56  ;;  %v11180_v61 = vcombine.high %v865_v46, %v869_v47  ;;  %v873_v58 = vld [vmem:[%s13603_s2 + $0xb50] sm:$0xff]  ;;  %v11179_v62 = vcombine.low %v865_v46, %v869_v47 }
 0x369   : > { %7504 = vmatprep.subr.bf16.mxu1 %v11268_v3  ;;  %v877_v11 = vld [vmem:[%s13603_s2 + $0xb70] sm:$0xff]  ;;  %v11307_v3 = vcombine.low %v993_v49, %v997_v51 }
 0x36a   : > { %7464 = vmatpush1.bf16.msra.mxu0 %v11139_v10  ;;  %v1001_v56 = vld [vmem:[%s13603_s2 + $0xf50] sm:$0xff]  ;;  %v11188_v4 = vcombine.high %v873_v58, %v877_v11 }
 0x36b   : > { %7465 = vmatprep.subr.bf16.mxu0 %v11148_v13  ;;  %v1005_v2 = vld [vmem:[%s13603_s2 + $0xf70] sm:$0xff]  ;;  %v11187_v13 = vcombine.low %v873_v58, %v877_v11 }
 0x36c   : > { %7505 = vmatpush1.bf16.msra.mxu1 %v11267_v12  ;;  %v11316_v6 = vcombine.high %v1001_v56, %v1005_v2  ;;  %v881_v7 = vld [vmem:[%s13603_s2 + $0xb90] sm:$0xff] }
 0x36d   : > { %7506 = vmatprep.subr.bf16.mxu1 %v11276_v40  ;;  %v885_v63 = vld [vmem:[%s13603_s2 + $0xbb0] sm:$0xff]  ;;  %v11315_v40 = vcombine.low %v1001_v56, %v1005_v2 }
 0x36e   : > { %7466 = vmatpush1.bf16.msra.mxu0 %v11147_v22  ;;  %v1009_v10 = vld [vmem:[%s13603_s2 + $0xf90] sm:$0xff]  ;;  %v11196_v14 = vcombine.high %v881_v7, %v885_v63 }
 0x36f   : > { %7467 = vmatprep.subr.bf16.mxu0 %v11156_v25  ;;  %v1013_v12 = vld [vmem:[%s13603_s2 + $0xfb0] sm:$0xff]  ;;  %v11195_v25 = vcombine.low %v881_v7, %v885_v63 }
 0x370   : > { %7507 = vmatpush1.bf16.msra.mxu1 %v11275_v24  ;;  %v11324_v15 = vcombine.high %v1009_v10, %v1013_v12  ;;  %v889_v43 = vld [vmem:[%s13603_s2 + $0xbd0] sm:$0xff] }
 0x371   : > { %7508 = vmatprep.subr.bf16.mxu1 %v11284_v54  ;;  %v893_v18 = vld [vmem:[%s13603_s2 + $0xbf0] sm:$0xff]  ;;  %v11323_v54 = vcombine.low %v1009_v10, %v1013_v12 }
 0x372   : > { %7468 = vmatpush1.bf16.msra.mxu0 %v11155_v31  ;;  %v1017_v22 = vld [vmem:[%s13603_s2 + $0xfd0] sm:$0xff]  ;;  %v11204_v26 = vcombine.high %v889_v43, %v893_v18 }
 0x373   : > { %7469 = vmatprep.subr.bf16.mxu0 %v11164_v33  ;;  %v1021_v24 = vld [vmem:[%s13603_s2 + $0xff0] sm:$0xff]  ;;  %v11203_v33 = vcombine.low %v889_v43, %v893_v18 }
 0x374   : > { %7509 = vmatpush1.bf16.msra.mxu1 %v11283_v32  ;;  %v11332_v27 = vcombine.high %v1017_v22, %v1021_v24  ;;  %v1025_v55 = vld [vmem:[%s13603_s2 + $0x1010] sm:$0xff] }
 0x375   : > { %7510 = vmatprep.subr.bf16.mxu1 %v11292_v34  ;;  %v1029_v29 = vld [vmem:[%s13603_s2 + $0x1030] sm:$0xff]  ;;  %v11331_v34 = vcombine.low %v1017_v22, %v1021_v24 }
 0x376   : > { %7470 = vmatpush1.bf16.msra.mxu0 %v11163_v42  ;;  %v1153_v31 = vld [vmem:[%s13603_s2 + $0x1410] sm:$0xff]  ;;  %v11340_v35 = vcombine.high %v1025_v55, %v1029_v29 }
 0x377   : > { %7471 = vmatprep.subr.bf16.mxu0 %v11172_v45  ;;  %v1157_v32 = vld [vmem:[%s13603_s2 + $0x1430] sm:$0xff]  ;;  %v11339_v45 = vcombine.low %v1025_v55, %v1029_v29 }
 0x378   : > { %7511 = vmatpush1.bf16.msra.mxu1 %v11291_v44  ;;  %v11468_v36 = vcombine.high %v1153_v31, %v1157_v32  ;;  %v1033_v38 = vld [vmem:[%s13603_s2 + $0x1050] sm:$0xff] }
 0x379   : > { %7512 = vmatprep.subr.bf16.mxu1 %v11300_v20  ;;  %v1037_v39 = vld [vmem:[%s13603_s2 + $0x1070] sm:$0xff]  ;;  %v11467_v20 = vcombine.low %v1153_v31, %v1157_v32 }
 0x37a   : > { %7472 = vmatpush1.bf16.msra.mxu0 %v11171_v53  ;;  %v1161_v42 = vld [vmem:[%s13603_s2 + $0x1450] sm:$0xff]  ;;  %v11348_v46 = vcombine.high %v1033_v38, %v1037_v39 }
 0x37b   : > { %7473 = vmatprep.subr.bf16.mxu0 %v11180_v61  ;;  %v1165_v44 = vld [vmem:[%s13603_s2 + $0x1470] sm:$0xff]  ;;  %v11347_v61 = vcombine.low %v1033_v38, %v1037_v39 }
 0x37c   : > { %7513 = vmatpush1.bf16.msra.mxu1 %v11299_v57  ;;  %v11476_v47 = vcombine.high %v1161_v42, %v1165_v44  ;;  %v1041_v49 = vld [vmem:[%s13603_s2 + $0x1090] sm:$0xff] }
 0x37d   : > { %7514 = vmatprep.subr.bf16.mxu1 %v11308_v8  ;;  %v1045_v51 = vld [vmem:[%s13603_s2 + $0x10b0] sm:$0xff]  ;;  %v11475_v8 = vcombine.low %v1161_v42, %v1165_v44 }
 0x37e   : > { %7474 = vmatpush1.bf16.msra.mxu0 %v11179_v62  ;;  %v1169_v53 = vld [vmem:[%s13603_s2 + $0x1490] sm:$0xff]  ;;  %v11356_v58 = vcombine.high %v1041_v49, %v1045_v51 }
 0x37f   : > { %7475 = vmatprep.subr.bf16.mxu0 %v11188_v4  ;;  %v1173_v57 = vld [vmem:[%s13603_s2 + $0x14b0] sm:$0xff]  ;;  %v11355_v4 = vcombine.low %v1041_v49, %v1045_v51 }
 0x380   : > { %7515 = vmatpush1.bf16.msra.mxu1 %v11307_v3  ;;  %v11484_v11 = vcombine.high %v1169_v53, %v1173_v57  ;;  %v1049_v56 = vld [vmem:[%s13603_s2 + $0x10d0] sm:$0xff] }
 0x381   : > { %7516 = vmatprep.subr.bf16.mxu1 %v11316_v6  ;;  %v1053_v2 = vld [vmem:[%s13603_s2 + $0x10f0] sm:$0xff]  ;;  %v11483_v6 = vcombine.low %v1169_v53, %v1173_v57 }
 0x382   : > { %7476 = vmatpush1.bf16.msra.mxu0 %v11187_v13  ;;  %v1177_v62 = vld [vmem:[%s13603_s2 + $0x14d0] sm:$0xff]  ;;  %v11364_v7 = vcombine.high %v1049_v56, %v1053_v2 }
 0x383   : > { %7477 = vmatprep.subr.bf16.mxu0 %v11196_v14  ;;  %v1181_v3 = vld [vmem:[%s13603_s2 + $0x14f0] sm:$0xff]  ;;  %v11363_v14 = vcombine.low %v1049_v56, %v1053_v2 }
 0x384   : > { %7517 = vmatpush1.bf16.msra.mxu1 %v11315_v40  ;;  %v11492_v63 = vcombine.high %v1177_v62, %v1181_v3  ;;  %v1057_v10 = vld [vmem:[%s13603_s2 + $0x1110] sm:$0xff] }
 0x385   : > { %7518 = vmatprep.subr.bf16.mxu1 %v11324_v15  ;;  %v1061_v12 = vld [vmem:[%s13603_s2 + $0x1130] sm:$0xff]  ;;  %v11491_v15 = vcombine.low %v1177_v62, %v1181_v3 }
 0x386   : > { %7478 = vmatpush1.bf16.msra.mxu0 %v11195_v25  ;;  %v1185_v13 = vld [vmem:[%s13603_s2 + $0x1510] sm:$0xff]  ;;  %v11372_v43 = vcombine.high %v1057_v10, %v1061_v12 }
 0x387   : > { %7479 = vmatprep.subr.bf16.mxu0 %v11204_v26  ;;  %v1189_v40 = vld [vmem:[%s13603_s2 + $0x1530] sm:$0xff]  ;;  %v11371_v26 = vcombine.low %v1057_v10, %v1061_v12 }
 0x388   : > { %7519 = vmatpush1.bf16.msra.mxu1 %v11323_v54  ;;  %v11500_v18 = vcombine.high %v1185_v13, %v1189_v40  ;;  %v1065_v22 = vld [vmem:[%s13603_s2 + $0x1150] sm:$0xff] }
 0x389   : > { %7520 = vmatprep.subr.bf16.mxu1 %v11332_v27  ;;  %v1069_v24 = vld [vmem:[%s13603_s2 + $0x1170] sm:$0xff]  ;;  %v11499_v27 = vcombine.low %v1185_v13, %v1189_v40 }
 0x38a   : > { %7480 = vmatpush1.bf16.msra.mxu0 %v11203_v33  ;;  %v1193_v25 = vld [vmem:[%s13603_s2 + $0x1550] sm:$0xff]  ;;  %v11380_v55 = vcombine.high %v1065_v22, %v1069_v24 }
 0x38b   : > { %7531 = vmatprep.subr.bf16.mxu0 %v11340_v35  ;;  %v1197_v54 = vld [vmem:[%s13603_s2 + $0x1570] sm:$0xff]  ;;  %v11379_v35 = vcombine.low %v1065_v22, %v1069_v24 }
 0x38c   : > { %7521 = vmatpush1.bf16.msra.mxu1 %v11331_v34  ;;  %v11508_v29 = vcombine.high %v1193_v25, %v1197_v54  ;;  %v1073_v31 = vld [vmem:[%s13603_s2 + $0x1190] sm:$0xff] }
 0x38d   : > { %7572 = vmatprep.subr.bf16.mxu1 %v11468_v36  ;;  %7482 = vmatmul.mubr.bf16.vlgmr.msra.gmra.mrb[36].mxu0 %v13804_v37  ;;  %v1077_v32 = vld [vmem:[%s13603_s2 + $0x11b0] sm:$0xff]  ;;  %v11507_v36 = vcombine.low %v1193_v25, %v1197_v54 }
 0x38e   : > { %7532 = vmatpush1.bf16.msra.mxu0 %v11339_v45  ;;  %7563 = vmatprep.mubr.bf16.mxu0 %v13822_v48  ;;  %v1201_v33 = vld [vmem:[%s13603_s2 + $0x1590] sm:$0xff]  ;;  %v11388_v38 = vcombine.high %v1073_v31, %v1077_v32 }
 0x38f   : > { %7523 = vmatmul.mubr.bf16.vlgmr.msra.gmra.mrb[36].mxu1 %v13813_v41  ;;  %7533 = vmatprep.subr.bf16.mxu0 %v11348_v46  ;;  %v1205_v34 = vld [vmem:[%s13603_s2 + $0x15b0] sm:$0xff] }
 0x390   : > { %7573 = vmatpush1.bf16.msra.mxu1 %v11467_v20  ;;  %7604 = vmatprep.mubr.bf16.mxu1 %v13829_v50  ;;  %v11516_v42 = vcombine.high %v1201_v33, %v1205_v34  ;;  %v1081_v44 = vld [vmem:[%s13603_s2 + $0x11d0] sm:$0xff] }
 0x391   : > { %7574 = vmatprep.subr.bf16.mxu1 %v11476_v47  ;;  %v1085_v45 = vld [vmem:[%s13603_s2 + $0x11f0] sm:$0xff] }
 0x392   : > { %7534 = vmatpush1.bf16.msra.mxu0 %v11347_v61  ;;  %v1209_v49 = vld [vmem:[%s13603_s2 + $0x15d0] sm:$0xff]  ;;  %v11396_v2 = vcombine.high %v1081_v44, %v1085_v45  ;;  %v11395_v10 = vcombine.low %v1081_v44, %v1085_v45 }
 0x393   : > { %7535 = vmatprep.subr.bf16.mxu0 %v11356_v58  ;;  %v1213_v51 = vld [vmem:[%s13603_s2 + $0x15f0] sm:$0xff] }
 0x394   : > { %7575 = vmatpush1.bf16.msra.mxu1 %v11475_v8  ;;  %v11387_v8 = vcombine.low %v1073_v31, %v1077_v32  ;;  %v11524_v3 = vcombine.high %v1209_v49, %v1213_v51  ;;  %v11523_v12 = vcombine.low %v1209_v49, %v1213_v51  ;;  %v1249_v49 = vld [vmem:[%s13603_s2 + $0x1710] sm:$0xff] }
 0x395   : > { %7576 = vmatprep.subr.bf16.mxu1 %v11484_v11  ;;  %v1253_v51 = vld [vmem:[%s13603_s2 + $0x1730] sm:$0xff] }
 0x396   : > { %7536 = vmatpush1.bf16.msra.mxu0 %v11355_v4  ;;  %v1089_v4 = vld [vmem:[%s13603_s2 + $0x1210] sm:$0xff] }
 0x397   : > { %7537 = vmatprep.subr.bf16.mxu0 %v11364_v7  ;;  %v1217_v7 = vld [vmem:[%s13603_s2 + $0x1610] sm:$0xff] }
 0x398   : > { %7577 = vmatpush1.bf16.msra.mxu1 %v11483_v6  ;;  %v1093_v6 = vld [vmem:[%s13603_s2 + $0x1230] sm:$0xff] }
 0x399   : > { %7578 = vmatprep.subr.bf16.mxu1 %v11492_v63  ;;  %v1221_v63 = vld [vmem:[%s13603_s2 + $0x1630] sm:$0xff]  ;;  %v11404_v13 = vcombine.high %v1089_v4, %v1093_v6  ;;  %v11403_v22 = vcombine.low %v1089_v4, %v1093_v6 }
 0x39a   : > { %7538 = vmatpush1.bf16.msra.mxu0 %v11363_v14  ;;  %v11532_v40 = vcombine.high %v1217_v7, %v1221_v63  ;;  %v1097_v14 = vld [vmem:[%s13603_s2 + $0x1250] sm:$0xff]  ;;  %v11531_v24 = vcombine.low %v1217_v7, %v1221_v63 }
 0x39b   : > { %7539 = vmatprep.subr.bf16.mxu0 %v11372_v43  ;;  %v1225_v43 = vld [vmem:[%s13603_s2 + $0x1650] sm:$0xff] }
 0x39c   : > { %7579 = vmatpush1.bf16.msra.mxu1 %v11491_v15  ;;  %v1101_v15 = vld [vmem:[%s13603_s2 + $0x1270] sm:$0xff] }
 0x39d   : > { %7580 = vmatprep.subr.bf16.mxu1 %v11500_v18  ;;  %v1229_v18 = vld [vmem:[%s13603_s2 + $0x1670] sm:$0xff]  ;;  %v11412_v25 = vcombine.high %v1097_v14, %v1101_v15  ;;  %v11411_v31 = vcombine.low %v1097_v14, %v1101_v15 }
 0x39e   : > { %7540 = vmatpush1.bf16.msra.mxu0 %v11371_v26  ;;  %v11540_v54 = vcombine.high %v1225_v43, %v1229_v18  ;;  %v1105_v26 = vld [vmem:[%s13603_s2 + $0x1290] sm:$0xff]  ;;  %v11539_v32 = vcombine.low %v1225_v43, %v1229_v18 }
 0x39f   : > { %7541 = vmatprep.subr.bf16.mxu0 %v11380_v55  ;;  %v1233_v55 = vld [vmem:[%s13603_s2 + $0x1690] sm:$0xff] }
 0x3a0   : > { %7581 = vmatpush1.bf16.msra.mxu1 %v11499_v27  ;;  %v7237_v39 = vpop.f32.mrb[24].mxu0  ;;  %v1109_v27 = vld [vmem:[%s13603_s2 + $0x12b0] sm:$0xff] }
 0x3a1   : > { %7582 = vmatprep.subr.bf16.mxu1 %v11508_v29  ;;  %v7238_v20 = vadd.f32 %v7237_v39, %v14384_v1  ;;  %v7239_v47 = vpop.f32.mrb[25].mxu0  ;;  %v11515_v1 = vcombine.low %v1201_v33, %v1205_v34  ;;  %v1237_v29 = vld [vmem:[%s13603_s2 + $0x16b0] sm:$0xff]  ;;  %v11420_v33 = vcombine.high %v1105_v26, %v1109_v27 }
 0x3a2   : > { %v7278_v46 = vpop.f32.mrb[24].mxu1  ;;  %v7240_v53 = vadd.f32 %v7239_v47, %v14386_v0  ;;  %v7241_v61 = vpop.f32.mrb[26].mxu0  ;;  %7542 = vmatpush1.bf16.msra.mxu0 %v11379_v35  ;;  %v11548_v34 = vcombine.high %v1233_v55, %v1237_v29  ;;  %v1113_v35 = vld [vmem:[%s13603_s2 + $0x12d0] sm:$0xff]  ;;  %v11547_v44 = vcombine.low %v1233_v55, %v1237_v29 }
 0x3a3   : > { %v7280_v57 = vpop.f32.mrb[25].mxu1  ;;  %v14458_v58 = vadd.f32 %v7278_v46, %v7238_v20  ;;  %v7242_v56 = vpop.f32.mrb[27].mxu0  ;;  %7543 = vmatprep.subr.bf16.mxu0 %v11388_v38  ;;  %v1241_v38 = vld [vmem:[%s13603_s2 + $0x16d0] sm:$0xff] }
 0x3a4   : > { %v7282_v11 = vpop.f32.mrb[26].mxu1  ;;  %7583 = vmatpush1.bf16.msra.mxu1 %v11507_v36  ;;  %v14460_v62 = vadd.f32 %v7280_v57, %v7240_v53  ;;  %v1117_v36 = vld [vmem:[%s13603_s2 + $0x12f0] sm:$0xff] }
 0x3a5   : > { %v7283_v0 = vpop.f32.mrb[27].mxu1  ;;  %7584 = vmatprep.subr.bf16.mxu1 %v11516_v42  ;;  %v1245_v39 = vld [vmem:[%s13603_s2 + $0x16f0] sm:$0xff]  ;;  %v11419_v42 = vcombine.low %v1105_v26, %v1109_v27  ;;  %v11428_v45 = vcombine.high %v1113_v35, %v1117_v36  ;;  %v11427_v53 = vcombine.low %v1113_v35, %v1117_v36 }
 0x3a6   : > { %7544 = vmatpush1.bf16.msra.mxu0 %v11387_v8  ;;  %v11556_v20 = vcombine.high %v1241_v38, %v1245_v39  ;;  %v1121_v46 = vld [vmem:[%s13603_s2 + $0x1310] sm:$0xff]  ;;  %v11555_v57 = vcombine.low %v1241_v38, %v1245_v39  ;;  %v11564_v8 = vcombine.high %v1249_v49, %v1253_v51 }
 0x3a7   : > { %7545 = vmatprep.subr.bf16.mxu0 %v11396_v2  ;;  %v1125_v47 = vld [vmem:[%s13603_s2 + $0x1330] sm:$0xff] }
 0x3a8   : > { %7585 = vmatpush1.bf16.msra.mxu1 %v11515_v1  ;;  %v11436_v61 = vcombine.high %v1121_v46, %v1125_v47  ;;  %v1129_v11 = vld [vmem:[%s13603_s2 + $0x1350] sm:$0xff]  ;;  %v11435_v0 = vcombine.low %v1121_v46, %v1125_v47 }
 0x3a9   : > { %7586 = vmatprep.subr.bf16.mxu1 %v11524_v3  ;;  %v1133_v56 = vld [vmem:[%s13603_s2 + $0x1370] sm:$0xff]  ;;  %v11563_v3 = vcombine.low %v1249_v49, %v1253_v51 }
 0x3aa   : > { %7546 = vmatpush1.bf16.msra.mxu0 %v11395_v10  ;;  %v1257_v1 = vld [vmem:[%s13603_s2 + $0x1750] sm:$0xff]  ;;  %v11444_v4 = vcombine.high %v1129_v11, %v1133_v56 }
 0x3ab   : > { %7547 = vmatprep.subr.bf16.mxu0 %v11404_v13  ;;  %v1261_v2 = vld [vmem:[%s13603_s2 + $0x1770] sm:$0xff]  ;;  %v11443_v13 = vcombine.low %v1129_v11, %v1133_v56 }
 0x3ac   : > { %7587 = vmatpush1.bf16.msra.mxu1 %v11523_v12  ;;  %v11572_v6 = vcombine.high %v1257_v1, %v1261_v2  ;;  %v1137_v7 = vld [vmem:[%s13603_s2 + $0x1390] sm:$0xff] }
 0x3ad   : > { %7588 = vmatprep.subr.bf16.mxu1 %v11532_v40  ;;  %v1141_v63 = vld [vmem:[%s13603_s2 + $0x13b0] sm:$0xff]  ;;  %v11571_v40 = vcombine.low %v1257_v1, %v1261_v2 }
 0x3ae   : > { %7548 = vmatpush1.bf16.msra.mxu0 %v11403_v22  ;;  %v1265_v10 = vld [vmem:[%s13603_s2 + $0x1790] sm:$0xff]  ;;  %v11452_v14 = vcombine.high %v1137_v7, %v1141_v63 }
 0x3af   : > { %7549 = vmatprep.subr.bf16.mxu0 %v11412_v25  ;;  %v1269_v12 = vld [vmem:[%s13603_s2 + $0x17b0] sm:$0xff]  ;;  %v11451_v25 = vcombine.low %v1137_v7, %v1141_v63 }
 0x3b0   : > { %7589 = vmatpush1.bf16.msra.mxu1 %v11531_v24  ;;  %v11580_v15 = vcombine.high %v1265_v10, %v1269_v12  ;;  %v1145_v43 = vld [vmem:[%s13603_s2 + $0x13d0] sm:$0xff] }
 0x3b1   : > { %7590 = vmatprep.subr.bf16.mxu1 %v11540_v54  ;;  %v1149_v18 = vld [vmem:[%s13603_s2 + $0x13f0] sm:$0xff]  ;;  %v11579_v54 = vcombine.low %v1265_v10, %v1269_v12 }
 0x3b2   : > { %7550 = vmatpush1.bf16.msra.mxu0 %v11411_v31  ;;  %v1273_v22 = vld [vmem:[%s13603_s2 + $0x17d0] sm:$0xff]  ;;  %v11460_v26 = vcombine.high %v1145_v43, %v1149_v18 }
 0x3b3   : > { %7551 = vmatprep.subr.bf16.mxu0 %v11420_v33  ;;  %v1277_v24 = vld [vmem:[%s13603_s2 + $0x17f0] sm:$0xff]  ;;  %v11459_v33 = vcombine.low %v1145_v43, %v1149_v18 }
 0x3b4   : > { %7591 = vmatpush1.bf16.msra.mxu1 %v11539_v32  ;;  %v11588_v27 = vcombine.high %v1273_v22, %v1277_v24  ;;  %v1281_v55 = vld [vmem:[%s13603_s2 + $0x1810] sm:$0xff] }
 0x3b5   : > { %7592 = vmatprep.subr.bf16.mxu1 %v11548_v34  ;;  %v1285_v29 = vld [vmem:[%s13603_s2 + $0x1830] sm:$0xff]  ;;  %v11587_v34 = vcombine.low %v1273_v22, %v1277_v24 }
 0x3b6   : > { %7552 = vmatpush1.bf16.msra.mxu0 %v11419_v42  ;;  %v1409_v31 = vld [vmem:[%s13603_s2 + $0x1c10] sm:$0xff]  ;;  %v11596_v35 = vcombine.high %v1281_v55, %v1285_v29 }
 0x3b7   : > { %7553 = vmatprep.subr.bf16.mxu0 %v11428_v45  ;;  %v1413_v32 = vld [vmem:[%s13603_s2 + $0x1c30] sm:$0xff]  ;;  %v11595_v45 = vcombine.low %v1281_v55, %v1285_v29 }
 0x3b8   : > { %7593 = vmatpush1.bf16.msra.mxu1 %v11547_v44  ;;  %v11724_v36 = vcombine.high %v1409_v31, %v1413_v32  ;;  %v1289_v38 = vld [vmem:[%s13603_s2 + $0x1850] sm:$0xff] }
 0x3b9   : > { %7594 = vmatprep.subr.bf16.mxu1 %v11556_v20  ;;  %v1293_v39 = vld [vmem:[%s13603_s2 + $0x1870] sm:$0xff]  ;;  %v11723_v20 = vcombine.low %v1409_v31, %v1413_v32 }
 0x3ba   : > { %7554 = vmatpush1.bf16.msra.mxu0 %v11427_v53  ;;  %v1417_v42 = vld [vmem:[%s13603_s2 + $0x1c50] sm:$0xff]  ;;  %v11604_v46 = vcombine.high %v1289_v38, %v1293_v39 }
 0x3bb   : > { %7555 = vmatprep.subr.bf16.mxu0 %v11436_v61  ;;  %v1421_v44 = vld [vmem:[%s13603_s2 + $0x1c70] sm:$0xff]  ;;  %v11603_v61 = vcombine.low %v1289_v38, %v1293_v39 }
 0x3bc   : > { %7595 = vmatpush1.bf16.msra.mxu1 %v11555_v57  ;;  %v11732_v47 = vcombine.high %v1417_v42, %v1421_v44  ;;  %v1297_v49 = vld [vmem:[%s13603_s2 + $0x1890] sm:$0xff] }
 0x3bd   : > { %7596 = vmatprep.subr.bf16.mxu1 %v11564_v8  ;;  %v1301_v51 = vld [vmem:[%s13603_s2 + $0x18b0] sm:$0xff]  ;;  %v11731_v8 = vcombine.low %v1417_v42, %v1421_v44 }
 0x3be   : > { %7556 = vmatpush1.bf16.msra.mxu0 %v11435_v0  ;;  %v1425_v53 = vld [vmem:[%s13603_s2 + $0x1c90] sm:$0xff]  ;;  %v11612_v11 = vcombine.high %v1297_v49, %v1301_v51 }
 0x3bf   : > { %7557 = vmatprep.subr.bf16.mxu0 %v11444_v4  ;;  %v1429_v57 = vld [vmem:[%s13603_s2 + $0x1cb0] sm:$0xff]  ;;  %v11611_v4 = vcombine.low %v1297_v49, %v1301_v51 }
 0x3c0   : > { %7597 = vmatpush1.bf16.msra.mxu1 %v11563_v3  ;;  %v11740_v56 = vcombine.high %v1425_v53, %v1429_v57  ;;  %v1305_v1 = vld [vmem:[%s13603_s2 + $0x18d0] sm:$0xff] }
 0x3c1   : > { %7598 = vmatprep.subr.bf16.mxu1 %v11572_v6  ;;  %v1309_v2 = vld [vmem:[%s13603_s2 + $0x18f0] sm:$0xff]  ;;  %v11739_v6 = vcombine.low %v1425_v53, %v1429_v57 }
 0x3c2   : > { %7558 = vmatpush1.bf16.msra.mxu0 %v11443_v13  ;;  %v1433_v0 = vld [vmem:[%s13603_s2 + $0x1cd0] sm:$0xff]  ;;  %v11620_v7 = vcombine.high %v1305_v1, %v1309_v2 }
 0x3c3   : > { %7559 = vmatprep.subr.bf16.mxu0 %v11452_v14  ;;  %v1437_v3 = vld [vmem:[%s13603_s2 + $0x1cf0] sm:$0xff]  ;;  %v11619_v14 = vcombine.low %v1305_v1, %v1309_v2  ;;  %v498_v1 = vld [vmem:[#allocation2 + $0x18] sm:$0xff] }
 0x3c4   : > { %7599 = vmatpush1.bf16.msra.mxu1 %v11571_v40  ;;  %v11748_v63 = vcombine.high %v1433_v0, %v1437_v3  ;;  %v1313_v10 = vld [vmem:[%s13603_s2 + $0x1910] sm:$0xff] }
 0x3c5   : > { %7600 = vmatprep.subr.bf16.mxu1 %v11580_v15  ;;  %v1317_v12 = vld [vmem:[%s13603_s2 + $0x1930] sm:$0xff]  ;;  %v11747_v15 = vcombine.low %v1433_v0, %v1437_v3 }
 0x3c6   : > { %7560 = vmatpush1.bf16.msra.mxu0 %v11451_v25  ;;  %v1441_v13 = vld [vmem:[%s13603_s2 + $0x1d10] sm:$0xff]  ;;  %v11628_v43 = vcombine.high %v1313_v10, %v1317_v12 }
 0x3c7   : > { %7561 = vmatprep.subr.bf16.mxu0 %v11460_v26  ;;  %v1445_v40 = vld [vmem:[%s13603_s2 + $0x1d30] sm:$0xff]  ;;  %v11627_v26 = vcombine.low %v1313_v10, %v1317_v12 }
 0x3c8   : > { %7601 = vmatpush1.bf16.msra.mxu1 %v11579_v54  ;;  %v11756_v18 = vcombine.high %v1441_v13, %v1445_v40  ;;  %v1321_v22 = vld [vmem:[%s13603_s2 + $0x1950] sm:$0xff] }
 0x3c9   : > { %7602 = vmatprep.subr.bf16.mxu1 %v11588_v27  ;;  %v1325_v24 = vld [vmem:[%s13603_s2 + $0x1970] sm:$0xff]  ;;  %v11755_v27 = vcombine.low %v1441_v13, %v1445_v40 }
 0x3ca   : > { %7562 = vmatpush1.bf16.msra.mxu0 %v11459_v33  ;;  %v1449_v25 = vld [vmem:[%s13603_s2 + $0x1d50] sm:$0xff]  ;;  %v11636_v55 = vcombine.high %v1321_v22, %v1325_v24 }
 0x3cb   : > { %7613 = vmatprep.subr.bf16.mxu0 %v11596_v35  ;;  %v1453_v54 = vld [vmem:[%s13603_s2 + $0x1d70] sm:$0xff]  ;;  %v11635_v35 = vcombine.low %v1321_v22, %v1325_v24 }
 0x3cc   : > { %7603 = vmatpush1.bf16.msra.mxu1 %v11587_v34  ;;  %v11764_v29 = vcombine.high %v1449_v25, %v1453_v54  ;;  %v1329_v31 = vld [vmem:[%s13603_s2 + $0x1990] sm:$0xff] }
 0x3cd   : > { %7654 = vmatprep.subr.bf16.mxu1 %v11724_v36  ;;  %7564 = vmatmul.mubr.bf16.vlgmr.msra.gmra.mrb[40].mxu0 %v13894_v5  ;;  %v1333_v32 = vld [vmem:[%s13603_s2 + $0x19b0] sm:$0xff]  ;;  %v11763_v36 = vcombine.low %v1449_v25, %v1453_v54 }
 0x3ce   : > { %7614 = vmatpush1.bf16.msra.mxu0 %v11595_v45  ;;  %7645 = vmatprep.mubr.bf16.mxu0 %v13912_v16  ;;  %v1457_v33 = vld [vmem:[%s13603_s2 + $0x1d90] sm:$0xff]  ;;  %v11644_v38 = vcombine.high %v1329_v31, %v1333_v32 }
 0x3cf   : > { %7605 = vmatmul.mubr.bf16.vlgmr.msra.gmra.mrb[40].mxu1 %v13903_v9  ;;  %7615 = vmatprep.subr.bf16.mxu0 %v11604_v46  ;;  %v1461_v34 = vld [vmem:[%s13603_s2 + $0x1db0] sm:$0xff] }
 0x3d0   : > { %7655 = vmatpush1.bf16.msra.mxu1 %v11723_v20  ;;  %7686 = vmatprep.mubr.bf16.mxu1 %v13919_v19  ;;  %v11772_v42 = vcombine.high %v1457_v33, %v1461_v34  ;;  %v1337_v44 = vld [vmem:[%s13603_s2 + $0x19d0] sm:$0xff]  ;;  %v11771_v0 = vcombine.low %v1457_v33, %v1461_v34 }
 0x3d1   : > { %7656 = vmatprep.subr.bf16.mxu1 %v11732_v47  ;;  %v1341_v45 = vld [vmem:[%s13603_s2 + $0x19f0] sm:$0xff] }
 0x3d2   : > { %7616 = vmatpush1.bf16.msra.mxu0 %v11603_v61  ;;  %v1465_v49 = vld [vmem:[%s13603_s2 + $0x1dd0] sm:$0xff]  ;;  %v11652_v3 = vcombine.high %v1337_v44, %v1341_v45 }
 0x3d3   : > { %7617 = vmatprep.subr.bf16.mxu0 %v11612_v11  ;;  %v1469_v51 = vld [vmem:[%s13603_s2 + $0x1df0] sm:$0xff]  ;;  %v11643_v11 = vcombine.low %v1329_v31, %v1333_v32 }
 0x3d4   : > { %7657 = vmatpush1.bf16.msra.mxu1 %v11731_v8  ;;  %v497_v53 = vld [vmem:[#allocation2 + $0x10] sm:$0xff] }
 0x3d5   : > { %7658 = vmatprep.subr.bf16.mxu1 %v11740_v56  ;;  %v1473_v12 = vld [vmem:[%s13603_s2 + $0x1e10] sm:$0xff] }
 0x3d6   : > { %7618 = vmatpush1.bf16.msra.mxu0 %v11611_v4  ;;  %v1477_v13 = vld [vmem:[%s13603_s2 + $0x1e30] sm:$0xff] }
 0x3d7   : > { %7619 = vmatprep.subr.bf16.mxu0 %v11620_v7  ;;  %v1345_v7 = vld [vmem:[%s13603_s2 + $0x1a10] sm:$0xff] }
 0x3d8   : > { %7659 = vmatpush1.bf16.msra.mxu1 %v11739_v6  ;;  %v1353_v22 = vld [vmem:[%s13603_s2 + $0x1a50] sm:$0xff] }
 0x3d9   : > { %7660 = vmatprep.subr.bf16.mxu1 %v11748_v63  ;;  %v1349_v63 = vld [vmem:[%s13603_s2 + $0x1a30] sm:$0xff] }
 0x3da   : > { %7620 = vmatpush1.bf16.msra.mxu0 %v11619_v14  ;;  %v11651_v14 = vcombine.low %v1337_v44, %v1341_v45  ;;  %v1357_v24 = vld [vmem:[%s13603_s2 + $0x1a70] sm:$0xff] }
 0x3db   : > { %7621 = vmatprep.subr.bf16.mxu0 %v11628_v43  ;;  %v11660_v43 = vcombine.high %v1345_v7, %v1349_v63  ;;  %v1481_v25 = vld [vmem:[%s13603_s2 + $0x1e50] sm:$0xff] }
 0x3dc   : > { %7661 = vmatpush1.bf16.msra.mxu1 %v11747_v15  ;;  %v11779_v15 = vcombine.low %v1465_v49, %v1469_v51  ;;  %v1485_v54 = vld [vmem:[%s13603_s2 + $0x1e70] sm:$0xff] }
 0x3dd   : > { %7662 = vmatprep.subr.bf16.mxu1 %v11756_v18  ;;  %v11788_v18 = vcombine.high %v1473_v12, %v1477_v13  ;;  %v1361_v31 = vld [vmem:[%s13603_s2 + $0x1a90] sm:$0xff] }
 0x3de   : > { %7622 = vmatpush1.bf16.msra.mxu0 %v11627_v26  ;;  %v11659_v26 = vcombine.low %v1345_v7, %v1349_v63  ;;  %v1365_v32 = vld [vmem:[%s13603_s2 + $0x1ab0] sm:$0xff] }
 0x3df   : > { %7623 = vmatprep.subr.bf16.mxu0 %v11636_v55  ;;  %v11668_v55 = vcombine.high %v1353_v22, %v1357_v24  ;;  %v1489_v33 = vld [vmem:[%s13603_s2 + $0x1e90] sm:$0xff] }
 0x3e0   : > { %7663 = vmatpush1.bf16.msra.mxu1 %v11755_v27  ;;  %v7319_v39 = vpop.f32.mrb[28].mxu0  ;;  %v11787_v27 = vcombine.low %v1473_v12, %v1477_v13  ;;  %v1493_v34 = vld [vmem:[%s13603_s2 + $0x1eb0] sm:$0xff] }
 0x3e1   : > { %7664 = vmatprep.subr.bf16.mxu1 %v11764_v29  ;;  %v7320_v20 = vadd.f32 %v7319_v39, %v14458_v58  ;;  %v7321_v47 = vpop.f32.mrb[29].mxu0  ;;  %v11796_v29 = vcombine.high %v1481_v25, %v1485_v54  ;;  %v11804_v39 = vcombine.high %v1489_v33, %v1493_v34  ;;  %v1373_v44 = vld [vmem:[%s13603_s2 + $0x1af0] sm:$0xff] }
 0x3e2   : > { %v7360_v46 = vpop.f32.mrb[28].mxu1  ;;  %v7322_v57 = vadd.f32 %v7321_v47, %v14460_v62  ;;  %v7323_v8 = vpop.f32.mrb[30].mxu0  ;;  %7624 = vmatpush1.bf16.msra.mxu0 %v11635_v35  ;;  %v11780_v62 = vcombine.high %v1465_v49, %v1469_v51  ;;  %v11667_v35 = vcombine.low %v1353_v22, %v1357_v24  ;;  %v1497_v45 = vld [vmem:[%s13603_s2 + $0x1ed0] sm:$0xff]  ;;  %v11803_v47 = vcombine.low %v1489_v33, %v1493_v34  ;;  %v642_v33 = vld [vmem:[%s13603_s2 + $0x418] sm:$0xff] }
 0x3e3   : > { %v7362_v61 = vpop.f32.mrb[29].mxu1  ;;  %v7361_v56 = vadd.f32 %v7360_v46, %v7320_v20  ;;  %v7324_v58 = vpop.f32.mrb[31].mxu0  ;;  %7625 = vmatprep.subr.bf16.mxu0 %v11644_v38  ;;  %v11676_v38 = vcombine.high %v1361_v31, %v1365_v32  ;;  %v1501_v20 = vld [vmem:[%s13603_s2 + $0x1ef0] sm:$0xff]  ;;  %v11675_v46 = vcombine.low %v1361_v31, %v1365_v32  ;;  %v514_v31 = vld [vmem:[%s13603_s2 + $0x18] sm:$0xff] }
 0x3e4   : > { %v7364_v2 = vpop.f32.mrb[30].mxu1  ;;  %7665 = vmatpush1.bf16.msra.mxu1 %v11763_v36  ;;  %v7363_v4 = vadd.f32 %v7362_v61, %v7322_v57  ;;  %v11795_v36 = vcombine.low %v1481_v25, %v1485_v54  ;;  %v11812_v51 = vcombine.high %v1497_v45, %v1501_v20  ;;  %v1381_v57 = vld [vmem:[%s13603_s2 + $0x1b30] sm:$0xff]  ;;  %v518_v32 = vld [vmem:[%s13603_s2 + $0x38] sm:$0xff] }
 0x3e5   : > { %v7365_v6 = vpop.f32.mrb[31].mxu1  ;;  %7666 = vmatprep.subr.bf16.mxu1 %v11772_v42  ;;  %v8025_v10 = vadd.f32 %v7361_v56, %v497_v53  ;;  %v1369_v42 = vld [vmem:[%s13603_s2 + $0x1ad0] sm:$0xff]  ;;  %v11811_v56 = vcombine.low %v1497_v45, %v1501_v20  ;;  %v646_v34 = vld [vmem:[%s13603_s2 + $0x438] sm:$0xff] }
 0x3e6   : > { %v8026_v40 = vadd.f32 %v7363_v4, %v498_v1  ;;  %7626 = vmatpush1.bf16.msra.mxu0 %v11643_v11  ;;  %v11684_v49 = vcombine.high %v1369_v42, %v1373_v44  ;;  %v1377_v53 = vld [vmem:[%s13603_s2 + $0x1b10] sm:$0xff]  ;;  %v11683_v11 = vcombine.low %v1369_v42, %v1373_v44  ;;  %v522_v42 = vld [vmem:[%s13603_s2 + $0x58] sm:$0xff] }
 0x3e7   : > { %8033 = vst [vmem:[#allocation2 + $0x10] sm:$0xff] %v8025_v10  ;;  %7627 = vmatprep.subr.bf16.mxu0 %v11652_v3  ;;  %v1505_v61 = vld [vmem:[%s13603_s2 + $0x1f10] sm:$0xff]  ;;  %v11692_v1 = vcombine.high %v1377_v53, %v1381_v57  ;;  %v11691_v6 = vcombine.low %v1377_v53, %v1381_v57  ;;  %v526_v44 = vld [vmem:[%s13603_s2 + $0x78] sm:$0xff] }
 0x3e8   : > { %7667 = vmatpush1.bf16.msra.mxu1 %v11771_v0  ;;  %8034 = vst [vmem:[#allocation2 + $0x18] sm:$0xff] %v8026_v40  ;;  %v1509_v8 = vld [vmem:[%s13603_s2 + $0x1f30] sm:$0xff]  ;;  %v650_v45 = vld [vmem:[%s13603_s2 + $0x458] sm:$0xff] }
 0x3e9   : > { %7668 = vmatprep.subr.bf16.mxu1 %v11780_v62  ;;  %v11820_v2 = vcombine.high %v1505_v61, %v1509_v8  ;;  %v1385_v58 = vld [vmem:[%s13603_s2 + $0x1b50] sm:$0xff]  ;;  %v11819_v62 = vcombine.low %v1505_v61, %v1509_v8  ;;  %v654_v20 = vld [vmem:[%s13603_s2 + $0x478] sm:$0xff] }
 0x3ea   : > { %7628 = vmatpush1.bf16.msra.mxu0 %v11651_v14  ;;  %v1389_v0 = vld [vmem:[%s13603_s2 + $0x1b70] sm:$0xff]  ;;  %v530_v53 = vld [vmem:[%s13603_s2 + $0x98] sm:$0xff] }
 0x3eb   : > { %7629 = vmatprep.subr.bf16.mxu0 %v11660_v43  ;;  %v1513_v3 = vld [vmem:[%s13603_s2 + $0x1f50] sm:$0xff]  ;;  %v11700_v7 = vcombine.high %v1385_v58, %v1389_v0  ;;  %v11699_v14 = vcombine.low %v1385_v58, %v1389_v0  ;;  %v534_v57 = vld [vmem:[%s13603_s2 + $0xb8] sm:$0xff] }
 0x3ec   : > { %7669 = vmatpush1.bf16.msra.mxu1 %v11779_v15  ;;  %v1517_v4 = vld [vmem:[%s13603_s2 + $0x1f70] sm:$0xff]  ;;  %v658_v61 = vld [vmem:[%s13603_s2 + $0x498] sm:$0xff] }
 0x3ed   : > { %7670 = vmatprep.subr.bf16.mxu1 %v11788_v18  ;;  %v11828_v63 = vcombine.high %v1513_v3, %v1517_v4  ;;  %v1393_v10 = vld [vmem:[%s13603_s2 + $0x1b90] sm:$0xff]  ;;  %v11827_v15 = vcombine.low %v1513_v3, %v1517_v4  ;;  %v662_v8 = vld [vmem:[%s13603_s2 + $0x4b8] sm:$0xff] }
 0x3ee   : > { %7630 = vmatpush1.bf16.msra.mxu0 %v11659_v26  ;;  %v1397_v12 = vld [vmem:[%s13603_s2 + $0x1bb0] sm:$0xff]  ;;  %v538_v58 = vld [vmem:[%s13603_s2 + $0xd8] sm:$0xff] }
 0x3ef   : > { %7631 = vmatprep.subr.bf16.mxu0 %v11668_v55  ;;  %v1521_v13 = vld [vmem:[%s13603_s2 + $0x1f90] sm:$0xff]  ;;  %v11708_v43 = vcombine.high %v1393_v10, %v1397_v12  ;;  %v11707_v26 = vcombine.low %v1393_v10, %v1397_v12  ;;  %v542_v0 = vld [vmem:[%s13603_s2 + $0xf8] sm:$0xff] }
 0x3f0   : > { %7671 = vmatpush1.bf16.msra.mxu1 %v11787_v27  ;;  %v1525_v40 = vld [vmem:[%s13603_s2 + $0x1fb0] sm:$0xff]  ;;  %v666_v3 = vld [vmem:[%s13603_s2 + $0x4d8] sm:$0xff] }
 0x3f1   : > { %7672 = vmatprep.subr.bf16.mxu1 %v11796_v29  ;;  %v11836_v18 = vcombine.high %v1521_v13, %v1525_v40  ;;  %v1401_v22 = vld [vmem:[%s13603_s2 + $0x1bd0] sm:$0xff]  ;;  %v11835_v27 = vcombine.low %v1521_v13, %v1525_v40  ;;  %v670_v4 = vld [vmem:[%s13603_s2 + $0x4f8] sm:$0xff]  ;;  %v10853_v40 = vcombine.low %v538_v58, %v542_v0 }
 0x3f2   : > { %7632 = vmatpush1.bf16.msra.mxu0 %v11667_v35  ;;  %v1405_v24 = vld [vmem:[%s13603_s2 + $0x1bf0] sm:$0xff]  ;;  %v546_v10 = vld [vmem:[%s13603_s2 + $0x118] sm:$0xff] }
 0x3f3   : > { %7633 = vmatprep.subr.bf16.mxu0 %v11676_v38  ;;  %v1529_v25 = vld [vmem:[%s13603_s2 + $0x1fd0] sm:$0xff]  ;;  %v11716_v55 = vcombine.high %v1401_v22, %v1405_v24  ;;  %v11715_v35 = vcombine.low %v1401_v22, %v1405_v24  ;;  %v10830_v38 = vcombine.high %v514_v31, %v518_v32  ;;  %v550_v12 = vld [vmem:[%s13603_s2 + $0x138] sm:$0xff] }
 0x3f4   : > { %7673 = vmatpush1.bf16.msra.mxu1 %v11795_v36  ;;  %v1533_v54 = vld [vmem:[%s13603_s2 + $0x1ff0] sm:$0xff]  ;;  %v674_v13 = vld [vmem:[%s13603_s2 + $0x518] sm:$0xff] }
 0x3f5   : > { %7674 = vmatprep.subr.bf16.mxu1 %v11804_v39  ;;  %v11844_v29 = vcombine.high %v1529_v25, %v1533_v54  ;;  %v11843_v36 = vcombine.low %v1529_v25, %v1533_v54  ;;  %v10958_v39 = vcombine.high %v642_v33, %v646_v34  ;;  %v682_v22 = vld [vmem:[%s13603_s2 + $0x558] sm:$0xff]  ;;  %v10861_v25 = vcombine.low %v546_v10, %v550_v12 }
 0x3f6   : > { %7634 = vmatpush1.bf16.msra.mxu0 %v11675_v46  ;;  %v10829_v46 = vcombine.low %v514_v31, %v518_v32  ;;  %v686_v24 = vld [vmem:[%s13603_s2 + $0x578] sm:$0xff] }
 0x3f7   : > { %7635 = vmatprep.subr.bf16.mxu0 %v11684_v49  ;;  %v10838_v49 = vcombine.high %v522_v42, %v526_v44  ;;  %v690_v31 = vld [vmem:[%s13603_s2 + $0x598] sm:$0xff] }
 0x3f8   : > { %7675 = vmatpush1.bf16.msra.mxu1 %v11803_v47  ;;  %v10957_v47 = vcombine.low %v642_v33, %v646_v34  ;;  %v694_v32 = vld [vmem:[%s13603_s2 + $0x5b8] sm:$0xff]  ;;  %v10997_v34 = vcombine.low %v682_v22, %v686_v24 }
 0x3f9   : > { %7676 = vmatprep.subr.bf16.mxu1 %v11812_v51  ;;  %v10966_v51 = vcombine.high %v650_v45, %v654_v20 }
 0x3fa   : > { %7636 = vmatpush1.bf16.msra.mxu0 %v11683_v11  ;;  %v10837_v11 = vcombine.low %v522_v42, %v526_v44  ;;  %v574_v42 = vld [vmem:[%s13603_s2 + $0x1f8] sm:$0xff] }
 0x3fb   : > { %7637 = vmatprep.subr.bf16.mxu0 %v11692_v1  ;;  %v10846_v1 = vcombine.high %v530_v53, %v534_v57 }
 0x3fc   : > { %7677 = vmatpush1.bf16.msra.mxu1 %v11811_v56  ;;  %v10965_v56 = vcombine.low %v650_v45, %v654_v20  ;;  %v698_v20 = vld [vmem:[%s13603_s2 + $0x5d8] sm:$0xff] }
 0x3fd   : > { %7678 = vmatprep.subr.bf16.mxu1 %v11820_v2  ;;  %v10974_v2 = vcombine.high %v658_v61, %v662_v8 }
 0x3fe   : > { %7638 = vmatpush1.bf16.msra.mxu0 %v11691_v6  ;;  %v10845_v6 = vcombine.low %v530_v53, %v534_v57 }
 0x3ff   : > { %7639 = vmatprep.subr.bf16.mxu0 %v11700_v7  ;;  %v10854_v7 = vcombine.high %v538_v58, %v542_v0  ;;  %v578_v58 = vld [vmem:[%s13603_s2 + $0x218] sm:$0xff] }
 0x400   : > { %7679 = vmatpush1.bf16.msra.mxu1 %v11819_v62  ;;  %v10973_v62 = vcombine.low %v658_v61, %v662_v8  ;;  %v582_v0 = vld [vmem:[%s13603_s2 + $0x238] sm:$0xff] }
 0x401   : > { %7680 = vmatprep.subr.bf16.mxu1 %v11828_v63  ;;  %v10982_v63 = vcombine.high %v666_v3, %v670_v4 }
 0x402   : > { %7640 = vmatpush1.bf16.msra.mxu0 %v11699_v14  ;;  %v10862_v14 = vcombine.high %v546_v10, %v550_v12  ;;  %v586_v10 = vld [vmem:[%s13603_s2 + $0x258] sm:$0xff] }
 0x403   : > { %7641 = vmatprep.subr.bf16.mxu0 %v11708_v43  ;;  %v554_v43 = vld [vmem:[%s13603_s2 + $0x158] sm:$0xff] }
 0x404   : > { %7681 = vmatpush1.bf16.msra.mxu1 %v11827_v15  ;;  %v590_v12 = vld [vmem:[%s13603_s2 + $0x278] sm:$0xff] }
 0x405   : > { %7682 = vmatprep.subr.bf16.mxu1 %v11836_v18  ;;  %v558_v18 = vld [vmem:[%s13603_s2 + $0x178] sm:$0xff] }
 0x406   : > { %7642 = vmatpush1.bf16.msra.mxu0 %v11707_v26  ;;  %v10870_v26 = vcombine.high %v554_v43, %v558_v18  ;;  %v10869_v33 = vcombine.low %v554_v43, %v558_v18  ;;  %v594_v43 = vld [vmem:[%s13603_s2 + $0x298] sm:$0xff] }
 0x407   : > { %7643 = vmatprep.subr.bf16.mxu0 %v11716_v55  ;;  %v562_v55 = vld [vmem:[%s13603_s2 + $0x198] sm:$0xff] }
 0x408   : > { %7683 = vmatpush1.bf16.msra.mxu1 %v11835_v27  ;;  %v10998_v27 = vcombine.high %v682_v22, %v686_v24  ;;  %v598_v18 = vld [vmem:[%s13603_s2 + $0x2b8] sm:$0xff] }
 0x409   : > { %7684 = vmatprep.subr.bf16.mxu1 %v11844_v29  ;;  %v566_v29 = vld [vmem:[%s13603_s2 + $0x1b8] sm:$0xff] }
 0x40a   : > { %7644 = vmatpush1.bf16.msra.mxu0 %v11715_v35  ;;  %v10878_v35 = vcombine.high %v562_v55, %v566_v29  ;;  %v10877_v53 = vcombine.low %v562_v55, %v566_v29  ;;  %v722_v22 = vld [vmem:[%s13603_s2 + $0x698] sm:$0xff] }
 0x40b   : > { %7695 = vmatprep.subr.bf16.mxu0 %v10830_v38  ;;  %v11006_v38 = vcombine.high %v690_v31, %v694_v32  ;;  %v726_v24 = vld [vmem:[%s13603_s2 + $0x6b8] sm:$0xff] }
 0x40c   : > { %7685 = vmatpush1.bf16.msra.mxu1 %v11843_v36  ;;  %v602_v55 = vld [vmem:[%s13603_s2 + $0x2d8] sm:$0xff] }
 0x40d   : > { %7736 = vmatprep.subr.bf16.mxu1 %v10958_v39  ;;  %7646 = vmatmul.mubr.bf16.vlgmr.msra.gmra.mrb[44].mxu0 %v13984_v23  ;;  %v570_v39 = vld [vmem:[%s13603_s2 + $0x1d8] sm:$0xff] }
 0x40e   : > { %7696 = vmatpush1.bf16.msra.mxu0 %v10829_v46  ;;  %7727 = vmatprep.mubr.bf16.mxu0 %v13664_v59  ;;  %v678_v59 = vld [vmem:[%s13603_s2 + $0x538] sm:$0xff] }
 0x40f   : > { %7687 = vmatmul.mubr.bf16.vlgmr.msra.gmra.mrb[44].mxu1 %v13990_v52  ;;  %7697 = vmatprep.subr.bf16.mxu0 %v10838_v49  ;;  %v10990_v15 = vcombine.high %v674_v13, %v678_v59  ;;  %v10989_v54 = vcombine.low %v674_v13, %v678_v59  ;;  %v702_v46 = vld [vmem:[%s13603_s2 + $0x5f8] sm:$0xff] }
 0x410   : > { %7737 = vmatpush1.bf16.msra.mxu1 %v10957_v47  ;;  %7768 = vmatprep.mubr.bf16.mxu1 %v13668_v60  ;;  %v10981_v60 = vcombine.low %v666_v3, %v670_v4  ;;  %v706_v3 = vld [vmem:[%s13603_s2 + $0x618] sm:$0xff] }
 0x411   : > { %7738 = vmatprep.subr.bf16.mxu1 %v10966_v51  ;;  %v710_v4 = vld [vmem:[%s13603_s2 + $0x638] sm:$0xff] }
 0x412   : > { %7698 = vmatpush1.bf16.msra.mxu0 %v10837_v11  ;;  %v11005_v11 = vcombine.low %v690_v31, %v694_v32  ;;  %v714_v13 = vld [vmem:[%s13603_s2 + $0x658] sm:$0xff] }
 0x413   : > { %7699 = vmatprep.subr.bf16.mxu0 %v10846_v1  ;;  %v718_v59 = vld [vmem:[%s13603_s2 + $0x678] sm:$0xff] }
 0x414   : > { %7739 = vmatpush1.bf16.msra.mxu1 %v10965_v56  ;;  %v10886_v56 = vcombine.high %v570_v39, %v574_v42  ;;  %v606_v29 = vld [vmem:[%s13603_s2 + $0x2f8] sm:$0xff] }
 0x415   : > { %7740 = vmatprep.subr.bf16.mxu1 %v10974_v2  ;;  %v11014_v2 = vcombine.high %v698_v20, %v702_v46  ;;  %v730_v31 = vld [vmem:[%s13603_s2 + $0x6d8] sm:$0xff] }
 0x416   : > { %7700 = vmatpush1.bf16.msra.mxu0 %v10845_v6  ;;  %v10885_v6 = vcombine.low %v570_v39, %v574_v42  ;;  %v734_v32 = vld [vmem:[%s13603_s2 + $0x6f8] sm:$0xff] }
 0x417   : > { %7701 = vmatprep.subr.bf16.mxu0 %v10854_v7  ;;  %v10894_v7 = vcombine.high %v578_v58, %v582_v0  ;;  %v614_v39 = vld [vmem:[%s13603_s2 + $0x338] sm:$0xff] }
 0x418   : > { %7741 = vmatpush1.bf16.msra.mxu1 %v10973_v62  ;;  %v11013_v62 = vcombine.low %v698_v20, %v702_v46  ;;  %v738_v42 = vld [vmem:[%s13603_s2 + $0x718] sm:$0xff]  ;;  %v11045_v20 = vcombine.low %v730_v31, %v734_v32 }
 0x419   : > { %7742 = vmatprep.subr.bf16.mxu1 %v10982_v63  ;;  %v11022_v63 = vcombine.high %v706_v3, %v710_v4 }
 0x41a   : > { %7702 = vmatpush1.bf16.msra.mxu0 %v10853_v40  ;;  %v10893_v40 = vcombine.low %v578_v58, %v582_v0  ;;  %v626_v58 = vld [vmem:[%s13603_s2 + $0x398] sm:$0xff] }
 0x41b   : > { %7703 = vmatprep.subr.bf16.mxu0 %v10862_v14  ;;  %v10902_v14 = vcombine.high %v586_v10, %v590_v12  ;;  %v630_v0 = vld [vmem:[%s13603_s2 + $0x3b8] sm:$0xff] }
 0x41c   : > { %7743 = vmatpush1.bf16.msra.mxu1 %v10981_v60  ;;  %v11021_v60 = vcombine.low %v706_v3, %v710_v4  ;;  %v754_v3 = vld [vmem:[%s13603_s2 + $0x798] sm:$0xff] }
 0x41d   : > { %7744 = vmatprep.subr.bf16.mxu1 %v10990_v15  ;;  %v11030_v15 = vcombine.high %v714_v13, %v718_v59  ;;  %v758_v4 = vld [vmem:[%s13603_s2 + $0x7b8] sm:$0xff] }
 0x41e   : > { %7704 = vmatpush1.bf16.msra.mxu0 %v10861_v25  ;;  %v10901_v25 = vcombine.low %v586_v10, %v590_v12  ;;  %v634_v10 = vld [vmem:[%s13603_s2 + $0x3d8] sm:$0xff] }
 0x41f   : > { %7705 = vmatprep.subr.bf16.mxu0 %v10870_v26  ;;  %v10910_v26 = vcombine.high %v594_v43, %v598_v18  ;;  %v638_v12 = vld [vmem:[%s13603_s2 + $0x3f8] sm:$0xff] }
 0x420   : > { %7745 = vmatpush1.bf16.msra.mxu1 %v10989_v54  ;;  %v7401_v36 = vpop.f32.mrb[32].mxu0  ;;  %v11029_v54 = vcombine.low %v714_v13, %v718_v59  ;;  %v762_v13 = vld [vmem:[%s13603_s2 + $0x7d8] sm:$0xff] }
 0x421   : > { %7746 = vmatprep.subr.bf16.mxu1 %v10998_v27  ;;  %v7403_v45 = vpop.f32.mrb[33].mxu0  ;;  %v11038_v27 = vcombine.high %v722_v22, %v726_v24  ;;  %v766_v59 = vld [vmem:[%s13603_s2 + $0x7f8] sm:$0xff] }
 0x422   : > { %v7442_v44 = vpop.f32.mrb[32].mxu1  ;;  %v7405_v51 = vpop.f32.mrb[34].mxu0  ;;  %7706 = vmatpush1.bf16.msra.mxu0 %v10869_v33  ;;  %v10909_v33 = vcombine.low %v594_v43, %v598_v18  ;;  %v770_v43 = vld [vmem:[%s13603_s2 + $0x818] sm:$0xff] }
 0x423   : > { %v14600_v47 = vadd.f32 %v7442_v44, %v7401_v36  ;;  %v7444_v49 = vpop.f32.mrb[33].mxu1  ;;  %v7406_v8 = vpop.f32.mrb[35].mxu0  ;;  %7707 = vmatprep.subr.bf16.mxu0 %v10878_v35  ;;  %v10918_v35 = vcombine.high %v602_v55, %v606_v29  ;;  %v11046_v36 = vcombine.high %v730_v31, %v734_v32  ;;  %v742_v44 = vld [vmem:[%s13603_s2 + $0x738] sm:$0xff] }
 0x424   : > { %v14602_v57 = vadd.f32 %v7444_v49, %v7403_v45  ;;  %v7446_v61 = vpop.f32.mrb[34].mxu1  ;;  %7747 = vmatpush1.bf16.msra.mxu1 %v10997_v34  ;;  %v11037_v34 = vcombine.low %v722_v22, %v726_v24  ;;  %v10917_v45 = vcombine.low %v602_v55, %v606_v29  ;;  %v11054_v49 = vcombine.high %v738_v42, %v742_v44  ;;  %v618_v51 = vld [vmem:[%s13603_s2 + $0x358] sm:$0xff] }
 0x425   : > { %v7447_v1 = vpop.f32.mrb[35].mxu1  ;;  %7748 = vmatprep.subr.bf16.mxu1 %v11006_v38  ;;  %v610_v38 = vld [vmem:[%s13603_s2 + $0x318] sm:$0xff] }
 0x426   : > { %7708 = vmatpush1.bf16.msra.mxu0 %v10877_v53  ;;  %v10926_v46 = vcombine.high %v610_v38, %v614_v39  ;;  %v622_v53 = vld [vmem:[%s13603_s2 + $0x378] sm:$0xff] }
 0x427   : > { %7709 = vmatprep.subr.bf16.mxu0 %v10886_v56  ;;  %v746_v61 = vld [vmem:[%s13603_s2 + $0x758] sm:$0xff]  ;;  %v11053_v56 = vcombine.low %v738_v42, %v742_v44  ;;  %v10934_v1 = vcombine.high %v618_v51, %v622_v53 }
 0x428   : > { %7749 = vmatpush1.bf16.msra.mxu1 %v11005_v11  ;;  %v750_v8 = vld [vmem:[%s13603_s2 + $0x778] sm:$0xff]  ;;  %v10925_v11 = vcombine.low %v610_v38, %v614_v39 }
 0x429   : > { %7750 = vmatprep.subr.bf16.mxu1 %v11014_v2  ;;  %v11062_v2 = vcombine.high %v746_v61, %v750_v8  ;;  %v774_v18 = vld [vmem:[%s13603_s2 + $0x838] sm:$0xff] }
 0x42a   : > { %7710 = vmatpush1.bf16.msra.mxu0 %v10885_v6  ;;  %v10933_v6 = vcombine.low %v618_v51, %v622_v53  ;;  %v898_v22 = vld [vmem:[%s13603_s2 + $0xc18] sm:$0xff] }
 0x42b   : > { %7711 = vmatprep.subr.bf16.mxu0 %v10894_v7  ;;  %v10942_v7 = vcombine.high %v626_v58, %v630_v0  ;;  %v902_v24 = vld [vmem:[%s13603_s2 + $0xc38] sm:$0xff] }
 0x42c   : > { %7751 = vmatpush1.bf16.msra.mxu1 %v11013_v62  ;;  %v11061_v62 = vcombine.low %v746_v61, %v750_v8  ;;  %v778_v55 = vld [vmem:[%s13603_s2 + $0x858] sm:$0xff] }
 0x42d   : > { %7752 = vmatprep.subr.bf16.mxu1 %v11022_v63  ;;  %v11070_v63 = vcombine.high %v754_v3, %v758_v4  ;;  %v782_v29 = vld [vmem:[%s13603_s2 + $0x878] sm:$0xff] }
 0x42e   : > { %7712 = vmatpush1.bf16.msra.mxu0 %v10893_v40  ;;  %v10941_v40 = vcombine.low %v626_v58, %v630_v0  ;;  %v906_v31 = vld [vmem:[%s13603_s2 + $0xc58] sm:$0xff] }
 0x42f   : > { %7713 = vmatprep.subr.bf16.mxu0 %v10902_v14  ;;  %v10950_v14 = vcombine.high %v634_v10, %v638_v12  ;;  %v910_v32 = vld [vmem:[%s13603_s2 + $0xc78] sm:$0xff] }
 0x430   : > { %7753 = vmatpush1.bf16.msra.mxu1 %v11021_v60  ;;  %v11069_v60 = vcombine.low %v754_v3, %v758_v4  ;;  %v786_v38 = vld [vmem:[%s13603_s2 + $0x898] sm:$0xff] }
 0x431   : > { %7754 = vmatprep.subr.bf16.mxu1 %v11030_v15  ;;  %v11078_v15 = vcombine.high %v762_v13, %v766_v59  ;;  %v790_v39 = vld [vmem:[%s13603_s2 + $0x8b8] sm:$0xff] }
 0x432   : > { %7714 = vmatpush1.bf16.msra.mxu0 %v10901_v25  ;;  %v10949_v25 = vcombine.low %v634_v10, %v638_v12  ;;  %v914_v42 = vld [vmem:[%s13603_s2 + $0xc98] sm:$0xff] }
 0x433   : > { %7715 = vmatprep.subr.bf16.mxu0 %v10910_v26  ;;  %v11086_v26 = vcombine.high %v770_v43, %v774_v18  ;;  %v918_v44 = vld [vmem:[%s13603_s2 + $0xcb8] sm:$0xff] }
 0x434   : > { %7755 = vmatpush1.bf16.msra.mxu1 %v11029_v54  ;;  %v11077_v54 = vcombine.low %v762_v13, %v766_v59  ;;  %v794_v51 = vld [vmem:[%s13603_s2 + $0x8d8] sm:$0xff]  ;;  %v11229_v8 = vcombine.low %v914_v42, %v918_v44 }
 0x435   : > { %7756 = vmatprep.subr.bf16.mxu1 %v11038_v27  ;;  %v11214_v27 = vcombine.high %v898_v22, %v902_v24  ;;  %v798_v53 = vld [vmem:[%s13603_s2 + $0x8f8] sm:$0xff] }
 0x436   : > { %7716 = vmatpush1.bf16.msra.mxu0 %v10909_v33  ;;  %v11085_v33 = vcombine.low %v770_v43, %v774_v18  ;;  %v926_v61 = vld [vmem:[%s13603_s2 + $0xcf8] sm:$0xff]  ;;  %v11109_v0 = vcombine.low %v794_v51, %v798_v53 }
 0x437   : > { %7717 = vmatprep.subr.bf16.mxu0 %v10918_v35  ;;  %v11094_v35 = vcombine.high %v778_v55, %v782_v29  ;;  %v930_v58 = vld [vmem:[%s13603_s2 + $0xd18] sm:$0xff] }
 0x438   : > { %7757 = vmatpush1.bf16.msra.mxu1 %v11037_v34  ;;  %v11213_v34 = vcombine.low %v898_v22, %v902_v24 }
 0x439   : > { %7758 = vmatprep.subr.bf16.mxu1 %v11046_v36  ;;  %v11222_v36 = vcombine.high %v906_v31, %v910_v32 }
 0x43a   : > { %7718 = vmatpush1.bf16.msra.mxu0 %v10917_v45  ;;  %v11093_v45 = vcombine.low %v778_v55, %v782_v29 }
 0x43b   : > { %7719 = vmatprep.subr.bf16.mxu0 %v10926_v46  ;;  %v11102_v46 = vcombine.high %v786_v38, %v790_v39 }
 0x43c   : > { %7759 = vmatpush1.bf16.msra.mxu1 %v11045_v20  ;;  %v11221_v20 = vcombine.low %v906_v31, %v910_v32  ;;  %v954_v31 = vld [vmem:[%s13603_s2 + $0xdd8] sm:$0xff] }
 0x43d   : > { %7760 = vmatprep.subr.bf16.mxu1 %v11054_v49  ;;  %v11230_v49 = vcombine.high %v914_v42, %v918_v44  ;;  %v958_v32 = vld [vmem:[%s13603_s2 + $0xdf8] sm:$0xff] }
 0x43e   : > { %7720 = vmatpush1.bf16.msra.mxu0 %v10925_v11  ;;  %v11110_v11 = vcombine.high %v794_v51, %v798_v53  ;;  %v962_v51 = vld [vmem:[%s13603_s2 + $0xe18] sm:$0xff] }
 0x43f   : > { %7721 = vmatprep.subr.bf16.mxu0 %v10934_v1  ;;  %v802_v1 = vld [vmem:[%s13603_s2 + $0x918] sm:$0xff] }
 0x440   : > { %7761 = vmatpush1.bf16.msra.mxu1 %v11053_v56  ;;  %v966_v53 = vld [vmem:[%s13603_s2 + $0xe38] sm:$0xff] }
 0x441   : > { %7762 = vmatprep.subr.bf16.mxu1 %v11062_v2  ;;  %v806_v2 = vld [vmem:[%s13603_s2 + $0x938] sm:$0xff] }
 0x442   : > { %7722 = vmatpush1.bf16.msra.mxu0 %v10933_v6  ;;  %v11118_v3 = vcombine.high %v802_v1, %v806_v2  ;;  %v810_v6 = vld [vmem:[%s13603_s2 + $0x958] sm:$0xff]  ;;  %v11117_v10 = vcombine.low %v802_v1, %v806_v2 }
 0x443   : > { %7723 = vmatprep.subr.bf16.mxu0 %v10942_v7  ;;  %v938_v7 = vld [vmem:[%s13603_s2 + $0xd58] sm:$0xff] }
 0x444   : > { %7763 = vmatpush1.bf16.msra.mxu1 %v11061_v62  ;;  %v814_v62 = vld [vmem:[%s13603_s2 + $0x978] sm:$0xff] }
 0x445   : > { %7764 = vmatprep.subr.bf16.mxu1 %v11070_v63  ;;  %v942_v63 = vld [vmem:[%s13603_s2 + $0xd78] sm:$0xff]  ;;  %v11126_v13 = vcombine.high %v810_v6, %v814_v62  ;;  %v11125_v43 = vcombine.low %v810_v6, %v814_v62 }
 0x446   : > { %7724 = vmatpush1.bf16.msra.mxu0 %v10941_v40  ;;  %v11254_v59 = vcombine.high %v938_v7, %v942_v63  ;;  %v818_v40 = vld [vmem:[%s13603_s2 + $0x998] sm:$0xff]  ;;  %v11253_v18 = vcombine.low %v938_v7, %v942_v63 }
 0x447   : > { %7725 = vmatprep.subr.bf16.mxu0 %v10950_v14  ;;  %v946_v14 = vld [vmem:[%s13603_s2 + $0xd98] sm:$0xff] }
 0x448   : > { %7765 = vmatpush1.bf16.msra.mxu1 %v11069_v60  ;;  %v822_v60 = vld [vmem:[%s13603_s2 + $0x9b8] sm:$0xff] }
 0x449   : > { %7766 = vmatprep.subr.bf16.mxu1 %v11078_v15  ;;  %v950_v15 = vld [vmem:[%s13603_s2 + $0xdb8] sm:$0xff]  ;;  %v11134_v22 = vcombine.high %v818_v40, %v822_v60 }
 0x44a   : > { %7726 = vmatpush1.bf16.msra.mxu0 %v10949_v25  ;;  %v11262_v25 = vcombine.high %v946_v14, %v950_v15  ;;  %v970_v1 = vld [vmem:[%s13603_s2 + $0xe58] sm:$0xff] }
 0x44b   : > { %7777 = vmatprep.subr.bf16.mxu0 %v11086_v26  ;;  %v830_v26 = vld [vmem:[%s13603_s2 + $0x9f8] sm:$0xff] }
 0x44c   : > { %7767 = vmatpush1.bf16.msra.mxu1 %v11077_v54  ;;  %v826_v54 = vld [vmem:[%s13603_s2 + $0x9d8] sm:$0xff] }
 0x44d   : > { %7818 = vmatprep.subr.bf16.mxu1 %v11214_v27  ;;  %7728 = vmatmul.mubr.bf16.vlgmr.msra.gmra.mrb[48].mxu0 %v13714_v17  ;;  %v922_v17 = vld [vmem:[%s13603_s2 + $0xcd8] sm:$0xff]  ;;  %v11142_v44 = vcombine.high %v826_v54, %v830_v26 }
 0x44e   : > { %7778 = vmatpush1.bf16.msra.mxu0 %v11085_v33  ;;  %7809 = vmatprep.mubr.bf16.mxu0 %v13732_v28  ;;  %v11238_v56 = vcombine.high %v922_v17, %v926_v61  ;;  %v934_v28 = vld [vmem:[%s13603_s2 + $0xd38] sm:$0xff] }
 0x44f   : > { %7769 = vmatmul.mubr.bf16.vlgmr.msra.gmra.mrb[48].mxu1 %v13723_v21  ;;  %7779 = vmatprep.subr.bf16.mxu0 %v11094_v35  ;;  %v11101_v21 = vcombine.low %v786_v38, %v790_v39  ;;  %v11246_v4 = vcombine.high %v930_v58, %v934_v28  ;;  %v11245_v12 = vcombine.low %v930_v58, %v934_v28  ;;  %v974_v2 = vld [vmem:[%s13603_s2 + $0xe78] sm:$0xff] }
 0x450   : > { %7819 = vmatpush1.bf16.msra.mxu1 %v11213_v34  ;;  %7850 = vmatprep.mubr.bf16.mxu1 %v13739_v30  ;;  %v11237_v30 = vcombine.low %v922_v17, %v926_v61  ;;  %v11141_v17 = vcombine.low %v826_v54, %v830_v26  ;;  %v11269_v61 = vcombine.low %v954_v31, %v958_v32  ;;  %v978_v6 = vld [vmem:[%s13603_s2 + $0xe98] sm:$0xff] }
 0x451   : > { %7820 = vmatprep.subr.bf16.mxu1 %v11222_v36  ;;  %v11133_v36 = vcombine.low %v818_v40, %v822_v60  ;;  %v11277_v28 = vcombine.low %v962_v51, %v966_v53  ;;  %v982_v62 = vld [vmem:[%s13603_s2 + $0xeb8] sm:$0xff]  ;;  %v11285_v63 = vcombine.low %v970_v1, %v974_v2 }
 0x452   : > { %7780 = vmatpush1.bf16.msra.mxu0 %v11093_v45  ;;  %v986_v40 = vld [vmem:[%s13603_s2 + $0xed8] sm:$0xff] }
 0x453   : > { %7781 = vmatprep.subr.bf16.mxu0 %v11102_v46  ;;  %v834_v46 = vld [vmem:[%s13603_s2 + $0xa18] sm:$0xff] }
 0x454   : > { %7821 = vmatpush1.bf16.msra.mxu1 %v11221_v20  ;;  %v11270_v20 = vcombine.high %v954_v31, %v958_v32  ;;  %v990_v60 = vld [vmem:[%s13603_s2 + $0xef8] sm:$0xff] }
 0x455   : > { %7822 = vmatprep.subr.bf16.mxu1 %v11230_v49  ;;  %v838_v49 = vld [vmem:[%s13603_s2 + $0xa38] sm:$0xff] }
 0x456   : > { %7782 = vmatpush1.bf16.msra.mxu0 %v11101_v21  ;;  %v11150_v21 = vcombine.high %v834_v46, %v838_v49  ;;  %v11149_v58 = vcombine.low %v834_v46, %v838_v49  ;;  %v998_v54 = vld [vmem:[%s13603_s2 + $0xf38] sm:$0xff] }
 0x457   : > { %7783 = vmatprep.subr.bf16.mxu0 %v11110_v11  ;;  %v842_v11 = vld [vmem:[%s13603_s2 + $0xa58] sm:$0xff] }
 0x458   : > { %7823 = vmatpush1.bf16.msra.mxu1 %v11229_v8  ;;  %v11278_v8 = vcombine.high %v962_v51, %v966_v53  ;;  %v874_v31 = vld [vmem:[%s13603_s2 + $0xb58] sm:$0xff] }
 0x459   : > { %7824 = vmatprep.subr.bf16.mxu1 %v11238_v56  ;;  %v846_v56 = vld [vmem:[%s13603_s2 + $0xa78] sm:$0xff] }
 0x45a   : > { %7784 = vmatpush1.bf16.msra.mxu0 %v11109_v0  ;;  %v11158_v0 = vcombine.high %v842_v11, %v846_v56  ;;  %v11157_v7 = vcombine.low %v842_v11, %v846_v56  ;;  %v878_v32 = vld [vmem:[%s13603_s2 + $0xb78] sm:$0xff] }
 0x45b   : > { %7785 = vmatprep.subr.bf16.mxu0 %v11118_v3  ;;  %v850_v3 = vld [vmem:[%s13603_s2 + $0xa98] sm:$0xff]  ;;  %v11189_v46 = vcombine.low %v874_v31, %v878_v32 }
 0x45c   : > { %7825 = vmatpush1.bf16.msra.mxu1 %v11237_v30  ;;  %v11286_v30 = vcombine.high %v970_v1, %v974_v2 }
 0x45d   : > { %7826 = vmatprep.subr.bf16.mxu1 %v11246_v4  ;;  %v854_v4 = vld [vmem:[%s13603_s2 + $0xab8] sm:$0xff] }
 0x45e   : > { %7786 = vmatpush1.bf16.msra.mxu0 %v11117_v10  ;;  %v11166_v10 = vcombine.high %v850_v3, %v854_v4 }
 0x45f   : > { %7787 = vmatprep.subr.bf16.mxu0 %v11126_v13  ;;  %v858_v13 = vld [vmem:[%s13603_s2 + $0xad8] sm:$0xff] }
 0x460   : > { %7827 = vmatpush1.bf16.msra.mxu1 %v11245_v12  ;;  %v7483_v24 = vpop.f32.mrb[36].mxu0  ;;  %v11294_v12 = vcombine.high %v978_v6, %v982_v62 }
 0x461   : > { %7828 = vmatprep.subr.bf16.mxu1 %v11254_v59  ;;  %v7484_v27 = vadd.f32 %v7483_v24, %v14600_v47  ;;  %v7485_v29 = vpop.f32.mrb[37].mxu0  ;;  %v11261_v47 = vcombine.low %v946_v14, %v950_v15  ;;  %v862_v59 = vld [vmem:[%s13603_s2 + $0xaf8] sm:$0xff]  ;;  %v11165_v14 = vcombine.low %v850_v3, %v854_v4  ;;  %v11293_v15 = vcombine.low %v978_v6, %v982_v62 }
 0x462   : > { %v7524_v55 = vpop.f32.mrb[36].mxu1  ;;  %v7486_v33 = vadd.f32 %v7485_v29, %v14602_v57  ;;  %v7487_v35 = vpop.f32.mrb[38].mxu0  ;;  %7788 = vmatpush1.bf16.msra.mxu0 %v11125_v43  ;;  %v11174_v43 = vcombine.high %v858_v13, %v862_v59  ;;  %v870_v24 = vld [vmem:[%s13603_s2 + $0xb38] sm:$0xff]  ;;  %v11173_v26 = vcombine.low %v858_v13, %v862_v59 }
 0x463   : > { %v7526_v34 = vpop.f32.mrb[37].mxu1  ;;  %v14674_v38 = vadd.f32 %v7524_v55, %v7484_v27  ;;  %v7488_v42 = vpop.f32.mrb[39].mxu0  ;;  %7789 = vmatprep.subr.bf16.mxu0 %v11134_v22  ;;  %v866_v22 = vld [vmem:[%s13603_s2 + $0xb18] sm:$0xff]  ;;  %v11301_v27 = vcombine.low %v986_v40, %v990_v60 }
 0x464   : > { %v7528_v39 = vpop.f32.mrb[38].mxu1  ;;  %7829 = vmatpush1.bf16.msra.mxu1 %v11253_v18  ;;  %v14676_v45 = vadd.f32 %v7526_v34, %v7486_v33  ;;  %v11302_v18 = vcombine.high %v986_v40, %v990_v60  ;;  %v11182_v55 = vcombine.high %v866_v22, %v870_v24  ;;  %v1002_v33 = vld [vmem:[%s13603_s2 + $0xf58] sm:$0xff]  ;;  %v11181_v35 = vcombine.low %v866_v22, %v870_v24 }
 0x465   : > { %v7529_v57 = vpop.f32.mrb[39].mxu1  ;;  %7830 = vmatprep.subr.bf16.mxu1 %v11262_v25  ;;  %v994_v25 = vld [vmem:[%s13603_s2 + $0xf18] sm:$0xff]  ;;  %v11190_v39 = vcombine.high %v874_v31, %v878_v32 }
 0x466   : > { %7790 = vmatpush1.bf16.msra.mxu0 %v11133_v36  ;;  %v11310_v29 = vcombine.high %v994_v25, %v998_v54  ;;  %v1006_v34 = vld [vmem:[%s13603_s2 + $0xf78] sm:$0xff]  ;;  %v11309_v36 = vcombine.low %v994_v25, %v998_v54 }
 0x467   : > { %7791 = vmatprep.subr.bf16.mxu0 %v11142_v44  ;;  %v11318_v42 = vcombine.high %v1002_v33, %v1006_v34  ;;  %v886_v44 = vld [vmem:[%s13603_s2 + $0xbb8] sm:$0xff]  ;;  %v11317_v49 = vcombine.low %v1002_v33, %v1006_v34 }
 0x468   : > { %7831 = vmatpush1.bf16.msra.mxu1 %v11261_v47  ;;  %v882_v47 = vld [vmem:[%s13603_s2 + $0xb98] sm:$0xff] }
 0x469   : > { %7832 = vmatprep.subr.bf16.mxu1 %v11270_v20  ;;  %v1010_v57 = vld [vmem:[%s13603_s2 + $0xf98] sm:$0xff]  ;;  %v11198_v51 = vcombine.high %v882_v47, %v886_v44  ;;  %v11197_v11 = vcombine.low %v882_v47, %v886_v44 }
 0x46a   : > { %7792 = vmatpush1.bf16.msra.mxu0 %v11141_v17  ;;  %v1014_v20 = vld [vmem:[%s13603_s2 + $0xfb8] sm:$0xff] }
 0x46b   : > { %7793 = vmatprep.subr.bf16.mxu0 %v11150_v21  ;;  %v11326_v53 = vcombine.high %v1010_v57, %v1014_v20  ;;  %v890_v17 = vld [vmem:[%s13603_s2 + $0xbd8] sm:$0xff]  ;;  %v11325_v56 = vcombine.low %v1010_v57, %v1014_v20 }
 0x46c   : > { %7833 = vmatpush1.bf16.msra.mxu1 %v11269_v61  ;;  %v894_v61 = vld [vmem:[%s13603_s2 + $0xbf8] sm:$0xff] }
 0x46d   : > { %7834 = vmatprep.subr.bf16.mxu1 %v11278_v8  ;;  %v1018_v21 = vld [vmem:[%s13603_s2 + $0xfd8] sm:$0xff]  ;;  %v11206_v1 = vcombine.high %v890_v17, %v894_v61  ;;  %v11205_v3 = vcombine.low %v890_v17, %v894_v61 }
 0x46e   : > { %7794 = vmatpush1.bf16.msra.mxu0 %v11149_v58  ;;  %v1022_v8 = vld [vmem:[%s13603_s2 + $0xff8] sm:$0xff] }
 0x46f   : > { %7795 = vmatprep.subr.bf16.mxu0 %v11158_v0  ;;  %v11334_v2 = vcombine.high %v1018_v21, %v1022_v8  ;;  %v1026_v58 = vld [vmem:[%s13603_s2 + $0x1018] sm:$0xff]  ;;  %v11333_v4 = vcombine.low %v1018_v21, %v1022_v8 }
 0x470   : > { %7835 = vmatpush1.bf16.msra.mxu1 %v11277_v28  ;;  %v1030_v28 = vld [vmem:[%s13603_s2 + $0x1038] sm:$0xff] }
 0x471   : > { %7836 = vmatprep.subr.bf16.mxu1 %v11286_v30  ;;  %v1154_v0 = vld [vmem:[%s13603_s2 + $0x1418] sm:$0xff]  ;;  %v11342_v6 = vcombine.high %v1026_v58, %v1030_v28  ;;  %v11341_v13 = vcombine.low %v1026_v58, %v1030_v28 }
 0x472   : > { %7796 = vmatpush1.bf16.msra.mxu0 %v11157_v7  ;;  %v1158_v30 = vld [vmem:[%s13603_s2 + $0x1438] sm:$0xff] }
 0x473   : > { %7797 = vmatprep.subr.bf16.mxu0 %v11166_v10  ;;  %v11470_v62 = vcombine.high %v1154_v0, %v1158_v30  ;;  %v1034_v7 = vld [vmem:[%s13603_s2 + $0x1058] sm:$0xff]  ;;  %v11469_v59 = vcombine.low %v1154_v0, %v1158_v30 }
 0x474   : > { %7837 = vmatpush1.bf16.msra.mxu1 %v11285_v63  ;;  %v1038_v63 = vld [vmem:[%s13603_s2 + $0x1078] sm:$0xff] }
 0x475   : > { %7838 = vmatprep.subr.bf16.mxu1 %v11294_v12  ;;  %v1162_v10 = vld [vmem:[%s13603_s2 + $0x1458] sm:$0xff]  ;;  %v11350_v40 = vcombine.high %v1034_v7, %v1038_v63  ;;  %v11349_v22 = vcombine.low %v1034_v7, %v1038_v63 }
 0x476   : > { %7798 = vmatpush1.bf16.msra.mxu0 %v11165_v14  ;;  %v1166_v12 = vld [vmem:[%s13603_s2 + $0x1478] sm:$0xff] }
 0x477   : > { %7799 = vmatprep.subr.bf16.mxu0 %v11174_v43  ;;  %v11478_v60 = vcombine.high %v1162_v10, %v1166_v12  ;;  %v1042_v14 = vld [vmem:[%s13603_s2 + $0x1098] sm:$0xff]  ;;  %v11477_v24 = vcombine.low %v1162_v10, %v1166_v12 }
 0x478   : > { %7839 = vmatpush1.bf16.msra.mxu1 %v11293_v15  ;;  %v1046_v15 = vld [vmem:[%s13603_s2 + $0x10b8] sm:$0xff] }
 0x479   : > { %7840 = vmatprep.subr.bf16.mxu1 %v11302_v18  ;;  %v1170_v43 = vld [vmem:[%s13603_s2 + $0x1498] sm:$0xff]  ;;  %v11358_v25 = vcombine.high %v1042_v14, %v1046_v15 }
 0x47a   : > { %7800 = vmatpush1.bf16.msra.mxu0 %v11173_v26  ;;  %v1174_v18 = vld [vmem:[%s13603_s2 + $0x14b8] sm:$0xff] }
 0x47b   : > { %7801 = vmatprep.subr.bf16.mxu0 %v11182_v55  ;;  %v11486_v54 = vcombine.high %v1170_v43, %v1174_v18  ;;  %v1050_v26 = vld [vmem:[%s13603_s2 + $0x10d8] sm:$0xff] }
 0x47c   : > { %7841 = vmatpush1.bf16.msra.mxu1 %v11301_v27  ;;  %v1054_v27 = vld [vmem:[%s13603_s2 + $0x10f8] sm:$0xff] }
 0x47d   : > { %7842 = vmatprep.subr.bf16.mxu1 %v11310_v29  ;;  %v1182_v55 = vld [vmem:[%s13603_s2 + $0x14f8] sm:$0xff]  ;;  %v11485_v29 = vcombine.low %v1170_v43, %v1174_v18  ;;  %v11366_v31 = vcombine.high %v1050_v26, %v1054_v27 }
 0x47e   : > { %7802 = vmatpush1.bf16.msra.mxu0 %v11181_v35  ;;  %v1058_v33 = vld [vmem:[%s13603_s2 + $0x1118] sm:$0xff] }
 0x47f   : > { %7803 = vmatprep.subr.bf16.mxu0 %v11190_v39  ;;  %v1062_v34 = vld [vmem:[%s13603_s2 + $0x1138] sm:$0xff] }
 0x480   : > { %7843 = vmatpush1.bf16.msra.mxu1 %v11309_v36  ;;  %v1186_v35 = vld [vmem:[%s13603_s2 + $0x1518] sm:$0xff]  ;;  %v11365_v36 = vcombine.low %v1050_v26, %v1054_v27  ;;  %v11374_v39 = vcombine.high %v1058_v33, %v1062_v34 }
 0x481   : > { %7844 = vmatprep.subr.bf16.mxu1 %v11318_v42  ;;  %v1066_v47 = vld [vmem:[%s13603_s2 + $0x1158] sm:$0xff] }
 0x482   : > { %7804 = vmatpush1.bf16.msra.mxu0 %v11189_v46  ;;  %v1070_v44 = vld [vmem:[%s13603_s2 + $0x1178] sm:$0xff]  ;;  %v11373_v46 = vcombine.low %v1058_v33, %v1062_v34 }
 0x483   : > { %7805 = vmatprep.subr.bf16.mxu0 %v11198_v51  ;;  %v1194_v57 = vld [vmem:[%s13603_s2 + $0x1558] sm:$0xff]  ;;  %v11382_v51 = vcombine.high %v1066_v47, %v1070_v44 }
 0x484   : > { %7845 = vmatpush1.bf16.msra.mxu1 %v11317_v49  ;;  %v1198_v20 = vld [vmem:[%s13603_s2 + $0x1578] sm:$0xff] }
 0x485   : > { %7846 = vmatprep.subr.bf16.mxu1 %v11326_v53  ;;  %v11510_v53 = vcombine.high %v1194_v57, %v1198_v20  ;;  %v1074_v17 = vld [vmem:[%s13603_s2 + $0x1198] sm:$0xff] }
 0x486   : > { %7806 = vmatpush1.bf16.msra.mxu0 %v11197_v11  ;;  %v1078_v61 = vld [vmem:[%s13603_s2 + $0x11b8] sm:$0xff]  ;;  %v11381_v11 = vcombine.low %v1066_v47, %v1070_v44 }
 0x487   : > { %7807 = vmatprep.subr.bf16.mxu0 %v11206_v1  ;;  %v1202_v21 = vld [vmem:[%s13603_s2 + $0x1598] sm:$0xff]  ;;  %v11390_v1 = vcombine.high %v1074_v17, %v1078_v61  ;;  %v11389_v12 = vcombine.low %v1074_v17, %v1078_v61 }
 0x488   : > { %7847 = vmatpush1.bf16.msra.mxu1 %v11325_v56  ;;  %v1206_v8 = vld [vmem:[%s13603_s2 + $0x15b8] sm:$0xff]  ;;  %v11509_v56 = vcombine.low %v1194_v57, %v1198_v20 }
 0x489   : > { %7848 = vmatprep.subr.bf16.mxu1 %v11334_v2  ;;  %v11518_v58 = vcombine.high %v1202_v21, %v1206_v8  ;;  %v1082_v28 = vld [vmem:[%s13603_s2 + $0x11d8] sm:$0xff] }
 0x48a   : > { %7808 = vmatpush1.bf16.msra.mxu0 %v11205_v3  ;;  %v1086_v0 = vld [vmem:[%s13603_s2 + $0x11f8] sm:$0xff] }
 0x48b   : > { %7859 = vmatprep.subr.bf16.mxu0 %v11342_v6  ;;  %v1210_v6 = vld [vmem:[%s13603_s2 + $0x15d8] sm:$0xff] }
 0x48c   : > { %7849 = vmatpush1.bf16.msra.mxu1 %v11333_v4  ;;  %v1090_v43 = vld [vmem:[%s13603_s2 + $0x1218] sm:$0xff] }
 0x48d   : > { %7900 = vmatprep.subr.bf16.mxu1 %v11470_v62  ;;  %7810 = vmatmul.mubr.bf16.vlgmr.msra.gmra.mrb[52].mxu0 %v13804_v37  ;;  %v1178_v37 = vld [vmem:[%s13603_s2 + $0x14d8] sm:$0xff] }
 0x48e   : > { %7860 = vmatpush1.bf16.msra.mxu0 %v11341_v13  ;;  %7891 = vmatprep.mubr.bf16.mxu0 %v13822_v48  ;;  %v11494_v32 = vcombine.high %v1178_v37, %v1182_v55  ;;  %v1190_v48 = vld [vmem:[%s13603_s2 + $0x1538] sm:$0xff] }
 0x48f   : > { %7851 = vmatmul.mubr.bf16.vlgmr.msra.gmra.mrb[52].mxu1 %v13813_v41  ;;  %7861 = vmatprep.subr.bf16.mxu0 %v11350_v40  ;;  %v11357_v41 = vcombine.low %v1042_v14, %v1046_v15  ;;  %v11502_v42 = vcombine.high %v1186_v35, %v1190_v48  ;;  %v11501_v49 = vcombine.low %v1186_v35, %v1190_v48  ;;  %v1214_v62 = vld [vmem:[%s13603_s2 + $0x15f8] sm:$0xff] }
 0x490   : > { %7901 = vmatpush1.bf16.msra.mxu1 %v11469_v59  ;;  %7932 = vmatprep.mubr.bf16.mxu1 %v13829_v50  ;;  %v11493_v50 = vcombine.low %v1178_v37, %v1182_v55  ;;  %v11526_v15 = vcombine.high %v1210_v6, %v1214_v62  ;;  %v1094_v18 = vld [vmem:[%s13603_s2 + $0x1238] sm:$0xff] }
 0x491   : > { %7902 = vmatprep.subr.bf16.mxu1 %v11478_v60  ;;  %v11398_v60 = vcombine.high %v1082_v28, %v1086_v0  ;;  %v11406_v26 = vcombine.high %v1090_v43, %v1094_v18  ;;  %v1098_v37 = vld [vmem:[%s13603_s2 + $0x1258] sm:$0xff] }
 0x492   : > { %7862 = vmatpush1.bf16.msra.mxu0 %v11349_v22  ;;  %v1218_v22 = vld [vmem:[%s13603_s2 + $0x1618] sm:$0xff] }
 0x493   : > { %7863 = vmatprep.subr.bf16.mxu0 %v11358_v25  ;;  %v11397_v25 = vcombine.low %v1082_v28, %v1086_v0  ;;  %v1102_v55 = vld [vmem:[%s13603_s2 + $0x1278] sm:$0xff] }
 0x494   : > { %7903 = vmatpush1.bf16.msra.mxu1 %v11477_v24  ;;  %v1222_v24 = vld [vmem:[%s13603_s2 + $0x1638] sm:$0xff]  ;;  %v11414_v33 = vcombine.high %v1098_v37, %v1102_v55 }
 0x495   : > { %7904 = vmatprep.subr.bf16.mxu1 %v11486_v54  ;;  %v11525_v54 = vcombine.low %v1210_v6, %v1214_v62  ;;  %v11534_v27 = vcombine.high %v1218_v22, %v1222_v24  ;;  %v1106_v35 = vld [vmem:[%s13603_s2 + $0x1298] sm:$0xff] }
 0x496   : > { %7864 = vmatpush1.bf16.msra.mxu0 %v11357_v41  ;;  %v1226_v41 = vld [vmem:[%s13603_s2 + $0x1658] sm:$0xff] }
 0x497   : > { %7865 = vmatprep.subr.bf16.mxu0 %v11366_v31  ;;  %v11405_v31 = vcombine.low %v1090_v43, %v1094_v18  ;;  %v1110_v48 = vld [vmem:[%s13603_s2 + $0x12b8] sm:$0xff] }
 0x498   : > { %7905 = vmatpush1.bf16.msra.mxu1 %v11485_v29  ;;  %v1230_v29 = vld [vmem:[%s13603_s2 + $0x1678] sm:$0xff]  ;;  %v11422_v47 = vcombine.high %v1106_v35, %v1110_v48 }
 0x499   : > { %7906 = vmatprep.subr.bf16.mxu1 %v11494_v32  ;;  %v11533_v32 = vcombine.low %v1218_v22, %v1222_v24  ;;  %v11542_v34 = vcombine.high %v1226_v41, %v1230_v29  ;;  %v1114_v57 = vld [vmem:[%s13603_s2 + $0x12d8] sm:$0xff] }
 0x49a   : > { %7866 = vmatpush1.bf16.msra.mxu0 %v11365_v36  ;;  %v1234_v36 = vld [vmem:[%s13603_s2 + $0x1698] sm:$0xff] }
 0x49b   : > { %7867 = vmatprep.subr.bf16.mxu0 %v11374_v39  ;;  %v11413_v39 = vcombine.low %v1098_v37, %v1102_v55  ;;  %v1118_v20 = vld [vmem:[%s13603_s2 + $0x12f8] sm:$0xff] }
 0x49c   : > { %7907 = vmatpush1.bf16.msra.mxu1 %v11493_v50  ;;  %v1238_v50 = vld [vmem:[%s13603_s2 + $0x16b8] sm:$0xff]  ;;  %v11430_v17 = vcombine.high %v1114_v57, %v1118_v20 }
 0x49d   : > { %7908 = vmatprep.subr.bf16.mxu1 %v11502_v42  ;;  %v11541_v42 = vcombine.low %v1226_v41, %v1230_v29  ;;  %v11550_v44 = vcombine.high %v1234_v36, %v1238_v50  ;;  %v1130_v0 = vld [vmem:[%s13603_s2 + $0x1358] sm:$0xff] }
 0x49e   : > { %7868 = vmatpush1.bf16.msra.mxu0 %v11373_v46  ;;  %v1242_v46 = vld [vmem:[%s13603_s2 + $0x16d8] sm:$0xff] }
 0x49f   : > { %7869 = vmatprep.subr.bf16.mxu0 %v11382_v51  ;;  %v11421_v51 = vcombine.low %v1106_v35, %v1110_v48  ;;  %v1146_v43 = vld [vmem:[%s13603_s2 + $0x13d8] sm:$0xff] }
 0x4a0   : > { %7909 = vmatpush1.bf16.msra.mxu1 %v11501_v49  ;;  %v7565_v2 = vpop.f32.mrb[40].mxu0  ;;  %v1246_v49 = vld [vmem:[%s13603_s2 + $0x16f8] sm:$0xff] }
 0x4a1   : > { %7910 = vmatprep.subr.bf16.mxu1 %v11510_v53  ;;  %v7566_v30 = vadd.f32 %v7565_v2, %v14674_v38  ;;  %v7567_v4 = vpop.f32.mrb[41].mxu0  ;;  %v11517_v38 = vcombine.low %v1202_v21, %v1206_v8  ;;  %v11549_v53 = vcombine.low %v1234_v36, %v1238_v50  ;;  %v11558_v61 = vcombine.high %v1242_v46, %v1246_v49  ;;  %v1122_v21 = vld [vmem:[%s13603_s2 + $0x1318] sm:$0xff] }
 0x4a2   : > { %v7606_v3 = vpop.f32.mrb[40].mxu1  ;;  %v7568_v7 = vadd.f32 %v7567_v4, %v14676_v45  ;;  %v7569_v10 = vpop.f32.mrb[42].mxu0  ;;  %7870 = vmatpush1.bf16.msra.mxu0 %v11381_v11  ;;  %v1126_v8 = vld [vmem:[%s13603_s2 + $0x1338] sm:$0xff]  ;;  %v11557_v2 = vcombine.low %v1242_v46, %v1246_v49 }
 0x4a3   : > { %v7608_v63 = vpop.f32.mrb[41].mxu1  ;;  %v14748_v13 = vadd.f32 %v7606_v3, %v7566_v30  ;;  %v7570_v40 = vpop.f32.mrb[43].mxu0  ;;  %7871 = vmatprep.subr.bf16.mxu0 %v11390_v1  ;;  %v1250_v11 = vld [vmem:[%s13603_s2 + $0x1718] sm:$0xff]  ;;  %v11429_v1 = vcombine.low %v1114_v57, %v1118_v20  ;;  %v11437_v6 = vcombine.low %v1122_v21, %v1126_v8 }
 0x4a4   : > { %v7610_v59 = vpop.f32.mrb[42].mxu1  ;;  %7911 = vmatpush1.bf16.msra.mxu1 %v11509_v56  ;;  %v14750_v14 = vadd.f32 %v7608_v63, %v7568_v7  ;;  %v1254_v56 = vld [vmem:[%s13603_s2 + $0x1738] sm:$0xff] }
 0x4a5   : > { %v7611_v45 = vpop.f32.mrb[43].mxu1  ;;  %7912 = vmatprep.subr.bf16.mxu1 %v11518_v58  ;;  %v11438_v58 = vcombine.high %v1122_v21, %v1126_v8  ;;  %v11566_v28 = vcombine.high %v1250_v11, %v1254_v56  ;;  %v1134_v30 = vld [vmem:[%s13603_s2 + $0x1378] sm:$0xff]  ;;  %v11565_v62 = vcombine.low %v1250_v11, %v1254_v56 }
 0x4a6   : > { %7872 = vmatpush1.bf16.msra.mxu0 %v11389_v12  ;;  %v1258_v3 = vld [vmem:[%s13603_s2 + $0x1758] sm:$0xff]  ;;  %v11446_v7 = vcombine.high %v1130_v0, %v1134_v30 }
 0x4a7   : > { %7873 = vmatprep.subr.bf16.mxu0 %v11398_v60  ;;  %v1262_v4 = vld [vmem:[%s13603_s2 + $0x1778] sm:$0xff] }
 0x4a8   : > { %7913 = vmatpush1.bf16.msra.mxu1 %v11517_v38  ;;  %v11574_v63 = vcombine.high %v1258_v3, %v1262_v4  ;;  %v1138_v10 = vld [vmem:[%s13603_s2 + $0x1398] sm:$0xff]  ;;  %v11445_v38 = vcombine.low %v1130_v0, %v1134_v30  ;;  %v11573_v60 = vcombine.low %v1258_v3, %v1262_v4 }
 0x4a9   : > { %7914 = vmatprep.subr.bf16.mxu1 %v11526_v15  ;;  %v1142_v12 = vld [vmem:[%s13603_s2 + $0x13b8] sm:$0xff] }
 0x4aa   : > { %7874 = vmatpush1.bf16.msra.mxu0 %v11397_v25  ;;  %v1266_v59 = vld [vmem:[%s13603_s2 + $0x1798] sm:$0xff]  ;;  %v11454_v45 = vcombine.high %v1138_v10, %v1142_v12  ;;  %v11453_v25 = vcombine.low %v1138_v10, %v1142_v12 }
 0x4ab   : > { %7875 = vmatprep.subr.bf16.mxu0 %v11406_v26  ;;  %v1270_v40 = vld [vmem:[%s13603_s2 + $0x17b8] sm:$0xff] }
 0x4ac   : > { %7915 = vmatpush1.bf16.msra.mxu1 %v11525_v54  ;;  %v11582_v15 = vcombine.high %v1266_v59, %v1270_v40  ;;  %v1150_v18 = vld [vmem:[%s13603_s2 + $0x13f8] sm:$0xff]  ;;  %v11581_v54 = vcombine.low %v1266_v59, %v1270_v40 }
 0x4ad   : > { %7916 = vmatprep.subr.bf16.mxu1 %v11534_v27  ;;  %v1274_v22 = vld [vmem:[%s13603_s2 + $0x17d8] sm:$0xff]  ;;  %v11462_v26 = vcombine.high %v1146_v43, %v1150_v18 }
 0x4ae   : > { %7876 = vmatpush1.bf16.msra.mxu0 %v11405_v31  ;;  %v1278_v24 = vld [vmem:[%s13603_s2 + $0x17f8] sm:$0xff]  ;;  %v11461_v31 = vcombine.low %v1146_v43, %v1150_v18 }
 0x4af   : > { %7877 = vmatprep.subr.bf16.mxu0 %v11414_v33  ;;  %v11590_v27 = vcombine.high %v1274_v22, %v1278_v24  ;;  %v1282_v37 = vld [vmem:[%s13603_s2 + $0x1818] sm:$0xff] }
 0x4b0   : > { %7917 = vmatpush1.bf16.msra.mxu1 %v11533_v32  ;;  %v1286_v55 = vld [vmem:[%s13603_s2 + $0x1838] sm:$0xff]  ;;  %v11589_v32 = vcombine.low %v1274_v22, %v1278_v24 }
 0x4b1   : > { %7918 = vmatprep.subr.bf16.mxu1 %v11542_v34  ;;  %v1410_v41 = vld [vmem:[%s13603_s2 + $0x1c18] sm:$0xff]  ;;  %v11598_v33 = vcombine.high %v1282_v37, %v1286_v55 }
 0x4b2   : > { %7878 = vmatpush1.bf16.msra.mxu0 %v11413_v39  ;;  %v1414_v29 = vld [vmem:[%s13603_s2 + $0x1c38] sm:$0xff]  ;;  %v11597_v39 = vcombine.low %v1282_v37, %v1286_v55 }
 0x4b3   : > { %7879 = vmatprep.subr.bf16.mxu0 %v11422_v47  ;;  %v11726_v34 = vcombine.high %v1410_v41, %v1414_v29  ;;  %v1290_v35 = vld [vmem:[%s13603_s2 + $0x1858] sm:$0xff] }
 0x4b4   : > { %7919 = vmatpush1.bf16.msra.mxu1 %v11541_v42  ;;  %v1294_v48 = vld [vmem:[%s13603_s2 + $0x1878] sm:$0xff]  ;;  %v11725_v42 = vcombine.low %v1410_v41, %v1414_v29 }
 0x4b5   : > { %7920 = vmatprep.subr.bf16.mxu1 %v11550_v44  ;;  %v1418_v36 = vld [vmem:[%s13603_s2 + $0x1c58] sm:$0xff]  ;;  %v11606_v47 = vcombine.high %v1290_v35, %v1294_v48 }
 0x4b6   : > { %7880 = vmatpush1.bf16.msra.mxu0 %v11421_v51  ;;  %v1422_v50 = vld [vmem:[%s13603_s2 + $0x1c78] sm:$0xff]  ;;  %v11605_v51 = vcombine.low %v1290_v35, %v1294_v48 }
 0x4b7   : > { %7881 = vmatprep.subr.bf16.mxu0 %v11430_v17  ;;  %v11734_v44 = vcombine.high %v1418_v36, %v1422_v50  ;;  %v1298_v57 = vld [vmem:[%s13603_s2 + $0x1898] sm:$0xff] }
 0x4b8   : > { %7921 = vmatpush1.bf16.msra.mxu1 %v11549_v53  ;;  %v1302_v20 = vld [vmem:[%s13603_s2 + $0x18b8] sm:$0xff]  ;;  %v11733_v53 = vcombine.low %v1418_v36, %v1422_v50  ;;  %v500_v36 = vld [vmem:[#allocation2 + $0x28] sm:$0xff] }
 0x4b9   : > { %7922 = vmatprep.subr.bf16.mxu1 %v11558_v61  ;;  %v1426_v46 = vld [vmem:[%s13603_s2 + $0x1c98] sm:$0xff]  ;;  %v11614_v17 = vcombine.high %v1298_v57, %v1302_v20 }
 0x4ba   : > { %7882 = vmatpush1.bf16.msra.mxu0 %v11429_v1  ;;  %v1430_v49 = vld [vmem:[%s13603_s2 + $0x1cb8] sm:$0xff] }
 0x4bb   : > { %7883 = vmatprep.subr.bf16.mxu0 %v11438_v58  ;;  %v11742_v61 = vcombine.high %v1426_v46, %v1430_v49  ;;  %v1306_v21 = vld [vmem:[%s13603_s2 + $0x18d8] sm:$0xff]  ;;  %v11741_v56 = vcombine.low %v1426_v46, %v1430_v49 }
 0x4bc   : > { %7923 = vmatpush1.bf16.msra.mxu1 %v11557_v2  ;;  %v1310_v8 = vld [vmem:[%s13603_s2 + $0x18f8] sm:$0xff] }
 0x4bd   : > { %7924 = vmatprep.subr.bf16.mxu1 %v11566_v28  ;;  %v1438_v11 = vld [vmem:[%s13603_s2 + $0x1cf8] sm:$0xff]  ;;  %v11622_v1 = vcombine.high %v1306_v21, %v1310_v8  ;;  %v11621_v30 = vcombine.low %v1306_v21, %v1310_v8 }
 0x4be   : > { %7884 = vmatpush1.bf16.msra.mxu0 %v11437_v6  ;;  %v1314_v58 = vld [vmem:[%s13603_s2 + $0x1918] sm:$0xff] }
 0x4bf   : > { %7885 = vmatprep.subr.bf16.mxu0 %v11446_v7  ;;  %v1318_v28 = vld [vmem:[%s13603_s2 + $0x1938] sm:$0xff] }
 0x4c0   : > { %7925 = vmatpush1.bf16.msra.mxu1 %v11565_v62  ;;  %v1442_v0 = vld [vmem:[%s13603_s2 + $0x1d18] sm:$0xff]  ;;  %v11630_v3 = vcombine.high %v1314_v58, %v1318_v28  ;;  %v11629_v10 = vcombine.low %v1314_v58, %v1318_v28 }
 0x4c1   : > { %7926 = vmatprep.subr.bf16.mxu1 %v11574_v63  ;;  %v1322_v6 = vld [vmem:[%s13603_s2 + $0x1958] sm:$0xff] }
 0x4c2   : > { %7886 = vmatpush1.bf16.msra.mxu0 %v11445_v38  ;;  %v1326_v62 = vld [vmem:[%s13603_s2 + $0x1978] sm:$0xff] }
 0x4c3   : > { %7887 = vmatprep.subr.bf16.mxu0 %v11454_v45  ;;  %v1450_v7 = vld [vmem:[%s13603_s2 + $0x1d58] sm:$0xff]  ;;  %v11638_v59 = vcombine.high %v1322_v6, %v1326_v62  ;;  %v11637_v43 = vcombine.low %v1322_v6, %v1326_v62 }
 0x4c4   : > { %7927 = vmatpush1.bf16.msra.mxu1 %v11573_v60  ;;  %v1454_v63 = vld [vmem:[%s13603_s2 + $0x1d78] sm:$0xff] }
 0x4c5   : > { %7928 = vmatprep.subr.bf16.mxu1 %v11582_v15  ;;  %v11766_v40 = vcombine.high %v1450_v7, %v1454_v63  ;;  %v1330_v38 = vld [vmem:[%s13603_s2 + $0x1998] sm:$0xff]  ;;  %v11765_v18 = vcombine.low %v1450_v7, %v1454_v63 }
 0x4c6   : > { %7888 = vmatpush1.bf16.msra.mxu0 %v11453_v25  ;;  %v1334_v60 = vld [vmem:[%s13603_s2 + $0x19b8] sm:$0xff] }
 0x4c7   : > { %7889 = vmatprep.subr.bf16.mxu0 %v11462_v26  ;;  %v1458_v45 = vld [vmem:[%s13603_s2 + $0x1d98] sm:$0xff]  ;;  %v11646_v22 = vcombine.high %v1330_v38, %v1334_v60  ;;  %v11645_v35 = vcombine.low %v1330_v38, %v1334_v60 }
 0x4c8   : > { %7929 = vmatpush1.bf16.msra.mxu1 %v11581_v54  ;;  %v1462_v15 = vld [vmem:[%s13603_s2 + $0x1db8] sm:$0xff] }
 0x4c9   : > { %7930 = vmatprep.subr.bf16.mxu1 %v11590_v27  ;;  %v11774_v25 = vcombine.high %v1458_v45, %v1462_v15  ;;  %v1338_v54 = vld [vmem:[%s13603_s2 + $0x19d8] sm:$0xff] }
 0x4ca   : > { %7890 = vmatpush1.bf16.msra.mxu0 %v11461_v31  ;;  %v1342_v26 = vld [vmem:[%s13603_s2 + $0x19f8] sm:$0xff]  ;;  %v499_v31 = vld [vmem:[#allocation2 + $0x20] sm:$0xff] }
 0x4cb   : > { %7941 = vmatprep.subr.bf16.mxu0 %v11598_v33  ;;  %v1466_v41 = vld [vmem:[%s13603_s2 + $0x1dd8] sm:$0xff] }
 0x4cc   : > { %7931 = vmatpush1.bf16.msra.mxu1 %v11589_v32  ;;  %v1470_v29 = vld [vmem:[%s13603_s2 + $0x1df8] sm:$0xff] }
 0x4cd   : > { %7982 = vmatprep.subr.bf16.mxu1 %v11726_v34  ;;  %7892 = vmatmul.mubr.bf16.vlgmr.msra.gmra.mrb[56].mxu0 %v13894_v5  ;;  %v1434_v5 = vld [vmem:[%s13603_s2 + $0x1cd8] sm:$0xff] }
 0x4ce   : > { %7942 = vmatpush1.bf16.msra.mxu0 %v11597_v39  ;;  %7973 = vmatprep.mubr.bf16.mxu0 %v13912_v16  ;;  %v11750_v2 = vcombine.high %v1434_v5, %v1438_v11  ;;  %v1446_v16 = vld [vmem:[%s13603_s2 + $0x1d38] sm:$0xff]  ;;  %v11773_v39 = vcombine.low %v1458_v45, %v1462_v15 }
 0x4cf   : > { %7933 = vmatmul.mubr.bf16.vlgmr.msra.gmra.mrb[56].mxu1 %v13903_v9  ;;  %7943 = vmatprep.subr.bf16.mxu0 %v11606_v47  ;;  %v11613_v9 = vcombine.low %v1298_v57, %v1302_v20  ;;  %v11758_v4 = vcombine.high %v1442_v0, %v1446_v16  ;;  %v11757_v12 = vcombine.low %v1442_v0, %v1446_v16  ;;  %v1346_v57 = vld [vmem:[%s13603_s2 + $0x1a18] sm:$0xff] }
 0x4d0   : > { %7983 = vmatpush1.bf16.msra.mxu1 %v11725_v42  ;;  %8014 = vmatprep.mubr.bf16.mxu1 %v13919_v19  ;;  %v11749_v19 = vcombine.low %v1434_v5, %v1438_v11  ;;  %v11654_v42 = vcombine.high %v1338_v54, %v1342_v26  ;;  %v1350_v20 = vld [vmem:[%s13603_s2 + $0x1a38] sm:$0xff] }
 0x4d1   : > { %7984 = vmatprep.subr.bf16.mxu1 %v11734_v44  ;;  %v1474_v49 = vld [vmem:[%s13603_s2 + $0x1e18] sm:$0xff]  ;;  %v11662_v21 = vcombine.high %v1346_v57, %v1350_v20 }
 0x4d2   : > { %7944 = vmatpush1.bf16.msra.mxu0 %v11605_v51  ;;  %v1478_v51 = vld [vmem:[%s13603_s2 + $0x1e38] sm:$0xff] }
 0x4d3   : > { %7945 = vmatprep.subr.bf16.mxu0 %v11614_v17  ;;  %v11653_v17 = vcombine.low %v1338_v54, %v1342_v26  ;;  %v11790_v8 = vcombine.high %v1474_v49, %v1478_v51  ;;  %v1354_v5 = vld [vmem:[%s13603_s2 + $0x1a58] sm:$0xff] }
 0x4d4   : > { %7985 = vmatpush1.bf16.msra.mxu1 %v11733_v53  ;;  %v1358_v11 = vld [vmem:[%s13603_s2 + $0x1a78] sm:$0xff] }
 0x4d5   : > { %7986 = vmatprep.subr.bf16.mxu1 %v11742_v61  ;;  %v11781_v61 = vcombine.low %v1466_v41, %v1470_v29  ;;  %v11670_v58 = vcombine.high %v1354_v5, %v1358_v11  ;;  %v1362_v0 = vld [vmem:[%s13603_s2 + $0x1a98] sm:$0xff] }
 0x4d6   : > { %7946 = vmatpush1.bf16.msra.mxu0 %v11613_v9  ;;  %v1482_v9 = vld [vmem:[%s13603_s2 + $0x1e58] sm:$0xff] }
 0x4d7   : > { %7947 = vmatprep.subr.bf16.mxu0 %v11622_v1  ;;  %v11661_v1 = vcombine.low %v1346_v57, %v1350_v20  ;;  %v1366_v16 = vld [vmem:[%s13603_s2 + $0x1ab8] sm:$0xff] }
 0x4d8   : > { %7987 = vmatpush1.bf16.msra.mxu1 %v11741_v56  ;;  %v1486_v56 = vld [vmem:[%s13603_s2 + $0x1e78] sm:$0xff]  ;;  %v11678_v6 = vcombine.high %v1362_v0, %v1366_v16 }
 0x4d9   : > { %7988 = vmatprep.subr.bf16.mxu1 %v11750_v2  ;;  %v11789_v2 = vcombine.low %v1474_v49, %v1478_v51  ;;  %v11798_v28 = vcombine.high %v1482_v9, %v1486_v56  ;;  %v1370_v7 = vld [vmem:[%s13603_s2 + $0x1ad8] sm:$0xff] }
 0x4da   : > { %7948 = vmatpush1.bf16.msra.mxu0 %v11621_v30  ;;  %v1490_v30 = vld [vmem:[%s13603_s2 + $0x1e98] sm:$0xff] }
 0x4db   : > { %7949 = vmatprep.subr.bf16.mxu0 %v11630_v3  ;;  %v11669_v3 = vcombine.low %v1354_v5, %v1358_v11  ;;  %v1374_v63 = vld [vmem:[%s13603_s2 + $0x1af8] sm:$0xff] }
 0x4dc   : > { %7989 = vmatpush1.bf16.msra.mxu1 %v11749_v19  ;;  %v1494_v19 = vld [vmem:[%s13603_s2 + $0x1eb8] sm:$0xff]  ;;  %v11686_v38 = vcombine.high %v1370_v7, %v1374_v63 }
 0x4dd   : > { %7990 = vmatprep.subr.bf16.mxu1 %v11758_v4  ;;  %v11797_v4 = vcombine.low %v1482_v9, %v1486_v56  ;;  %v11806_v62 = vcombine.high %v1490_v30, %v1494_v19  ;;  %v1378_v45 = vld [vmem:[%s13603_s2 + $0x1b18] sm:$0xff] }
 0x4de   : > { %7950 = vmatpush1.bf16.msra.mxu0 %v11629_v10  ;;  %v1498_v10 = vld [vmem:[%s13603_s2 + $0x1ed8] sm:$0xff] }
 0x4df   : > { %7951 = vmatprep.subr.bf16.mxu0 %v11638_v59  ;;  %v11677_v59 = vcombine.low %v1362_v0, %v1366_v16  ;;  %v1382_v15 = vld [vmem:[%s13603_s2 + $0x1b38] sm:$0xff] }
 0x4e0   : > { %7991 = vmatpush1.bf16.msra.mxu1 %v11757_v12  ;;  %v7647_v24 = vpop.f32.mrb[44].mxu0  ;;  %v1502_v12 = vld [vmem:[%s13603_s2 + $0x1ef8] sm:$0xff] }
 0x4e1   : > { %7992 = vmatprep.subr.bf16.mxu1 %v11766_v40  ;;  %v7648_v27 = vadd.f32 %v7647_v24, %v14748_v13  ;;  %v7649_v55 = vpop.f32.mrb[45].mxu0  ;;  %v11805_v40 = vcombine.low %v1490_v30, %v1494_v19  ;;  %v11814_v60 = vcombine.high %v1498_v10, %v1502_v12  ;;  %v11813_v24 = vcombine.low %v1498_v10, %v1502_v12  ;;  %v1386_v26 = vld [vmem:[%s13603_s2 + $0x1b58] sm:$0xff] }
 0x4e2   : > { %v7688_v37 = vpop.f32.mrb[44].mxu1  ;;  %v7650_v32 = vadd.f32 %v7649_v55, %v14750_v14  ;;  %v7651_v34 = vpop.f32.mrb[46].mxu0  ;;  %7952 = vmatpush1.bf16.msra.mxu0 %v11637_v43  ;;  %v11782_v14 = vcombine.high %v1466_v41, %v1470_v29  ;;  %v1506_v43 = vld [vmem:[%s13603_s2 + $0x1f18] sm:$0xff]  ;;  %v11693_v41 = vcombine.low %v1378_v45, %v1382_v15 }
 0x4e3   : > { %v7690_v33 = vpop.f32.mrb[45].mxu1  ;;  %v7689_v48 = vadd.f32 %v7688_v37, %v7648_v27  ;;  %v7652_v13 = vpop.f32.mrb[47].mxu0  ;;  %7953 = vmatprep.subr.bf16.mxu0 %v11646_v22  ;;  %v11685_v22 = vcombine.low %v1370_v7, %v1374_v63  ;;  %v1390_v27 = vld [vmem:[%s13603_s2 + $0x1b78] sm:$0xff] }
 0x4e4   : > { %v7692_v50 = vpop.f32.mrb[46].mxu1  ;;  %7993 = vmatpush1.bf16.msra.mxu1 %v11765_v18  ;;  %v7691_v47 = vadd.f32 %v7690_v33, %v7650_v32  ;;  %v1510_v18 = vld [vmem:[%s13603_s2 + $0x1f38] sm:$0xff] }
 0x4e5   : > { %v7693_v44 = vpop.f32.mrb[47].mxu1  ;;  %7994 = vmatprep.subr.bf16.mxu1 %v11774_v25  ;;  %v8027_v46 = vadd.f32 %v7689_v48, %v499_v31  ;;  %v11694_v25 = vcombine.high %v1378_v45, %v1382_v15  ;;  %v11822_v54 = vcombine.high %v1506_v43, %v1510_v18  ;;  %v1514_v37 = vld [vmem:[%s13603_s2 + $0x1f58] sm:$0xff]  ;;  %v11821_v29 = vcombine.low %v1506_v43, %v1510_v18 }
 0x4e6   : > { %v8028_v53 = vadd.f32 %v7691_v47, %v500_v36  ;;  %7954 = vmatpush1.bf16.msra.mxu0 %v11645_v35  ;;  %v1518_v55 = vld [vmem:[%s13603_s2 + $0x1f78] sm:$0xff]  ;;  %v11702_v31 = vcombine.high %v1386_v26, %v1390_v27  ;;  %v11701_v36 = vcombine.low %v1386_v26, %v1390_v27  ;;  %v501_v26 = vld [vmem:[#allocation2 + $0x30] sm:$0xff] }
 0x4e7   : > { %8035 = vst [vmem:[#allocation2 + $0x20] sm:$0xff] %v8027_v46  ;;  %7955 = vmatprep.subr.bf16.mxu0 %v11654_v42  ;;  %v11830_v32 = vcombine.high %v1514_v37, %v1518_v55  ;;  %v1394_v33 = vld [vmem:[%s13603_s2 + $0x1b98] sm:$0xff]  ;;  %v11829_v50 = vcombine.low %v1514_v37, %v1518_v55 }
 0x4e8   : > { %7995 = vmatpush1.bf16.msra.mxu1 %v11773_v39  ;;  %8036 = vst [vmem:[#allocation2 + $0x28] sm:$0xff] %v8028_v53  ;;  %v1398_v34 = vld [vmem:[%s13603_s2 + $0x1bb8] sm:$0xff] }
 0x4e9   : > { %7996 = vmatprep.subr.bf16.mxu1 %v11782_v14  ;;  %v1522_v35 = vld [vmem:[%s13603_s2 + $0x1f98] sm:$0xff]  ;;  %v11710_v13 = vcombine.high %v1394_v33, %v1398_v34  ;;  %v11709_v57 = vcombine.low %v1394_v33, %v1398_v34 }
 0x4ea   : > { %7956 = vmatpush1.bf16.msra.mxu0 %v11653_v17  ;;  %v1526_v48 = vld [vmem:[%s13603_s2 + $0x1fb8] sm:$0xff] }
 0x4eb   : > { %7957 = vmatprep.subr.bf16.mxu0 %v11662_v21  ;;  %v11838_v39 = vcombine.high %v1522_v35, %v1526_v48  ;;  %v1402_v42 = vld [vmem:[%s13603_s2 + $0x1bd8] sm:$0xff]  ;;  %v11837_v20 = vcombine.low %v1522_v35, %v1526_v48 }
 0x4ec   : > { %7997 = vmatpush1.bf16.msra.mxu1 %v11781_v61  ;;  %v1406_v47 = vld [vmem:[%s13603_s2 + $0x1bf8] sm:$0xff] }
 0x4ed   : > { %7998 = vmatprep.subr.bf16.mxu1 %v11790_v8  ;;  %v1530_v44 = vld [vmem:[%s13603_s2 + $0x1fd8] sm:$0xff]  ;;  %v11718_v46 = vcombine.high %v1402_v42, %v1406_v47  ;;  %v11717_v51 = vcombine.low %v1402_v42, %v1406_v47 }
 0x4ee   : > { %7958 = vmatpush1.bf16.msra.mxu0 %v11661_v1  ;;  %v1534_v14 = vld [vmem:[%s13603_s2 + $0x1ff8] sm:$0xff] }
 0x4ef   : > { %7959 = vmatprep.subr.bf16.mxu0 %v11670_v58  ;;  %v11846_v49 = vcombine.high %v1530_v44, %v1534_v14  ;;  %v11845_v53 = vcombine.low %v1530_v44, %v1534_v14  ;;  %v12431_v42 = vld [vmem:[#allocation10 + $0x24] ss:$16 sps:$4 sm:$0xff] (!%p11847_p9)   ;;  %v12435_v44 = vld [vmem:[#allocation10 + $0x20] ss:$16 sps:$4 sm:$0xff] (!%p11847_p9)  }
 0x4f0   : > { %7999 = vmatpush1.bf16.msra.mxu1 %v11789_v2  ;;  %v12433_v47 = vld [vmem:[#allocation10 + $0x224] ss:$16 sps:$4 sm:$0xff] (!%p11847_p9)   ;;  %v12436_v14 = vld [vmem:[#allocation10 + $0x220] ss:$16 sps:$4 sm:$0xff] (!%p11847_p9)  }
 0x4f1   : > { %8000 = vmatprep.subr.bf16.mxu1 %v11798_v28 }
 0x4f2   : > { %7960 = vmatpush1.bf16.msra.mxu0 %v11669_v3 }
 0x4f3   : > { %7961 = vmatprep.subr.bf16.mxu0 %v11678_v6 }
 0x4f4   : > { %8001 = vmatpush1.bf16.msra.mxu1 %v11797_v4 }
 0x4f5   : > { %8002 = vmatprep.subr.bf16.mxu1 %v11806_v62 }
 0x4f6   : > { %7962 = vmatpush1.bf16.msra.mxu0 %v11677_v59 }
 0x4f7   : > { %7963 = vmatprep.subr.bf16.mxu0 %v11686_v38 }
 0x4f8   : > { %8003 = vmatpush1.bf16.msra.mxu1 %v11805_v40 }
 0x4f9   : > { %8004 = vmatprep.subr.bf16.mxu1 %v11814_v60 }
 0x4fa   : > { %7964 = vmatpush1.bf16.msra.mxu0 %v11685_v22 }
 0x4fb   : > { %7965 = vmatprep.subr.bf16.mxu0 %v11694_v25 }
 0x4fc   : > { %8005 = vmatpush1.bf16.msra.mxu1 %v11813_v24 }
 0x4fd   : > { %8006 = vmatprep.subr.bf16.mxu1 %v11822_v54 }
 0x4fe   : > { %7966 = vmatpush1.bf16.msra.mxu0 %v11693_v41 }
 0x4ff   : > { %7967 = vmatprep.subr.bf16.mxu0 %v11702_v31 }
 0x500   : > { %8007 = vmatpush1.bf16.msra.mxu1 %v11821_v29  ;;  %v502_v29 = vld [vmem:[#allocation2 + $0x38] sm:$0xff] }
 0x501   : > { %8008 = vmatprep.subr.bf16.mxu1 %v11830_v32 }
 0x502   : > { %7968 = vmatpush1.bf16.msra.mxu0 %v11701_v36  ;;  %v12425_v36 = vld [vmem:[#allocation10 + $0x4] ss:$16 sps:$4 sm:$0xff] (!%p11847_p9)  }
 0x503   : > { %7969 = vmatprep.subr.bf16.mxu0 %v11710_v13  ;;  %v12429_v13 = vld [vmem:[#allocation10] ss:$16 sps:$4 sm:$0xff] (!%p11847_p9)  }
 0x504   : > { %8009 = vmatpush1.bf16.msra.mxu1 %v11829_v50  ;;  %v12427_v50 = vld [vmem:[#allocation10 + $0x204] ss:$16 sps:$4 sm:$0xff] (!%p11847_p9)  }
 0x505   : > { %8010 = vmatprep.subr.bf16.mxu1 %v11838_v39  ;;  %v12430_v39 = vld [vmem:[#allocation10 + $0x200] ss:$16 sps:$4 sm:$0xff] (!%p11847_p9)  }
 0x506   : > { %7970 = vmatpush1.bf16.msra.mxu0 %v11709_v57  ;;  %v12437_v57 = vld [vmem:[#allocation10 + $0x44] ss:$16 sps:$4 sm:$0xff] (!%p11847_p9)  }
 0x507   : > { %7971 = vmatprep.subr.bf16.mxu0 %v11718_v46  ;;  %v12441_v46 = vld [vmem:[#allocation10 + $0x40] ss:$16 sps:$4 sm:$0xff] (!%p11847_p9)  }
 0x508   : > { %8011 = vmatpush1.bf16.msra.mxu1 %v11837_v20  ;;  %v12439_v20 = vld [vmem:[#allocation10 + $0x244] ss:$16 sps:$4 sm:$0xff] (!%p11847_p9)  }
 0x509   : > { %8012 = vmatprep.subr.bf16.mxu1 %v11846_v49  ;;  %v12442_v49 = vld [vmem:[#allocation10 + $0x240] ss:$16 sps:$4 sm:$0xff] (!%p11847_p9)  }
 0x50a   : > { %7972 = vmatpush1.bf16.msra.mxu0 %v11717_v51  ;;  %v12443_v51 = vld [vmem:[#allocation10 + $0x64] ss:$16 sps:$4 sm:$0xff] (!%p11847_p9)  }
 0x50b   : > { %9732 = vmatprep.subr.bf16.mxu0 (!%p11847_p9), %v12427_v50 }
 0x50c   : > { %8013 = vmatpush1.bf16.msra.mxu1 %v11845_v53  ;;  %v12445_v53 = vld [vmem:[#allocation10 + $0x264] ss:$16 sps:$4 sm:$0xff] (!%p11847_p9)  }
 0x50d   : > { %7974 = vmatmul.mubr.bf16.vlgmr.msra.gmra.mrb[60].mxu0 %v13984_v23  ;;  %9691 = vmatprep.subr.bf16.mxu1 (!%p11847_p9), %v12425_v36  ;;  %v12502_v36 = vld [vmem:[#allocation10 + $0x380] ss:$16 sps:$4 sm:$0xff] (!%p11847_p9)  }
 0x50e   : > { %9733 = vmatpush1.bf16.msra.mxu0 (!%p11847_p9), %v12430_v39  ;;  %v12503_v39 = vld [vmem:[#allocation10 + $0x1a4] ss:$16 sps:$4 sm:$0xff] (!%p11847_p9)  }
 0x50f   : > { %8015 = vmatmul.mubr.bf16.vlgmr.msra.gmra.mrb[60].mxu1 %v13990_v52  ;;  %9734 = vmatprep.subr.bf16.mxu0 (!%p11847_p9), %v12433_v47 }
 0x510   : > { %9692 = vmatpush1.bf16.msra.mxu1 (!%p11847_p9), %v12429_v13 }
 0x511   : > { %9693 = vmatprep.subr.bf16.mxu1 (!%p11847_p9), %v12431_v42  ;;  %v12505_v42 = vld [vmem:[#allocation10 + $0x3a4] ss:$16 sps:$4 sm:$0xff] (!%p11847_p9)  }
 0x512   : > { %9735 = vmatpush1.bf16.msra.mxu0 (!%p11847_p9), %v12436_v14 }
 0x513   : > { %9736 = vmatprep.subr.bf16.mxu0 (!%p11847_p9), %v12439_v20 }
 0x514   : > { %9694 = vmatpush1.bf16.msra.mxu1 (!%p11847_p9), %v12435_v44 }
 0x515   : > { %9695 = vmatprep.subr.bf16.mxu1 (!%p11847_p9), %v12437_v57  ;;  %v8043_v57 = vld [vmem:[#allocation2] sm:$0xff] (!%p11847_p9) }
 0x516   : > { %9737 = vmatpush1.bf16.msra.mxu0 (!%p11847_p9), %v12442_v49 }
 0x517   : > { %9738 = vmatprep.subr.bf16.mxu0 (!%p11847_p9), %v12445_v53 }
 0x518   : > { %9696 = vmatpush1.bf16.msra.mxu1 (!%p11847_p9), %v12441_v46  ;;  %v8045_v46 = vld [vmem:[#allocation2 + $0x10] sm:$0xff] (!%p11847_p9) }
 0x519   : > { %9697 = vmatprep.subr.bf16.mxu1 (!%p11847_p9), %v12443_v51  ;;  %v12507_v51 = vld [vmem:[#allocation10 + $0x1a0] ss:$16 sps:$4 sm:$0xff] (!%p11847_p9)  }
 0x520   : > { %v7729_v17 = vpop.f32.mrb[48].mxu0 }
 0x521   : > { %v7731_v21 = vpop.f32.mrb[49].mxu0 }
 0x522   : > { %v7770_v61 = vpop.f32.mrb[48].mxu1  ;;  %v7733_v11 = vpop.f32.mrb[50].mxu0 }
 0x523   : > { %v7771_v8 = vadd.f32 %v7770_v61, %v7729_v17  ;;  %v7772_v5 = vpop.f32.mrb[49].mxu1  ;;  %v7734_v1 = vpop.f32.mrb[51].mxu0  ;;  %v12447_v17 = vld [vmem:[#allocation10 + $0x60] ss:$16 sps:$4 sm:$0xff] (!%p11847_p9)  }
 0x524   : > { %v7773_v9 = vadd.f32 %v7772_v5, %v7731_v21  ;;  %v7774_v56 = vpop.f32.mrb[50].mxu1  ;;  %v12448_v61 = vld [vmem:[#allocation10 + $0x260] ss:$16 sps:$4 sm:$0xff] (!%p11847_p9)   ;;  %v12449_v21 = vld [vmem:[#allocation10 + $0x84] ss:$16 sps:$4 sm:$0xff] (!%p11847_p9)   ;;  %9698 = vmatpush1.bf16.msra.mxu1 (!%p11847_p9), %v12447_v17 }
 0x525   : > { %v7775_v2 = vpop.f32.mrb[51].mxu1  ;;  %v12453_v5 = vld [vmem:[#allocation10 + $0x80] ss:$16 sps:$4 sm:$0xff] (!%p11847_p9)   ;;  %9739 = vmatpush1.bf16.msra.mxu0 (!%p11847_p9), %v12448_v61  ;;  %9699 = vmatprep.subr.bf16.mxu1 (!%p11847_p9), %v12449_v21  ;;  %v12457_v56 = vld [vmem:[#allocation10 + $0x2a4] ss:$16 sps:$4 sm:$0xff] (!%p11847_p9)  }
 0x526   : > { %v12454_v11 = vld [vmem:[#allocation10 + $0x280] ss:$16 sps:$4 sm:$0xff] (!%p11847_p9)   ;;  %v12509_v21 = vld [vmem:[#allocation10 + $0x1c4] ss:$16 sps:$4 sm:$0xff] (!%p11847_p9)  }
 0x527   : > { %v12459_v1 = vld [vmem:[#allocation10 + $0xa0] ss:$16 sps:$4 sm:$0xff] (!%p11847_p9)  }
 0x528   : > { %9700 = vmatpush1.bf16.msra.mxu1 (!%p11847_p9), %v12453_v5  ;;  %v12460_v2 = vld [vmem:[#allocation10 + $0x2a0] ss:$16 sps:$4 sm:$0xff] (!%p11847_p9)  }
 0x529   : > { %v12508_v61 = vld [vmem:[#allocation10 + $0x3a0] ss:$16 sps:$4 sm:$0xff] (!%p11847_p9)  }
 0x560   : > { %v7811_v58 = vpop.f32.mrb[52].mxu0 }
 0x561   : > { %v7812_v28 = vadd.f32 %v7811_v58, %v7771_v8  ;;  %v7813_v16 = vpop.f32.mrb[53].mxu0  ;;  %v12451_v8 = vld [vmem:[#allocation10 + $0x284] ss:$16 sps:$4 sm:$0xff] (!%p11847_p9)  }
 0x562   : > { %v7852_v0 = vpop.f32.mrb[52].mxu1  ;;  %v7814_v30 = vadd.f32 %v7813_v16, %v7773_v9  ;;  %v7815_v3 = vpop.f32.mrb[54].mxu0  ;;  %v12455_v9 = vld [vmem:[#allocation10 + $0xa4] ss:$16 sps:$4 sm:$0xff] (!%p11847_p9)   ;;  %9740 = vmatprep.subr.bf16.mxu0 (!%p11847_p9), %v12451_v8  ;;  %v12466_v16 = vld [vmem:[#allocation10 + $0x2c0] ss:$16 sps:$4 sm:$0xff] (!%p11847_p9)  }
 0x563   : > { %v7854_v19 = vpop.f32.mrb[53].mxu1  ;;  %v7853_v23 = vadd.f32 %v7852_v0, %v7812_v28  ;;  %v7816_v52 = vpop.f32.mrb[55].mxu0  ;;  %9741 = vmatpush1.bf16.msra.mxu0 (!%p11847_p9), %v12454_v11  ;;  %v12461_v58 = vld [vmem:[#allocation10 + $0xc4] ss:$16 sps:$4 sm:$0xff] (!%p11847_p9)   ;;  %9701 = vmatprep.subr.bf16.mxu1 (!%p11847_p9), %v12455_v9  ;;  %v12465_v0 = vld [vmem:[#allocation10 + $0xc0] ss:$16 sps:$4 sm:$0xff] (!%p11847_p9)  }
 0x564   : > { %v7856_v4 = vpop.f32.mrb[54].mxu1  ;;  %v7855_v6 = vadd.f32 %v7854_v19, %v7814_v30  ;;  %9742 = vmatprep.subr.bf16.mxu0 (!%p11847_p9), %v12457_v56  ;;  %v12463_v28 = vld [vmem:[#allocation10 + $0x2c4] ss:$16 sps:$4 sm:$0xff] (!%p11847_p9)   ;;  %9702 = vmatpush1.bf16.msra.mxu1 (!%p11847_p9), %v12459_v1  ;;  %v12471_v3 = vld [vmem:[#allocation10 + $0xe0] ss:$16 sps:$4 sm:$0xff] (!%p11847_p9)  }
 0x565   : > { %v7857_v62 = vpop.f32.mrb[55].mxu1  ;;  %v12467_v30 = vld [vmem:[#allocation10 + $0xe4] ss:$16 sps:$4 sm:$0xff] (!%p11847_p9)   ;;  %9703 = vmatprep.subr.bf16.mxu1 (!%p11847_p9), %v12461_v58  ;;  %v12513_v56 = vld [vmem:[#allocation10 + $0x1c0] ss:$16 sps:$4 sm:$0xff] (!%p11847_p9)  }
 0x566   : > { %v12469_v19 = vld [vmem:[#allocation10 + $0x2e4] ss:$16 sps:$4 sm:$0xff] (!%p11847_p9)   ;;  %v12478_v62 = vld [vmem:[#allocation10 + $0x300] ss:$16 sps:$4 sm:$0xff] (!%p11847_p9)  }
 0x567   : > { %9743 = vmatpush1.bf16.msra.mxu0 (!%p11847_p9), %v12460_v2  ;;  %v12473_v4 = vld [vmem:[#allocation10 + $0x104] ss:$16 sps:$4 sm:$0xff] (!%p11847_p9)   ;;  %v12514_v1 = vld [vmem:[#allocation10 + $0x3c0] ss:$16 sps:$4 sm:$0xff] (!%p11847_p9)  }
 0x568   : > { %9744 = vmatprep.subr.bf16.mxu0 (!%p11847_p9), %v12463_v28  ;;  %9704 = vmatpush1.bf16.msra.mxu1 (!%p11847_p9), %v12465_v0  ;;  %v12475_v52 = vld [vmem:[#allocation10 + $0x304] ss:$16 sps:$4 sm:$0xff] (!%p11847_p9)  }
 0x569   : > { %9705 = vmatprep.subr.bf16.mxu1 (!%p11847_p9), %v12467_v30  ;;  %v12511_v9 = vld [vmem:[#allocation10 + $0x3c4] ss:$16 sps:$4 sm:$0xff] (!%p11847_p9)  }
 0x56a   : > { %v12515_v2 = vld [vmem:[#allocation10 + $0x1e4] ss:$16 sps:$4 sm:$0xff] (!%p11847_p9)  }
 0x56b   : > { %9745 = vmatpush1.bf16.msra.mxu0 (!%p11847_p9), %v12466_v16  ;;  %v12517_v30 = vld [vmem:[#allocation10 + $0x3e4] ss:$16 sps:$4 sm:$0xff] (!%p11847_p9)  }
 0x56c   : > { %9746 = vmatprep.subr.bf16.mxu0 (!%p11847_p9), %v12469_v19  ;;  %9706 = vmatpush1.bf16.msra.mxu1 (!%p11847_p9), %v12471_v3 }
 0x56d   : > { %9707 = vmatprep.subr.bf16.mxu1 (!%p11847_p9), %v12473_v4  ;;  %v12520_v4 = vld [vmem:[#allocation10 + $0x3e0] ss:$16 sps:$4 sm:$0xff] (!%p11847_p9)  }
 0x5a0   : > { %v7893_v7 = vpop.f32.mrb[56].mxu0 }
 0x5a1   : > { %v7894_v63 = vadd.f32 %v7893_v7, %v7853_v23  ;;  %v7895_v12 = vpop.f32.mrb[57].mxu0  ;;  %v12472_v23 = vld [vmem:[#allocation10 + $0x2e0] ss:$16 sps:$4 sm:$0xff] (!%p11847_p9)   ;;  %v12479_v7 = vld [vmem:[#allocation10 + $0x124] ss:$16 sps:$4 sm:$0xff] (!%p11847_p9)  }
 0x5a2   : > { %v7934_v10 = vpop.f32.mrb[56].mxu1  ;;  %v7896_v59 = vadd.f32 %v7895_v12, %v7855_v6  ;;  %v7897_v38 = vpop.f32.mrb[58].mxu0  ;;  %v12477_v6 = vld [vmem:[#allocation10 + $0x100] ss:$16 sps:$4 sm:$0xff] (!%p11847_p9)   ;;  %9747 = vmatpush1.bf16.msra.mxu0 (!%p11847_p9), %v12472_v23 }
 0x5a3   : > { %v7936_v40 = vpop.f32.mrb[57].mxu1  ;;  %v7935_v60 = vadd.f32 %v7934_v10, %v7894_v63  ;;  %v7898_v15 = vpop.f32.mrb[59].mxu0  ;;  %v8053_v63 = vlaneseq (!%p11847_p9)  ;;  %9748 = vmatprep.subr.bf16.mxu0 (!%p11847_p9), %v12475_v52  ;;  %v12481_v10 = vld [vmem:[#allocation10 + $0x324] ss:$16 sps:$4 sm:$0xff] (!%p11847_p9)   ;;  %v12483_v12 = vld [vmem:[#allocation10 + $0x120] ss:$16 sps:$4 sm:$0xff] (!%p11847_p9)   ;;  %9708 = vmatpush1.bf16.msra.mxu1 (!%p11847_p9), %v12477_v6 }
 0x5a4   : > { %v7938_v45 = vpop.f32.mrb[58].mxu1  ;;  %v7937_v43 = vadd.f32 %v7936_v40, %v7896_v59  ;;  %v12484_v59 = vld [vmem:[#allocation10 + $0x320] ss:$16 sps:$4 sm:$0xff] (!%p11847_p9)   ;;  %v12485_v40 = vld [vmem:[#allocation10 + $0x144] ss:$16 sps:$4 sm:$0xff] (!%p11847_p9)   ;;  %9709 = vmatprep.subr.bf16.mxu1 (!%p11847_p9), %v12479_v7 }
 0x5a5   : > { %v7939_v18 = vpop.f32.mrb[59].mxu1  ;;  %v14857_v38 = vshrl.u32 (!%p11847_p9), %v8053_v63, 7  ;;  %v12489_v45 = vld [vmem:[#allocation10 + $0x140] ss:$16 sps:$4 sm:$0xff] (!%p11847_p9)   ;;  %v12523_v6 = vld [vmem:[#allocation10 + $0x404] ss:$16 sps:$4 sm:$0xff] (!%p11847_p9)  }
 0x5a6   : > { %9749 = vmatpush1.bf16.msra.mxu0 (!%p11847_p9), %v12478_v62  ;;  %v12490_v15 = vld [vmem:[#allocation10 + $0x340] ss:$16 sps:$4 sm:$0xff] (!%p11847_p9)   ;;  %v12526_v7 = vld [vmem:[#allocation10 + $0xc] ss:$16 sps:$4 sm:$0xff] (!%p11847_p9)  }
 0x5a7   : > { %9750 = vmatprep.subr.bf16.mxu0 (!%p11847_p9), %v12481_v10  ;;  %9710 = vmatpush1.bf16.msra.mxu1 (!%p11847_p9), %v12483_v12  ;;  %v14860_v18 = vsub.s32 (!%p11847_p9), 1, %v14857_v38  ;;  %v8083_v58 = vsub.s32 (!%p11847_p9), 7, %v14857_v38  ;;  %v8079_v16 = vsub.s32 (!%p11847_p9), 6, %v14857_v38  ;;  %v12519_v23 = vld [vmem:[#allocation10 + $0x1e0] ss:$16 sps:$4 sm:$0xff] (!%p11847_p9)  }
 0x5a8   : > { %9711 = vmatprep.subr.bf16.mxu1 (!%p11847_p9), %v12485_v40  ;;  %v12521_v10 = vld [vmem:[#allocation10 + $0x400] ss:$16 sps:$4 sm:$0xff] (!%p11847_p9)   ;;  %v12529_v40 = vld [vmem:[#allocation10 + $0x424] ss:$16 sps:$4 sm:$0xff] (!%p11847_p9)  }
 0x5aa   : > { %9751 = vmatpush1.bf16.msra.mxu0 (!%p11847_p9), %v12484_v59  ;;  %v12524_v59 = vld [vmem:[#allocation10 + $0x8] ss:$16 sps:$4 sm:$0xff] (!%p11847_p9)  }
 0x5ab   : > { %9712 = vmatpush1.bf16.msra.mxu1 (!%p11847_p9), %v12489_v45  ;;  %v12527_v45 = vld [vmem:[#allocation10 + $0x420] ss:$16 sps:$4 sm:$0xff] (!%p11847_p9)  }
 0x5e0   : > { %v7975_v22 = vpop.f32.mrb[60].mxu0 }
 0x5e1   : > { %v7976_v24 = vadd.f32 %v7975_v22, %v7935_v60  ;;  %v7977_v54 = vpop.f32.mrb[61].mxu0  ;;  %v12487_v60 = vld [vmem:[#allocation10 + $0x344] ss:$16 sps:$4 sm:$0xff] (!%p11847_p9)   ;;  %v8067_v22 = vsub.s32 (!%p11847_p9), 3, %v14857_v38 }
 0x5e2   : > { %v8016_v25 = vpop.f32.mrb[60].mxu1  ;;  %v7978_v27 = vadd.f32 %v7977_v54, %v7937_v43  ;;  %v7979_v55 = vpop.f32.mrb[62].mxu0  ;;  %8042 = sbr.rel (%p11847_p9) target bundleno = 2459 (0x99b), region = 96  ;;  %v12491_v43 = vld [vmem:[#allocation10 + $0x164] ss:$16 sps:$4 sm:$0xff] (!%p11847_p9)   ;;  %9752 = vmatprep.subr.bf16.mxu0 (!%p11847_p9), %v12487_v60 }
 0x5e3   : > { %v8018_v37 = vpop.f32.mrb[61].mxu1  ;;  %v8017_v41 = vadd.f32 %v8016_v25, %v7976_v24  ;;  %v7980_v32 = vpop.f32.mrb[63].mxu0  ;;  %v12493_v24 = vld [vmem:[#allocation10 + $0x364] ss:$16 sps:$4 sm:$0xff] (!%p11847_p9)   ;;  %v8071_v25 = vsub.s32 (!%p11847_p9), 4, %v14857_v38  ;;  %9753 = vmatpush1.bf16.msra.mxu0 (!%p11847_p9), %v12490_v15  ;;  %9713 = vmatprep.subr.bf16.mxu1 (!%p11847_p9), %v12491_v43 }
 0x5e4   : > { %v8020_v31 = vpop.f32.mrb[62].mxu1  ;;  %v8019_v33 = vadd.f32 %v8018_v37, %v7978_v27  ;;  %v12495_v54 = vld [vmem:[#allocation10 + $0x160] ss:$16 sps:$4 sm:$0xff] (!%p11847_p9)   ;;  %v14864_v37 = vld [vmem:[#allocation9] sm:$0xff] (!%p11847_p9)  ;;  %9754 = vmatprep.subr.bf16.mxu0 (!%p11847_p9), %v12493_v24  ;;  %v12535_v43 = vld [vmem:[#allocation10 + $0x444] ss:$16 sps:$4 sm:$0xff] (!%p11847_p9)  }
 0x5e5   : > { %v8021_v34 = vpop.f32.mrb[63].mxu1  ;;  %v8029_v35 = vadd.f32 %v8017_v41, %v501_v26  ;;  %v12496_v26 = vld [vmem:[#allocation10 + $0x360] ss:$16 sps:$4 sm:$0xff] (!%p11847_p9)   ;;  %v12497_v41 = vld [vmem:[#allocation10 + $0x184] ss:$16 sps:$4 sm:$0xff] (!%p11847_p9)   ;;  %v14869_v31 = vsub.s32 (!%p11847_p9), 0, %v14857_v38  ;;  %v8068_v32 = vrot.slane (!%p11847_p9), %v14864_v37, %v8067_v22  ;;  %9714 = vmatpush1.bf16.msra.mxu1 (!%p11847_p9), %v12495_v54  ;;  %v14889_v19 = vrot.slane (!%p11847_p9), %v14864_v37, %v8083_v58 }
 0x5e6   : > { %v8030_v48 = vadd.f32 %v8019_v33, %v502_v29  ;;  %v8044_v27 = vld [vmem:[#allocation2 + $0x8] sm:$0xff] (!%p11847_p9)  ;;  %v8046_v55 = vld [vmem:[#allocation2 + $0x18] sm:$0xff] (!%p11847_p9)  ;;  %v8060_v29 = vrot.slane (!%p11847_p9), %v14864_v37, %v14860_v18  ;;  %v8063_v33 = vsub.s32 (!%p11847_p9), 2, %v14857_v38  ;;  %9715 = vmatprep.subr.bf16.mxu1 (!%p11847_p9), %v12497_v41  ;;  %v14892_v3 = vrot.slane (!%p11847_p9), %v14864_v37, %v8079_v16  ;;  %v12532_v60 = vld [vmem:[#allocation10 + $0x2c] ss:$16 sps:$4 sm:$0xff] (!%p11847_p9)  }
 0x5e7   : > { %8037 = vst [vmem:[#allocation2 + $0x30] sm:$0xff] %v8029_v35  ;;  %v12499_v34 = vld [vmem:[#allocation10 + $0x384] ss:$16 sps:$4 sm:$0xff] (!%p11847_p9)   ;;  %v14876_v35 = vrot.slane (!%p11847_p9), %v14864_v37, %v8071_v25  ;;  %v8096_v13 = vadd.f32 (!%p11847_p9), %v8068_v32, %v8046_v55  ;;  %9755 = vmatpush1.bf16.msra.mxu0 (!%p11847_p9), %v12496_v26  ;;  %v8056_v44 = vrot.slane (!%p11847_p9), %v14864_v37, %v14869_v31  ;;  %v12530_v15 = vld [vmem:[#allocation10 + $0x28] ss:$16 sps:$4 sm:$0xff] (!%p11847_p9)  }
 0x5e8   : > { %8038 = vst [vmem:[#allocation2 + $0x38] sm:$0xff] %v8030_v48  ;;  %v12501_v48 = vld [vmem:[#allocation10 + $0x180] ss:$16 sps:$4 sm:$0xff] (!%p11847_p9)   ;;  %v8094_v50 = vadd.f32 (!%p11847_p9), %v8060_v29, %v8044_v27  ;;  %v8064_v14 = vrot.slane (!%p11847_p9), %v14864_v37, %v8063_v33  ;;  %9756 = vmatprep.subr.bf16.mxu0 (!%p11847_p9), %v12499_v34  ;;  %v12538_v24 = vld [vmem:[#allocation10 + $0x4c] ss:$16 sps:$4 sm:$0xff] (!%p11847_p9)  }
 0x5e9   : > { %vm8104_vm1 = vcmp.ge.f32.partialorder %v8096_v13, 0.0  ;;  %v8112_v20 = vmul.f32 0.4, %v8096_v13  ;;  %9716 = vmatpush1.bf16.msra.mxu1 %v12501_v48  ;;  %v8093_v8 = vadd.f32 %v8056_v44, %v8043_v57  ;;  %v12533_v25 = vld [vmem:[#allocation10 + $0x440] ss:$16 sps:$4 sm:$0xff]  }
 0x5ea   : > { %vm8102_vm0 = vcmp.ge.f32.partialorder %v8094_v50, 0.0  ;;  %v8110_v47 = vmul.f32 0.4, %v8094_v50  ;;  %v8095_v11 = vadd.f32 %v8064_v14, %v8045_v46  ;;  %9717 = vmatprep.subr.bf16.mxu1 %v12503_v39  ;;  %v12536_v54 = vld [vmem:[#allocation10 + $0x48] ss:$16 sps:$4 sm:$0xff]  }
 0x5eb   : > { %v8120_v17 = vsel %vm8104_vm1, %v8096_v13, %v8112_v20  ;;  %9757 = vmatpush1.bf16.msra.mxu0 %v12502_v36  ;;  %v8109_v28 = vmul.f32 0.4, %v8093_v8  ;;  %vm8101_vm2 = vcmp.ge.f32.partialorder %v8093_v8, 0.0  ;;  %v12541_v26 = vld [vmem:[#allocation10 + $0x464] ss:$16 sps:$4 sm:$0xff]   ;;  %v8075_v13 = vsub.s32 5, %v14857_v38 }
 0x5ec   : > { %v8118_v49 = vsel %vm8102_vm0, %v8094_v50, %v8110_v47  ;;  %v14883_v5 = vpack.c.bf16 %v8120_v17, %v8120_v17  ;;  %9758 = vmatprep.subr.bf16.mxu0 %v12505_v42  ;;  %v8111_v0 = vmul.f32 0.4, %v8095_v11  ;;  %vm8103_vm3 = vcmp.ge.f32.partialorder %v8095_v11, 0.0  ;;  %v12544_v27 = vld [vmem:[#allocation10 + $0x6c] ss:$16 sps:$4 sm:$0xff]  }
 0x5ed   : > { %v8126_v53 = vpack.c.bf16 %v8118_v49, %v8118_v49  ;;  %9718 = vmatpush1.bf16.msra.mxu1 %v12507_v51  ;;  %v8117_v52 = vsel %vm8101_vm2, %v8093_v8, %v8109_v28  ;;  %v12539_v55 = vld [vmem:[#allocation10 + $0x460] ss:$16 sps:$4 sm:$0xff]   ;;  %v12542_v41 = vld [vmem:[#allocation10 + $0x68] ss:$16 sps:$4 sm:$0xff]   ;;  %v12547_v29 = vld [vmem:[#allocation10 + $0x484] ss:$16 sps:$4 sm:$0xff]   ;;  %v8076_v14 = vrot.slane %v14864_v37, %v8075_v13 }
 0x5ee   : > { %9764 = vmatprep.mubr.bf16.mxu0 %v14883_v5  ;;  %9719 = vmatprep.subr.bf16.mxu1 %v12509_v21  ;;  %v8119_v62 = vsel %vm8103_vm3, %v8095_v11, %v8111_v0  ;;  %v14894_v63 = vpack.c.bf16 %v8117_v52, %v8117_v52  ;;  %v12550_v32 = vld [vmem:[#allocation10 + $0x8c] ss:$16 sps:$4 sm:$0xff]   ;;  %v12545_v34 = vld [vmem:[#allocation10 + $0x480] ss:$16 sps:$4 sm:$0xff]   ;;  %v12548_v48 = vld [vmem:[#allocation10 + $0x88] ss:$16 sps:$4 sm:$0xff]  }
 0x5ef   : > { %9723 = vmatprep.mubr.bf16.mxu1 %v8126_v53  ;;  %9759 = vmatpush1.bf16.msra.mxu0 %v12508_v61  ;;  %v14896_v12 = vpack.c.bf16 %v8119_v62, %v8119_v62  ;;  %v12553_v36 = vld [vmem:[#allocation10 + $0x4a4] ss:$16 sps:$4 sm:$0xff]   ;;  %v12556_v50 = vld [vmem:[#allocation10 + $0xac] ss:$16 sps:$4 sm:$0xff]   ;;  %v12551_v39 = vld [vmem:[#allocation10 + $0x4a0] ss:$16 sps:$4 sm:$0xff]  }
 0x5f0   : > { %9760 = vmatprep.subr.bf16.mxu0 %v12511_v9  ;;  %v12554_v42 = vld [vmem:[#allocation10 + $0xa8] ss:$16 sps:$4 sm:$0xff]   ;;  %v12559_v47 = vld [vmem:[#allocation10 + $0x4c4] ss:$16 sps:$4 sm:$0xff]   ;;  %v12562_v44 = vld [vmem:[#allocation10 + $0xcc] ss:$16 sps:$4 sm:$0xff]  }
 0x5f1   : > { %9720 = vmatpush1.bf16.msra.mxu1 %v12513_v56  ;;  %v12557_v57 = vld [vmem:[#allocation10 + $0x4c0] ss:$16 sps:$4 sm:$0xff]   ;;  %v12560_v20 = vld [vmem:[#allocation10 + $0xc8] ss:$16 sps:$4 sm:$0xff]   ;;  %v12565_v46 = vld [vmem:[#allocation10 + $0x4e4] ss:$16 sps:$4 sm:$0xff]  }
 0x5f2   : > { %9721 = vmatprep.subr.bf16.mxu1 %v12515_v2  ;;  %v12568_v49 = vld [vmem:[#allocation10 + $0xec] ss:$16 sps:$4 sm:$0xff]   ;;  %v8048_v51 = vld [vmem:[#allocation2 + $0x28] sm:$0xff]  ;;  %v12566_v61 = vld [vmem:[#allocation10 + $0xe8] ss:$16 sps:$4 sm:$0xff]  }
 0x5f3   : > { %9761 = vmatpush1.bf16.msra.mxu0 %v12514_v1  ;;  %v12563_v17 = vld [vmem:[#allocation10 + $0x4e0] ss:$16 sps:$4 sm:$0xff]   ;;  %v12571_v8 = vld [vmem:[#allocation10 + $0x504] ss:$16 sps:$4 sm:$0xff]   ;;  %v12574_v37 = vld [vmem:[#allocation10 + $0x10c] ss:$16 sps:$4 sm:$0xff]  }
 0x5f4   : > { %9762 = vmatprep.subr.bf16.mxu0 %v12517_v30  ;;  %v12569_v56 = vld [vmem:[#allocation10 + $0x500] ss:$16 sps:$4 sm:$0xff]   ;;  %v12572_v1 = vld [vmem:[#allocation10 + $0x108] ss:$16 sps:$4 sm:$0xff]   ;;  %v12577_v2 = vld [vmem:[#allocation10 + $0x524] ss:$16 sps:$4 sm:$0xff]  }
 0x5f5   : > { %9722 = vmatpush1.bf16.msra.mxu1 %v12519_v23  ;;  %v12580_v58 = vld [vmem:[#allocation10 + $0x12c] ss:$16 sps:$4 sm:$0xff]   ;;  %v12575_v28 = vld [vmem:[#allocation10 + $0x520] ss:$16 sps:$4 sm:$0xff]   ;;  %v12578_v0 = vld [vmem:[#allocation10 + $0x128] ss:$16 sps:$4 sm:$0xff]  }
 0x5f6   : > { %9855 = vmatprep.subr.bf16.mxu1 %v12526_v7  ;;  %v12583_v16 = vld [vmem:[#allocation10 + $0x544] ss:$16 sps:$4 sm:$0xff]   ;;  %v12586_v30 = vld [vmem:[#allocation10 + $0x14c] ss:$16 sps:$4 sm:$0xff]   ;;  %v12581_v23 = vld [vmem:[#allocation10 + $0x540] ss:$16 sps:$4 sm:$0xff]  }
 0x5f7   : > { %9763 = vmatpush1.bf16.msra.mxu0 %v12520_v4  ;;  %v12584_v4 = vld [vmem:[#allocation10 + $0x148] ss:$16 sps:$4 sm:$0xff]   ;;  %v12589_v52 = vld [vmem:[#allocation10 + $0x564] ss:$16 sps:$4 sm:$0xff]   ;;  %v12587_v62 = vld [vmem:[#allocation10 + $0x560] ss:$16 sps:$4 sm:$0xff]  }
 0x5f8   : > { %9773 = vmatprep.subr.bf16.mxu0 %v12523_v6  ;;  %9724 = vmatmul.mubr.bf16.vlgmr.msra.gmra.mrb[0].mxu1 %v14894_v63  ;;  %v12592_v6 = vld [vmem:[#allocation10 + $0x16c] ss:$16 sps:$4 sm:$0xff]   ;;  %v12590_v7 = vld [vmem:[#allocation10 + $0x168] ss:$16 sps:$4 sm:$0xff]  }
 0x5f9   : > { %9856 = vmatpush1.bf16.msra.mxu1 %v12524_v59  ;;  %9887 = vmatprep.mubr.bf16.mxu1 %v8126_v53  ;;  %v8098_v53 = vadd.f32 %v8076_v14, %v8048_v51  ;;  %v12598_v59 = vld [vmem:[#allocation10 + $0x18c] ss:$16 sps:$4 sm:$0xff]  }
 0x5fa   : > { %9765 = vmatmul.mubr.bf16.vlgmr.msra.gmra.mrb[0].mxu0 %v14896_v12  ;;  %9857 = vmatprep.subr.bf16.mxu1 %v12532_v60  ;;  %v12596_v60 = vld [vmem:[#allocation10 + $0x188] ss:$16 sps:$4 sm:$0xff]   ;;  %v12622_v13 = vld [vmem:[#allocation10 + $0x20c] ss:$16 sps:$4 sm:$0xff]  }
 0x5fb   : > { %9774 = vmatpush1.bf16.msra.mxu0 %v12521_v10  ;;  %vm8106_vm4 = vcmp.ge.f32.partialorder %v8098_v53, 0.0  ;;  %v8114_v21 = vmul.f32 0.4, %v8098_v53  ;;  %v12595_v10 = vld [vmem:[#allocation10 + $0x584] ss:$16 sps:$4 sm:$0xff]  }
 0x5fc   : > { %9775 = vmatprep.subr.bf16.mxu0 %v12529_v40  ;;  %v12593_v40 = vld [vmem:[#allocation10 + $0x580] ss:$16 sps:$4 sm:$0xff]   ;;  %v12628_v14 = vld [vmem:[#allocation10 + $0x22c] ss:$16 sps:$4 sm:$0xff]  }
 0x5fd   : > { %9858 = vmatpush1.bf16.msra.mxu1 %v12530_v15  ;;  %v8122_v11 = vsel %vm8106_vm4, %v8098_v53, %v8114_v21  ;;  %v12604_v15 = vld [vmem:[#allocation10 + $0x1ac] ss:$16 sps:$4 sm:$0xff]   ;;  %v12632_v21 = vld [vmem:[#allocation10 + $0x248] ss:$16 sps:$4 sm:$0xff]  }
 0x5fe   : > { %9859 = vmatprep.subr.bf16.mxu1 %v12538_v24  ;;  %v14902_v9 = vpack.c.bf16 %v8122_v11, %v8122_v11  ;;  %v12599_v24 = vld [vmem:[#allocation10 + $0x5a0] ss:$16 sps:$4 sm:$0xff]   ;;  %v12634_v51 = vld [vmem:[#allocation10 + $0x24c] ss:$16 sps:$4 sm:$0xff]  }
 0x5ff   : > { %9776 = vmatpush1.bf16.msra.mxu0 %v12527_v45  ;;  %v12601_v45 = vld [vmem:[#allocation10 + $0x5a4] ss:$16 sps:$4 sm:$0xff]  }
 0x600   : > { %9777 = vmatprep.subr.bf16.mxu0 %v12535_v43  ;;  %9805 = vmatprep.mubr.bf16.mxu0 %v14902_v9  ;;  %v8047_v43 = vld [vmem:[#allocation2 + $0x20] sm:$0xff]  ;;  %v10548_v38 = vld [vmem:[#allocation16 + $0xe8] sm:$0xff] }
 0x601   : > { %9860 = vmatpush1.bf16.msra.mxu1 %v12536_v54  ;;  %v8097_v54 = vadd.f32 %v14876_v35, %v8047_v43  ;;  %v12619_v35 = vld [vmem:[#allocation10 + $0x604] ss:$16 sps:$4 sm:$0xff]  }
 0x602   : > { %9861 = vmatprep.subr.bf16.mxu1 %v12544_v27  ;;  %v12610_v27 = vld [vmem:[#allocation10 + $0x1cc] ss:$16 sps:$4 sm:$0xff]   ;;  %v12673_v43 = vld [vmem:[#allocation10 + $0x724] ss:$16 sps:$4 sm:$0xff]  }
 0x603   : > { %9778 = vmatpush1.bf16.msra.mxu0 %v12533_v25  ;;  %v12602_v25 = vld [vmem:[#allocation10 + $0x1a8] ss:$16 sps:$4 sm:$0xff]   ;;  %vm8105_vm5 = vcmp.ge.f32.partialorder %v8097_v54, 0.0 }
 0x604   : > { %9779 = vmatprep.subr.bf16.mxu0 %v12541_v26  ;;  %v12607_v26 = vld [vmem:[#allocation10 + $0x5c4] ss:$16 sps:$4 sm:$0xff]  }
 0x605   : > { %9862 = vmatpush1.bf16.msra.mxu1 %v12542_v41  ;;  %v12608_v41 = vld [vmem:[#allocation10 + $0x1c8] ss:$16 sps:$4 sm:$0xff]  }
 0x606   : > { %9863 = vmatprep.subr.bf16.mxu1 %v12550_v32  ;;  %v12613_v32 = vld [vmem:[#allocation10 + $0x5e4] ss:$16 sps:$4 sm:$0xff]  }
 0x607   : > { %9780 = vmatpush1.bf16.msra.mxu0 %v12539_v55  ;;  %v12605_v55 = vld [vmem:[#allocation10 + $0x5c0] ss:$16 sps:$4 sm:$0xff]  }
 0x608   : > { %9781 = vmatprep.subr.bf16.mxu0 %v12547_v29  ;;  %v8113_v29 = vmul.f32 0.4, %v8097_v54 }
 0x609   : > { %9864 = vmatpush1.bf16.msra.mxu1 %v12548_v48  ;;  %v12611_v48 = vld [vmem:[#allocation10 + $0x5e0] ss:$16 sps:$4 sm:$0xff]  }
 0x60a   : > { %9865 = vmatprep.subr.bf16.mxu1 %v12556_v50  ;;  %v8121_v50 = vsel %vm8105_vm5, %v8097_v54, %v8113_v29  ;;  %v12674_v54 = vld [vmem:[#allocation10 + $0x328] ss:$16 sps:$4 sm:$0xff]   ;;  %v12685_v29 = vld [vmem:[#allocation10 + $0x764] ss:$16 sps:$4 sm:$0xff]  }
 0x60b   : > { %9782 = vmatpush1.bf16.msra.mxu0 %v12545_v34  ;;  %v12616_v34 = vld [vmem:[#allocation10 + $0x1ec] ss:$16 sps:$4 sm:$0xff]  }
 0x60c   : > { %9783 = vmatprep.subr.bf16.mxu0 %v12553_v36  ;;  %v12614_v36 = vld [vmem:[#allocation10 + $0x1e8] ss:$16 sps:$4 sm:$0xff]  }
 0x60d   : > { %9866 = vmatpush1.bf16.msra.mxu1 %v12554_v42  ;;  %v14906_v42 = vpack.c.bf16 %v8121_v50, %v8121_v50  ;;  %v12694_v50 = vld [vmem:[#allocation10 + $0x38c] ss:$16 sps:$4 sm:$0xff]  }
 0x60e   : > { %9867 = vmatprep.subr.bf16.mxu1 %v12562_v44  ;;  %v12625_v44 = vld [vmem:[#allocation10 + $0x624] ss:$16 sps:$4 sm:$0xff]  }
 0x60f   : > { %9784 = vmatpush1.bf16.msra.mxu0 %v12551_v39  ;;  %v12617_v39 = vld [vmem:[#allocation10 + $0x600] ss:$16 sps:$4 sm:$0xff]  }
 0x610   : > { %9785 = vmatprep.subr.bf16.mxu0 %v12559_v47  ;;  %v12620_v47 = vld [vmem:[#allocation10 + $0x208] ss:$16 sps:$4 sm:$0xff]  }
 0x611   : > { %9868 = vmatpush1.bf16.msra.mxu1 %v12560_v20  ;;  %v12626_v20 = vld [vmem:[#allocation10 + $0x228] ss:$16 sps:$4 sm:$0xff]  }
 0x612   : > { %9869 = vmatprep.subr.bf16.mxu1 %v12568_v49  ;;  %v8050_v49 = vld [vmem:[#allocation2 + $0x38] sm:$0xff] }
 0x613   : > { %9786 = vmatpush1.bf16.msra.mxu0 %v12557_v57  ;;  %v12623_v57 = vld [vmem:[#allocation10 + $0x620] ss:$16 sps:$4 sm:$0xff]   ;;  %v8100_v53 = vadd.f32 %v14889_v19, %v8050_v49  ;;  %v12646_v19 = vld [vmem:[#allocation10 + $0x28c] ss:$16 sps:$4 sm:$0xff]  }
 0x614   : > { %9787 = vmatprep.subr.bf16.mxu0 %v12565_v46  ;;  %v12631_v46 = vld [vmem:[#allocation10 + $0x644] ss:$16 sps:$4 sm:$0xff]  }
 0x615   : > { %9870 = vmatpush1.bf16.msra.mxu1 %v12566_v61  ;;  %vm8108_vm6 = vcmp.ge.f32.partialorder %v8100_v53, 0.0  ;;  %v12629_v61 = vld [vmem:[#allocation10 + $0x640] ss:$16 sps:$4 sm:$0xff]  }
 0x616   : > { %9871 = vmatprep.subr.bf16.mxu1 %v12574_v37 }
 0x617   : > { %9788 = vmatpush1.bf16.msra.mxu0 %v12563_v17  ;;  %v8116_v17 = vmul.f32 0.4, %v8100_v53 }
 0x618   : > { %9789 = vmatprep.subr.bf16.mxu0 %v12571_v8  ;;  %v12640_v8 = vld [vmem:[#allocation10 + $0x26c] ss:$16 sps:$4 sm:$0xff]  }
 0x619   : > { %9872 = vmatpush1.bf16.msra.mxu1 %v12572_v1  ;;  %v8124_v37 = vsel %vm8108_vm6, %v8100_v53, %v8116_v17  ;;  %v12638_v1 = vld [vmem:[#allocation10 + $0x268] ss:$16 sps:$4 sm:$0xff]   ;;  %v12709_v17 = vld [vmem:[#allocation10 + $0x7e4] ss:$16 sps:$4 sm:$0xff]  }
 0x61a   : > { %9873 = vmatprep.subr.bf16.mxu1 %v12580_v58  ;;  %v14912_v11 = vpack.c.bf16 %v8124_v37, %v8124_v37  ;;  %v12644_v58 = vld [vmem:[#allocation10 + $0x288] ss:$16 sps:$4 sm:$0xff]  }
 0x61b   : > { %9790 = vmatpush1.bf16.msra.mxu0 %v12569_v56  ;;  %v12635_v56 = vld [vmem:[#allocation10 + $0x660] ss:$16 sps:$4 sm:$0xff]   ;;  %v12704_v53 = vld [vmem:[#allocation10 + $0x3c8] ss:$16 sps:$4 sm:$0xff]  }
 0x61c   : > { %9791 = vmatprep.subr.bf16.mxu0 %v12577_v2  ;;  %v12641_v2 = vld [vmem:[#allocation10 + $0x680] ss:$16 sps:$4 sm:$0xff]  }
 0x61d   : > { %9874 = vmatpush1.bf16.msra.mxu1 %v12578_v0  ;;  %v12652_v0 = vld [vmem:[#allocation10 + $0x2ac] ss:$16 sps:$4 sm:$0xff]  }
 0x61e   : > { %9875 = vmatprep.subr.bf16.mxu1 %v12586_v30  ;;  %v12650_v30 = vld [vmem:[#allocation10 + $0x2a8] ss:$16 sps:$4 sm:$0xff]  }
 0x61f   : > { %9792 = vmatpush1.bf16.msra.mxu0 %v12575_v28  ;;  %v12649_v28 = vld [vmem:[#allocation10 + $0x6a4] ss:$16 sps:$4 sm:$0xff]  }
 0x620   : > { %9793 = vmatprep.subr.bf16.mxu0 %v12583_v16  ;;  %v12647_v16 = vld [vmem:[#allocation10 + $0x6a0] ss:$16 sps:$4 sm:$0xff]  }
 0x621   : > { %9876 = vmatpush1.bf16.msra.mxu1 %v12584_v4  ;;  %v12658_v4 = vld [vmem:[#allocation10 + $0x2cc] ss:$16 sps:$4 sm:$0xff]  }
 0x622   : > { %9877 = vmatprep.subr.bf16.mxu1 %v12592_v6  ;;  %v12656_v6 = vld [vmem:[#allocation10 + $0x2c8] ss:$16 sps:$4 sm:$0xff]  }
 0x623   : > { %9794 = vmatpush1.bf16.msra.mxu0 %v12581_v23  ;;  %v12655_v23 = vld [vmem:[#allocation10 + $0x6c4] ss:$16 sps:$4 sm:$0xff]  }
 0x624   : > { %9795 = vmatprep.subr.bf16.mxu0 %v12589_v52  ;;  %v12653_v52 = vld [vmem:[#allocation10 + $0x6c0] ss:$16 sps:$4 sm:$0xff]  }
 0x625   : > { %9878 = vmatpush1.bf16.msra.mxu1 %v12590_v7  ;;  %v12664_v7 = vld [vmem:[#allocation10 + $0x2ec] ss:$16 sps:$4 sm:$0xff]  }
 0x626   : > { %9879 = vmatprep.subr.bf16.mxu1 %v12598_v59  ;;  %v12662_v59 = vld [vmem:[#allocation10 + $0x2e8] ss:$16 sps:$4 sm:$0xff]  }
 0x627   : > { %9796 = vmatpush1.bf16.msra.mxu0 %v12587_v62  ;;  %v12661_v62 = vld [vmem:[#allocation10 + $0x6e4] ss:$16 sps:$4 sm:$0xff]  }
 0x628   : > { %9797 = vmatprep.subr.bf16.mxu0 %v12595_v10  ;;  %v12659_v10 = vld [vmem:[#allocation10 + $0x6e0] ss:$16 sps:$4 sm:$0xff]  }
 0x629   : > { %9880 = vmatpush1.bf16.msra.mxu1 %v12596_v60  ;;  %v12670_v60 = vld [vmem:[#allocation10 + $0x30c] ss:$16 sps:$4 sm:$0xff]  }
 0x62a   : > { %9881 = vmatprep.subr.bf16.mxu1 %v12604_v15  ;;  %v12668_v15 = vld [vmem:[#allocation10 + $0x308] ss:$16 sps:$4 sm:$0xff]  }
 0x62b   : > { %9798 = vmatpush1.bf16.msra.mxu0 %v12593_v40  ;;  %v12667_v40 = vld [vmem:[#allocation10 + $0x704] ss:$16 sps:$4 sm:$0xff]  }
 0x62c   : > { %9799 = vmatprep.subr.bf16.mxu0 %v12601_v45  ;;  %v12665_v45 = vld [vmem:[#allocation10 + $0x700] ss:$16 sps:$4 sm:$0xff]  }
 0x62d   : > { %9882 = vmatpush1.bf16.msra.mxu1 %v12602_v25  ;;  %v12671_v25 = vld [vmem:[#allocation10 + $0x720] ss:$16 sps:$4 sm:$0xff]  }
 0x62e   : > { %9883 = vmatprep.subr.bf16.mxu1 %v12610_v27  ;;  %v12682_v27 = vld [vmem:[#allocation10 + $0x34c] ss:$16 sps:$4 sm:$0xff]  }
 0x62f   : > { %9800 = vmatpush1.bf16.msra.mxu0 %v12599_v24  ;;  %v12676_v24 = vld [vmem:[#allocation10 + $0x32c] ss:$16 sps:$4 sm:$0xff]  }
 0x630   : > { %9801 = vmatprep.subr.bf16.mxu0 %v12607_v26  ;;  %v12679_v26 = vld [vmem:[#allocation10 + $0x744] ss:$16 sps:$4 sm:$0xff]  }
 0x631   : > { %9884 = vmatpush1.bf16.msra.mxu1 %v12608_v41  ;;  %v12680_v41 = vld [vmem:[#allocation10 + $0x348] ss:$16 sps:$4 sm:$0xff]  }
 0x632   : > { %9885 = vmatprep.subr.bf16.mxu1 %v12616_v34  ;;  %v12683_v34 = vld [vmem:[#allocation10 + $0x760] ss:$16 sps:$4 sm:$0xff]  }
 0x633   : > { %9802 = vmatpush1.bf16.msra.mxu0 %v12605_v55  ;;  %v12677_v55 = vld [vmem:[#allocation10 + $0x740] ss:$16 sps:$4 sm:$0xff]  }
 0x634   : > { %9803 = vmatprep.subr.bf16.mxu0 %v12613_v32  ;;  %v12688_v32 = vld [vmem:[#allocation10 + $0x36c] ss:$16 sps:$4 sm:$0xff]  }
 0x635   : > { %9886 = vmatpush1.bf16.msra.mxu1 %v12614_v36  ;;  %v12691_v36 = vld [vmem:[#allocation10 + $0x784] ss:$16 sps:$4 sm:$0xff]  }
 0x636   : > { %9896 = vmatprep.subr.bf16.mxu1 %v12622_v13  ;;  %v12692_v13 = vld [vmem:[#allocation10 + $0x388] ss:$16 sps:$4 sm:$0xff]  }
 0x637   : > { %9804 = vmatpush1.bf16.msra.mxu0 %v12611_v48  ;;  %v12686_v48 = vld [vmem:[#allocation10 + $0x368] ss:$16 sps:$4 sm:$0xff]  }
 0x638   : > { %9814 = vmatprep.subr.bf16.mxu0 %v12619_v35  ;;  %9888 = vmatmul.mubr.bf16.vlgmr.msra.gmra.mrb[4].mxu1 %v14894_v63  ;;  %v12637_v63 = vld [vmem:[#allocation10 + $0x664] ss:$16 sps:$4 sm:$0xff]   ;;  %v12689_v35 = vld [vmem:[#allocation10 + $0x780] ss:$16 sps:$4 sm:$0xff]  }
 0x639   : > { %9897 = vmatpush1.bf16.msra.mxu1 %v12620_v47  ;;  %9928 = vmatprep.mubr.bf16.mxu1 %v14883_v5  ;;  %v12643_v5 = vld [vmem:[#allocation10 + $0x684] ss:$16 sps:$4 sm:$0xff]   ;;  %v12700_v47 = vld [vmem:[#allocation10 + $0x3ac] ss:$16 sps:$4 sm:$0xff]  }
 0x63a   : > { %9806 = vmatmul.mubr.bf16.vlgmr.msra.gmra.mrb[0].mxu0 %v14906_v42  ;;  %9898 = vmatprep.subr.bf16.mxu1 %v12628_v14  ;;  %v12695_v14 = vld [vmem:[#allocation10 + $0x7a0] ss:$16 sps:$4 sm:$0xff]  }
 0x63b   : > { %9815 = vmatpush1.bf16.msra.mxu0 %v12617_v39  ;;  %9846 = vmatprep.mubr.bf16.mxu0 %v14912_v11  ;;  %v12697_v39 = vld [vmem:[#allocation10 + $0x7a4] ss:$16 sps:$4 sm:$0xff]  }
 0x63c   : > { %9816 = vmatprep.subr.bf16.mxu0 %v12625_v44  ;;  %v8049_v44 = vld [vmem:[#allocation2 + $0x30] sm:$0xff] }
 0x63d   : > { %9899 = vmatpush1.bf16.msra.mxu1 %v12626_v20  ;;  %v12703_v20 = vld [vmem:[#allocation10 + $0x7c4] ss:$16 sps:$4 sm:$0xff]   ;;  %v8099_v49 = vadd.f32 %v14892_v3, %v8049_v44  ;;  %v12713_v3 = vld [vmem:[#allocation10 + $0x408] ss:$16 sps:$4 sm:$0xff]  }
 0x63e   : > { %9900 = vmatprep.subr.bf16.mxu1 %v12634_v51  ;;  %v12701_v51 = vld [vmem:[#allocation10 + $0x7c0] ss:$16 sps:$4 sm:$0xff]   ;;  %v12743_v44 = vld [vmem:[#allocation10 + $0x548] ss:$16 sps:$4 sm:$0xff]  }
 0x63f   : > { %9817 = vmatpush1.bf16.msra.mxu0 %v12623_v57  ;;  %v12698_v57 = vld [vmem:[#allocation10 + $0x3a8] ss:$16 sps:$4 sm:$0xff]   ;;  %vm8107_vm7 = vcmp.ge.f32.partialorder %v8099_v49, 0.0 }
 0x640   : > { %9818 = vmatprep.subr.bf16.mxu0 %v12631_v46  ;;  %v12706_v46 = vld [vmem:[#allocation10 + $0x3cc] ss:$16 sps:$4 sm:$0xff]  }
 0x641   : > { %9901 = vmatpush1.bf16.msra.mxu1 %v12632_v21  ;;  %v8115_v21 = vmul.f32 0.4, %v8099_v49 }
 0x642   : > { %9902 = vmatprep.subr.bf16.mxu1 %v12640_v8  ;;  %v12710_v8 = vld [vmem:[#allocation10 + $0x3e8] ss:$16 sps:$4 sm:$0xff]  }
 0x643   : > { %9819 = vmatpush1.bf16.msra.mxu0 %v12629_v61  ;;  %v12712_v61 = vld [vmem:[#allocation10 + $0x3ec] ss:$16 sps:$4 sm:$0xff]   ;;  %v8123_v37 = vsel %vm8107_vm7, %v8099_v49, %v8115_v21 }
 0x644   : > { %9820 = vmatprep.subr.bf16.mxu0 %v12637_v63  ;;  %v12707_v63 = vld [vmem:[#allocation10 + $0x7e0] ss:$16 sps:$4 sm:$0xff]   ;;  %v12751_v49 = vld [vmem:[#allocation10 + $0x58c] ss:$16 sps:$4 sm:$0xff]  }
 0x645   : > { %9903 = vmatpush1.bf16.msra.mxu1 %v12638_v1  ;;  %v14916_v1 = vpack.c.bf16 %v8123_v37, %v8123_v37  ;;  %v12845_v21 = vld [vmem:[#allocation13 + $0xc0] ss:$8 sps:$4 sm:$0xff]  }
 0x646   : > { %9904 = vmatprep.subr.bf16.mxu1 %v12646_v19  ;;  %v12809_v19 = vld [vmem:[#allocation13] ss:$8 sps:$4 sm:$0xff]  }
 0x647   : > { %9821 = vmatpush1.bf16.msra.mxu0 %v12635_v56  ;;  %v12715_v56 = vld [vmem:[#allocation10 + $0x40c] ss:$16 sps:$4 sm:$0xff]  }
 0x648   : > { %9822 = vmatprep.subr.bf16.mxu0 %v12643_v5  ;;  %v12718_v5 = vld [vmem:[#allocation10 + $0x42c] ss:$16 sps:$4 sm:$0xff]  }
 0x649   : > { %9905 = vmatpush1.bf16.msra.mxu1 %v12644_v58  ;;  %v12716_v58 = vld [vmem:[#allocation10 + $0x428] ss:$16 sps:$4 sm:$0xff]   ;;  %v12757_v37 = vld [vmem:[#allocation10 + $0x5cc] ss:$16 sps:$4 sm:$0xff]  }
 0x64a   : > { %9906 = vmatprep.subr.bf16.mxu1 %v12652_v0  ;;  %v12721_v0 = vld [vmem:[#allocation10 + $0x44c] ss:$16 sps:$4 sm:$0xff]  }
 0x64b   : > { %9823 = vmatpush1.bf16.msra.mxu0 %v12641_v2  ;;  %v12811_v2 = vld [vmem:[#allocation13 + $0x4] ss:$8 sps:$4 sm:$0xff]  }
 0x64c   : > { %9824 = vmatprep.subr.bf16.mxu0 %v12649_v28  ;;  %v12814_v28 = vld [vmem:[#allocation13 + $0x14] ss:$8 sps:$4 sm:$0xff]  }
 0x64d   : > { %9907 = vmatpush1.bf16.msra.mxu1 %v12650_v30  ;;  %v12817_v30 = vld [vmem:[#allocation13 + $0x24] ss:$8 sps:$4 sm:$0xff]  }
 0x64e   : > { %9908 = vmatprep.subr.bf16.mxu1 %v12658_v4  ;;  %v12724_v4 = vld [vmem:[#allocation10 + $0x46c] ss:$16 sps:$4 sm:$0xff]  }
 0x64f   : > { %9825 = vmatpush1.bf16.msra.mxu0 %v12647_v16  ;;  %v12812_v16 = vld [vmem:[#allocation13 + $0x10] ss:$8 sps:$4 sm:$0xff]  }
 0x650   : > { %9826 = vmatprep.subr.bf16.mxu0 %v12655_v23  ;;  %v12719_v23 = vld [vmem:[#allocation10 + $0x448] ss:$16 sps:$4 sm:$0xff]  }
 0x651   : > { %9909 = vmatpush1.bf16.msra.mxu1 %v12656_v6  ;;  %v12727_v6 = vld [vmem:[#allocation10 + $0x48c] ss:$16 sps:$4 sm:$0xff]  }
 0x652   : > { %9910 = vmatprep.subr.bf16.mxu1 %v12664_v7  ;;  %v12823_v7 = vld [vmem:[#allocation13 + $0x44] ss:$8 sps:$4 sm:$0xff]  }
 0x653   : > { %9827 = vmatpush1.bf16.msra.mxu0 %v12653_v52  ;;  %v12722_v52 = vld [vmem:[#allocation10 + $0x468] ss:$16 sps:$4 sm:$0xff]  }
 0x654   : > { %9828 = vmatprep.subr.bf16.mxu0 %v12661_v62  ;;  %v12820_v62 = vld [vmem:[#allocation13 + $0x34] ss:$8 sps:$4 sm:$0xff]  }
 0x655   : > { %9911 = vmatpush1.bf16.msra.mxu1 %v12662_v59  ;;  %v12730_v59 = vld [vmem:[#allocation10 + $0x4ac] ss:$16 sps:$4 sm:$0xff]  }
 0x656   : > { %9912 = vmatprep.subr.bf16.mxu1 %v12670_v60  ;;  %v12826_v60 = vld [vmem:[#allocation13 + $0x54] ss:$8 sps:$4 sm:$0xff]  }
 0x657   : > { %9829 = vmatpush1.bf16.msra.mxu0 %v12659_v10  ;;  %v12725_v10 = vld [vmem:[#allocation10 + $0x488] ss:$16 sps:$4 sm:$0xff]  }
 0x658   : > { %9830 = vmatprep.subr.bf16.mxu0 %v12667_v40  ;;  %v12821_v40 = vld [vmem:[#allocation13 + $0x40] ss:$8 sps:$4 sm:$0xff]  }
 0x659   : > { %9913 = vmatpush1.bf16.msra.mxu1 %v12668_v15  ;;  %v12733_v15 = vld [vmem:[#allocation10 + $0x4cc] ss:$16 sps:$4 sm:$0xff]  }
 0x65a   : > { %9914 = vmatprep.subr.bf16.mxu1 %v12676_v24  ;;  %v12829_v24 = vld [vmem:[#allocation13 + $0x64] ss:$8 sps:$4 sm:$0xff]  }
 0x65b   : > { %9831 = vmatpush1.bf16.msra.mxu0 %v12665_v45  ;;  %v12728_v45 = vld [vmem:[#allocation10 + $0x4a8] ss:$16 sps:$4 sm:$0xff]  }
 0x65c   : > { %9832 = vmatprep.subr.bf16.mxu0 %v12673_v43  ;;  %v12824_v43 = vld [vmem:[#allocation13 + $0x50] ss:$8 sps:$4 sm:$0xff]  }
 0x65d   : > { %9915 = vmatpush1.bf16.msra.mxu1 %v12674_v54  ;;  %v12736_v54 = vld [vmem:[#allocation10 + $0x4ec] ss:$16 sps:$4 sm:$0xff]  }
 0x65e   : > { %9916 = vmatprep.subr.bf16.mxu1 %v12682_v27  ;;  %v12832_v27 = vld [vmem:[#allocation13 + $0x74] ss:$8 sps:$4 sm:$0xff]  }
 0x65f   : > { %9833 = vmatpush1.bf16.msra.mxu0 %v12671_v25  ;;  %v12731_v25 = vld [vmem:[#allocation10 + $0x4c8] ss:$16 sps:$4 sm:$0xff]  }
 0x660   : > { %9834 = vmatprep.subr.bf16.mxu0 %v12679_v26  ;;  %v12827_v26 = vld [vmem:[#allocation13 + $0x60] ss:$8 sps:$4 sm:$0xff]  }
 0x661   : > { %9917 = vmatpush1.bf16.msra.mxu1 %v12680_v41  ;;  %v12739_v41 = vld [vmem:[#allocation10 + $0x50c] ss:$16 sps:$4 sm:$0xff]  }
 0x662   : > { %9918 = vmatprep.subr.bf16.mxu1 %v12688_v32  ;;  %v12835_v32 = vld [vmem:[#allocation13 + $0x84] ss:$8 sps:$4 sm:$0xff]  }
 0x663   : > { %9835 = vmatpush1.bf16.msra.mxu0 %v12677_v55  ;;  %v12734_v55 = vld [vmem:[#allocation10 + $0x4e8] ss:$16 sps:$4 sm:$0xff]  }
 0x664   : > { %9836 = vmatprep.subr.bf16.mxu0 %v12685_v29  ;;  %v12830_v29 = vld [vmem:[#allocation13 + $0x70] ss:$8 sps:$4 sm:$0xff]  }
 0x665   : > { %9919 = vmatpush1.bf16.msra.mxu1 %v12686_v48  ;;  %v12742_v48 = vld [vmem:[#allocation10 + $0x52c] ss:$16 sps:$4 sm:$0xff]  }
 0x666   : > { %9920 = vmatprep.subr.bf16.mxu1 %v12694_v50  ;;  %v12838_v50 = vld [vmem:[#allocation13 + $0x94] ss:$8 sps:$4 sm:$0xff]  }
 0x667   : > { %9837 = vmatpush1.bf16.msra.mxu0 %v12683_v34  ;;  %v12737_v34 = vld [vmem:[#allocation10 + $0x508] ss:$16 sps:$4 sm:$0xff]  }
 0x668   : > { %9838 = vmatprep.subr.bf16.mxu0 %v12691_v36  ;;  %v12833_v36 = vld [vmem:[#allocation13 + $0x80] ss:$8 sps:$4 sm:$0xff]  }
 0x669   : > { %9921 = vmatpush1.bf16.msra.mxu1 %v12692_v13  ;;  %v12745_v13 = vld [vmem:[#allocation10 + $0x54c] ss:$16 sps:$4 sm:$0xff]  }
 0x66a   : > { %9922 = vmatprep.subr.bf16.mxu1 %v12700_v47  ;;  %v12841_v47 = vld [vmem:[#allocation13 + $0xa4] ss:$8 sps:$4 sm:$0xff]  }
 0x66b   : > { %9839 = vmatpush1.bf16.msra.mxu0 %v12689_v35  ;;  %v12740_v35 = vld [vmem:[#allocation10 + $0x528] ss:$16 sps:$4 sm:$0xff]  }
 0x66c   : > { %9840 = vmatprep.subr.bf16.mxu0 %v12697_v39  ;;  %v12836_v39 = vld [vmem:[#allocation13 + $0x90] ss:$8 sps:$4 sm:$0xff]  }
 0x66d   : > { %9923 = vmatpush1.bf16.msra.mxu1 %v12698_v57  ;;  %v12839_v57 = vld [vmem:[#allocation13 + $0xa0] ss:$8 sps:$4 sm:$0xff]  }
 0x66e   : > { %9924 = vmatprep.subr.bf16.mxu1 %v12706_v46  ;;  %v12746_v46 = vld [vmem:[#allocation10 + $0x568] ss:$16 sps:$4 sm:$0xff]  }
 0x66f   : > { %9841 = vmatpush1.bf16.msra.mxu0 %v12695_v14  ;;  %v12748_v14 = vld [vmem:[#allocation10 + $0x56c] ss:$16 sps:$4 sm:$0xff]  }
 0x670   : > { %9842 = vmatprep.subr.bf16.mxu0 %v12703_v20  ;;  %v12844_v20 = vld [vmem:[#allocation13 + $0xb4] ss:$8 sps:$4 sm:$0xff]  }
 0x671   : > { %9925 = vmatpush1.bf16.msra.mxu1 %v12704_v53  ;;  %v12847_v53 = vld [vmem:[#allocation13 + $0xc4] ss:$8 sps:$4 sm:$0xff]  }
 0x672   : > { %9926 = vmatprep.subr.bf16.mxu1 %v12712_v61  ;;  %v12754_v61 = vld [vmem:[#allocation10 + $0x5ac] ss:$16 sps:$4 sm:$0xff]  }
 0x673   : > { %9843 = vmatpush1.bf16.msra.mxu0 %v12701_v51  ;;  %v12842_v51 = vld [vmem:[#allocation13 + $0xb0] ss:$8 sps:$4 sm:$0xff]  }
 0x674   : > { %9844 = vmatprep.subr.bf16.mxu0 %v12709_v17  ;;  %v12749_v17 = vld [vmem:[#allocation10 + $0x588] ss:$16 sps:$4 sm:$0xff]  }
 0x675   : > { %9927 = vmatpush1.bf16.msra.mxu1 %v12710_v8  ;;  %v12752_v8 = vld [vmem:[#allocation10 + $0x5a8] ss:$16 sps:$4 sm:$0xff]  }
 0x676   : > { %9937 = vmatprep.subr.bf16.mxu1 %v12715_v56  ;;  %v12848_v56 = vld [vmem:[#allocation13 + $0xd0] ss:$8 sps:$4 sm:$0xff]  }
 0x677   : > { %9845 = vmatpush1.bf16.msra.mxu0 %v12707_v63  ;;  %v12850_v63 = vld [vmem:[#allocation13 + $0xd4] ss:$8 sps:$4 sm:$0xff]  }
 0x678   : > { %9929 = vmatmul.mubr.bf16.vlgmr.msra.gmra.mrb[4].mxu1 %v14896_v12  ;;  %10431 = vmatprep.subr.bf16.mxu0 %v12811_v2  ;;  %v12815_v12 = vld [vmem:[#allocation13 + $0x20] ss:$8 sps:$4 sm:$0xff]  }
 0x679   : > { %9938 = vmatpush1.bf16.msra.mxu1 %v12713_v3  ;;  %9969 = vmatprep.mubr.bf16.mxu1 %v14902_v9  ;;  %v12818_v9 = vld [vmem:[#allocation13 + $0x30] ss:$8 sps:$4 sm:$0xff]   ;;  %v12755_v3 = vld [vmem:[#allocation10 + $0x5c8] ss:$16 sps:$4 sm:$0xff]  }
 0x67a   : > { %9847 = vmatmul.mubr.bf16.vlgmr.msra.gmra.mrb[0].mxu0 %v14916_v1  ;;  %9939 = vmatprep.subr.bf16.mxu1 %v12718_v5  ;;  %v12760_v5 = vld [vmem:[#allocation10 + $0x5ec] ss:$16 sps:$4 sm:$0xff]  }
 0x67b   : > { %10432 = vmatpush1.bf16.msra.mxu0 %v12809_v19  ;;  %v12758_v19 = vld [vmem:[#allocation10 + $0x5e8] ss:$16 sps:$4 sm:$0xff]   ;;  %v12763_v2 = vld [vmem:[#allocation10 + $0x60c] ss:$16 sps:$4 sm:$0xff]  }
 0x67c   : > { %10433 = vmatprep.subr.bf16.mxu0 %v12814_v28  ;;  %v12766_v28 = vld [vmem:[#allocation10 + $0x62c] ss:$16 sps:$4 sm:$0xff]  }
 0x67d   : > { %9940 = vmatpush1.bf16.msra.mxu1 %v12716_v58  ;;  %v12761_v58 = vld [vmem:[#allocation10 + $0x608] ss:$16 sps:$4 sm:$0xff]  }
 0x67e   : > { %9941 = vmatprep.subr.bf16.mxu1 %v12721_v0  ;;  %v12764_v0 = vld [vmem:[#allocation10 + $0x628] ss:$16 sps:$4 sm:$0xff]  }
 0x67f   : > { %10434 = vmatpush1.bf16.msra.mxu0 %v12812_v16  ;;  %v12769_v16 = vld [vmem:[#allocation10 + $0x64c] ss:$16 sps:$4 sm:$0xff]  }
 0x680   : > { %10435 = vmatprep.subr.bf16.mxu0 %v12817_v30  ;;  %v12767_v30 = vld [vmem:[#allocation10 + $0x648] ss:$16 sps:$4 sm:$0xff]  }
 0x681   : > { %9942 = vmatpush1.bf16.msra.mxu1 %v12719_v23  ;;  %v12772_v23 = vld [vmem:[#allocation10 + $0x66c] ss:$16 sps:$4 sm:$0xff]  }
 0x682   : > { %9943 = vmatprep.subr.bf16.mxu1 %v12724_v4  ;;  %v12770_v4 = vld [vmem:[#allocation10 + $0x668] ss:$16 sps:$4 sm:$0xff]  }
 0x683   : > { %10436 = vmatpush1.bf16.msra.mxu0 %v12815_v12  ;;  %v12775_v12 = vld [vmem:[#allocation10 + $0x68c] ss:$16 sps:$4 sm:$0xff]  }
 0x684   : > { %10437 = vmatprep.subr.bf16.mxu0 %v12820_v62  ;;  %v12781_v62 = vld [vmem:[#allocation10 + $0x6cc] ss:$16 sps:$4 sm:$0xff]  }
 0x685   : > { %9944 = vmatpush1.bf16.msra.mxu1 %v12722_v52  ;;  %v12773_v52 = vld [vmem:[#allocation10 + $0x688] ss:$16 sps:$4 sm:$0xff]  }
 0x686   : > { %9945 = vmatprep.subr.bf16.mxu1 %v12727_v6  ;;  %v12778_v6 = vld [vmem:[#allocation10 + $0x6ac] ss:$16 sps:$4 sm:$0xff]  }
 0x687   : > { %10438 = vmatpush1.bf16.msra.mxu0 %v12818_v9 }
 0x688   : > { %10439 = vmatprep.subr.bf16.mxu0 %v12823_v7 }
 0x689   : > { %9946 = vmatpush1.bf16.msra.mxu1 %v12725_v10  ;;  %v12851_v10 = vld [vmem:[#allocation13 + $0xe0] ss:$8 sps:$4 sm:$0xff]  }
 0x68a   : > { %9947 = vmatprep.subr.bf16.mxu1 %v12730_v59 }
 0x68b   : > { %10440 = vmatpush1.bf16.msra.mxu0 %v12821_v40  ;;  %v12779_v40 = vld [vmem:[#allocation10 + $0x6c8] ss:$16 sps:$4 sm:$0xff]  }
 0x68c   : > { %10441 = vmatprep.subr.bf16.mxu0 %v12826_v60 }
 0x68d   : > { %9948 = vmatpush1.bf16.msra.mxu1 %v12728_v45  ;;  %v12784_v45 = vld [vmem:[#allocation10 + $0x6ec] ss:$16 sps:$4 sm:$0xff]  }
 0x68e   : > { %9949 = vmatprep.subr.bf16.mxu1 %v12733_v15  ;;  %v12856_v15 = vld [vmem:[#allocation13 + $0xf4] ss:$8 sps:$4 sm:$0xff]  }
 0x68f   : > { %10442 = vmatpush1.bf16.msra.mxu0 %v12824_v43  ;;  %v12854_v43 = vld [vmem:[#allocation13 + $0xf0] ss:$8 sps:$4 sm:$0xff]  }
 0x690   : > { %10443 = vmatprep.subr.bf16.mxu0 %v12829_v24  ;;  %v12782_v24 = vld [vmem:[#allocation10 + $0x6e8] ss:$16 sps:$4 sm:$0xff]  }
 0x691   : > { %9950 = vmatpush1.bf16.msra.mxu1 %v12731_v25  ;;  %v12787_v25 = vld [vmem:[#allocation10 + $0x70c] ss:$16 sps:$4 sm:$0xff]  }
 0x692   : > { %9951 = vmatprep.subr.bf16.mxu1 %v12736_v54  ;;  %v12785_v54 = vld [vmem:[#allocation10 + $0x708] ss:$16 sps:$4 sm:$0xff]  }
 0x693   : > { %10444 = vmatpush1.bf16.msra.mxu0 %v12827_v26  ;;  %v12859_v26 = vld [vmem:[#allocation13 + $0x104] ss:$8 sps:$4 sm:$0xff]  }
 0x694   : > { %10445 = vmatprep.subr.bf16.mxu0 %v12832_v27  ;;  %v12790_v27 = vld [vmem:[#allocation10 + $0x72c] ss:$16 sps:$4 sm:$0xff]  }
 0x695   : > { %9952 = vmatpush1.bf16.msra.mxu1 %v12734_v55  ;;  %v12788_v55 = vld [vmem:[#allocation10 + $0x728] ss:$16 sps:$4 sm:$0xff]  }
 0x696   : > { %9953 = vmatprep.subr.bf16.mxu1 %v12739_v41  ;;  %v12793_v41 = vld [vmem:[#allocation10 + $0x74c] ss:$16 sps:$4 sm:$0xff]  }
 0x697   : > { %10446 = vmatpush1.bf16.msra.mxu0 %v12830_v29  ;;  %v12791_v29 = vld [vmem:[#allocation10 + $0x748] ss:$16 sps:$4 sm:$0xff]  }
 0x698   : > { %10447 = vmatprep.subr.bf16.mxu0 %v12835_v32  ;;  %v12796_v32 = vld [vmem:[#allocation10 + $0x76c] ss:$16 sps:$4 sm:$0xff]  }
 0x699   : > { %9954 = vmatpush1.bf16.msra.mxu1 %v12737_v34  ;;  %v12794_v34 = vld [vmem:[#allocation10 + $0x768] ss:$16 sps:$4 sm:$0xff]  }
 0x69a   : > { %9955 = vmatprep.subr.bf16.mxu1 %v12742_v48  ;;  %v12799_v48 = vld [vmem:[#allocation10 + $0x78c] ss:$16 sps:$4 sm:$0xff]  }
 0x69b   : > { %10448 = vmatpush1.bf16.msra.mxu0 %v12833_v36  ;;  %v12797_v36 = vld [vmem:[#allocation10 + $0x788] ss:$16 sps:$4 sm:$0xff]  }
 0x69c   : > { %10449 = vmatprep.subr.bf16.mxu0 %v12838_v50  ;;  %v12802_v50 = vld [vmem:[#allocation10 + $0x7ac] ss:$16 sps:$4 sm:$0xff]  }
 0x69d   : > { %9956 = vmatpush1.bf16.msra.mxu1 %v12740_v35  ;;  %v12800_v35 = vld [vmem:[#allocation10 + $0x7a8] ss:$16 sps:$4 sm:$0xff]  }
 0x69e   : > { %9957 = vmatprep.subr.bf16.mxu1 %v12745_v13  ;;  %v12805_v13 = vld [vmem:[#allocation10 + $0x7cc] ss:$16 sps:$4 sm:$0xff]  }
 0x69f   : > { %10450 = vmatpush1.bf16.msra.mxu0 %v12836_v39  ;;  %v12803_v39 = vld [vmem:[#allocation10 + $0x7c8] ss:$16 sps:$4 sm:$0xff]  }
 0x6a0   : > { %10451 = vmatprep.subr.bf16.mxu0 %v12841_v47  ;;  %v12808_v47 = vld [vmem:[#allocation10 + $0x7ec] ss:$16 sps:$4 sm:$0xff]  }
 0x6a1   : > { %9958 = vmatpush1.bf16.msra.mxu1 %v12743_v44  ;;  %v12806_v44 = vld [vmem:[#allocation10 + $0x7e8] ss:$16 sps:$4 sm:$0xff]  }
 0x6a2   : > { %9959 = vmatprep.subr.bf16.mxu1 %v12748_v14  ;;  %v14924_v14 = vld [vmem:[#allocation12] sm:$0xf] }
 0x6a3   : > { %10452 = vmatpush1.bf16.msra.mxu0 %v12839_v57  ;;  %v8394_v57 = vrot.slane %v14924_v14, %v14869_v31 }
 0x6a4   : > { %10453 = vmatprep.subr.bf16.mxu0 %v12844_v20  ;;  %v8398_v20 = vrot.slane %v14924_v14, %v14860_v18 }
 0x6a5   : > { %9960 = vmatpush1.bf16.msra.mxu1 %v12746_v46 }
 0x6a6   : > { %9961 = vmatprep.subr.bf16.mxu1 %v12751_v49 }
 0x6a7   : > { %10454 = vmatpush1.bf16.msra.mxu0 %v12842_v51 }
 0x6a8   : > { %10455 = vmatprep.subr.bf16.mxu0 %v12847_v53 }
 0x6a9   : > { %9962 = vmatpush1.bf16.msra.mxu1 %v12749_v17 }
 0x6aa   : > { %9963 = vmatprep.subr.bf16.mxu1 %v12754_v61 }
 0x6ab   : > { %10456 = vmatpush1.bf16.msra.mxu0 %v12845_v21 }
 0x6ac   : > { %10457 = vmatprep.subr.bf16.mxu0 %v12850_v63 }
 0x6ad   : > { %9964 = vmatpush1.bf16.msra.mxu1 %v12752_v8 }
 0x6ae   : > { %9965 = vmatprep.subr.bf16.mxu1 %v12757_v37 }
 0x6af   : > { %10458 = vmatpush1.bf16.msra.mxu0 %v12848_v56 }
 0x6b1   : > { %9966 = vmatpush1.bf16.msra.mxu1 %v12755_v3 }
 0x6b2   : > { %9967 = vmatprep.subr.bf16.mxu1 %v12760_v5  ;;  %v12857_v5 = vld [vmem:[#allocation13 + $0x100] ss:$8 sps:$4 sm:$0xff]  }
 0x6b5   : > { %9968 = vmatpush1.bf16.msra.mxu1 %v12758_v19 }
 0x6b6   : > { %9978 = vmatprep.subr.bf16.mxu1 %v12763_v2  ;;  %v12862_v2 = vld [vmem:[#allocation13 + $0x114] ss:$8 sps:$4 sm:$0xff]  }
 0x6b8   : > { %9970 = vmatmul.mubr.bf16.vlgmr.msra.gmra.mrb[4].mxu1 %v14906_v42  ;;  %v12776_v42 = vld [vmem:[#allocation10 + $0x6a8] ss:$16 sps:$4 sm:$0xff]  }
 0x6b9   : > { %9979 = vmatpush1.bf16.msra.mxu1 %v12761_v58  ;;  %10010 = vmatprep.mubr.bf16.mxu1 %v14912_v11  ;;  %v12853_v11 = vld [vmem:[#allocation13 + $0xe4] ss:$8 sps:$4 sm:$0xff]   ;;  %v12860_v58 = vld [vmem:[#allocation13 + $0x110] ss:$8 sps:$4 sm:$0xff]  }
 0x6ba   : > { %9980 = vmatprep.subr.bf16.mxu1 %v12766_v28  ;;  %10459 = vmatprep.subr.bf16.mxu0 %v12853_v11  ;;  %v12865_v28 = vld [vmem:[#allocation13 + $0x124] ss:$8 sps:$4 sm:$0xff]  }
 0x6bb   : > { %10460 = vmatpush1.bf16.msra.mxu0 %v12851_v10  ;;  %v10539_v11 = vld [vmem:[#allocation16 + $0xa0] sm:$0xff] }
 0x6bc   : > { %10461 = vmatprep.subr.bf16.mxu0 %v12856_v15  ;;  %v12868_v15 = vld [vmem:[#allocation13 + $0x134] ss:$8 sps:$4 sm:$0xff]  }
 0x6bd   : > { %9981 = vmatpush1.bf16.msra.mxu1 %v12764_v0  ;;  %v10535_v0 = vld [vmem:[#allocation16 + $0x80] sm:$0xff] }
 0x6be   : > { %9982 = vmatprep.subr.bf16.mxu1 %v12769_v16  ;;  %v10536_v16 = vld [vmem:[#allocation16 + $0x88] sm:$0xff] }
 0x6bf   : > { %10462 = vmatpush1.bf16.msra.mxu0 %v12854_v43  ;;  %v10541_v43 = vld [vmem:[#allocation16 + $0xb0] sm:$0xff] }
 0x6c0   : > { %10472 = vmatprep.subr.bf16.mxu0 %v12859_v26 }
 0x6c1   : > { %9983 = vmatpush1.bf16.msra.mxu1 %v12767_v30  ;;  %v10519_v30 = vld [vmem:[#allocation16] sm:$0xff] }
 0x6c2   : > { %9984 = vmatprep.subr.bf16.mxu1 %v12772_v23  ;;  %v12210_v23 = vpack.c.bf16 %v10536_v16, %v10535_v0  ;;  %v12896_v0 = vld [vmem:[#allocation13 + $0x1d0] ss:$8 sps:$4 sm:$0xff]   ;;  %v12901_v16 = vld [vmem:[#allocation13 + $0x1e4] ss:$8 sps:$4 sm:$0xff]  }
 0x6c5   : > { %9985 = vmatpush1.bf16.msra.mxu1 %v12770_v4  ;;  %v10520_v4 = vld [vmem:[#allocation16 + $0x8] sm:$0xff] }
 0x6c6   : > { %9986 = vmatprep.subr.bf16.mxu1 %v12775_v12  ;;  %v10537_v12 = vld [vmem:[#allocation16 + $0x90] sm:$0xff] }
 0x6c9   : > { %9987 = vmatpush1.bf16.msra.mxu1 %v12773_v52  ;;  %v10538_v52 = vld [vmem:[#allocation16 + $0x98] sm:$0xff] }
 0x6ca   : > { %9988 = vmatprep.subr.bf16.mxu1 %v12778_v6  ;;  %v12212_v6 = vpack.c.bf16 %v10520_v4, %v10519_v30  ;;  %v12899_v30 = vld [vmem:[#allocation13 + $0x1e0] ss:$8 sps:$4 sm:$0xff]   ;;  %v12902_v4 = vld [vmem:[#allocation13 + $0x1f0] ss:$8 sps:$4 sm:$0xff]  }
 0x6cb   : > { %v9725_v9 = vpop.f32.mrb[0].mxu1 }
 0x6cc   : > { %v9727_v7 = vpop.f32.mrb[1].mxu1  ;;  %v9726_v46 = vadd.f32 %v9725_v9, %v8394_v57  ;;  %v10522_v9 = vld [vmem:[#allocation16 + $0x18] sm:$0xff] }
 0x6cd   : > { %v9729_v59 = vpop.f32.mrb[2].mxu1  ;;  %9989 = vmatpush1.bf16.msra.mxu1 %v12776_v42  ;;  %v9728_v49 = vadd.f32 %v9727_v7, %v8398_v20  ;;  %v12214_v42 = vpack.c.bf16 %v10538_v52, %v10537_v12  ;;  %v10540_v7 = vld [vmem:[#allocation16 + $0xa8] sm:$0xff]  ;;  %v8402_v12 = vrot.slane %v14924_v14, %v8063_v33  ;;  %v8406_v52 = vrot.slane %v14924_v14, %v8067_v22  ;;  %v10547_v33 = vld [vmem:[#allocation16 + $0xe0] sm:$0xff] }
 0x6ce   : > { %v9730_v60 = vpop.f32.mrb[3].mxu1  ;;  %9990 = vmatprep.subr.bf16.mxu1 %v12781_v62  ;;  %v10521_v62 = vld [vmem:[#allocation16 + $0x10] sm:$0xff]  ;;  %v12863_v59 = vld [vmem:[#allocation13 + $0x120] ss:$8 sps:$4 sm:$0xff]  }
 0x6cf   : > { %v12216_v10 = vpack.c.bf16 %v10522_v9, %v10521_v62  ;;  %v10523_v60 = vld [vmem:[#allocation16 + $0x20] sm:$0xff]  ;;  %v12872_v57 = vld [vmem:[#allocation13 + $0x150] ss:$8 sps:$4 sm:$0xff]  }
 0x6d0   : > { %v10531_v22 = vld [vmem:[#allocation16 + $0x60] sm:$0xff]  ;;  %v10532_v14 = vld [vmem:[#allocation16 + $0x68] sm:$0xff] }
 0x6d1   : > { %9991 = vmatpush1.bf16.msra.mxu1 %v12779_v40  ;;  %v12218_v40 = vpack.c.bf16 %v10540_v7, %v10539_v11 }
 0x6d2   : > { %9992 = vmatprep.subr.bf16.mxu1 %v12784_v45  ;;  %v10524_v45 = vld [vmem:[#allocation16 + $0x28] sm:$0xff] }
 0x6d5   : > { %9993 = vmatpush1.bf16.msra.mxu1 %v12782_v24  ;;  %v10542_v24 = vld [vmem:[#allocation16 + $0xb8] sm:$0xff] }
 0x6d6   : > { %9994 = vmatprep.subr.bf16.mxu1 %v12787_v25  ;;  %v12220_v25 = vpack.c.bf16 %v10524_v45, %v10523_v60  ;;  %v12222_v26 = vpack.c.bf16 %v10542_v24, %v10541_v43  ;;  %v12234_v43 = vpack.c.bf16 %v10548_v38, %v10547_v33  ;;  %v12236_v24 = vpack.c.bf16 %v10532_v14, %v10531_v22 }
 0x6d9   : > { %9995 = vmatpush1.bf16.msra.mxu1 %v12785_v54  ;;  %v12866_v54 = vld [vmem:[#allocation13 + $0x130] ss:$8 sps:$4 sm:$0xff]  }
 0x6da   : > { %9996 = vmatprep.subr.bf16.mxu1 %v12790_v27  ;;  %v10525_v27 = vld [vmem:[#allocation16 + $0x30] sm:$0xff] }
 0x6dd   : > { %9997 = vmatpush1.bf16.msra.mxu1 %v12788_v55  ;;  %v10526_v55 = vld [vmem:[#allocation16 + $0x38] sm:$0xff] }
 0x6de   : > { %9998 = vmatprep.subr.bf16.mxu1 %v12793_v41  ;;  %v12871_v41 = vld [vmem:[#allocation13 + $0x144] ss:$8 sps:$4 sm:$0xff]  }
 0x6e1   : > { %9999 = vmatpush1.bf16.msra.mxu1 %v12791_v29  ;;  %v10543_v29 = vld [vmem:[#allocation16 + $0xc0] sm:$0xff] }
 0x6e2   : > { %10000 = vmatprep.subr.bf16.mxu1 %v12796_v32  ;;  %v10544_v32 = vld [vmem:[#allocation16 + $0xc8] sm:$0xff] }
 0x6e5   : > { %10001 = vmatpush1.bf16.msra.mxu1 %v12794_v34  ;;  %v12224_v34 = vpack.c.bf16 %v10526_v55, %v10525_v27  ;;  %v10533_v27 = vld [vmem:[#allocation16 + $0x70] sm:$0xff]  ;;  %v10534_v55 = vld [vmem:[#allocation16 + $0x78] sm:$0xff] }
 0x6e6   : > { %10002 = vmatprep.subr.bf16.mxu1 %v12799_v48  ;;  %v12869_v48 = vld [vmem:[#allocation13 + $0x140] ss:$8 sps:$4 sm:$0xff]  }
 0x6e9   : > { %10003 = vmatpush1.bf16.msra.mxu1 %v12797_v36  ;;  %v12226_v36 = vpack.c.bf16 %v10544_v32, %v10543_v29  ;;  %v10099_v29 = vld [vmem:[#allocation15] sm:$0x3] }
 0x6ea   : > { %10004 = vmatprep.subr.bf16.mxu1 %v12802_v50  ;;  %v10527_v50 = vld [vmem:[#allocation16 + $0x40] sm:$0xff]  ;;  %v10104_v32 = vrot.slane %v10099_v29, %v14869_v31 }
 0x6ed   : > { %10005 = vmatpush1.bf16.msra.mxu1 %v12800_v35  ;;  %v10528_v35 = vld [vmem:[#allocation16 + $0x48] sm:$0xff] }
 0x6ee   : > { %10006 = vmatprep.subr.bf16.mxu1 %v12805_v13  ;;  %v12874_v13 = vld [vmem:[#allocation13 + $0x154] ss:$8 sps:$4 sm:$0xff]  }
 0x6f1   : > { %10007 = vmatpush1.bf16.msra.mxu1 %v12803_v39  ;;  %v10545_v39 = vld [vmem:[#allocation16 + $0xd0] sm:$0xff] }
 0x6f2   : > { %10008 = vmatprep.subr.bf16.mxu1 %v12808_v47  ;;  %v10546_v47 = vld [vmem:[#allocation16 + $0xd8] sm:$0xff] }
 0x6f3   : > { %v12230_v20 = vpack.c.bf16 %v10546_v47, %v10545_v39 }
 0x6f5   : > { %10009 = vmatpush1.bf16.msra.mxu1 %v12806_v44  ;;  %v12228_v44 = vpack.c.bf16 %v10528_v35, %v10527_v50 }
 0x6f6   : > { %12211 = vmatprep.subr.bf16.mxu1 %v12210_v23  ;;  %v12904_v23 = vld [vmem:[#allocation13 + $0x1f4] ss:$8 sps:$4 sm:$0xff]  }
 0x6f8   : > { %10011 = vmatmul.mubr.bf16.vlgmr.msra.gmra.mrb[4].mxu1 %v14916_v1 }
 0x6f9   : > { %12213 = vmatpush3.bf16.msra.mxu1 %v12212_v6 }
 0x6fa   : > { %12215 = vmatprep.subr.bf16.mxu1 %v12214_v42 }
 0x6fd   : > { %12217 = vmatpush3.bf16.msra.mxu1 %v12216_v10 }
 0x6fe   : > { %12219 = vmatprep.subr.bf16.mxu1 %v12218_v40 }
 0x701   : > { %12221 = vmatpush3.bf16.msra.mxu1 %v12220_v25  ;;  %v10549_v25 = vld [vmem:[#allocation16 + $0xf0] sm:$0xff] }
 0x702   : > { %12223 = vmatprep.subr.bf16.mxu1 %v12222_v26 }
 0x705   : > { %12225 = vmatpush3.bf16.msra.mxu1 %v12224_v34  ;;  %v10108_v34 = vrot.slane %v10099_v29, %v14860_v18 }
 0x706   : > { %12227 = vmatprep.subr.bf16.mxu1 %v12226_v36 }
 0x709   : > { %12229 = vmatpush3.bf16.msra.mxu1 %v12228_v44 }
 0x70a   : > { %12231 = vmatprep.subr.bf16.mxu1 %v12230_v20 }
 0x74d   : > { %v9848_v51 = vpop.f32.mrb[0].mxu0 }
 0x74e   : > { %v12243_v53 = vadd.f32 %v9848_v51, %v9726_v46  ;;  %v9850_v17 = vpop.f32.mrb[1].mxu0  ;;  %v10529_v46 = vld [vmem:[#allocation16 + $0x50] sm:$0xff]  ;;  %v12877_v51 = vld [vmem:[#allocation13 + $0x164] ss:$8 sps:$4 sm:$0xff]  }
 0x74f   : > { %v12245_v61 = vadd.f32 %v9850_v17, %v9728_v49  ;;  %v9852_v21 = vpop.f32.mrb[2].mxu0  ;;  %v10530_v49 = vld [vmem:[#allocation16 + $0x58] sm:$0xff] }
 0x750   : > { %vm10019_vm8 = vcmp.ge.f32.partialorder %v12243_v53, 0.0  ;;  %v10023_v63 = vmul.f32 0.4, %v12243_v53  ;;  %v9853_v8 = vpop.f32.mrb[3].mxu0  ;;  %v12875_v17 = vld [vmem:[#allocation13 + $0x160] ss:$8 sps:$4 sm:$0xff]  }
 0x751   : > { %vm10020_vm9 = vcmp.ge.f32.partialorder %v12245_v61, 0.0  ;;  %v10024_v1 = vmul.f32 0.4, %v12245_v61  ;;  %v12878_v21 = vld [vmem:[#allocation13 + $0x170] ss:$8 sps:$4 sm:$0xff]  }
 0x752   : > { %v10027_v37 = vsel %vm10019_vm8, %v12243_v53, %v10023_v63  ;;  %v12232_v53 = vpack.c.bf16 %v10530_v49, %v10529_v46  ;;  %v12883_v63 = vld [vmem:[#allocation13 + $0x184] ss:$8 sps:$4 sm:$0xff]   ;;  %v12881_v8 = vld [vmem:[#allocation13 + $0x180] ss:$8 sps:$4 sm:$0xff]   ;;  %v10552_v49 = vstv %s10551_s9 }
 0x753   : > { %v10028_v56 = vsel %vm10020_vm9, %v12245_v61, %v10024_v1  ;;  %v10031_v19 = vpack.c.bf16 %v10027_v37, %v10027_v37  ;;  %v12880_v61 = vld [vmem:[#allocation13 + $0x174] ss:$8 sps:$4 sm:$0xff]   ;;  %v12884_v37 = vld [vmem:[#allocation13 + $0x190] ss:$8 sps:$4 sm:$0xff]  }
 0x754   : > { %v10032_v3 = vpack.c.bf16 %v10028_v56, %v10028_v56  ;;  %12233 = vmatpush3.bf16.msra.mxu1 %v12232_v53  ;;  %v12886_v1 = vld [vmem:[#allocation13 + $0x194] ss:$8 sps:$4 sm:$0xff]   ;;  %v12889_v56 = vld [vmem:[#allocation13 + $0x1a4] ss:$8 sps:$4 sm:$0xff]  }
 0x755   : > { %12235 = vmatprep.subr.bf16.mxu1 %v12234_v43 }
 0x756   : > { %10463 = vmatprep.mubr.bf16.mxu0 %v10032_v3  ;;  %v12887_v3 = vld [vmem:[#allocation13 + $0x1a0] ss:$8 sps:$4 sm:$0xff]  }
 0x757   : > { %10464 = vmatmul.mubr.bf16.vlgmr.msra.gmra.mrb[4].mxu0 %v10031_v19  ;;  %v12890_v19 = vld [vmem:[#allocation13 + $0x1b0] ss:$8 sps:$4 sm:$0xff]  }
 0x758   : > { %10473 = vmatpush1.bf16.msra.mxu0 %v12857_v5  ;;  %v12892_v5 = vld [vmem:[#allocation13 + $0x1b4] ss:$8 sps:$4 sm:$0xff]   ;;  %12237 = vmatpush3.bf16.msra.mxu1 %v12236_v24 }
 0x759   : > { %10474 = vmatprep.subr.bf16.mxu0 %v12862_v2  ;;  %v12895_v2 = vld [vmem:[#allocation13 + $0x1c4] ss:$8 sps:$4 sm:$0xff]  }
 0x75c   : > { %10475 = vmatpush1.bf16.msra.mxu0 %v12860_v58  ;;  %v12893_v58 = vld [vmem:[#allocation13 + $0x1c0] ss:$8 sps:$4 sm:$0xff]  }
 0x75d   : > { %10476 = vmatprep.subr.bf16.mxu0 %v12865_v28  ;;  %v12898_v28 = vld [vmem:[#allocation13 + $0x1d4] ss:$8 sps:$4 sm:$0xff]  }
 0x760   : > { %10477 = vmatpush1.bf16.msra.mxu0 %v12863_v59 }
 0x761   : > { %10478 = vmatprep.subr.bf16.mxu0 %v12868_v15 }
 0x764   : > { %10479 = vmatpush1.bf16.msra.mxu0 %v12866_v54  ;;  %v10550_v54 = vld [vmem:[#allocation16 + $0xf8] sm:$0xff] }
 0x765   : > { %10480 = vmatprep.subr.bf16.mxu0 %v12871_v41  ;;  %v12238_v26 = vpack.c.bf16 %v10550_v54, %v10549_v25  ;;  %v12240_v41 = vpack.c.bf16 %v10534_v55, %v10533_v27 }
 0x767   : > { %12239 = vmatprep.subr.bf16.mxu1 %v12238_v26 }
 0x768   : > { %10481 = vmatpush1.bf16.msra.mxu0 %v12869_v48  ;;  %12241 = vmatpush3.bf16.msra.mxu1 %v12240_v41 }
 0x769   : > { %10482 = vmatprep.subr.bf16.mxu0 %v12874_v13 }
 0x76c   : > { %10483 = vmatpush1.bf16.msra.mxu0 %v12872_v57 }
 0x76d   : > { %10484 = vmatprep.subr.bf16.mxu0 %v12877_v51 }
 0x770   : > { %10485 = vmatpush1.bf16.msra.mxu0 %v12875_v17 }
 0x771   : > { %10486 = vmatprep.subr.bf16.mxu0 %v12880_v61 }
 0x774   : > { %10487 = vmatpush1.bf16.msra.mxu0 %v12878_v21 }
 0x775   : > { %10488 = vmatprep.subr.bf16.mxu0 %v12883_v63 }
 0x778   : > { %10489 = vmatpush1.bf16.msra.mxu0 %v12881_v8 }
 0x779   : > { %10490 = vmatprep.subr.bf16.mxu0 %v12886_v1 }
 0x77c   : > { %10491 = vmatpush1.bf16.msra.mxu0 %v12884_v37 }
 0x77d   : > { %10492 = vmatprep.subr.bf16.mxu0 %v12889_v56 }
 0x780   : > { %10493 = vmatpush1.bf16.msra.mxu0 %v12887_v3 }
 0x781   : > { %10494 = vmatprep.subr.bf16.mxu0 %v12892_v5 }
 0x784   : > { %10495 = vmatpush1.bf16.msra.mxu0 %v12890_v19 }
 0x785   : > { %10496 = vmatprep.subr.bf16.mxu0 %v12895_v2 }
 0x788   : > { %10497 = vmatpush1.bf16.msra.mxu0 %v12893_v58 }
 0x789   : > { %10498 = vmatprep.subr.bf16.mxu0 %v12898_v28 }
 0x78c   : > { %10499 = vmatpush1.bf16.msra.mxu0 %v12896_v0 }
 0x78d   : > { %10500 = vmatprep.subr.bf16.mxu0 %v12901_v16 }
 0x790   : > { %10501 = vmatpush1.bf16.msra.mxu0 %v12899_v30 }
 0x791   : > { %10502 = vmatprep.subr.bf16.mxu0 %v12904_v23 }
 0x794   : > { %10503 = vmatpush1.bf16.msra.mxu0 %v12902_v4 }
 0x7cb   : > { %v10012_v6 = vpop.f32.mrb[4].mxu1 }
 0x7cc   : > { %v12246_v42 = vadd.f32 %v10012_v6, %v8402_v12  ;;  %v10014_v62 = vpop.f32.mrb[5].mxu1 }
 0x7cd   : > { %v12247_v9 = vadd.f32 %v10014_v62, %v8406_v52  ;;  %v10016_v11 = vpop.f32.mrb[6].mxu1 }
 0x7ce   : > { %vm10021_vm10 = vcmp.ge.f32.partialorder %v12246_v42, 0.0  ;;  %v10025_v7 = vmul.f32 0.4, %v12246_v42  ;;  %v10017_v10 = vpop.f32.mrb[7].mxu1 }
 0x7cf   : > { %vm10022_vm11 = vcmp.ge.f32.partialorder %v12247_v9, 0.0  ;;  %v10026_v59 = vmul.f32 0.4, %v12247_v9 }
 0x7d0   : > { %v10029_v40 = vsel %vm10021_vm10, %v12246_v42, %v10025_v7 }
 0x7d1   : > { %v10030_v60 = vsel %vm10022_vm11, %v12247_v9, %v10026_v59  ;;  %v10033_v15 = vpack.c.bf16 %v10029_v40, %v10029_v40 }
 0x7d2   : > { %v10034_v45 = vpack.c.bf16 %v10030_v60, %v10030_v60 }
 0x7d4   : > { %10504 = vmatprep.mubr.bf16.mxu0 %v10034_v45 }
 0x7d5   : > { %10505 = vmatmul.mubr.bf16.vlgmr.msra.gmra.mrb[4].mxu0 %v10033_v15 }
 0x8a8   : > { %v10506_v48 = vpop.f32.mrb[4].mxu0 }
 0x8a9   : > { %v12248_v36 = vadd.f32 %v10506_v48, %v10104_v32  ;;  %v10508_v50 = vpop.f32.mrb[5].mxu0 }
 0x8aa   : > { %v12249_v35 = vadd.f32 %v10508_v50, %v10108_v34  ;;  %v10510_v13 = vpop.f32.mrb[6].mxu0 }
 0x8ab   : > { %v10515_v39 = vmul.f32 0.4, %v12248_v36  ;;  %v10511_v47 = vpop.f32.mrb[7].mxu0  ;;  %vm10513_vm12 = vcmp.ge.f32.partialorder %v12248_v36, 0.0 }
 0x8ac   : > { %v10516_v44 = vmul.f32 0.4, %v12249_v35  ;;  %vm10514_vm13 = vcmp.ge.f32.partialorder %v12249_v35, 0.0 }
 0x8ad   : > { %v10517_v20 = vsel %vm10513_vm12, %v12248_v36, %v10515_v39 }
 0x8ae   : > { %v10518_v57 = vsel %vm10514_vm13, %v12249_v35, %v10516_v44 }
 0x8af   : > { %10617 = vmatprep.mubr.f32.mxu1 %v10518_v57 }
 0x8b0   : > { %10618 = vmatmul.mubr.f32.vlgmr.msra.gmra.mrb[8].mxu1 %v10517_v20 }
 0x983   : > { %v12207_v46 = vpop.f32.mrb[8].mxu1 }
 0x984   : > { %v12208_v31 = vpop.f32.mrb[9].mxu1 }
 0x985   : > { %v12209_v51 = vadd.f32 %v12208_v31, %v12207_v46 }
 0x987   : > { %v10620_v18 = vadd.f32 %v12209_v51, %v10552_v49 }
 0x989   : > { %v10623_v53 = vmul.f32 0.5, %v10620_v18 }
 0x98b   : > { %12905 = vtanh.f32 %v10623_v53 }
 0x995   : > { %v12906_v17 = vpop.eup %12905 }
 0x996   : > { %v10625_v61 = vadd.f32 1.0, %v12906_v17 }
 0x998   : > { %v10626_v21 = vmul.f32 0.5, %v10625_v61 }
 0x99a   : > { %10627 = vst [vmem:[#allocation18] sm:$0xff] %v10626_v21 }
 0x99b PF: > { %p12345_p3 = scmp.eq.s32.totalorder %s13337_s8, 1  ;;  %s13252_s20 = smov [#allocation18]  }
 0x99c   : > { %s10637_s10 = sshll.u32 %s13252_s20, 4  ;;  %s10638_s10 = int_to_ptr.vmem [resolvable:$true] %s10637_s10 }
 0x99d   : > { %s13135_s30 = scalar_lea.vmem %s10638_s10, 128  ;;  %p13142_p12 = scmp.lt.s32.totalorder %s10638_s10, %s10638_s10 }
 0x99e   : > { %p13136_p5 = scmp.ne.s32.totalorder %s10638_s10, %s13135_s30  ;;  %p13143_p1 = scmp.lt.s32.totalorder %s13135_s30, %s13135_s30 }
 0x9a0   : > { %p13137_p11 = pnand %p13136_p5, %p12345_p3  ;;  %p13144_p13 = por %p13143_p1, %p13142_p12 }
 0x9a2   : > { %p13138_p0 = pneg %p13137_p11 }
 0x9a4   : > { %p13145_p2 = pnand %p13144_p13, %p13138_p0 }
 0x9a6   : > { %13148 = shalt.err (!%p13145_p2)
}
 0x9a7   : > { %s15016_s11 = sld [smem:[#allocation29_spill]] }
 0x9ad   : > { %s15017_s3 = smov %s15016_s11  ;;  %s13149_s25 = scalar_lea.hbm %s15016_s11, 128 }
 0x9ae   : > { %p13150_p7 = scmp.ne.s32.totalorder %s15017_s3, %s13149_s25  ;;  %p13155_p8 = scmp.lt.u32.totalorder %s13149_s25, %s15017_s3 }
 0x9b0   : > { %p13151_p6 = pnand %p13150_p7, %p12345_p3 }
 0x9b2   : > { %p13152_p10 = pneg %p13151_p6 }
 0x9b4   : > { %p13157_p4 = pnand %p13155_p8, %p13152_p10 }
 0x9b6   : > { %13160 = shalt.err (!%p13157_p4)
}
 0x9b7   : > { %12303 = dma.vmem_to_hbm [thread:$0]  (%p12345_p3), %s10638_s10, 128, %s15017_s3, [#allocation6]  }
 0x9b8   : > { %13210 = dma.done.wait (%p12345_p3), [#allocation6], 128  }
 0x9b9   : > { %13212 = vsyncadd (%p12345_p3), [#allocation6], 4294967168 }
 0x9ba PF: > { %s30_s16 = sadd.s32 1, %s13235_s16   ;;  %s15018_s11 = smov %s13219_s12 }
 0x9bb   : > { %p27_p9 = scmp.ge.s32.totalorder %s30_s16, 4   ;;  %s15019_s12 = smov %s13223_s13 }
 0x9bc   : > { %s15020_s13 = smov %s13511_s24  ;;  %s15021_s14 = smov %s13231_s15 }
 0x9bd   : > { %s15022_s15 = smov %s15024_s22  ;;  %29 = sbr.rel (!%p27_p9) target bundleno = 15 (0xf), region = 139 }
 0x9c4   :  { %10650 = vsyncpa [#allocation5], 1 }
 0x9c5   :  { %10652 = vsyncpa [#allocation5 + $0x1], 1 }
 0x9c6   :  { %10653 = vsyncpa [#allocation8], 1 }
 0x9c7   :  { %10655 = vsyncpa [#allocation8 + $0x1], 1 }
 0x9c8   :  { %10656 = vsyncpa [#allocation11], 1 }
 0x9c9   :  { %10657 = vsyncpa [#allocation14], 1 }
 0x9ca   :  { %10658 = vsyncpa [#allocation17], 1 }
 0x9cb   :  { %10659 = vsyncpa [#allocation6], 1 }
 0x9cc   :  { %10661 = vsyncpa [#allocation6 + $0x1], 1 }

</bundles_post_ra>
